<compile_context>
chip_gen: v6e
topology: v6e:2x2x1
jax: 0.10.0
libtpu: 0.0.40
codegen_flags: <defaults>
</compile_context>

<pallas_src>
import functools

import jax
import jax.numpy as jnp
from jax.experimental import pallas as pl
from jax.experimental.pallas import tpu as pltpu


# ----------------------------------------------------------------------------
# Pallas kernel: one grid step == one batch element b, all N points at once.
# ----------------------------------------------------------------------------
def _surface_conv_kernel(xyz_cl_ref, xyz_cf_ref, feat_ref, wg_f_ref, wg_x_ref,
                         wh_ref, s0_ref, b0_ref, b2_ref, o_ref, sel_ref, *, k):
    # xyz_cl_ref: (1, N, 3)   points, channels last
    # xyz_cf_ref: (1, 3, N)   points, channels first (avoids in-kernel transpose)
    # feat_ref  : (1, N, F)   input features, channels last
    # wg_f_ref  : (F, F/2)    g_func weight rows for the feat channels
    # wg_x_ref  : (3, F/2)    g_func weight rows for the xyz channels
    # wh_ref    : (4, F/2, F) h_func weight (bn2 scale folded), per relative block
    # s0_ref    : (1, F)      bn0 folded scale,  b0_ref: (1, F) bn0 folded shift
    # b2_ref    : (1, F)      bn2 folded shift (scale already folded into wh)
    # o_ref     : (1, N, F)   output, channels last
    # sel_ref   : (k, N, N)   VMEM scratch: one-hot neighbor-selection matrices
    xyz_nl = xyz_cl_ref[0]                                       # (N, 3)
    xyz_cf = xyz_cf_ref[0]                                       # (3, N)
    feat = feat_ref[0]                                           # (N, F)
    n = xyz_nl.shape[0]

    # bn0 (inference mode, folded to a per-channel affine)
    feat_bn = feat * s0_ref[...] + b0_ref[...]                   # (N, F)

    # g_func: Linear(F+3 -> F/2, bias=False) on concat(feat_bn, xyz) --
    # concat avoided by splitting the weight into feat / xyz parts.
    feat0 = (jnp.dot(feat_bn, wg_f_ref[...], preferred_element_type=jnp.float32)
             + jnp.dot(xyz_nl, wg_x_ref[...], preferred_element_type=jnp.float32))

    # kNN ranking key r[q, m] = ||x_m||^2 - 2 x_q . x_m  (the per-row constant
    # ||x_q||^2 of the true squared distance does not change the per-row top-k).
    inner = jnp.dot(xyz_nl, xyz_cf, preferred_element_type=jnp.float32)  # (N, N)
    row_i = jax.lax.broadcasted_iota(jnp.int32, (n, n), 0)
    col_i = jax.lax.broadcasted_iota(jnp.int32, (n, n), 1)
    eye = (row_i == col_i).astype(jnp.float32)
    sq_row = jnp.sum(inner * eye, axis=0, keepdims=True)         # (1, N) = ||x_m||^2
    r = sq_row - 2.0 * inner                                     # (N, N)

    # Extract k one-hot selections per row (smallest key; ties -> lowest column),
    # written to VMEM scratch so they don't stay live in vregs.
    col_f = col_i.astype(jnp.float32)
    for j in range(k):                                           # k is small, static
        rmin = jnp.min(r, axis=-1, keepdims=True)                # (N, 1)
        is_min = r <= rmin
        first = jnp.min(jnp.where(is_min, col_f, jnp.float32(n)),
                        axis=-1, keepdims=True)                  # (N, 1)
        sel = jnp.logical_and(is_min, col_f == first)            # exactly one per row
        sel_ref[j] = sel.astype(jnp.float32)
        r = jnp.where(sel, jnp.float32(1e30), r)                 # knock out selection

    def neighbor_max(x):
        # max over the k nearest neighbors' feature rows; each gather is an
        # exact one-hot [N, N] @ [N, C] matmul on the MXU.
        acc = jnp.dot(sel_ref[0], x, preferred_element_type=jnp.float32)
        for j in range(1, k):
            acc = jnp.maximum(
                acc, jnp.dot(sel_ref[j], x, preferred_element_type=jnp.float32))
        return acc

    feat1 = neighbor_max(feat0)
    feat2 = neighbor_max(feat1)
    feat3 = neighbor_max(feat2)
    feat4 = feat3          # the original module pools feat2 twice (feat3 == feat4)

    # h_func: Linear(2F -> F, bias=False) on concat of the 4 relative blocks,
    # with bn2's scale folded into wh and its shift applied as a bias.
    out = jnp.dot(feat1 - feat0, wh_ref[0], preferred_element_type=jnp.float32)
    out = out + jnp.dot(feat2 - feat0, wh_ref[1], preferred_element_type=jnp.float32)
    out = out + jnp.dot(feat3 - feat0, wh_ref[2], preferred_element_type=jnp.float32)
    out = out + jnp.dot(feat4 - feat0, wh_ref[3], preferred_element_type=jnp.float32)

    # residual with bn0(feat); output stays channels-last (lane-dense on F).
    o_ref[0] = out + b2_ref[...] + feat_bn


def surface_conv_forward(xyz, feat, params, k):
    """xyz: [B, 3, N], feat: [B, F, N] float32.  Returns [B, F, N]."""
    B, _, N = xyz.shape
    F = feat.shape[1]
    F2 = F // 2
    assert k <= N

    xyz_cl = jnp.transpose(xyz, (0, 2, 1))    # [B, N, 3]
    feat_cl = jnp.transpose(feat, (0, 2, 1))  # [B, N, F]

    out_cl = pl.pallas_call(
        functools.partial(_surface_conv_kernel, k=k),
        out_shape=jax.ShapeDtypeStruct((B, N, F), jnp.float32),
        grid_spec=pltpu.PrefetchScalarGridSpec(
            num_scalar_prefetch=0,
            grid=(B,),
            in_specs=[
                pl.BlockSpec((1, N, 3), lambda b: (b, 0, 0)),    # xyz channels-last
                pl.BlockSpec((1, 3, N), lambda b: (b, 0, 0)),    # xyz channels-first
                pl.BlockSpec((1, N, F), lambda b: (b, 0, 0)),    # feat channels-last
                pl.BlockSpec((F, F2), lambda b: (0, 0)),         # wg (feat rows)
                pl.BlockSpec((3, F2), lambda b: (0, 0)),         # wg (xyz rows)
                pl.BlockSpec((4, F2, F), lambda b: (0, 0, 0)),   # wh (bn2 folded)
                pl.BlockSpec((1, F), lambda b: (0, 0)),          # bn0 scale
                pl.BlockSpec((1, F), lambda b: (0, 0)),          # bn0 shift
                pl.BlockSpec((1, F), lambda b: (0, 0)),          # bn2 shift
            ],
            out_specs=pl.BlockSpec((1, N, F), lambda b: (b, 0, 0)),
            scratch_shapes=[pltpu.VMEM((k, N, N), jnp.float32)],
        ),
        compiler_params=pltpu.CompilerParams(
            dimension_semantics=("parallel",)),
    )(xyz_cl, xyz, feat_cl, params["wg_f"], params["wg_x"], params["wh"],
      params["scale0"], params["shift0"], params["shift2"])

    # back to the PyTorch output layout [B, F, N] (tiny wrapper-side transpose).
    return jnp.transpose(out_cl, (0, 2, 1))


# ----------------------------------------------------------------------------
# Deterministic parameter construction + BN folding (inference mode)
# ----------------------------------------------------------------------------
def make_raw_params(key, n_feat):
    F = n_feat
    F2 = F // 2
    ks = jax.random.split(key, 4)

    def lin(k_, fan_out, fan_in):
        lim = 1.0 / float(fan_in) ** 0.5
        return jax.random.uniform(k_, (fan_out, fan_in), jnp.float32, -lim, lim)

    def bn_stats(k_, c):
        k1, k2, k3, k4 = jax.random.split(k_, 4)
        gamma = 0.5 + jax.random.uniform(k1, (c,), jnp.float32)
        beta = 0.1 * jax.random.normal(k2, (c,), jnp.float32)
        mean = 0.1 * jax.random.normal(k3, (c,), jnp.float32)
        var = 0.5 + jax.random.uniform(k4, (c,), jnp.float32)
        return gamma, beta, mean, var

    Wg = lin(ks[0], F2, F + 3)          # g_func: Linear(F+3 -> F/2, bias=False)
    Wh = lin(ks[1], F, 4 * F2)          # h_func: Linear(2F  -> F,   bias=False)
    g0, b0, m0, v0 = bn_stats(ks[2], F)
    g2, b2, m2, v2 = bn_stats(ks[3], F)
    # bn1 exists in the module but is unused by forward().
    return dict(Wg=Wg, Wh=Wh,
                gamma0=g0, beta0=b0, mean0=m0, var0=v0,
                gamma2=g2, beta2=b2, mean2=m2, var2=v2)


def fold_params(raw, eps=1e-5):
    F = raw["Wh"].shape[0]
    F2 = raw["Wg"].shape[0]
    scale0 = raw["gamma0"] / jnp.sqrt(raw["var0"] + eps)
    shift0 = raw["beta0"] - raw["mean0"] * scale0
    scale2 = raw["gamma2"] / jnp.sqrt(raw["var2"] + eps)
    shift2 = raw["beta2"] - raw["mean2"] * scale2
    Wg_cl = raw["Wg"].T                            # [F+3, F2], channels-last
    Wh_cl = raw["Wh"].T * scale2[None, :]          # [2F, F], bn2 scale folded
    return dict(
        wg_f=Wg_cl[:F],                            # feat rows of g_func weight
        wg_x=Wg_cl[F:],                            # xyz rows of g_func weight
        wh=Wh_cl.reshape(4, F2, F),                # per relative-feature block
        scale0=scale0[None, :], shift0=shift0[None, :],
        shift2=shift2[None, :],
    )


# ----------------------------------------------------------------------------
# Pure-JAX reference (same math as the PyTorch module, eval-mode BN)
# ----------------------------------------------------------------------------
def _bn_eval(x_cf, gamma, beta, mean, var, eps=1e-5):
    inv = gamma / jnp.sqrt(var + eps)
    return (x_cf - mean[None, :, None]) * inv[None, :, None] + beta[None, :, None]


def _knn_indices(dist, k):
    # k smallest per row; ties broken toward the lower index (the downstream
    # max-pool is order-invariant, only the selected set matters).
    d = dist
    idxs = []
    n = d.shape[-1]
    cols = jnp.arange(n)
    for _ in range(k):
        am = jnp.argmin(d, axis=-1)                                 # [B, N]
        idxs.append(am)
        onehot = am[..., None] == cols[None, None, :]               # [B, N, N]
        d = jnp.where(onehot, jnp.inf, d)
    return jnp.stack(idxs, axis=-1)                                 # [B, N, k]


def surface_conv_reference(xyz, feat, raw, k):
    hi = jax.lax.Precision.HIGHEST
    feat_bn = _bn_eval(feat, raw["gamma0"], raw["beta0"], raw["mean0"], raw["var0"])
    x_cat = jnp.concatenate([feat_bn, xyz], axis=1)                     # [B, F+3, N]
    feat0 = jnp.einsum("bcn,oc->bno", x_cat, raw["Wg"], precision=hi)   # [B, N, F/2]

    inner = jnp.einsum("bdn,bdm->bnm", xyz, xyz, precision=hi)          # [B, N, N]
    xx = jnp.sum(xyz * xyz, axis=1, keepdims=True)                      # [B, 1, N]
    dist = xx - 2.0 * inner + jnp.transpose(xx, (0, 2, 1))              # [B, N, N]
    idx = _knn_indices(dist, k)                                         # [B, N, k]

    def gather_max(f_cl):
        g = jax.vmap(lambda f, i: f[i])(f_cl, idx)                      # [B, N, k, C]
        return jnp.max(g, axis=2)

    feat1 = gather_max(feat0)
    feat2 = gather_max(feat1)
    feat3 = gather_max(feat2)
    feat4 = gather_max(feat2)                     # module gathers feat2 twice
    rel = jnp.concatenate(
        [feat1 - feat0, feat2 - feat0, feat3 - feat0, feat4 - feat0], axis=-1)
    h = jnp.einsum("bnc,oc->bon", rel, raw["Wh"], precision=hi)         # [B, F, N]
    return _bn_eval(h, raw["gamma2"], raw["beta2"], raw["mean2"], raw["var2"]) + feat_bn


if __name__ == "__main__":
    # Small shapes consistent with SurfaceConv(n_points=128, k_value=8, n_feat=128):
    # xyz [B, 3, N], feat [B, n_feat, N].  F=128 keeps the output block lane-dense.
    B, N, K, F = 2, 128, 8, 128

    key = jax.random.PRNGKey(0)
    kx, kf, kp = jax.random.split(key, 3)
    # Coordinates quantized to multiples of 1/8 so the pairwise-distance ranking
    # is computed exactly by both the MXU kernel and the XLA reference (no
    # near-tie flips in the neighbor sets of the self-check).
    xyz = jnp.round(jax.random.normal(kx, (B, 3, N), jnp.float32) * 8.0) / 8.0
    feat = jax.random.normal(kf, (B, F, N), jnp.float32)

    raw = make_raw_params(kp, F)
    params = fold_params(raw)

    out = surface_conv_forward(xyz, feat, params, k=K)
    out = jax.block_until_ready(out)
    assert out.shape == (B, F, N), out.shape

    ref = surface_conv_reference(xyz, feat, raw, k=K)
    max_err = float(jnp.max(jnp.abs(out - ref)))
    assert jnp.allclose(out, ref, atol=2e-3, rtol=2e-3), max_err

    print("KERNEL_OK")
</pallas_src>

<mosaic_0001>
module attributes {stable_mosaic.version = 11 : i64} {
  func.func @_surface_conv_kernel(%arg0: i32, %arg1: memref<1x128x3xf32, #tpu.memory_space<vmem>>, %arg2: memref<1x3x128xf32, #tpu.memory_space<vmem>>, %arg3: memref<1x128x128xf32, #tpu.memory_space<vmem>>, %arg4: memref<128x64xf32, #tpu.memory_space<vmem>>, %arg5: memref<3x64xf32, #tpu.memory_space<vmem>>, %arg6: memref<4x64x128xf32, #tpu.memory_space<vmem>>, %arg7: memref<1x128xf32, #tpu.memory_space<vmem>>, %arg8: memref<1x128xf32, #tpu.memory_space<vmem>>, %arg9: memref<1x128xf32, #tpu.memory_space<vmem>>, %arg10: memref<1x128x128xf32, #tpu.memory_space<vmem>>, %arg11: memref<8x128x128xf32, #tpu.memory_space<vmem>>) attributes {dimension_semantics = [#tpu.dimension_semantics<parallel>], iteration_bounds = array<i64: 2>, scalar_prefetch = 0 : i64, scratch_operands = 1 : i64, tpu.core_type = #tpu.core_type<tc>, window_params = [{transform_indices = @transform_0, window_bounds = array<i64: 1, 128, 3>}, {transform_indices = @transform_1, window_bounds = array<i64: 1, 3, 128>}, {transform_indices = @transform_2, window_bounds = array<i64: 1, 128, 128>}, {pipeline_mode = #tpu.pipeline_mode<synchronous>, transform_indices = @transform_3, window_bounds = array<i64: 128, 64>}, {pipeline_mode = #tpu.pipeline_mode<synchronous>, transform_indices = @transform_4, window_bounds = array<i64: 3, 64>}, {pipeline_mode = #tpu.pipeline_mode<synchronous>, transform_indices = @transform_5, window_bounds = array<i64: 4, 64, 128>}, {pipeline_mode = #tpu.pipeline_mode<synchronous>, transform_indices = @transform_6, window_bounds = array<i64: 1, 128>}, {pipeline_mode = #tpu.pipeline_mode<synchronous>, transform_indices = @transform_7, window_bounds = array<i64: 1, 128>}, {pipeline_mode = #tpu.pipeline_mode<synchronous>, transform_indices = @transform_8, window_bounds = array<i64: 1, 128>}, {transform_indices = @transform_9, window_bounds = array<i64: 1, 128, 128>}]} {
    %c0 = arith.constant 0 : index
    %c0_0 = arith.constant 0 : index
    %c0_1 = arith.constant 0 : index
    %0 = vector.load %arg1[%c0, %c0_0, %c0_1] : memref<1x128x3xf32, #tpu.memory_space<vmem>>, vector<1x128x3xf32>
    %1 = vector.shape_cast %0 : vector<1x128x3xf32> to vector<128x3xf32>
    %c0_2 = arith.constant 0 : index
    %c0_3 = arith.constant 0 : index
    %c0_4 = arith.constant 0 : index
    %2 = vector.load %arg2[%c0_2, %c0_3, %c0_4] : memref<1x3x128xf32, #tpu.memory_space<vmem>>, vector<1x3x128xf32>
    %3 = vector.shape_cast %2 : vector<1x3x128xf32> to vector<3x128xf32>
    %c0_5 = arith.constant 0 : index
    %c0_6 = arith.constant 0 : index
    %c0_7 = arith.constant 0 : index
    %4 = vector.load %arg3[%c0_5, %c0_6, %c0_7] : memref<1x128x128xf32, #tpu.memory_space<vmem>>, vector<1x128x128xf32>
    %5 = vector.shape_cast %4 : vector<1x128x128xf32> to vector<128x128xf32>
    %c0_8 = arith.constant 0 : index
    %c0_9 = arith.constant 0 : index
    %6 = vector.load %arg7[%c0_8, %c0_9] : memref<1x128xf32, #tpu.memory_space<vmem>>, vector<1x128xf32>
    %7 = vector.broadcast %6 : vector<1x128xf32> to vector<128x128xf32>
    %8 = arith.mulf %5, %7 : vector<128x128xf32>
    %c0_10 = arith.constant 0 : index
    %c0_11 = arith.constant 0 : index
    %9 = vector.load %arg8[%c0_10, %c0_11] : memref<1x128xf32, #tpu.memory_space<vmem>>, vector<1x128xf32>
    %10 = vector.broadcast %9 : vector<1x128xf32> to vector<128x128xf32>
    %11 = arith.addf %8, %10 : vector<128x128xf32>
    %c0_12 = arith.constant 0 : index
    %c0_13 = arith.constant 0 : index
    %12 = vector.load %arg4[%c0_12, %c0_13] : memref<128x64xf32, #tpu.memory_space<vmem>>, vector<128x64xf32>
    %cst = arith.constant dense<0.000000e+00> : vector<128x64xf32>
    %13 = tpu.matmul %11, %12, %cst {dimension_numbers = #tpu.dot_dimension_numbers<[1], [0], [0], [1], [0, 0, 1, 1], [], []>} : vector<128x128xf32>, vector<128x64xf32>, vector<128x64xf32> -> vector<128x64xf32>
    %c0_14 = arith.constant 0 : index
    %c0_15 = arith.constant 0 : index
    %14 = vector.load %arg5[%c0_14, %c0_15] : memref<3x64xf32, #tpu.memory_space<vmem>>, vector<3x64xf32>
    %cst_16 = arith.constant dense<0.000000e+00> : vector<128x64xf32>
    %15 = tpu.matmul %1, %14, %cst_16 {dimension_numbers = #tpu.dot_dimension_numbers<[1], [0], [0], [1], [0, 0, 1, 1], [], []>} : vector<128x3xf32>, vector<3x64xf32>, vector<128x64xf32> -> vector<128x64xf32>
    %16 = arith.addf %13, %15 : vector<128x64xf32>
    %cst_17 = arith.constant dense<0.000000e+00> : vector<128x128xf32>
    %17 = tpu.matmul %1, %3, %cst_17 {dimension_numbers = #tpu.dot_dimension_numbers<[1], [0], [0], [1], [0, 0, 1, 1], [], []>} : vector<128x3xf32>, vector<3x128xf32>, vector<128x128xf32> -> vector<128x128xf32>
    %18 = tpu.iota {dimensions = array<i32: 0>} : vector<128x128xi32>
    %19 = tpu.iota {dimensions = array<i32: 1>} : vector<128x128xi32>
    %20 = arith.cmpi eq, %18, %19 : vector<128x128xi32>
    %21 = arith.extui %20 : vector<128x128xi1> to vector<128x128xi32>
    %22 = arith.sitofp %21 : vector<128x128xi32> to vector<128x128xf32>
    %23 = arith.mulf %17, %22 : vector<128x128xf32>
    %cst_18 = arith.constant dense<0.000000e+00> : vector<128xf32>
    %24 = vector.multi_reduction <add>, %23, %cst_18 [0] : vector<128x128xf32> to vector<128xf32>
    %25 = vector.shape_cast %24 : vector<128xf32> to vector<1x128xf32>
    %cst_19 = arith.constant 2.000000e+00 : f32
    %26 = vector.broadcast %cst_19 : f32 to vector<128x128xf32>
    %27 = arith.mulf %26, %17 : vector<128x128xf32>
    %28 = vector.broadcast %25 : vector<1x128xf32> to vector<128x128xf32>
    %29 = arith.subf %28, %27 : vector<128x128xf32>
    %30 = arith.sitofp %19 : vector<128x128xi32> to vector<128x128xf32>
    %cst_20 = arith.constant dense<0x7F800000> : vector<128xf32>
    %31 = vector.multi_reduction <minimumf>, %29, %cst_20 [1] : vector<128x128xf32> to vector<128xf32>
    %32 = vector.shape_cast %31 : vector<128xf32> to vector<128x1xf32>
    %33 = vector.broadcast %32 : vector<128x1xf32> to vector<128x128xf32>
    %34 = arith.cmpf ole, %29, %33 : vector<128x128xf32>
    %cst_21 = arith.constant 1.280000e+02 : f32
    %35 = vector.broadcast %cst_21 : f32 to vector<128x128xf32>
    %36 = arith.select %34, %30, %35 : vector<128x128xi1>, vector<128x128xf32>
    %cst_22 = arith.constant dense<0x7F800000> : vector<128xf32>
    %37 = vector.multi_reduction <minimumf>, %36, %cst_22 [1] : vector<128x128xf32> to vector<128xf32>
    %38 = vector.shape_cast %37 : vector<128xf32> to vector<128x1xf32>
    %39 = vector.broadcast %38 : vector<128x1xf32> to vector<128x128xf32>
    %40 = arith.cmpf oeq, %30, %39 : vector<128x128xf32>
    %41 = arith.andi %34, %40 : vector<128x128xi1>
    %42 = arith.extui %41 : vector<128x128xi1> to vector<128x128xi32>
    %43 = arith.sitofp %42 : vector<128x128xi32> to vector<128x128xf32>
    %c0_23 = arith.constant 0 : index
    %c0_24 = arith.constant 0 : index
    %c0_25 = arith.constant 0 : index
    %44 = vector.load %arg11[%c0_23, %c0_24, %c0_25] : memref<8x128x128xf32, #tpu.memory_space<vmem>>, vector<1x128x128xf32>
    %45 = vector.shape_cast %44 : vector<1x128x128xf32> to vector<128x128xf32>
    %46 = vector.shape_cast %43 : vector<128x128xf32> to vector<1x128x128xf32>
    tpu.vector_store %arg11[%c0_23, %c0_24, %c0_25], %46 {strides = array<i32>} : memref<8x128x128xf32, #tpu.memory_space<vmem>>, vector<1x128x128xf32>,
    %cst_26 = arith.constant 1.000000e+30 : f32
    %47 = vector.broadcast %cst_26 : f32 to vector<128x128xf32>
    %48 = arith.select %41, %47, %29 : vector<128x128xi1>, vector<128x128xf32>
    %cst_27 = arith.constant dense<0x7F800000> : vector<128xf32>
    %49 = vector.multi_reduction <minimumf>, %48, %cst_27 [1] : vector<128x128xf32> to vector<128xf32>
    %50 = vector.shape_cast %49 : vector<128xf32> to vector<128x1xf32>
    %51 = vector.broadcast %50 : vector<128x1xf32> to vector<128x128xf32>
    %52 = arith.cmpf ole, %48, %51 : vector<128x128xf32>
    %cst_28 = arith.constant 1.280000e+02 : f32
    %53 = vector.broadcast %cst_28 : f32 to vector<128x128xf32>
    %54 = arith.select %52, %30, %53 : vector<128x128xi1>, vector<128x128xf32>
    %cst_29 = arith.constant dense<0x7F800000> : vector<128xf32>
    %55 = vector.multi_reduction <minimumf>, %54, %cst_29 [1] : vector<128x128xf32> to vector<128xf32>
    %56 = vector.shape_cast %55 : vector<128xf32> to vector<128x1xf32>
    %57 = vector.broadcast %56 : vector<128x1xf32> to vector<128x128xf32>
    %58 = arith.cmpf oeq, %30, %57 : vector<128x128xf32>
    %59 = arith.andi %52, %58 : vector<128x128xi1>
    %60 = arith.extui %59 : vector<128x128xi1> to vector<128x128xi32>
    %61 = arith.sitofp %60 : vector<128x128xi32> to vector<128x128xf32>
    %c1 = arith.constant 1 : index
    %c0_30 = arith.constant 0 : index
    %c0_31 = arith.constant 0 : index
    %62 = vector.load %arg11[%c1, %c0_30, %c0_31] : memref<8x128x128xf32, #tpu.memory_space<vmem>>, vector<1x128x128xf32>
    %63 = vector.shape_cast %62 : vector<1x128x128xf32> to vector<128x128xf32>
    %64 = vector.shape_cast %61 : vector<128x128xf32> to vector<1x128x128xf32>
    tpu.vector_store %arg11[%c1, %c0_30, %c0_31], %64 {strides = array<i32>} : memref<8x128x128xf32, #tpu.memory_space<vmem>>, vector<1x128x128xf32>,
    %cst_32 = arith.constant 1.000000e+30 : f32
    %65 = vector.broadcast %cst_32 : f32 to vector<128x128xf32>
    %66 = arith.select %59, %65, %48 : vector<128x128xi1>, vector<128x128xf32>
    %cst_33 = arith.constant dense<0x7F800000> : vector<128xf32>
    %67 = vector.multi_reduction <minimumf>, %66, %cst_33 [1] : vector<128x128xf32> to vector<128xf32>
    %68 = vector.shape_cast %67 : vector<128xf32> to vector<128x1xf32>
    %69 = vector.broadcast %68 : vector<128x1xf32> to vector<128x128xf32>
    %70 = arith.cmpf ole, %66, %69 : vector<128x128xf32>
    %cst_34 = arith.constant 1.280000e+02 : f32
    %71 = vector.broadcast %cst_34 : f32 to vector<128x128xf32>
    %72 = arith.select %70, %30, %71 : vector<128x128xi1>, vector<128x128xf32>
    %cst_35 = arith.constant dense<0x7F800000> : vector<128xf32>
    %73 = vector.multi_reduction <minimumf>, %72, %cst_35 [1] : vector<128x128xf32> to vector<128xf32>
    %74 = vector.shape_cast %73 : vector<128xf32> to vector<128x1xf32>
    %75 = vector.broadcast %74 : vector<128x1xf32> to vector<128x128xf32>
    %76 = arith.cmpf oeq, %30, %75 : vector<128x128xf32>
    %77 = arith.andi %70, %76 : vector<128x128xi1>
    %78 = arith.extui %77 : vector<128x128xi1> to vector<128x128xi32>
    %79 = arith.sitofp %78 : vector<128x128xi32> to vector<128x128xf32>
    %c2 = arith.constant 2 : index
    %c0_36 = arith.constant 0 : index
    %c0_37 = arith.constant 0 : index
    %80 = vector.load %arg11[%c2, %c0_36, %c0_37] : memref<8x128x128xf32, #tpu.memory_space<vmem>>, vector<1x128x128xf32>
    %81 = vector.shape_cast %80 : vector<1x128x128xf32> to vector<128x128xf32>
    %82 = vector.shape_cast %79 : vector<128x128xf32> to vector<1x128x128xf32>
    tpu.vector_store %arg11[%c2, %c0_36, %c0_37], %82 {strides = array<i32>} : memref<8x128x128xf32, #tpu.memory_space<vmem>>, vector<1x128x128xf32>,
    %cst_38 = arith.constant 1.000000e+30 : f32
    %83 = vector.broadcast %cst_38 : f32 to vector<128x128xf32>
    %84 = arith.select %77, %83, %66 : vector<128x128xi1>, vector<128x128xf32>
    %cst_39 = arith.constant dense<0x7F800000> : vector<128xf32>
    %85 = vector.multi_reduction <minimumf>, %84, %cst_39 [1] : vector<128x128xf32> to vector<128xf32>
    %86 = vector.shape_cast %85 : vector<128xf32> to vector<128x1xf32>
    %87 = vector.broadcast %86 : vector<128x1xf32> to vector<128x128xf32>
    %88 = arith.cmpf ole, %84, %87 : vector<128x128xf32>
    %cst_40 = arith.constant 1.280000e+02 : f32
    %89 = vector.broadcast %cst_40 : f32 to vector<128x128xf32>
    %90 = arith.select %88, %30, %89 : vector<128x128xi1>, vector<128x128xf32>
    %cst_41 = arith.constant dense<0x7F800000> : vector<128xf32>
    %91 = vector.multi_reduction <minimumf>, %90, %cst_41 [1] : vector<128x128xf32> to vector<128xf32>
    %92 = vector.shape_cast %91 : vector<128xf32> to vector<128x1xf32>
    %93 = vector.broadcast %92 : vector<128x1xf32> to vector<128x128xf32>
    %94 = arith.cmpf oeq, %30, %93 : vector<128x128xf32>
    %95 = arith.andi %88, %94 : vector<128x128xi1>
    %96 = arith.extui %95 : vector<128x128xi1> to vector<128x128xi32>
    %97 = arith.sitofp %96 : vector<128x128xi32> to vector<128x128xf32>
    %c3 = arith.constant 3 : index
    %c0_42 = arith.constant 0 : index
    %c0_43 = arith.constant 0 : index
    %98 = vector.load %arg11[%c3, %c0_42, %c0_43] : memref<8x128x128xf32, #tpu.memory_space<vmem>>, vector<1x128x128xf32>
    %99 = vector.shape_cast %98 : vector<1x128x128xf32> to vector<128x128xf32>
    %100 = vector.shape_cast %97 : vector<128x128xf32> to vector<1x128x128xf32>
    tpu.vector_store %arg11[%c3, %c0_42, %c0_43], %100 {strides = array<i32>} : memref<8x128x128xf32, #tpu.memory_space<vmem>>, vector<1x128x128xf32>,
    %cst_44 = arith.constant 1.000000e+30 : f32
    %101 = vector.broadcast %cst_44 : f32 to vector<128x128xf32>
    %102 = arith.select %95, %101, %84 : vector<128x128xi1>, vector<128x128xf32>
    %cst_45 = arith.constant dense<0x7F800000> : vector<128xf32>
    %103 = vector.multi_reduction <minimumf>, %102, %cst_45 [1] : vector<128x128xf32> to vector<128xf32>
    %104 = vector.shape_cast %103 : vector<128xf32> to vector<128x1xf32>
    %105 = vector.broadcast %104 : vector<128x1xf32> to vector<128x128xf32>
    %106 = arith.cmpf ole, %102, %105 : vector<128x128xf32>
    %cst_46 = arith.constant 1.280000e+02 : f32
    %107 = vector.broadcast %cst_46 : f32 to vector<128x128xf32>
    %108 = arith.select %106, %30, %107 : vector<128x128xi1>, vector<128x128xf32>
    %cst_47 = arith.constant dense<0x7F800000> : vector<128xf32>
    %109 = vector.multi_reduction <minimumf>, %108, %cst_47 [1] : vector<128x128xf32> to vector<128xf32>
    %110 = vector.shape_cast %109 : vector<128xf32> to vector<128x1xf32>
    %111 = vector.broadcast %110 : vector<128x1xf32> to vector<128x128xf32>
    %112 = arith.cmpf oeq, %30, %111 : vector<128x128xf32>
    %113 = arith.andi %106, %112 : vector<128x128xi1>
    %114 = arith.extui %113 : vector<128x128xi1> to vector<128x128xi32>
    %115 = arith.sitofp %114 : vector<128x128xi32> to vector<128x128xf32>
    %c4 = arith.constant 4 : index
    %c0_48 = arith.constant 0 : index
    %c0_49 = arith.constant 0 : index
    %116 = vector.load %arg11[%c4, %c0_48, %c0_49] : memref<8x128x128xf32, #tpu.memory_space<vmem>>, vector<1x128x128xf32>
    %117 = vector.shape_cast %116 : vector<1x128x128xf32> to vector<128x128xf32>
    %118 = vector.shape_cast %115 : vector<128x128xf32> to vector<1x128x128xf32>
    tpu.vector_store %arg11[%c4, %c0_48, %c0_49], %118 {strides = array<i32>} : memref<8x128x128xf32, #tpu.memory_space<vmem>>, vector<1x128x128xf32>,
    %cst_50 = arith.constant 1.000000e+30 : f32
    %119 = vector.broadcast %cst_50 : f32 to vector<128x128xf32>
    %120 = arith.select %113, %119, %102 : vector<128x128xi1>, vector<128x128xf32>
    %cst_51 = arith.constant dense<0x7F800000> : vector<128xf32>
    %121 = vector.multi_reduction <minimumf>, %120, %cst_51 [1] : vector<128x128xf32> to vector<128xf32>
    %122 = vector.shape_cast %121 : vector<128xf32> to vector<128x1xf32>
    %123 = vector.broadcast %122 : vector<128x1xf32> to vector<128x128xf32>
    %124 = arith.cmpf ole, %120, %123 : vector<128x128xf32>
    %cst_52 = arith.constant 1.280000e+02 : f32
    %125 = vector.broadcast %cst_52 : f32 to vector<128x128xf32>
    %126 = arith.select %124, %30, %125 : vector<128x128xi1>, vector<128x128xf32>
    %cst_53 = arith.constant dense<0x7F800000> : vector<128xf32>
    %127 = vector.multi_reduction <minimumf>, %126, %cst_53 [1] : vector<128x128xf32> to vector<128xf32>
    %128 = vector.shape_cast %127 : vector<128xf32> to vector<128x1xf32>
    %129 = vector.broadcast %128 : vector<128x1xf32> to vector<128x128xf32>
    %130 = arith.cmpf oeq, %30, %129 : vector<128x128xf32>
    %131 = arith.andi %124, %130 : vector<128x128xi1>
    %132 = arith.extui %131 : vector<128x128xi1> to vector<128x128xi32>
    %133 = arith.sitofp %132 : vector<128x128xi32> to vector<128x128xf32>
    %c5 = arith.constant 5 : index
    %c0_54 = arith.constant 0 : index
    %c0_55 = arith.constant 0 : index
    %134 = vector.load %arg11[%c5, %c0_54, %c0_55] : memref<8x128x128xf32, #tpu.memory_space<vmem>>, vector<1x128x128xf32>
    %135 = vector.shape_cast %134 : vector<1x128x128xf32> to vector<128x128xf32>
    %136 = vector.shape_cast %133 : vector<128x128xf32> to vector<1x128x128xf32>
    tpu.vector_store %arg11[%c5, %c0_54, %c0_55], %136 {strides = array<i32>} : memref<8x128x128xf32, #tpu.memory_space<vmem>>, vector<1x128x128xf32>,
    %cst_56 = arith.constant 1.000000e+30 : f32
    %137 = vector.broadcast %cst_56 : f32 to vector<128x128xf32>
    %138 = arith.select %131, %137, %120 : vector<128x128xi1>, vector<128x128xf32>
    %cst_57 = arith.constant dense<0x7F800000> : vector<128xf32>
    %139 = vector.multi_reduction <minimumf>, %138, %cst_57 [1] : vector<128x128xf32> to vector<128xf32>
    %140 = vector.shape_cast %139 : vector<128xf32> to vector<128x1xf32>
    %141 = vector.broadcast %140 : vector<128x1xf32> to vector<128x128xf32>
    %142 = arith.cmpf ole, %138, %141 : vector<128x128xf32>
    %cst_58 = arith.constant 1.280000e+02 : f32
    %143 = vector.broadcast %cst_58 : f32 to vector<128x128xf32>
    %144 = arith.select %142, %30, %143 : vector<128x128xi1>, vector<128x128xf32>
    %cst_59 = arith.constant dense<0x7F800000> : vector<128xf32>
    %145 = vector.multi_reduction <minimumf>, %144, %cst_59 [1] : vector<128x128xf32> to vector<128xf32>
    %146 = vector.shape_cast %145 : vector<128xf32> to vector<128x1xf32>
    %147 = vector.broadcast %146 : vector<128x1xf32> to vector<128x128xf32>
    %148 = arith.cmpf oeq, %30, %147 : vector<128x128xf32>
    %149 = arith.andi %142, %148 : vector<128x128xi1>
    %150 = arith.extui %149 : vector<128x128xi1> to vector<128x128xi32>
    %151 = arith.sitofp %150 : vector<128x128xi32> to vector<128x128xf32>
    %c6 = arith.constant 6 : index
    %c0_60 = arith.constant 0 : index
    %c0_61 = arith.constant 0 : index
    %152 = vector.load %arg11[%c6, %c0_60, %c0_61] : memref<8x128x128xf32, #tpu.memory_space<vmem>>, vector<1x128x128xf32>
    %153 = vector.shape_cast %152 : vector<1x128x128xf32> to vector<128x128xf32>
    %154 = vector.shape_cast %151 : vector<128x128xf32> to vector<1x128x128xf32>
    tpu.vector_store %arg11[%c6, %c0_60, %c0_61], %154 {strides = array<i32>} : memref<8x128x128xf32, #tpu.memory_space<vmem>>, vector<1x128x128xf32>,
    %cst_62 = arith.constant 1.000000e+30 : f32
    %155 = vector.broadcast %cst_62 : f32 to vector<128x128xf32>
    %156 = arith.select %149, %155, %138 : vector<128x128xi1>, vector<128x128xf32>
    %cst_63 = arith.constant dense<0x7F800000> : vector<128xf32>
    %157 = vector.multi_reduction <minimumf>, %156, %cst_63 [1] : vector<128x128xf32> to vector<128xf32>
    %158 = vector.shape_cast %157 : vector<128xf32> to vector<128x1xf32>
    %159 = vector.broadcast %158 : vector<128x1xf32> to vector<128x128xf32>
    %160 = arith.cmpf ole, %156, %159 : vector<128x128xf32>
    %cst_64 = arith.constant 1.280000e+02 : f32
    %161 = vector.broadcast %cst_64 : f32 to vector<128x128xf32>
    %162 = arith.select %160, %30, %161 : vector<128x128xi1>, vector<128x128xf32>
    %cst_65 = arith.constant dense<0x7F800000> : vector<128xf32>
    %163 = vector.multi_reduction <minimumf>, %162, %cst_65 [1] : vector<128x128xf32> to vector<128xf32>
    %164 = vector.shape_cast %163 : vector<128xf32> to vector<128x1xf32>
    %165 = vector.broadcast %164 : vector<128x1xf32> to vector<128x128xf32>
    %166 = arith.cmpf oeq, %30, %165 : vector<128x128xf32>
    %167 = arith.andi %160, %166 : vector<128x128xi1>
    %168 = arith.extui %167 : vector<128x128xi1> to vector<128x128xi32>
    %169 = arith.sitofp %168 : vector<128x128xi32> to vector<128x128xf32>
    %c7 = arith.constant 7 : index
    %c0_66 = arith.constant 0 : index
    %c0_67 = arith.constant 0 : index
    %170 = vector.load %arg11[%c7, %c0_66, %c0_67] : memref<8x128x128xf32, #tpu.memory_space<vmem>>, vector<1x128x128xf32>
    %171 = vector.shape_cast %170 : vector<1x128x128xf32> to vector<128x128xf32>
    %172 = vector.shape_cast %169 : vector<128x128xf32> to vector<1x128x128xf32>
    tpu.vector_store %arg11[%c7, %c0_66, %c0_67], %172 {strides = array<i32>} : memref<8x128x128xf32, #tpu.memory_space<vmem>>, vector<1x128x128xf32>,
    %c0_68 = arith.constant 0 : index
    %c0_69 = arith.constant 0 : index
    %c0_70 = arith.constant 0 : index
    %173 = vector.load %arg11[%c0_68, %c0_69, %c0_70] : memref<8x128x128xf32, #tpu.memory_space<vmem>>, vector<1x128x128xf32>
    %174 = vector.shape_cast %173 : vector<1x128x128xf32> to vector<128x128xf32>
    %cst_71 = arith.constant dense<0.000000e+00> : vector<128x64xf32>
    %175 = tpu.matmul %174, %16, %cst_71 {dimension_numbers = #tpu.dot_dimension_numbers<[1], [0], [0], [1], [0, 0, 1, 1], [], []>} : vector<128x128xf32>, vector<128x64xf32>, vector<128x64xf32> -> vector<128x64xf32>
    %c1_72 = arith.constant 1 : index
    %c0_73 = arith.constant 0 : index
    %c0_74 = arith.constant 0 : index
    %176 = vector.load %arg11[%c1_72, %c0_73, %c0_74] : memref<8x128x128xf32, #tpu.memory_space<vmem>>, vector<1x128x128xf32>
    %177 = vector.shape_cast %176 : vector<1x128x128xf32> to vector<128x128xf32>
    %cst_75 = arith.constant dense<0.000000e+00> : vector<128x64xf32>
    %178 = tpu.matmul %177, %16, %cst_75 {dimension_numbers = #tpu.dot_dimension_numbers<[1], [0], [0], [1], [0, 0, 1, 1], [], []>} : vector<128x128xf32>, vector<128x64xf32>, vector<128x64xf32> -> vector<128x64xf32>
    %179 = arith.maximumf %175, %178 : vector<128x64xf32>
    %c2_76 = arith.constant 2 : index
    %c0_77 = arith.constant 0 : index
    %c0_78 = arith.constant 0 : index
    %180 = vector.load %arg11[%c2_76, %c0_77, %c0_78] : memref<8x128x128xf32, #tpu.memory_space<vmem>>, vector<1x128x128xf32>
    %181 = vector.shape_cast %180 : vector<1x128x128xf32> to vector<128x128xf32>
    %cst_79 = arith.constant dense<0.000000e+00> : vector<128x64xf32>
    %182 = tpu.matmul %181, %16, %cst_79 {dimension_numbers = #tpu.dot_dimension_numbers<[1], [0], [0], [1], [0, 0, 1, 1], [], []>} : vector<128x128xf32>, vector<128x64xf32>, vector<128x64xf32> -> vector<128x64xf32>
    %183 = arith.maximumf %179, %182 : vector<128x64xf32>
    %c3_80 = arith.constant 3 : index
    %c0_81 = arith.constant 0 : index
    %c0_82 = arith.constant 0 : index
    %184 = vector.load %arg11[%c3_80, %c0_81, %c0_82] : memref<8x128x128xf32, #tpu.memory_space<vmem>>, vector<1x128x128xf32>
    %185 = vector.shape_cast %184 : vector<1x128x128xf32> to vector<128x128xf32>
    %cst_83 = arith.constant dense<0.000000e+00> : vector<128x64xf32>
    %186 = tpu.matmul %185, %16, %cst_83 {dimension_numbers = #tpu.dot_dimension_numbers<[1], [0], [0], [1], [0, 0, 1, 1], [], []>} : vector<128x128xf32>, vector<128x64xf32>, vector<128x64xf32> -> vector<128x64xf32>
    %187 = arith.maximumf %183, %186 : vector<128x64xf32>
    %c4_84 = arith.constant 4 : index
    %c0_85 = arith.constant 0 : index
    %c0_86 = arith.constant 0 : index
    %188 = vector.load %arg11[%c4_84, %c0_85, %c0_86] : memref<8x128x128xf32, #tpu.memory_space<vmem>>, vector<1x128x128xf32>
    %189 = vector.shape_cast %188 : vector<1x128x128xf32> to vector<128x128xf32>
    %cst_87 = arith.constant dense<0.000000e+00> : vector<128x64xf32>
    %190 = tpu.matmul %189, %16, %cst_87 {dimension_numbers = #tpu.dot_dimension_numbers<[1], [0], [0], [1], [0, 0, 1, 1], [], []>} : vector<128x128xf32>, vector<128x64xf32>, vector<128x64xf32> -> vector<128x64xf32>
    %191 = arith.maximumf %187, %190 : vector<128x64xf32>
    %c5_88 = arith.constant 5 : index
    %c0_89 = arith.constant 0 : index
    %c0_90 = arith.constant 0 : index
    %192 = vector.load %arg11[%c5_88, %c0_89, %c0_90] : memref<8x128x128xf32, #tpu.memory_space<vmem>>, vector<1x128x128xf32>
    %193 = vector.shape_cast %192 : vector<1x128x128xf32> to vector<128x128xf32>
    %cst_91 = arith.constant dense<0.000000e+00> : vector<128x64xf32>
    %194 = tpu.matmul %193, %16, %cst_91 {dimension_numbers = #tpu.dot_dimension_numbers<[1], [0], [0], [1], [0, 0, 1, 1], [], []>} : vector<128x128xf32>, vector<128x64xf32>, vector<128x64xf32> -> vector<128x64xf32>
    %195 = arith.maximumf %191, %194 : vector<128x64xf32>
    %c6_92 = arith.constant 6 : index
    %c0_93 = arith.constant 0 : index
    %c0_94 = arith.constant 0 : index
    %196 = vector.load %arg11[%c6_92, %c0_93, %c0_94] : memref<8x128x128xf32, #tpu.memory_space<vmem>>, vector<1x128x128xf32>
    %197 = vector.shape_cast %196 : vector<1x128x128xf32> to vector<128x128xf32>
    %cst_95 = arith.constant dense<0.000000e+00> : vector<128x64xf32>
    %198 = tpu.matmul %197, %16, %cst_95 {dimension_numbers = #tpu.dot_dimension_numbers<[1], [0], [0], [1], [0, 0, 1, 1], [], []>} : vector<128x128xf32>, vector<128x64xf32>, vector<128x64xf32> -> vector<128x64xf32>
    %199 = arith.maximumf %195, %198 : vector<128x64xf32>
    %c7_96 = arith.constant 7 : index
    %c0_97 = arith.constant 0 : index
    %c0_98 = arith.constant 0 : index
    %200 = vector.load %arg11[%c7_96, %c0_97, %c0_98] : memref<8x128x128xf32, #tpu.memory_space<vmem>>, vector<1x128x128xf32>
    %201 = vector.shape_cast %200 : vector<1x128x128xf32> to vector<128x128xf32>
    %cst_99 = arith.constant dense<0.000000e+00> : vector<128x64xf32>
    %202 = tpu.matmul %201, %16, %cst_99 {dimension_numbers = #tpu.dot_dimension_numbers<[1], [0], [0], [1], [0, 0, 1, 1], [], []>} : vector<128x128xf32>, vector<128x64xf32>, vector<128x64xf32> -> vector<128x64xf32>
    %203 = arith.maximumf %199, %202 : vector<128x64xf32>
    %c0_100 = arith.constant 0 : index
    %c0_101 = arith.constant 0 : index
    %c0_102 = arith.constant 0 : index
    %204 = vector.load %arg11[%c0_100, %c0_101, %c0_102] : memref<8x128x128xf32, #tpu.memory_space<vmem>>, vector<1x128x128xf32>
    %205 = vector.shape_cast %204 : vector<1x128x128xf32> to vector<128x128xf32>
    %cst_103 = arith.constant dense<0.000000e+00> : vector<128x64xf32>
    %206 = tpu.matmul %205, %203, %cst_103 {dimension_numbers = #tpu.dot_dimension_numbers<[1], [0], [0], [1], [0, 0, 1, 1], [], []>} : vector<128x128xf32>, vector<128x64xf32>, vector<128x64xf32> -> vector<128x64xf32>
    %c1_104 = arith.constant 1 : index
    %c0_105 = arith.constant 0 : index
    %c0_106 = arith.constant 0 : index
    %207 = vector.load %arg11[%c1_104, %c0_105, %c0_106] : memref<8x128x128xf32, #tpu.memory_space<vmem>>, vector<1x128x128xf32>
    %208 = vector.shape_cast %207 : vector<1x128x128xf32> to vector<128x128xf32>
    %cst_107 = arith.constant dense<0.000000e+00> : vector<128x64xf32>
    %209 = tpu.matmul %208, %203, %cst_107 {dimension_numbers = #tpu.dot_dimension_numbers<[1], [0], [0], [1], [0, 0, 1, 1], [], []>} : vector<128x128xf32>, vector<128x64xf32>, vector<128x64xf32> -> vector<128x64xf32>
    %210 = arith.maximumf %206, %209 : vector<128x64xf32>
    %c2_108 = arith.constant 2 : index
    %c0_109 = arith.constant 0 : index
    %c0_110 = arith.constant 0 : index
    %211 = vector.load %arg11[%c2_108, %c0_109, %c0_110] : memref<8x128x128xf32, #tpu.memory_space<vmem>>, vector<1x128x128xf32>
    %212 = vector.shape_cast %211 : vector<1x128x128xf32> to vector<128x128xf32>
    %cst_111 = arith.constant dense<0.000000e+00> : vector<128x64xf32>
    %213 = tpu.matmul %212, %203, %cst_111 {dimension_numbers = #tpu.dot_dimension_numbers<[1], [0], [0], [1], [0, 0, 1, 1], [], []>} : vector<128x128xf32>, vector<128x64xf32>, vector<128x64xf32> -> vector<128x64xf32>
    %214 = arith.maximumf %210, %213 : vector<128x64xf32>
    %c3_112 = arith.constant 3 : index
    %c0_113 = arith.constant 0 : index
    %c0_114 = arith.constant 0 : index
    %215 = vector.load %arg11[%c3_112, %c0_113, %c0_114] : memref<8x128x128xf32, #tpu.memory_space<vmem>>, vector<1x128x128xf32>
    %216 = vector.shape_cast %215 : vector<1x128x128xf32> to vector<128x128xf32>
    %cst_115 = arith.constant dense<0.000000e+00> : vector<128x64xf32>
    %217 = tpu.matmul %216, %203, %cst_115 {dimension_numbers = #tpu.dot_dimension_numbers<[1], [0], [0], [1], [0, 0, 1, 1], [], []>} : vector<128x128xf32>, vector<128x64xf32>, vector<128x64xf32> -> vector<128x64xf32>
    %218 = arith.maximumf %214, %217 : vector<128x64xf32>
    %c4_116 = arith.constant 4 : index
    %c0_117 = arith.constant 0 : index
    %c0_118 = arith.constant 0 : index
    %219 = vector.load %arg11[%c4_116, %c0_117, %c0_118] : memref<8x128x128xf32, #tpu.memory_space<vmem>>, vector<1x128x128xf32>
    %220 = vector.shape_cast %219 : vector<1x128x128xf32> to vector<128x128xf32>
    %cst_119 = arith.constant dense<0.000000e+00> : vector<128x64xf32>
    %221 = tpu.matmul %220, %203, %cst_119 {dimension_numbers = #tpu.dot_dimension_numbers<[1], [0], [0], [1], [0, 0, 1, 1], [], []>} : vector<128x128xf32>, vector<128x64xf32>, vector<128x64xf32> -> vector<128x64xf32>
    %222 = arith.maximumf %218, %221 : vector<128x64xf32>
    %c5_120 = arith.constant 5 : index
    %c0_121 = arith.constant 0 : index
    %c0_122 = arith.constant 0 : index
    %223 = vector.load %arg11[%c5_120, %c0_121, %c0_122] : memref<8x128x128xf32, #tpu.memory_space<vmem>>, vector<1x128x128xf32>
    %224 = vector.shape_cast %223 : vector<1x128x128xf32> to vector<128x128xf32>
    %cst_123 = arith.constant dense<0.000000e+00> : vector<128x64xf32>
    %225 = tpu.matmul %224, %203, %cst_123 {dimension_numbers = #tpu.dot_dimension_numbers<[1], [0], [0], [1], [0, 0, 1, 1], [], []>} : vector<128x128xf32>, vector<128x64xf32>, vector<128x64xf32> -> vector<128x64xf32>
    %226 = arith.maximumf %222, %225 : vector<128x64xf32>
    %c6_124 = arith.constant 6 : index
    %c0_125 = arith.constant 0 : index
    %c0_126 = arith.constant 0 : index
    %227 = vector.load %arg11[%c6_124, %c0_125, %c0_126] : memref<8x128x128xf32, #tpu.memory_space<vmem>>, vector<1x128x128xf32>
    %228 = vector.shape_cast %227 : vector<1x128x128xf32> to vector<128x128xf32>
    %cst_127 = arith.constant dense<0.000000e+00> : vector<128x64xf32>
    %229 = tpu.matmul %228, %203, %cst_127 {dimension_numbers = #tpu.dot_dimension_numbers<[1], [0], [0], [1], [0, 0, 1, 1], [], []>} : vector<128x128xf32>, vector<128x64xf32>, vector<128x64xf32> -> vector<128x64xf32>
    %230 = arith.maximumf %226, %229 : vector<128x64xf32>
    %c7_128 = arith.constant 7 : index
    %c0_129 = arith.constant 0 : index
    %c0_130 = arith.constant 0 : index
    %231 = vector.load %arg11[%c7_128, %c0_129, %c0_130] : memref<8x128x128xf32, #tpu.memory_space<vmem>>, vector<1x128x128xf32>
    %232 = vector.shape_cast %231 : vector<1x128x128xf32> to vector<128x128xf32>
    %cst_131 = arith.constant dense<0.000000e+00> : vector<128x64xf32>
    %233 = tpu.matmul %232, %203, %cst_131 {dimension_numbers = #tpu.dot_dimension_numbers<[1], [0], [0], [1], [0, 0, 1, 1], [], []>} : vector<128x128xf32>, vector<128x64xf32>, vector<128x64xf32> -> vector<128x64xf32>
    %234 = arith.maximumf %230, %233 : vector<128x64xf32>
    %c0_132 = arith.constant 0 : index
    %c0_133 = arith.constant 0 : index
    %c0_134 = arith.constant 0 : index
    %235 = vector.load %arg11[%c0_132, %c0_133, %c0_134] : memref<8x128x128xf32, #tpu.memory_space<vmem>>, vector<1x128x128xf32>
    %236 = vector.shape_cast %235 : vector<1x128x128xf32> to vector<128x128xf32>
    %cst_135 = arith.constant dense<0.000000e+00> : vector<128x64xf32>
    %237 = tpu.matmul %236, %234, %cst_135 {dimension_numbers = #tpu.dot_dimension_numbers<[1], [0], [0], [1], [0, 0, 1, 1], [], []>} : vector<128x128xf32>, vector<128x64xf32>, vector<128x64xf32> -> vector<128x64xf32>
    %c1_136 = arith.constant 1 : index
    %c0_137 = arith.constant 0 : index
    %c0_138 = arith.constant 0 : index
    %238 = vector.load %arg11[%c1_136, %c0_137, %c0_138] : memref<8x128x128xf32, #tpu.memory_space<vmem>>, vector<1x128x128xf32>
    %239 = vector.shape_cast %238 : vector<1x128x128xf32> to vector<128x128xf32>
    %cst_139 = arith.constant dense<0.000000e+00> : vector<128x64xf32>
    %240 = tpu.matmul %239, %234, %cst_139 {dimension_numbers = #tpu.dot_dimension_numbers<[1], [0], [0], [1], [0, 0, 1, 1], [], []>} : vector<128x128xf32>, vector<128x64xf32>, vector<128x64xf32> -> vector<128x64xf32>
    %241 = arith.maximumf %237, %240 : vector<128x64xf32>
    %c2_140 = arith.constant 2 : index
    %c0_141 = arith.constant 0 : index
    %c0_142 = arith.constant 0 : index
    %242 = vector.load %arg11[%c2_140, %c0_141, %c0_142] : memref<8x128x128xf32, #tpu.memory_space<vmem>>, vector<1x128x128xf32>
    %243 = vector.shape_cast %242 : vector<1x128x128xf32> to vector<128x128xf32>
    %cst_143 = arith.constant dense<0.000000e+00> : vector<128x64xf32>
    %244 = tpu.matmul %243, %234, %cst_143 {dimension_numbers = #tpu.dot_dimension_numbers<[1], [0], [0], [1], [0, 0, 1, 1], [], []>} : vector<128x128xf32>, vector<128x64xf32>, vector<128x64xf32> -> vector<128x64xf32>
    %245 = arith.maximumf %241, %244 : vector<128x64xf32>
    %c3_144 = arith.constant 3 : index
    %c0_145 = arith.constant 0 : index
    %c0_146 = arith.constant 0 : index
    %246 = vector.load %arg11[%c3_144, %c0_145, %c0_146] : memref<8x128x128xf32, #tpu.memory_space<vmem>>, vector<1x128x128xf32>
    %247 = vector.shape_cast %246 : vector<1x128x128xf32> to vector<128x128xf32>
    %cst_147 = arith.constant dense<0.000000e+00> : vector<128x64xf32>
    %248 = tpu.matmul %247, %234, %cst_147 {dimension_numbers = #tpu.dot_dimension_numbers<[1], [0], [0], [1], [0, 0, 1, 1], [], []>} : vector<128x128xf32>, vector<128x64xf32>, vector<128x64xf32> -> vector<128x64xf32>
    %249 = arith.maximumf %245, %248 : vector<128x64xf32>
    %c4_148 = arith.constant 4 : index
    %c0_149 = arith.constant 0 : index
    %c0_150 = arith.constant 0 : index
    %250 = vector.load %arg11[%c4_148, %c0_149, %c0_150] : memref<8x128x128xf32, #tpu.memory_space<vmem>>, vector<1x128x128xf32>
    %251 = vector.shape_cast %250 : vector<1x128x128xf32> to vector<128x128xf32>
    %cst_151 = arith.constant dense<0.000000e+00> : vector<128x64xf32>
    %252 = tpu.matmul %251, %234, %cst_151 {dimension_numbers = #tpu.dot_dimension_numbers<[1], [0], [0], [1], [0, 0, 1, 1], [], []>} : vector<128x128xf32>, vector<128x64xf32>, vector<128x64xf32> -> vector<128x64xf32>
    %253 = arith.maximumf %249, %252 : vector<128x64xf32>
    %c5_152 = arith.constant 5 : index
    %c0_153 = arith.constant 0 : index
    %c0_154 = arith.constant 0 : index
    %254 = vector.load %arg11[%c5_152, %c0_153, %c0_154] : memref<8x128x128xf32, #tpu.memory_space<vmem>>, vector<1x128x128xf32>
    %255 = vector.shape_cast %254 : vector<1x128x128xf32> to vector<128x128xf32>
    %cst_155 = arith.constant dense<0.000000e+00> : vector<128x64xf32>
    %256 = tpu.matmul %255, %234, %cst_155 {dimension_numbers = #tpu.dot_dimension_numbers<[1], [0], [0], [1], [0, 0, 1, 1], [], []>} : vector<128x128xf32>, vector<128x64xf32>, vector<128x64xf32> -> vector<128x64xf32>
    %257 = arith.maximumf %253, %256 : vector<128x64xf32>
    %c6_156 = arith.constant 6 : index
    %c0_157 = arith.constant 0 : index
    %c0_158 = arith.constant 0 : index
    %258 = vector.load %arg11[%c6_156, %c0_157, %c0_158] : memref<8x128x128xf32, #tpu.memory_space<vmem>>, vector<1x128x128xf32>
    %259 = vector.shape_cast %258 : vector<1x128x128xf32> to vector<128x128xf32>
    %cst_159 = arith.constant dense<0.000000e+00> : vector<128x64xf32>
    %260 = tpu.matmul %259, %234, %cst_159 {dimension_numbers = #tpu.dot_dimension_numbers<[1], [0], [0], [1], [0, 0, 1, 1], [], []>} : vector<128x128xf32>, vector<128x64xf32>, vector<128x64xf32> -> vector<128x64xf32>
    %261 = arith.maximumf %257, %260 : vector<128x64xf32>
    %c7_160 = arith.constant 7 : index
    %c0_161 = arith.constant 0 : index
    %c0_162 = arith.constant 0 : index
    %262 = vector.load %arg11[%c7_160, %c0_161, %c0_162] : memref<8x128x128xf32, #tpu.memory_space<vmem>>, vector<1x128x128xf32>
    %263 = vector.shape_cast %262 : vector<1x128x128xf32> to vector<128x128xf32>
    %cst_163 = arith.constant dense<0.000000e+00> : vector<128x64xf32>
    %264 = tpu.matmul %263, %234, %cst_163 {dimension_numbers = #tpu.dot_dimension_numbers<[1], [0], [0], [1], [0, 0, 1, 1], [], []>} : vector<128x128xf32>, vector<128x64xf32>, vector<128x64xf32> -> vector<128x64xf32>
    %265 = arith.maximumf %261, %264 : vector<128x64xf32>
    %266 = arith.subf %203, %16 : vector<128x64xf32>
    %c0_164 = arith.constant 0 : index
    %c0_165 = arith.constant 0 : index
    %c0_166 = arith.constant 0 : index
    %267 = vector.load %arg6[%c0_164, %c0_165, %c0_166] : memref<4x64x128xf32, #tpu.memory_space<vmem>>, vector<1x64x128xf32>
    %268 = vector.shape_cast %267 : vector<1x64x128xf32> to vector<64x128xf32>
    %cst_167 = arith.constant dense<0.000000e+00> : vector<128x128xf32>
    %269 = tpu.matmul %266, %268, %cst_167 {dimension_numbers = #tpu.dot_dimension_numbers<[1], [0], [0], [1], [0, 0, 1, 1], [], []>} : vector<128x64xf32>, vector<64x128xf32>, vector<128x128xf32> -> vector<128x128xf32>
    %270 = arith.subf %234, %16 : vector<128x64xf32>
    %c1_168 = arith.constant 1 : index
    %c0_169 = arith.constant 0 : index
    %c0_170 = arith.constant 0 : index
    %271 = vector.load %arg6[%c1_168, %c0_169, %c0_170] : memref<4x64x128xf32, #tpu.memory_space<vmem>>, vector<1x64x128xf32>
    %272 = vector.shape_cast %271 : vector<1x64x128xf32> to vector<64x128xf32>
    %cst_171 = arith.constant dense<0.000000e+00> : vector<128x128xf32>
    %273 = tpu.matmul %270, %272, %cst_171 {dimension_numbers = #tpu.dot_dimension_numbers<[1], [0], [0], [1], [0, 0, 1, 1], [], []>} : vector<128x64xf32>, vector<64x128xf32>, vector<128x128xf32> -> vector<128x128xf32>
    %274 = arith.addf %269, %273 : vector<128x128xf32>
    %275 = arith.subf %265, %16 : vector<128x64xf32>
    %c2_172 = arith.constant 2 : index
    %c0_173 = arith.constant 0 : index
    %c0_174 = arith.constant 0 : index
    %276 = vector.load %arg6[%c2_172, %c0_173, %c0_174] : memref<4x64x128xf32, #tpu.memory_space<vmem>>, vector<1x64x128xf32>
    %277 = vector.shape_cast %276 : vector<1x64x128xf32> to vector<64x128xf32>
    %cst_175 = arith.constant dense<0.000000e+00> : vector<128x128xf32>
    %278 = tpu.matmul %275, %277, %cst_175 {dimension_numbers = #tpu.dot_dimension_numbers<[1], [0], [0], [1], [0, 0, 1, 1], [], []>} : vector<128x64xf32>, vector<64x128xf32>, vector<128x128xf32> -> vector<128x128xf32>
    %279 = arith.addf %274, %278 : vector<128x128xf32>
    %280 = arith.subf %265, %16 : vector<128x64xf32>
    %c3_176 = arith.constant 3 : index
    %c0_177 = arith.constant 0 : index
    %c0_178 = arith.constant 0 : index
    %281 = vector.load %arg6[%c3_176, %c0_177, %c0_178] : memref<4x64x128xf32, #tpu.memory_space<vmem>>, vector<1x64x128xf32>
    %282 = vector.shape_cast %281 : vector<1x64x128xf32> to vector<64x128xf32>
    %cst_179 = arith.constant dense<0.000000e+00> : vector<128x128xf32>
    %283 = tpu.matmul %280, %282, %cst_179 {dimension_numbers = #tpu.dot_dimension_numbers<[1], [0], [0], [1], [0, 0, 1, 1], [], []>} : vector<128x64xf32>, vector<64x128xf32>, vector<128x128xf32> -> vector<128x128xf32>
    %284 = arith.addf %279, %283 : vector<128x128xf32>
    %c0_180 = arith.constant 0 : index
    %c0_181 = arith.constant 0 : index
    %285 = vector.load %arg9[%c0_180, %c0_181] : memref<1x128xf32, #tpu.memory_space<vmem>>, vector<1x128xf32>
    %286 = vector.broadcast %285 : vector<1x128xf32> to vector<128x128xf32>
    %287 = arith.addf %284, %286 : vector<128x128xf32>
    %288 = arith.addf %287, %11 : vector<128x128xf32>
    %c0_182 = arith.constant 0 : index
    %c0_183 = arith.constant 0 : index
    %c0_184 = arith.constant 0 : index
    %289 = vector.load %arg10[%c0_182, %c0_183, %c0_184] : memref<1x128x128xf32, #tpu.memory_space<vmem>>, vector<1x128x128xf32>
    %290 = vector.shape_cast %289 : vector<1x128x128xf32> to vector<128x128xf32>
    %291 = vector.shape_cast %288 : vector<128x128xf32> to vector<1x128x128xf32>
    tpu.vector_store %arg10[%c0_182, %c0_183, %c0_184], %291 {strides = array<i32>} : memref<1x128x128xf32, #tpu.memory_space<vmem>>, vector<1x128x128xf32>,
    return
  }
  func.func @transform_0(%arg0: i32) -> (i32, i32, i32) {
    %c0_i32 = arith.constant 0 : i32
    %c0_i32_0 = arith.constant 0 : i32
    %c0_i32_1 = arith.constant 0 : i32
    return %arg0, %c0_i32, %c0_i32_0 : i32, i32, i32
  }
  func.func @transform_1(%arg0: i32) -> (i32, i32, i32) {
    %c0_i32 = arith.constant 0 : i32
    %c0_i32_0 = arith.constant 0 : i32
    %c0_i32_1 = arith.constant 0 : i32
    return %arg0, %c0_i32, %c0_i32_0 : i32, i32, i32
  }
  func.func @transform_2(%arg0: i32) -> (i32, i32, i32) {
    %c0_i32 = arith.constant 0 : i32
    %c0_i32_0 = arith.constant 0 : i32
    %c0_i32_1 = arith.constant 0 : i32
    return %arg0, %c0_i32, %c0_i32_0 : i32, i32, i32
  }
  func.func @transform_3(%arg0: i32) -> (i32, i32) {
    %c0_i32 = arith.constant 0 : i32
    %c0_i32_0 = arith.constant 0 : i32
    %c0_i32_1 = arith.constant 0 : i32
    return %c0_i32, %c0_i32_0 : i32, i32
  }
  func.func @transform_4(%arg0: i32) -> (i32, i32) {
    %c0_i32 = arith.constant 0 : i32
    %c0_i32_0 = arith.constant 0 : i32
    %c0_i32_1 = arith.constant 0 : i32
    return %c0_i32, %c0_i32_0 : i32, i32
  }
  func.func @transform_5(%arg0: i32) -> (i32, i32, i32) {
    %c0_i32 = arith.constant 0 : i32
    %c0_i32_0 = arith.constant 0 : i32
    %c0_i32_1 = arith.constant 0 : i32
    %c0_i32_2 = arith.constant 0 : i32
    return %c0_i32, %c0_i32_0, %c0_i32_1 : i32, i32, i32
  }
  func.func @transform_6(%arg0: i32) -> (i32, i32) {
    %c0_i32 = arith.constant 0 : i32
    %c0_i32_0 = arith.constant 0 : i32
    %c0_i32_1 = arith.constant 0 : i32
    return %c0_i32, %c0_i32_0 : i32, i32
  }
  func.func @transform_7(%arg0: i32) -> (i32, i32) {
    %c0_i32 = arith.constant 0 : i32
    %c0_i32_0 = arith.constant 0 : i32
    %c0_i32_1 = arith.constant 0 : i32
    return %c0_i32, %c0_i32_0 : i32, i32
  }
  func.func @transform_8(%arg0: i32) -> (i32, i32) {
    %c0_i32 = arith.constant 0 : i32
    %c0_i32_0 = arith.constant 0 : i32
    %c0_i32_1 = arith.constant 0 : i32
    return %c0_i32, %c0_i32_0 : i32, i32
  }
  func.func @transform_9(%arg0: i32) -> (i32, i32, i32) {
    %c0_i32 = arith.constant 0 : i32
    %c0_i32_0 = arith.constant 0 : i32
    %c0_i32_1 = arith.constant 0 : i32
    return %arg0, %c0_i32, %c0_i32_0 : i32, i32, i32
  }
}

</mosaic_0001>

<bundles_post_ra>
// kernel: tpu_custom_call.1
= control target key start
LH: loop header
LB: loop body
LE: loop exit
PB: predicated region body
PF: predicated region fallthrough
CT: control target
= control target key end

     0   :  { %s17568_s0 = inlined_call_operand.vmem [shape: f32[2,128,3], index: 0, kind: input, shape index: {}]   ;;  %s17569_s1 = inlined_call_operand.vmem [shape: f32[2,3,128], index: 1, kind: input, shape index: {}]   ;;  %s17570_s2 = inlined_call_operand.vmem [shape: f32[2,128,128], index: 2, kind: input, shape index: {}]   ;;  %s17571_s3 = inlined_call_operand.vmem [shape: f32[128,64], index: 3, kind: input, shape index: {}]   ;;  %s17572_s4 = inlined_call_operand.vmem [shape: f32[3,64], index: 4, kind: input, shape index: {}]   ;;  %s17573_s5 = inlined_call_operand.hbm [shape: f32[4,64,128], index: 5, kind: input, shape index: {}]   ;;  %s17574_s6 = inlined_call_operand.vmem [shape: f32[1,128], index: 6, kind: input, shape index: {}]   ;;  %s17575_s7 = inlined_call_operand.vmem [shape: f32[1,128], index: 7, kind: input, shape index: {}]   ;;  %s17576_s8 = inlined_call_operand.vmem [shape: f32[1,128], index: 8, kind: input, shape index: {}]   ;;  %s17577_s9 = inlined_call_operand.hbm [shape: f32[2,128,128], index: 9, kind: output, shape index: {}]  }
   0x1   :  { %18318 = sst [smem:[#allocation229_spill]] %s17573_s5 }
   0x2   :  { %14 = vsyncpa [#allocation4], 0 }
   0x3   :  { %15 = vsyncpa [#allocation5], 0 }
   0x4   :  { %17 = vsyncpa [#allocation5 + $0x1], 0  ;;  %s10982_s30 = smov 0   ;;  %s10984_s10 = smov 0  }
   0x5   :  { %s10986_s11 = smov 0   ;;  %s10988_s12 = smov 0  }
   0x6 LB: > { %s11003_s13 = sadd.s32 4294967295, %s10922_s12   ;;  %s7585_s14 = sadd.s32 4294967294, %s10922_s12   ;;  %s10922_s12 = sphi %s10988_s12, %s19769_s12   ;;  %s10918_s11 = sphi %s10986_s11, %s19768_s11   ;;  %s10914_s10 = sphi %s10984_s10, %s19767_s10   ;;  %s10910_s30 = sphi %s10982_s30, %s19766_s30  }
   0x7   : > { %s11007_s15 = sadd.s32 1, %s10922_s12   ;;  %s234_s16 = sadd.s32 1, %s10918_s11 }
   0x8   : > { %s231_s17 = ssub.s32 %s10922_s12, %s11007_s15  ;;  %p244_p0 = scmp.ne.s32.totalorder %s10918_s11, %s10914_s10 }
   0x9   : > { %p232_p1 = scmp.eq.s32.totalorder %s231_s17, 0  ;;  %p245_p2 = scmp.eq.s32.totalorder %s11003_s13, 1 }
   0xa   : > { %p250_p3 = scmp.ne.s32.totalorder %s10914_s10, %s10910_s30  ;;  %p251_p4 = scmp.eq.s32.totalorder %s7585_s14, 1 }
   0xb   : > { %s11018_s18 = scalar_select %p232_p1, %s10918_s11, %s234_s16  }
   0xc   : > { %p11020_p5 = por %p245_p2, %p244_p0  ;;  %p11024_p6 = por %p251_p4, %p250_p3 }
   0xd   : > { %p7586_p7 = scmp.ge.s32.totalorder %s10922_s12, 1  ;;  %p258_p8 = scmp.lt.s32.totalorder %s10922_s12, 3 }
   0xe   : > { %s18320_s20 = scalar_select %p11024_p6, 1, 0 }
   0xf   : > { %p10790_p9 = scmp.eq.s32.totalorder %s11003_s13, 0  ;;  %p11031_p10 = pnand %p7586_p7, %p258_p8 }
  0x10   : > { %s10924_s22 = smov [#allocation3]  }
  0x11   : > { %s276_s23 = sshll.u32 %s10924_s22, 4  ;;  %p10782_p11 = pneg %p11031_p10  ;;  %s277_s23 = int_to_ptr.vmem [resolvable:$true] %s276_s23 }
  0x12   : > { %s10843_s24 = scalar_lea.vmem %s277_s23, 4096  ;;  %p10851_p3 = scmp.lt.s32.totalorder %s277_s23, %s277_s23 }
  0x13   : > { %p10783_p12 = pnand %p10790_p9, %p10782_p11  ;;  %p10844_p0 = scmp.ne.s32.totalorder %s277_s23, %s10843_s24 }
  0x14   : > { %p10852_p4 = scmp.lt.s32.totalorder %s10843_s24, %s10843_s24 }
  0x15   : > { %p10834_p13 = pneg %p10783_p12 }
  0x16   : > { %p10853_p6 = por %p10852_p4, %p10851_p3 }
  0x17   : > { %p10846_p1 = pnand %p10844_p0, %p10834_p13 }
  0x19   : > { %p10847_p2 = pneg %p10846_p1 }
  0x1b   : > { %p10854_p7 = pnand %p10853_p6, %p10847_p2 }
  0x1d   : > { %10857 = shalt.err (!%p10854_p7)
}
  0x1e   : > { %s10925_s25 = smov 128   ;;  %s10926_s26 = smov 8  }
  0x1f   : > { %s18322_s5 = sld [smem:[#allocation229_spill]] }
  0x21   : > { %324 = sbr.rel (%p11031_p10) target bundleno = 3827 (0xef3), region = 56 }
  0x25   : > { %10785 = dma.hbm_to_vmem [thread:$0]  (!%p10783_p12), %s18322_s5, 4096, %s277_s23, [#allocation4], %s10925_s25, %s10925_s25, %s10926_s26  }
  0x26   : > { %10901 = dma.done.wait (%p10790_p9), [#allocation4], 4096  }
  0x27   : > { %10903 = vsyncadd (%p10790_p9), [#allocation4], 4294963200  ;;  %p369_p8 = scmp.lt.s32.totalorder %s11003_s13, 1  ;;  %vm528_vm0 = vcmask 1042432   ;;  %vm479_vm1 = vcmask 23552   ;;  %v477_v1 = vld [vmem:[%s17571_s3 + $0x78] sm:$0xff] }
  0x28   : > { %v478_v0 = vld [vmem:[%s17572_s4] sm:$0x7]  ;;  %9190 = vmatprep.subr.mxu1 %v477_v1  ;;  %v476_v4 = vld [vmem:[%s17571_s3 + $0x70] sm:$0xff]  ;;  %v475_v6 = vld [vmem:[%s17571_s3 + $0x68] sm:$0xff] }
  0x29   : > { %s11050_s29 = scalar_select %p369_p8, %s11003_s13, 1  ;;  %9164 = vmatprep.subr.msk.mxu0 %vm528_vm0, %v478_v0  ;;  %9191 = vmatpush3.msra.mxu1 %v477_v1  ;;  %v474_v9 = vld [vmem:[%s17571_s3 + $0x60] sm:$0xff]  ;;  %v473_v11 = vld [vmem:[%s17571_s3 + $0x58] sm:$0xff]  ;;  %v472_v13 = vld [vmem:[%s17571_s3 + $0x50] sm:$0xff] }
  0x2a   : > { %9165 = vmatpush3.msk.msra.mxu0 %vm528_vm0, %v478_v0  ;;  %9192 = vmatprep.subr.mxu1 %v476_v4  ;;  %v471_v15 = vld [vmem:[%s17571_s3 + $0x48] sm:$0xff]  ;;  %v11136_v17 = vld [vmem:[%s17574_s6] ss:$0 sm:$0xff]  ;;  %v469_v24 = vld [vmem:[%s17571_s3 + $0x38] sm:$0xff] }
  0x2b   : > { %s7847_s14 = sshll.u32 %s11050_s29, 7  ;;  %s7594_s16 = sshll.u32 %s11050_s29, 2  ;;  %9193 = vmatpush3.msra.mxu1 %v476_v4  ;;  %v11147_v20 = vld [vmem:[%s17575_s7] ss:$0 sm:$0xff]  ;;  %v468_v26 = vld [vmem:[%s17571_s3 + $0x30] sm:$0xff]  ;;  %v467_v28 = vld [vmem:[%s17571_s3 + $0x28] sm:$0xff] }
  0x2c   : > { %s11059_s22 = scalar_lea.vmem %s17568_s0, %s7847_s14  ;;  %s377_s25 = scalar_lea.vmem %s17569_s1, %s7594_s16  ;;  %9194 = vmatprep.subr.mxu1 %v475_v6  ;;  %v470_v21 = vld [vmem:[%s17571_s3 + $0x40] sm:$0xff]  ;;  %v465_v32 = vld [vmem:[%s17571_s3 + $0x18] sm:$0xff]  ;;  %v464_v36 = vld [vmem:[%s17571_s3 + $0x10] sm:$0xff] }
  0x2d   : > { %v11071_v2 = vld [vmem:[%s11059_s22] sm:$0xff]  ;;  %v11075_v3 = vld [vmem:[%s11059_s22 + $0x8] sm:$0xff]  ;;  %v11089_v7 = vld [vmem:[%s11059_s22 + $0x10] sm:$0xff]  ;;  %9195 = vmatpush3.msra.mxu1 %v475_v6  ;;  %s11114_s17 = scalar_lea.vmem %s17570_s2, %s7847_s14  ;;  %s10929_s29 = smov [#allocation6]  }
  0x2e   : > { %v399_v5 = vld [vmem:[%s377_s25] sm:$0x7]  ;;  %9166 = vmatprep.mubr.msk.f32.mxu0 %vm479_vm1, %v11071_v2  ;;  %v11093_v8 = vld [vmem:[%s11059_s22 + $0x18] sm:$0xff]  ;;  %9196 = vmatprep.subr.mxu1 %v474_v9  ;;  %v11119_v12 = vld [vmem:[%s11059_s22 + $0x28] sm:$0xff]  ;;  %s7849_s25 = sshll.u32 %s11003_s13, 11  ;;  %s10862_s14 = sshll.u32 %s10929_s29, 4  ;;  %s10863_s14 = int_to_ptr.vmem [resolvable:$false] %s10862_s14 }
  0x2f   : > { %9167 = vmatmul.mubr.msk.f32.vlgmr.msra.gmra.mxu0 %vm479_vm1, %v11075_v3  ;;  %9246 = vmatprep.subr.msk.mxu0 %vm528_vm0, %v399_v5  ;;  %v11100_v10 = vld [vmem:[%s11059_s22 + $0x20] sm:$0xff]  ;;  %v11125_v14 = vld [vmem:[%s11059_s22 + $0x30] sm:$0xff]  ;;  %v11141_v18 = vld [vmem:[%s11059_s22 + $0x38] sm:$0xff]  ;;  %s17519_s21 = scalar_lea.hbm %s17577_s9, %s7849_s25 }
  0x30   : > { %9247 = vmatpush3.msk.msra.mxu0 %vm528_vm0, %v399_v5  ;;  %9169 = vmatprep.mubr.msk.f32.mxu0 %vm479_vm1, %v11089_v7  ;;  %v400_v16 = vld [vmem:[%s11114_s17] sm:$0xff]  ;;  %v11166_v25 = vld [vmem:[%s11059_s22 + $0x48] sm:$0xff]  ;;  %v11172_v27 = vld [vmem:[%s11059_s22 + $0x50] sm:$0xff] }
  0x31   : > { %9197 = vmatpush3.msra.mxu1 %v474_v9  ;;  %v423_v19 = vmul.f32 %v11136_v17, %v400_v16  ;;  %v11153_v22 = vld [vmem:[%s11059_s22 + $0x40] sm:$0xff]  ;;  %v11183_v29 = vld [vmem:[%s11059_s22 + $0x58] sm:$0xff]  ;;  %v401_v33 = vld [vmem:[%s11114_s17 + $0x8] sm:$0xff] }
  0x32   : > { %9198 = vmatprep.subr.mxu1 %v473_v11  ;;  %v466_v30 = vld [vmem:[%s17571_s3 + $0x20] sm:$0xff]  ;;  %v11200_v34 = vld [vmem:[%s11059_s22 + $0x68] sm:$0xff]  ;;  %v402_v35 = vld [vmem:[%s11114_s17 + $0x10] sm:$0xff]  ;;  %v424_v38 = vmul.f32 %v11136_v17, %v401_v33 }
  0x33   : > { %9170 = vmatmul.mubr.msk.f32.gmra.mxu0 %vm479_vm1, %v11093_v8  ;;  %9199 = vmatpush3.msra.mxu1 %v473_v11  ;;  %v11156_v23 = vadd.f32 %v11147_v20, %v423_v19  ;;  %v11189_v31 = vld [vmem:[%s11059_s22 + $0x60] sm:$0xff]  ;;  %v11207_v37 = vld [vmem:[%s11059_s22 + $0x70] sm:$0xff]  ;;  %v463_v39 = vld [vmem:[%s17571_s3 + $0x8] sm:$0xff]  ;;  %v425_v40 = vmul.f32 %v11136_v17, %v402_v35 }
  0x34   : > { %9172 = vmatprep.mubr.msk.f32.mxu0 %vm479_vm1, %v11100_v10  ;;  %9200 = vmatprep.subr.mxu1 %v472_v13  ;;  %v403_v41 = vld [vmem:[%s11114_s17 + $0x18] sm:$0xff]  ;;  %v404_v43 = vld [vmem:[%s11114_s17 + $0x20] sm:$0xff]  ;;  %v11227_v45 = vadd.f32 %v11147_v20, %v424_v38  ;;  %v405_v49 = vld [vmem:[%s11114_s17 + $0x28] sm:$0xff] }
  0x35   : > { %9201 = vmatpush3.msra.mxu1 %v472_v13  ;;  %18323 = vst [vmem:[#allocation9_spill] sm:$0xff] %v11156_v23  ;;  %9222 = vmatprep.mubr.f32.mxu1 %v11156_v23  ;;  %v11220_v42 = vld [vmem:[%s11059_s22 + $0x78] sm:$0xff]  ;;  %v462_v44 = vld [vmem:[%s17571_s3] sm:$0xff]  ;;  %v426_v46 = vmul.f32 %v11136_v17, %v403_v41  ;;  %v11233_v47 = vadd.f32 %v11147_v20, %v425_v40  ;;  %v406_v50 = vld [vmem:[%s11114_s17 + $0x30] sm:$0xff]  ;;  %s366_s22 = sand.u32 1, %s10914_s10  }
  0x36   : > { %9202 = vmatprep.subr.mxu1 %v471_v15  ;;  %18324 = vst [vmem:[#allocation10_spill] sm:$0xff] %v11227_v45  ;;  %v427_v48 = vmul.f32 %v11136_v17, %v404_v43  ;;  %v428_v52 = vmul.f32 %v11136_v17, %v405_v49  ;;  %v429_v54 = vmul.f32 %v11136_v17, %v406_v50  ;;  %v407_v55 = vld [vmem:[%s11114_s17 + $0x38] sm:$0xff]  ;;  %v408_v56 = vld [vmem:[%s11114_s17 + $0x40] sm:$0xff]  ;;  %v409_v61 = vld [vmem:[%s11114_s17 + $0x48] sm:$0xff]  ;;  %s7591_s23 = sshll.u32 %s366_s22, 7  ;;  %s17528_s13 = scalar_lea.sflag [#allocation5], %s366_s22 }
  0x37   : > { %9173 = vmatmul.mubr.msk.f32.gmra.mxu0 %vm479_vm1, %v11119_v12  ;;  %9203 = vmatpush3.msra.mxu1 %v471_v15  ;;  %18325 = vst [vmem:[#allocation11_spill] sm:$0xff] %v11233_v47  ;;  %v11242_v51 = vadd.f32 %v11147_v20, %v426_v46  ;;  %v430_v58 = vmul.f32 %v11136_v17, %v407_v55  ;;  %v410_v62 = vld [vmem:[%s11114_s17 + $0x50] sm:$0xff]  ;;  %v412_v4 = vld [vmem:[%s11114_s17 + $0x60] sm:$0xff]  ;;  %v413_v9 = vld [vmem:[%s11114_s17 + $0x68] sm:$0xff]  ;;  %v10927_v46 = vmov 0.0   ;;  %s17454_s24 = scalar_lea.vmem [#allocation6], %s7591_s23 }
  0x38   : > { %9175 = vmatprep.mubr.msk.f32.mxu0 %vm479_vm1, %v11125_v14  ;;  %9204 = vmatprep.subr.mxu1 %v470_v21  ;;  %v11249_v53 = vadd.f32 %v11147_v20, %v427_v48  ;;  %v11258_v57 = vadd.f32 %v11147_v20, %v428_v52  ;;  %v11265_v59 = vadd.f32 %v11147_v20, %v429_v54  ;;  %v415_v15 = vld [vmem:[%s11114_s17 + $0x78] sm:$0xff]  ;;  %s7487_s26 = sshll.u32 %s17454_s24, 4  ;;  %s17521_s26 = int_to_ptr.vmem [resolvable:$true] %s7487_s26 }
  0x39   : > { %9205 = vmatpush3.msra.mxu1 %v470_v21  ;;  %18326 = vst [vmem:[#allocation12_spill] sm:$0xff] %v11242_v51  ;;  %v431_v60 = vmul.f32 %v11136_v17, %v408_v56  ;;  %v11274_v63 = vadd.f32 %v11147_v20, %v430_v58  ;;  %v432_v0 = vmul.f32 %v11136_v17, %v409_v61  ;;  %s10858_s5 = scalar_lea.vmem %s17521_s26, 2048  ;;  %p10865_p11 = scmp.lt.s32.totalorder %s17521_s26, %s10863_s14 }
  0x3a   : > { %9206 = vmatprep.subr.mxu1 %v469_v24  ;;  %18327 = vst [vmem:[#allocation13_spill] sm:$0xff] %v11249_v53  ;;  %18328 = vst [vmem:[#allocation14_spill] sm:$0xff] %v11258_v57  ;;  %p10859_p6 = scmp.ne.s32.totalorder %s17521_s26, %s10858_s5 }
  0x3b   : > { %9176 = vmatmul.mubr.msk.f32.gmra.mxu0 %vm479_vm1, %v11141_v18  ;;  %9207 = vmatpush3.msra.mxu1 %v469_v24  ;;  %18329 = vst [vmem:[#allocation15_spill] sm:$0xff] %v11265_v59  ;;  %18330 = vst [vmem:[#allocation16_spill] sm:$0xff] %v11274_v63  ;;  %v11281_v1 = vadd.f32 %v11147_v20, %v431_v60  ;;  %v11290_v5 = vadd.f32 %v11147_v20, %v432_v0 }
  0x3c   : > { %9178 = vmatprep.mubr.msk.f32.mxu0 %vm479_vm1, %v11153_v22  ;;  %9208 = vmatprep.subr.mxu1 %v468_v26  ;;  %p10860_p9 = pnand %p10859_p6, %p11020_p5 }
  0x3d   : > { %9209 = vmatpush3.msra.mxu1 %v468_v26  ;;  %18331 = vst [vmem:[#allocation17_spill] sm:$0xff] %v11281_v1  ;;  %18332 = vst [vmem:[#allocation18_spill] sm:$0xff] %v11290_v5 }
  0x3e   : > { %9210 = vmatprep.subr.mxu1 %v467_v28  ;;  %p10861_p10 = pneg %p10860_p9 }
  0x3f   : > { %9179 = vmatmul.mubr.msk.f32.gmra.mxu0 %vm479_vm1, %v11166_v25  ;;  %9211 = vmatpush3.msra.mxu1 %v467_v28 }
  0x40   : > { %9181 = vmatprep.mubr.msk.f32.mxu0 %vm479_vm1, %v11172_v27  ;;  %9212 = vmatprep.subr.mxu1 %v466_v30 }
  0x41   : > { %9213 = vmatpush3.msra.mxu1 %v466_v30 }
  0x42   : > { %9214 = vmatprep.subr.mxu1 %v465_v32 }
  0x43   : > { %9182 = vmatmul.mubr.msk.f32.gmra.mxu0 %vm479_vm1, %v11183_v29  ;;  %9215 = vmatpush3.msra.mxu1 %v465_v32 }
  0x44   : > { %9184 = vmatprep.mubr.msk.f32.mxu0 %vm479_vm1, %v11189_v31  ;;  %9216 = vmatprep.subr.mxu1 %v464_v36 }
  0x45   : > { %9217 = vmatpush3.msra.mxu1 %v464_v36 }
  0x46   : > { %9218 = vmatprep.subr.mxu1 %v463_v39 }
  0x47   : > { %9185 = vmatmul.mubr.msk.f32.gmra.mxu0 %vm479_vm1, %v11200_v34  ;;  %9219 = vmatpush3.msra.mxu1 %v463_v39 }
  0x48   : > { %9187 = vmatprep.mubr.msk.f32.mxu0 %vm479_vm1, %v11207_v37  ;;  %9220 = vmatprep.subr.mxu1 %v462_v44 }
  0x49   : > { %9221 = vmatpush3.msra.mxu1 %v462_v44 }
  0x4a   : > { %9223 = vmatmul.mubr.f32.vlgmr.msra.gmra.mxu1 %v11227_v45 }
  0x4b   : > { %9188 = vmatmul.mubr.msk.f32.gmra.mxu0 %vm479_vm1, %v11220_v42  ;;  %9225 = vmatprep.mubr.f32.mxu1 %v11233_v47 }
  0x4c   : > { %9248 = vmatprep.mubr.msk.f32.mxu0 %vm479_vm1, %v11071_v2  ;;  %v433_v2 = vmul.f32 %v11136_v17, %v410_v62 }
  0x4e   : > { %9226 = vmatmul.mubr.f32.gmra.mxu1 %v11242_v51 }
  0x4f   : > { %9249 = vmatmul.mubr.msk.f32.vlgmr.msra.gmra.mxu0 %vm479_vm1, %v11075_v3  ;;  %9228 = vmatprep.mubr.f32.mxu1 %v11249_v53  ;;  %v411_v3 = vld [vmem:[%s11114_s17 + $0x58] sm:$0xff] }
  0x50   : > { %9251 = vmatprep.mubr.msk.f32.mxu0 %vm479_vm1, %v11089_v7  ;;  %v434_v6 = vmul.f32 %v11136_v17, %v411_v3  ;;  %v11297_v7 = vadd.f32 %v11147_v20, %v433_v2 }
  0x52   : > { %9229 = vmatmul.mubr.f32.gmra.mxu1 %v11258_v57  ;;  %18333 = vst [vmem:[#allocation19_spill] sm:$0xff] %v11297_v7  ;;  %v11306_v11 = vadd.f32 %v11147_v20, %v434_v6 }
  0x53   : > { %9252 = vmatmul.mubr.msk.f32.gmra.mxu0 %vm479_vm1, %v11093_v8  ;;  %9231 = vmatprep.mubr.f32.mxu1 %v11265_v59  ;;  %v435_v8 = vmul.f32 %v11136_v17, %v412_v4 }
  0x54   : > { %9254 = vmatprep.mubr.msk.f32.mxu0 %vm479_vm1, %v11100_v10  ;;  %v414_v10 = vld [vmem:[%s11114_s17 + $0x70] sm:$0xff]  ;;  %18334 = vst [vmem:[#allocation20_spill] sm:$0xff] %v11306_v11  ;;  %s10864_s17 = scalar_lea.vmem %s10863_s14, 4096 }
  0x55   : > { %v11313_v13 = vadd.f32 %v11147_v20, %v435_v8  ;;  %p10866_p12 = scmp.lt.s32.totalorder %s10864_s17, %s10858_s5 }
  0x56   : > { %9232 = vmatmul.mubr.f32.gmra.mxu1 %v11274_v63 }
  0x57   : > { %9255 = vmatmul.mubr.msk.f32.gmra.mxu0 %vm479_vm1, %v11119_v12  ;;  %9234 = vmatprep.mubr.f32.mxu1 %v11281_v1  ;;  %v436_v12 = vmul.f32 %v11136_v17, %v413_v9  ;;  %18335 = vst [vmem:[#allocation21_spill] sm:$0xff] %v11313_v13  ;;  %p10867_p13 = por %p10866_p12, %p10865_p11 }
  0x58   : > { %9257 = vmatprep.mubr.msk.f32.mxu0 %vm479_vm1, %v11125_v14  ;;  %v437_v14 = vmul.f32 %v11136_v17, %v414_v10 }
  0x59   : > { %v11321_v16 = vadd.f32 %v11147_v20, %v436_v12  ;;  %p10868_p0 = pnand %p10867_p13, %p10861_p10 }
  0x5a   : > { %9235 = vmatmul.mubr.f32.gmra.mxu1 %v11290_v5  ;;  %v11328_v19 = vadd.f32 %v11147_v20, %v437_v14 }
  0x5b   : > { %9258 = vmatmul.mubr.msk.f32.gmra.mxu0 %vm479_vm1, %v11141_v18  ;;  %9237 = vmatprep.mubr.f32.mxu1 %v11297_v7  ;;  %18336 = vst [vmem:[#allocation22_spill] sm:$0xff] %v11321_v16  ;;  %v438_v18 = vmul.f32 %v11136_v17, %v415_v15 }
  0x5c   : > { %9260 = vmatprep.mubr.msk.f32.mxu0 %vm479_vm1, %v11153_v22  ;;  %18337 = vst [vmem:[#allocation23_spill] sm:$0xff] %v11328_v19 }
  0x5d   : > { %v11334_v21 = vadd.f32 %v11147_v20, %v438_v18 }
  0x5e   : > { %9238 = vmatmul.mubr.f32.gmra.mxu1 %v11306_v11 }
  0x5f   : > { %9261 = vmatmul.mubr.msk.f32.gmra.mxu0 %vm479_vm1, %v11166_v25  ;;  %9240 = vmatprep.mubr.f32.mxu1 %v11313_v13  ;;  %18338 = vst [vmem:[#allocation24_spill] sm:$0xff] %v11334_v21 }
  0x60   : > { %9263 = vmatprep.mubr.msk.f32.mxu0 %vm479_vm1, %v11172_v27 }
  0x62   : > { %9241 = vmatmul.mubr.f32.gmra.mxu1 %v11321_v16 }
  0x63   : > { %9264 = vmatmul.mubr.msk.f32.gmra.mxu0 %vm479_vm1, %v11183_v29  ;;  %9243 = vmatprep.mubr.f32.mxu1 %v11328_v19 }
  0x64   : > { %9266 = vmatprep.mubr.msk.f32.mxu0 %vm479_vm1, %v11189_v31  ;;  %v970_v31 = vlaneseq }
  0x66   : > { %9244 = vmatmul.mubr.f32.gmra.mxu1 %v11334_v21  ;;  %v11375_v38 = vand.u32 127, %v970_v31 }
  0x67   : > { %9267 = vmatmul.mubr.msk.f32.gmra.mxu0 %vm479_vm1, %v11200_v34  ;;  %v11368_v34 = vshrl.u32 %v970_v31, 7 }
  0x68   : > { %9269 = vmatprep.mubr.msk.f32.mxu0 %vm479_vm1, %v11207_v37 }
  0x69   : > { %v972_v37 = vadd.s32 8, %v11368_v34  ;;  %vm989_vm2 = vcmp.eq.s32.totalorder %v11368_v34, %v11375_v38  ;;  %v973_v40 = vadd.s32 16, %v11368_v34  ;;  %v974_v43 = vadd.s32 24, %v11368_v34 }
  0x6a   : > { %v7633_v48 = vsel %vm989_vm2, 1.0, %v10927_v46  ;;  %v975_v50 = vadd.s32 32, %v11368_v34  ;;  %v976_v58 = vadd.s32 40, %v11368_v34  ;;  %v977_v2 = vadd.s32 48, %v11368_v34 }
  0x6b   : > { %9270 = vmatmul.mubr.msk.f32.gmra.mxu0 %vm479_vm1, %v11220_v42  ;;  %vm990_vm3 = vcmp.eq.s32.totalorder %v972_v37, %v11375_v38  ;;  %vm991_vm4 = vcmp.eq.s32.totalorder %v973_v40, %v11375_v38  ;;  %vm992_vm5 = vcmp.eq.s32.totalorder %v974_v43, %v11375_v38  ;;  %v978_v10 = vadd.s32 56, %v11368_v34 }
  0x6c   : > { %v7634_v52 = vsel %vm990_vm3, 1.0, %v10927_v46  ;;  %v7635_v61 = vsel %vm991_vm4, 1.0, %v10927_v46  ;;  %vm993_vm6 = vcmp.eq.s32.totalorder %v975_v50, %v11375_v38  ;;  %v7636_v3 = vsel %vm992_vm5, 1.0, %v10927_v46 }
  0x6d   : > { %vm994_vm7 = vcmp.eq.s32.totalorder %v976_v58, %v11375_v38  ;;  %v7637_v14 = vsel %vm993_vm6, 1.0, %v10927_v46  ;;  %vm995_vm8 = vcmp.eq.s32.totalorder %v977_v2, %v11375_v38  ;;  %v979_v37 = vadd.s32 64, %v11368_v34 }
  0x6e   : > { %v7638_v40 = vsel %vm994_vm7, 1.0, %v10927_v46  ;;  %vm996_vm9 = vcmp.eq.s32.totalorder %v978_v10, %v11375_v38  ;;  %v983_v13 = vadd.s32 96, %v11368_v34  ;;  %v984_v7 = vadd.s32 104, %v11368_v34 }
  0x6f   : > { %vm997_vm10 = vcmp.eq.s32.totalorder %v979_v37, %v11375_v38  ;;  %v985_v1 = vadd.s32 112, %v11368_v34  ;;  %v986_v59 = vadd.s32 120, %v11368_v34 }
  0x70   : > { %vm1001_vm14 = vcmp.eq.s32.totalorder %v983_v13, %v11375_v38  ;;  %vm1002_vm15 = vcmp.eq.s32.totalorder %v984_v7, %v11375_v38 }
  0x71   : > { %vm1003_vm0 = vcmp.eq.s32.totalorder %v985_v1, %v11375_v38  ;;  %v7646_v53 = vsel %vm1002_vm15, 1.0, %v10927_v46  ;;  %vm1004_vm1 = vcmp.eq.s32.totalorder %v986_v59, %v11375_v38 }
  0x72   : > { %v7648_v51 = vsel %vm1004_vm1, 1.0, %v10927_v46 }
  0xef   : > { %v11344_v17 = vpop.f32.mrf.mxu0 }
  0xf1   : > { %v11346_v22 = vpop.f32.mrf.mxu0 }
  0xf3   : > { %v11348_v24 = vpop.f32.mrf.mxu0 }
  0xf5   : > { %v11350_v20 = vpop.f32.mrf.mxu0 }
  0xf7   : > { %v11352_v25 = vpop.f32.mrf.mxu0 }
  0xf9   : > { %v11354_v26 = vpop.f32.mrf.mxu0 }
  0xfb   : > { %v11356_v27 = vpop.f32.mrf.mxu0 }
  0xfd   : > { %v11358_v28 = vpop.f32.mrf.mxu0 }
  0xff   : > { %v11360_v29 = vpop.f32.mrf.mxu0 }
 0x101   : > { %v11362_v30 = vpop.f32.mrf.mxu0 }
 0x103   : > { %v11364_v32 = vpop.f32.mrf.mxu0 }
 0x105   : > { %v11366_v33 = vpop.f32.mrf.mxu0 }
 0x107   : > { %v11370_v35 = vpop.f32.mrf.mxu0 }
 0x109   : > { %v11372_v36 = vpop.f32.mrf.mxu0 }
 0x10a   : > { %v11384_v42 = vpop.f32.mrf.mxu1 }
 0x10b   : > { %v11377_v39 = vpop.f32.mrf.mxu0 }
 0x10c   : > { %v11391_v49 = vpop.f32.mrf.mxu1 }
 0x10d   : > { %v11382_v41 = vpop.f32.mrf.mxu0 }
 0x10e   : > { %v11398_v55 = vpop.f32.mrf.mxu1 }
 0x10f   : > { %v11388_v44 = vpop.f32.mrf.mxu0 }
 0x110   : > { %v1038_v62 = vmul.f32 %v11388_v44, %v7634_v52  ;;  %v11407_v0 = vpop.f32.mrf.mxu1 }
 0x111   : > { %v11396_v54 = vpop.f32.mrf.mxu0 }
 0x112   : > { %v1037_v56 = vmul.f32 %v7633_v48, %v11396_v54  ;;  %v11414_v8 = vpop.f32.mrf.mxu1 }
 0x113   : > { %v11403_v60 = vpop.f32.mrf.mxu0 }
 0x114   : > { %v1053_v6 = vadd.f32 %v1038_v62, %v1037_v56  ;;  %v1040_v15 = vmul.f32 %v11403_v60, %v7636_v3  ;;  %v11423_v31 = vpop.f32.mrf.mxu1  ;;  %v980_v56 = vadd.s32 72, %v11368_v34 }
 0x115   : > { %v11412_v4 = vpop.f32.mrf.mxu0 }
 0x116   : > { %v1039_v9 = vmul.f32 %v7635_v61, %v11412_v4  ;;  %v11430_v48 = vpop.f32.mrf.mxu1  ;;  %v7639_v61 = vsel %vm995_vm8, 1.0, %v10927_v46  ;;  %vm998_vm11 = vcmp.eq.s32.totalorder %v980_v56, %v11375_v38 }
 0x117   : > { %v11419_v12 = vpop.f32.mrf.mxu0 }
 0x118   : > { %v1054_v18 = vadd.f32 %v1053_v6, %v1039_v9  ;;  %v1042_v62 = vmul.f32 %v11419_v12, %v7638_v40  ;;  %v11439_v3 = vpop.f32.mrf.mxu1  ;;  %v981_v6 = vadd.s32 80, %v11368_v34  ;;  %v7640_v9 = vsel %vm996_vm9, 1.0, %v10927_v46 }
 0x119   : > { %v11428_v43 = vpop.f32.mrf.mxu0  ;;  %v982_v40 = vadd.s32 88, %v11368_v34 }
 0x11a   : > { %v1041_v50 = vmul.f32 %v7637_v14, %v11428_v43  ;;  %v1055_v52 = vadd.f32 %v1054_v18, %v1040_v15  ;;  %v11446_v10 = vpop.f32.mrf.mxu1  ;;  %vm999_vm12 = vcmp.eq.s32.totalorder %v981_v6, %v11375_v38 }
 0x11b   : > { %v11435_v58 = vpop.f32.mrf.mxu0  ;;  %vm1000_vm13 = vcmp.eq.s32.totalorder %v982_v40, %v11375_v38 }
 0x11c   : > { %v1056_v2 = vadd.f32 %v1055_v52, %v1041_v50  ;;  %v7641_v52 = vsel %vm997_vm10, 1.0, %v10927_v46  ;;  %v1044_v37 = vmul.f32 %v11435_v58, %v7640_v9  ;;  %v11455_v21 = vpop.f32.mrf.mxu1  ;;  %v7644_v5 = vsel %vm1000_vm13, 1.0, %v10927_v46 }
 0x11d   : > { %v11444_v14 = vpop.f32.mrf.mxu0 }
 0x11e   : > { %v1043_v15 = vmul.f32 %v7639_v61, %v11444_v14  ;;  %v1057_v18 = vadd.f32 %v1056_v2, %v1042_v62  ;;  %v7642_v61 = vsel %vm998_vm11, 1.0, %v10927_v46  ;;  %v9239_v56 = vpop.f32.mrf.mxu1 }
 0x11f   : > { %v11451_v50 = vpop.f32.mrf.mxu0 }
 0x120   : > { %v1058_v19 = vadd.f32 %v1057_v18, %v1043_v15  ;;  %v7643_v15 = vsel %vm999_vm12, 1.0, %v10927_v46  ;;  %v1046_v6 = vmul.f32 %v11451_v50, %v7642_v61  ;;  %v793_v11 = vpop.f32.mrf.mxu1 }
 0x121   : > { %v11460_v62 = vpop.f32.mrf.mxu0 }
 0x122   : > { %v1045_v2 = vmul.f32 %v7641_v52, %v11460_v62  ;;  %v1059_v16 = vadd.f32 %v1058_v19, %v1044_v37  ;;  %v9242_v19 = vpop.f32.mrf.mxu1 }
 0x123   : > { %v11465_v9 = vpop.f32.mrf.mxu0 }
 0x124   : > { %v1060_v18 = vadd.f32 %v1059_v16, %v1045_v2  ;;  %v7645_v16 = vsel %vm1001_vm14, 1.0, %v10927_v46  ;;  %v1048_v13 = vmul.f32 %v11465_v9, %v7644_v5  ;;  %v803_v2 = vpop.f32.mrf.mxu1  ;;  %v7647_v5 = vsel %vm1003_vm0, 1.0, %v10927_v46 }
 0x125   : > { %v11472_v52 = vpop.f32.mrf.mxu0 }
 0x126   : > { %v1047_v40 = vmul.f32 %v7643_v15, %v11472_v52  ;;  %v1061_v37 = vadd.f32 %v1060_v18, %v1046_v6  ;;  %v9245_v15 = vpop.f32.mrf.mxu1 }
 0x127   : > { %v11477_v63 = vpop.f32.mrf.mxu0  ;;  %v11488_v34 = vadd.f32 %v9245_v15, %v11377_v39 }
 0x128   : > { %v1062_v61 = vadd.f32 %v1061_v37, %v1047_v40  ;;  %v1050_v40 = vmul.f32 %v11477_v63, %v7646_v53  ;;  %v813_v37 = vpop.f32.mrf.mxu1  ;;  %v11506_v53 = vadd.f32 %v9242_v19, %v11370_v35  ;;  %v11521_v19 = vadd.f32 %v9239_v56, %v11364_v32 }
 0x129   : > { %v11483_v57 = vpop.f32.mrf.mxu0  ;;  %18339 = vst [vmem:[#allocation25_spill] sm:$0xff] %v11488_v34  ;;  %v11495_v47 = vadd.f32 %v813_v37, %v11382_v41  ;;  %9272 = vmatprep.subr.mxu1 %v11488_v34  ;;  %9328 = vmatprep.subr.mxu0 %v11488_v34  ;;  %v11536_v32 = vadd.f32 %v11446_v10, %v11360_v29 }
 0x12a   : > { %v1049_v6 = vmul.f32 %v7645_v16, %v11483_v57  ;;  %v1063_v7 = vadd.f32 %v1062_v61, %v1048_v13  ;;  %9273 = vmatpush3.msra.mxu1 %v11488_v34  ;;  %9329 = vmatpush3.msra.mxu0 %v11488_v34  ;;  %18341 = vst [vmem:[#allocation27_spill] sm:$0xff] %v11506_v53  ;;  %18343 = vst [vmem:[#allocation29_spill] sm:$0xff] %v11521_v19 }
 0x12b   : > { %v11490_v18 = vpop.f32.mrf.mxu0  ;;  %18340 = vst [vmem:[#allocation26_spill] sm:$0xff] %v11495_v47  ;;  %9274 = vmatprep.subr.mxu1 %v11495_v47  ;;  %9330 = vmatprep.subr.mxu0 %v11495_v47  ;;  %v11514_v13 = vadd.f32 %v803_v2, %v11372_v36  ;;  %v11528_v36 = vadd.f32 %v793_v11, %v11366_v33  ;;  %18345 = vst [vmem:[#allocation31_spill] sm:$0xff] %v11536_v32 }
 0x12c   : > { %v1064_v1 = vadd.f32 %v1063_v7, %v1049_v6  ;;  %v1052_v41 = vmul.f32 %v11490_v18, %v7648_v51  ;;  %9275 = vmatpush3.msra.mxu1 %v11495_v47  ;;  %9331 = vmatpush3.msra.mxu0 %v11495_v47  ;;  %v11544_v11 = vadd.f32 %v11455_v21, %v11362_v30  ;;  %v1076_v30 = vmul.f32 2.0, %v11412_v4 }
 0x12d   : > { %v11500_v59 = vpop.f32.mrf.mxu0  ;;  %18342 = vst [vmem:[#allocation28_spill] sm:$0xff] %v11514_v13  ;;  %9276 = vmatprep.subr.mxu1 %v11506_v53  ;;  %9332 = vmatprep.subr.mxu0 %v11506_v53  ;;  %18344 = vst [vmem:[#allocation30_spill] sm:$0xff] %v11528_v36  ;;  %v11552_v29 = vadd.f32 %v11430_v48, %v11356_v27  ;;  %v11560_v21 = vadd.f32 %v11439_v3, %v11358_v28  ;;  %v1074_v27 = vmul.f32 2.0, %v11396_v54 }
 0x12e   : > { %v1051_v39 = vmul.f32 %v7647_v5, %v11500_v59  ;;  %v1065_v16 = vadd.f32 %v1064_v1, %v1050_v40  ;;  %9277 = vmatpush3.msra.mxu1 %v11506_v53  ;;  %9333 = vmatpush3.msra.mxu0 %v11506_v53  ;;  %18346 = vst [vmem:[#allocation32_spill] sm:$0xff] %v11544_v11  ;;  %v1075_v4 = vmul.f32 2.0, %v11388_v44  ;;  %v1077_v3 = vmul.f32 2.0, %v11403_v60 }
 0x12f   : > { %9278 = vmatprep.subr.mxu1 %v11514_v13  ;;  %9334 = vmatprep.subr.mxu0 %v11514_v13  ;;  %18347 = vst [vmem:[#allocation33_spill] sm:$0xff] %v11552_v29  ;;  %18348 = vst [vmem:[#allocation34_spill] sm:$0xff] %v11560_v21  ;;  %v11572_v2 = vadd.f32 %v11414_v8, %v11352_v25  ;;  %v11588_v25 = vadd.f32 %v11423_v31, %v11354_v26  ;;  %v1079_v60 = vmul.f32 2.0, %v11419_v12 }
 0x130   : > { %v1066_v46 = vadd.f32 %v1065_v16, %v1051_v39  ;;  %9279 = vmatpush3.msra.mxu1 %v11514_v13  ;;  %9335 = vmatpush3.msra.mxu0 %v11514_v13  ;;  %v11597_v8 = vadd.f32 %v11398_v55, %v11348_v24  ;;  %v11614_v44 = vadd.f32 %v11407_v0, %v11350_v20  ;;  %v1078_v31 = vmul.f32 2.0, %v11428_v43 }
 0x131   : > { %9280 = vmatprep.subr.mxu1 %v11521_v19  ;;  %9336 = vmatprep.subr.mxu0 %v11521_v19  ;;  %18349 = vst [vmem:[#allocation35_spill] sm:$0xff] %v11572_v2  ;;  %18350 = vst [vmem:[#allocation36_spill] sm:$0xff] %v11588_v25  ;;  %v11622_v55 = vadd.f32 %v11384_v42, %v11344_v17  ;;  %v11640_v42 = vadd.f32 %v11391_v49, %v11346_v22  ;;  %v1081_v0 = vmul.f32 2.0, %v11435_v58 }
 0x132   : > { %v1067_v35 = vadd.f32 %v1066_v46, %v1052_v41  ;;  %9281 = vmatpush3.msra.mxu1 %v11521_v19  ;;  %9337 = vmatpush3.msra.mxu0 %v11521_v19  ;;  %18351 = vst [vmem:[#allocation37_spill] sm:$0xff] %v11597_v8  ;;  %18352 = vst [vmem:[#allocation38_spill] sm:$0xff] %v11614_v44  ;;  %v1080_v12 = vmul.f32 2.0, %v11444_v14  ;;  %v1083_v43 = vmul.f32 2.0, %v11451_v50  ;;  %v1082_v58 = vmul.f32 2.0, %v11460_v62 }
 0x133   : > { %9282 = vmatprep.subr.mxu1 %v11528_v36  ;;  %9338 = vmatprep.subr.mxu0 %v11528_v36  ;;  %18353 = vst [vmem:[#allocation39_spill] sm:$0xff] %v11622_v55  ;;  %18354 = vst [vmem:[#allocation40_spill] sm:$0xff] %v11640_v42  ;;  %v1085_v6 = vmul.f32 2.0, %v11465_v9  ;;  %v1084_v7 = vmul.f32 2.0, %v11472_v52  ;;  %v1087_v5 = vmul.f32 2.0, %v11477_v63  ;;  %v1086_v40 = vmul.f32 2.0, %v11483_v57 }
 0x134   : > { %v1068_v51 = vrot.slane %v1067_v35, 4  ;;  %9283 = vmatpush3.msra.mxu1 %v11528_v36  ;;  %9339 = vmatpush3.msra.mxu0 %v11528_v36  ;;  %v1089_v1 = vmul.f32 2.0, %v11490_v18  ;;  %v1088_v37 = vmul.f32 2.0, %v11500_v59  ;;  %v11703_v39 = vcvt.s32.f32 %v11375_v38 }
 0x135   : > { %9284 = vmatprep.subr.mxu1 %v11536_v32  ;;  %9340 = vmatprep.subr.mxu0 %v11536_v32 }
 0x136   : > { %v1069_v61 = vadd.f32 %v1068_v51, %v1067_v35  ;;  %9285 = vmatpush3.msra.mxu1 %v11536_v32  ;;  %9341 = vmatpush3.msra.mxu0 %v11536_v32 }
 0x137   : > { %9286 = vmatprep.subr.mxu1 %v11544_v11  ;;  %9342 = vmatprep.subr.mxu0 %v11544_v11 }
 0x138   : > { %v1070_v56 = vrot.slane %v1069_v61, 2  ;;  %9287 = vmatpush3.msra.mxu1 %v11544_v11  ;;  %9343 = vmatpush3.msra.mxu0 %v11544_v11 }
 0x139   : > { %9288 = vmatprep.subr.mxu1 %v11552_v29  ;;  %9344 = vmatprep.subr.mxu0 %v11552_v29 }
 0x13a   : > { %v1071_v33 = vadd.f32 %v1070_v56, %v1069_v61  ;;  %9289 = vmatpush3.msra.mxu1 %v11552_v29  ;;  %9345 = vmatpush3.msra.mxu0 %v11552_v29 }
 0x13b   : > { %9290 = vmatprep.subr.mxu1 %v11560_v21  ;;  %9346 = vmatprep.subr.mxu0 %v11560_v21 }
 0x13c   : > { %v1072_v10 = vrot.slane %v1071_v33, 1  ;;  %9291 = vmatpush3.msra.mxu1 %v11560_v21  ;;  %9347 = vmatpush3.msra.mxu0 %v11560_v21 }
 0x13d   : > { %9292 = vmatprep.subr.mxu1 %v11572_v2  ;;  %9348 = vmatprep.subr.mxu0 %v11572_v2 }
 0x13e   : > { %v11566_v48 = vadd.f32 %v1072_v10, %v1071_v33  ;;  %9293 = vmatpush3.msra.mxu1 %v11572_v2  ;;  %9349 = vmatpush3.msra.mxu0 %v11572_v2 }
 0x13f   : > { %9294 = vmatprep.subr.mxu1 %v11588_v25  ;;  %9350 = vmatprep.subr.mxu0 %v11588_v25 }
 0x140   : > { %v11579_v28 = vsub.f32 %v11566_v48, %v1076_v30  ;;  %v11582_v54 = vsub.f32 %v11566_v48, %v1074_v27  ;;  %9295 = vmatpush3.msra.mxu1 %v11588_v25  ;;  %9351 = vmatpush3.msra.mxu0 %v11588_v25  ;;  %v11607_v26 = vsub.f32 %v11566_v48, %v1077_v3 }
 0x141   : > { %9296 = vmatprep.subr.mxu1 %v11597_v8  ;;  %9352 = vmatprep.subr.mxu0 %v11597_v8  ;;  %v11610_v24 = vsub.f32 %v11566_v48, %v1075_v4  ;;  %v11633_v20 = vsub.f32 %v11566_v48, %v1079_v60  ;;  %v11636_v17 = vsub.f32 %v11566_v48, %v1078_v31 }
 0x142   : > { %1111 = vmin.xlane.f32.xlu1 %v11579_v28  ;;  %1107 = vmin.xlane.f32.xlu0 %v11582_v54  ;;  %v11653_v22 = vsub.f32 %v11566_v48, %v1081_v0  ;;  %v11656_v49 = vsub.f32 %v11566_v48, %v1080_v12  ;;  %v11665_v14 = vsub.f32 %v11566_v48, %v1083_v43 }
 0x143   : > { %9297 = vmatpush3.msra.mxu1 %v11597_v8  ;;  %9353 = vmatpush3.msra.mxu0 %v11597_v8  ;;  %v11668_v15 = vsub.f32 %v11566_v48, %v1082_v58  ;;  %v11675_v50 = vsub.f32 %v11566_v48, %v1085_v6  ;;  %v11678_v62 = vsub.f32 %v11566_v48, %v1084_v7 }
 0x144   : > { %9298 = vmatprep.subr.mxu1 %v11614_v44  ;;  %9354 = vmatprep.subr.mxu0 %v11614_v44  ;;  %v11685_v9 = vsub.f32 %v11566_v48, %v1087_v5  ;;  %v11688_v52 = vsub.f32 %v11566_v48, %v1086_v40  ;;  %v11695_v57 = vsub.f32 %v11566_v48, %v1089_v1 }
 0x145   : > { %9299 = vmatpush3.msra.mxu1 %v11614_v44  ;;  %9355 = vmatpush3.msra.mxu0 %v11614_v44  ;;  %v11698_v63 = vsub.f32 %v11566_v48, %v1088_v37 }
 0x146   : > { %1113 = vmin.xlane.f32.xlu1 %v11607_v26  ;;  %1109 = vmin.xlane.f32.xlu0 %v11610_v24 }
 0x147   : > { %9300 = vmatprep.subr.mxu1 %v11622_v55  ;;  %9356 = vmatprep.subr.mxu0 %v11622_v55 }
 0x148   : > { %9301 = vmatpush3.msra.mxu1 %v11622_v55  ;;  %9357 = vmatpush3.msra.mxu0 %v11622_v55 }
 0x149   : > { %9302 = vmatprep.subr.mxu1 %v11640_v42  ;;  %9358 = vmatprep.subr.mxu0 %v11640_v42 }
 0x14a   : > { %1117 = vmin.xlane.f32.xlu1 %v11633_v20  ;;  %1115 = vmin.xlane.f32.xlu0 %v11636_v17 }
 0x14b   : > { %9303 = vmatpush3.msra.mxu1 %v11640_v42  ;;  %9359 = vmatpush3.msra.mxu0 %v11640_v42 }
 0x14c   : > { %9384 = vmatprep.subr.mxu1 %v11488_v34  ;;  %9440 = vmatprep.subr.mxu0 %v11488_v34 }
 0x14e   : > { %1121 = vmin.xlane.f32.xlu1 %v11653_v22  ;;  %1119 = vmin.xlane.f32.xlu0 %v11656_v49 }
 0x152   : > { %1125 = vmin.xlane.f32.xlu1 %v11665_v14  ;;  %1123 = vmin.xlane.f32.xlu0 %v11668_v15 }
 0x156   : > { %1129 = vmin.xlane.f32.xlu1 %v11675_v50  ;;  %1127 = vmin.xlane.f32.xlu0 %v11678_v62 }
 0x15a   : > { %1133 = vmin.xlane.f32.xlu1 %v11685_v9  ;;  %1131 = vmin.xlane.f32.xlu0 %v11688_v52 }
 0x15e   : > { %1137 = vmin.xlane.f32.xlu1 %v11695_v57  ;;  %1135 = vmin.xlane.f32.xlu0 %v11698_v63 }
 0x1cb   : > { %v11705_v18 = vpop.xlane.xlu1 %1111  ;;  %v11707_v59 = vpop.xlane.xlu0 %1107 }
 0x1cc   : > { %vm1139_vm2 = vcmp.le.f32.partialorder %v11582_v54, %v11707_v59  ;;  %vm1141_vm3 = vcmp.le.f32.partialorder %v11579_v28, %v11705_v18  ;;  %v18358_v59 = vmov 0 }
 0x1cd   : > { %v1155_v16 = vsel %vm1139_vm2, %v11703_v39, 128.0  ;;  %v1157_v46 = vsel %vm1141_vm3, %v11703_v39, 128.0 }
 0x1ce   : > { %1171 = vmin.xlane.f32.xlu0 %v1155_v16 }
 0x1cf   : > { %v11717_v41 = vpop.xlane.xlu1 %1113  ;;  %v11719_v38 = vpop.xlane.xlu0 %1109 }
 0x1d0   : > { %vm1140_vm4 = vcmp.le.f32.partialorder %v11610_v24, %v11719_v38  ;;  %vm1142_vm5 = vcmp.le.f32.partialorder %v11607_v26, %v11717_v41 }
 0x1d1   : > { %v1156_v35 = vsel %vm1140_vm4, %v11703_v39, 128.0  ;;  %v1158_v56 = vsel %vm1142_vm5, %v11703_v39, 128.0 }
 0x1d2   : > { %1175 = vmin.xlane.f32.xlu0 %v1157_v46  ;;  %1173 = vmin.xlane.f32.xlu1 %v1156_v35 }
 0x1d3   : > { %v11733_v51 = vpop.xlane.xlu1 %1117  ;;  %v11735_v61 = vpop.xlane.xlu0 %1115 }
 0x1d4   : > { %vm1143_vm6 = vcmp.le.f32.partialorder %v11636_v17, %v11735_v61  ;;  %vm1144_vm7 = vcmp.le.f32.partialorder %v11633_v20, %v11733_v51 }
 0x1d5   : > { %v1159_v33 = vsel %vm1143_vm6, %v11703_v39, 128.0  ;;  %v1160_v30 = vsel %vm1144_vm7, %v11703_v39, 128.0 }
 0x1d6   : > { %1177 = vmin.xlane.f32.xlu1 %v1158_v56  ;;  %1179 = vmin.xlane.f32.xlu0 %v1159_v33  ;;  %v18355_v33 = vmov 0 }
 0x1d7   : > { %v11749_v10 = vpop.xlane.xlu1 %1121  ;;  %v11751_v27 = vpop.xlane.xlu0 %1119 }
 0x1d8   : > { %vm1145_vm8 = vcmp.le.f32.partialorder %v11656_v49, %v11751_v27  ;;  %vm1146_vm9 = vcmp.le.f32.partialorder %v11653_v22, %v11749_v10 }
 0x1d9   : > { %v1161_v48 = vsel %vm1145_vm8, %v11703_v39, 128.0  ;;  %v1162_v60 = vsel %vm1146_vm9, %v11703_v39, 128.0 }
 0x1da   : > { %1181 = vmin.xlane.f32.xlu1 %v1160_v30  ;;  %1183 = vmin.xlane.f32.xlu0 %v1161_v48  ;;  %v17608_v30 = vmov 1.0  }
 0x1db   : > { %v11765_v4 = vpop.xlane.xlu1 %1125  ;;  %v11767_v3 = vpop.xlane.xlu0 %1123 }
 0x1dc   : > { %vm1147_vm10 = vcmp.le.f32.partialorder %v11668_v15, %v11767_v3  ;;  %vm1148_vm11 = vcmp.le.f32.partialorder %v11665_v14, %v11765_v4 }
 0x1dd   : > { %v1163_v31 = vsel %vm1147_vm10, %v11703_v39, 128.0  ;;  %v1164_v43 = vsel %vm1148_vm11, %v11703_v39, 128.0 }
 0x1de   : > { %1185 = vmin.xlane.f32.xlu1 %v1162_v60  ;;  %1187 = vmin.xlane.f32.xlu0 %v1163_v31 }
 0x1df   : > { %v11781_v0 = vpop.xlane.xlu1 %1129  ;;  %v11783_v12 = vpop.xlane.xlu0 %1127 }
 0x1e0   : > { %vm1149_vm12 = vcmp.le.f32.partialorder %v11678_v62, %v11783_v12  ;;  %vm1150_vm13 = vcmp.le.f32.partialorder %v11675_v50, %v11781_v0 }
 0x1e1   : > { %v1165_v58 = vsel %vm1149_vm12, %v11703_v39, 128.0  ;;  %v1166_v5 = vsel %vm1150_vm13, %v11703_v39, 128.0 }
 0x1e2   : > { %1189 = vmin.xlane.f32.xlu1 %v1164_v43  ;;  %1191 = vmin.xlane.f32.xlu0 %v1165_v58  ;;  %v18367_v58 = vmov 0 }
 0x1e3   : > { %v11797_v6 = vpop.xlane.xlu1 %1133  ;;  %v11799_v7 = vpop.xlane.xlu0 %1131 }
 0x1e4   : > { %vm17593_vm14 = vcmp.le.f32.partialorder %v11688_v52, %v11799_v7  ;;  %vm17592_vm15 = vcmp.le.f32.partialorder %v11685_v9, %v11797_v6 }
 0x1e5   : > { %v1167_v40 = vsel %vm17593_vm14, %v11703_v39, 128.0  ;;  %v1168_v16 = vsel %vm17592_vm15, %v11703_v39, 128.0 }
 0x1e6   : > { %1193 = vmin.xlane.f32.xlu1 %v1166_v5  ;;  %1195 = vmin.xlane.f32.xlu0 %v1167_v40 }
 0x1e7   : > { %v11813_v1 = vpop.xlane.xlu1 %1137  ;;  %v11815_v37 = vpop.xlane.xlu0 %1135 }
 0x1e8   : > { %vm17595_vm0 = vcmp.le.f32.partialorder %v11698_v63, %v11815_v37  ;;  %vm17594_vm1 = vcmp.le.f32.partialorder %v11695_v57, %v11813_v1 }
 0x1e9   : > { %v1169_v46 = vsel %vm17595_vm0, %v11703_v39, 128.0  ;;  %v1170_v35 = vsel %vm17594_vm1, %v11703_v39, 128.0 }
 0x1ea   : > { %1197 = vmin.xlane.f32.xlu1 %v1168_v16  ;;  %1199 = vmin.xlane.f32.xlu0 %v1169_v46  ;;  %v18376_v46 = vmov 0 }
 0x1ee   : > { %1201 = vmin.xlane.f32.xlu1 %v1170_v35 }
 0x257   : > { %v1172_v56 = vpop.xlane.xlu0 %1171 }
 0x258   : > { %vm1203_vm15 = vcmp.eq.f32.partialorder %v11703_v39, %v1172_v56 }
 0x259   : > { %vm11837_vm14 = vmand %vm1139_vm2, %vm1203_vm15 }
 0x25a   : > { %v18356_v33 = vsel %vm11837_vm14, 4294967295, %v18355_v33  ;;  %9304 = vmatprep.mubr.msk.f32.mxu1 %vm11837_vm14, %v17608_v30  ;;  %v11847_v48 = vsel %vm11837_vm14, 1e+30, %v11582_v54  ;;  %v18361_v54 = vmov 0 }
 0x25b   : > { %18357 = vst [vmem:[#allocation41_spill] sm:$0xff] %v18356_v33  ;;  %1299 = vmin.xlane.f32.xlu0 %v11847_v48  ;;  %v1176_v60 = vpop.xlane.xlu0 %1175  ;;  %v1174_v31 = vpop.xlane.xlu1 %1173 }
 0x25c   : > { %vm1205_vm1 = vcmp.eq.f32.partialorder %v11703_v39, %v1176_v60  ;;  %vm1204_vm2 = vcmp.eq.f32.partialorder %v11703_v39, %v1174_v31 }
 0x25d   : > { %vm11855_vm15 = vmand %vm1141_vm3, %vm1205_vm1 }
 0x25e   : > { %v18359_v59 = vsel %vm11855_vm15, 4294967295, %v18358_v59  ;;  %vm11862_vm0 = vmand %vm1140_vm4, %vm1204_vm2  ;;  %v11869_v43 = vsel %vm11855_vm15, 1e+30, %v11579_v28 }
 0x25f   : > { %18360 = vst [vmem:[#allocation42_spill] sm:$0xff] %v18359_v59  ;;  %v18362_v54 = vsel %vm11862_vm0, 4294967295, %v18361_v54  ;;  %9305 = vmatmul.mubr.msk.f32.vlgmr.msra.gmra.mxu1 %vm11862_vm0, %v17608_v30  ;;  %v11877_v18 = vsel %vm11862_vm0, 1e+30, %v11610_v24  ;;  %1303 = vmin.xlane.f32.xlu0 %v11869_v43  ;;  %v1178_v38 = vpop.xlane.xlu1 %1177  ;;  %v1180_v28 = vpop.xlane.xlu0 %1179  ;;  %v18364_v24 = vmov 0 }
 0x260   : > { %18363 = vst [vmem:[#allocation43_spill] sm:$0xff] %v18362_v54  ;;  %9385 = vmatpush3.msra.mxu1 %v11488_v34  ;;  %1301 = vmin.xlane.f32.xlu1 %v11877_v18  ;;  %vm1206_vm3 = vcmp.eq.f32.partialorder %v11703_v39, %v1178_v38  ;;  %vm1207_vm1 = vcmp.eq.f32.partialorder %v11703_v39, %v1180_v28 }
 0x261   : > { %9307 = vmatprep.mubr.msk.f32.mxu1 %vm11855_vm15, %v17608_v30  ;;  %9386 = vmatprep.subr.mxu1 %v11495_v47  ;;  %vm11890_vm4 = vmand %vm1142_vm5, %vm1206_vm3 }
 0x262   : > { %v18365_v24 = vsel %vm11890_vm4, 4294967295, %v18364_v24  ;;  %9387 = vmatpush3.msra.mxu1 %v11495_v47  ;;  %vm11899_vm2 = vmand %vm1143_vm6, %vm1207_vm1  ;;  %v11910_v41 = vsel %vm11890_vm4, 1e+30, %v11607_v26  ;;  %v18370_v26 = vmov 0 }
 0x263   : > { %18366 = vst [vmem:[#allocation44_spill] sm:$0xff] %v18365_v24  ;;  %v18368_v58 = vsel %vm11899_vm2, 4294967295, %v18367_v58  ;;  %9388 = vmatprep.subr.mxu1 %v11506_v53  ;;  %9308 = vmatmul.mubr.msk.f32.gmra.mxu1 %vm11890_vm4, %v17608_v30  ;;  %v1182_v61 = vpop.xlane.xlu1 %1181  ;;  %v11917_v5 = vsel %vm11899_vm2, 1e+30, %v11636_v17  ;;  %v1184_v40 = vpop.xlane.xlu0 %1183  ;;  %v18373_v17 = vmov 0 }
 0x264   : > { %18369 = vst [vmem:[#allocation45_spill] sm:$0xff] %v18368_v58  ;;  %9389 = vmatpush3.msra.mxu1 %v11506_v53  ;;  %1305 = vmin.xlane.f32.xlu1 %v11910_v41  ;;  %vm1208_vm5 = vcmp.eq.f32.partialorder %v11703_v39, %v1182_v61  ;;  %vm1209_vm3 = vcmp.eq.f32.partialorder %v11703_v39, %v1184_v40  ;;  %v18404_v40 = vmov 0 }
 0x265   : > { %1307 = vmin.xlane.f32.xlu0 %v11917_v5  ;;  %9310 = vmatprep.mubr.msk.f32.mxu1 %vm11899_vm2, %v17608_v30  ;;  %vm11927_vm6 = vmand %vm1144_vm7, %vm1208_vm5 }
 0x266   : > { %v18371_v26 = vsel %vm11927_vm6, 4294967295, %v18370_v26  ;;  %9390 = vmatprep.subr.mxu1 %v11514_v13  ;;  %vm11936_vm1 = vmand %vm1145_vm8, %vm1209_vm3  ;;  %v11944_v51 = vsel %vm11927_vm6, 1e+30, %v11633_v20 }
 0x267   : > { %18372 = vst [vmem:[#allocation46_spill] sm:$0xff] %v18371_v26  ;;  %v18374_v17 = vsel %vm11936_vm1, 4294967295, %v18373_v17  ;;  %9391 = vmatpush3.msra.mxu1 %v11514_v13  ;;  %v1186_v16 = vpop.xlane.xlu1 %1185  ;;  %v11953_v27 = vsel %vm11936_vm1, 1e+30, %v11656_v49  ;;  %v1188_v20 = vpop.xlane.xlu0 %1187  ;;  %v18379_v49 = vmov 0 }
 0x268   : > { %18375 = vst [vmem:[#allocation47_spill] sm:$0xff] %v18374_v17  ;;  %9392 = vmatprep.subr.mxu1 %v11521_v19  ;;  %9311 = vmatmul.mubr.msk.f32.gmra.mxu1 %vm11927_vm6, %v17608_v30  ;;  %vm1210_vm7 = vcmp.eq.f32.partialorder %v11703_v39, %v1186_v16  ;;  %vm1211_vm5 = vcmp.eq.f32.partialorder %v11703_v39, %v1188_v20 }
 0x269   : > { %9393 = vmatpush3.msra.mxu1 %v11521_v19  ;;  %1309 = vmin.xlane.f32.xlu1 %v11944_v51  ;;  %vm11961_vm8 = vmand %vm1146_vm9, %vm1210_vm7 }
 0x26a   : > { %v18377_v46 = vsel %vm11961_vm8, 4294967295, %v18376_v46  ;;  %1311 = vmin.xlane.f32.xlu0 %v11953_v27  ;;  %9313 = vmatprep.mubr.msk.f32.mxu1 %vm11936_vm1, %v17608_v30  ;;  %vm11973_vm3 = vmand %vm1147_vm10, %vm1211_vm5  ;;  %v11981_v10 = vsel %vm11961_vm8, 1e+30, %v11653_v22  ;;  %v18382_v22 = vmov 0 }
 0x26b   : > { %18378 = vst [vmem:[#allocation48_spill] sm:$0xff] %v18377_v46  ;;  %v18380_v49 = vsel %vm11973_vm3, 4294967295, %v18379_v49  ;;  %9394 = vmatprep.subr.mxu1 %v11528_v36  ;;  %v1190_v35 = vpop.xlane.xlu1 %1189  ;;  %v11987_v56 = vsel %vm11973_vm3, 1e+30, %v11668_v15  ;;  %v1192_v3 = vpop.xlane.xlu0 %1191  ;;  %v18385_v15 = vmov 0 }
 0x26c   : > { %18381 = vst [vmem:[#allocation49_spill] sm:$0xff] %v18380_v49  ;;  %9395 = vmatpush3.msra.mxu1 %v11528_v36  ;;  %vm1212_vm9 = vcmp.eq.f32.partialorder %v11703_v39, %v1190_v35  ;;  %vm1213_vm7 = vcmp.eq.f32.partialorder %v11703_v39, %v1192_v3 }
 0x26d   : > { %9396 = vmatprep.subr.mxu1 %v11536_v32  ;;  %9314 = vmatmul.mubr.msk.f32.gmra.mxu1 %vm11961_vm8, %v17608_v30  ;;  %vm11999_vm10 = vmand %vm1148_vm11, %vm1212_vm9 }
 0x26e   : > { %9397 = vmatpush3.msra.mxu1 %v11536_v32  ;;  %1313 = vmin.xlane.f32.xlu1 %v11981_v10  ;;  %v18383_v22 = vsel %vm11999_vm10, 4294967295, %v18382_v22  ;;  %vm12008_vm5 = vmand %vm1149_vm12, %vm1213_vm7  ;;  %v12019_v4 = vsel %vm11999_vm10, 1e+30, %v11665_v14  ;;  %v18388_v14 = vmov 0  ;;  %vm18391_vm7 = vcmp.le.f32.partialorder %v11688_v52, %v11799_v7 }
 0x26f   : > { %18384 = vst [vmem:[#allocation50_spill] sm:$0xff] %v18383_v22  ;;  %1315 = vmin.xlane.f32.xlu0 %v11987_v56  ;;  %v18386_v15 = vsel %vm12008_vm5, 4294967295, %v18385_v15  ;;  %9316 = vmatprep.mubr.msk.f32.mxu1 %vm11973_vm3, %v17608_v30  ;;  %v1194_v60 = vpop.xlane.xlu1 %1193  ;;  %v12026_v12 = vsel %vm12008_vm5, 1e+30, %v11678_v62  ;;  %v1196_v31 = vpop.xlane.xlu0 %1195  ;;  %v18392_v62 = vmov 0 }
 0x270   : > { %18387 = vst [vmem:[#allocation51_spill] sm:$0xff] %v18386_v15  ;;  %9398 = vmatprep.subr.mxu1 %v11544_v11  ;;  %vm1214_vm11 = vcmp.eq.f32.partialorder %v11703_v39, %v1194_v60  ;;  %vm1215_vm9 = vcmp.eq.f32.partialorder %v11703_v39, %v1196_v31 }
 0x271   : > { %9399 = vmatpush3.msra.mxu1 %v11544_v11  ;;  %vm12035_vm12 = vmand %vm1150_vm13, %vm1214_vm11 }
 0x272   : > { %9400 = vmatprep.subr.mxu1 %v11552_v29  ;;  %9317 = vmatmul.mubr.msk.f32.gmra.mxu1 %vm11999_vm10, %v17608_v30  ;;  %v18389_v14 = vsel %vm12035_vm12, 4294967295, %v18388_v14  ;;  %vm12045_vm3 = vmand %vm18391_vm7, %vm1215_vm9  ;;  %v12057_v38 = vsel %vm12035_vm12, 1e+30, %v11675_v50  ;;  %vm18395_vm9 = vcmp.le.f32.partialorder %v11685_v9, %v11797_v6  ;;  %v18396_v50 = vmov 0 }
 0x273   : > { %18390 = vst [vmem:[#allocation52_spill] sm:$0xff] %v18389_v14  ;;  %9401 = vmatpush3.msra.mxu1 %v11552_v29  ;;  %1317 = vmin.xlane.f32.xlu1 %v12019_v4  ;;  %v18393_v62 = vsel %vm12045_vm3, 4294967295, %v18392_v62  ;;  %v1198_v0 = vpop.xlane.xlu1 %1197  ;;  %v1200_v7 = vpop.xlane.xlu0 %1199  ;;  %v12064_v28 = vsel %vm12045_vm3, 1e+30, %v11688_v52  ;;  %v18400_v52 = vmov 0 }
 0x274   : > { %18394 = vst [vmem:[#allocation53_spill] sm:$0xff] %v18393_v62  ;;  %1319 = vmin.xlane.f32.xlu0 %v12026_v12  ;;  %9319 = vmatprep.mubr.msk.f32.mxu1 %vm12008_vm5, %v17608_v30  ;;  %vm1216_vm13 = vcmp.eq.f32.partialorder %v11703_v39, %v1198_v0  ;;  %vm1217_vm11 = vcmp.eq.f32.partialorder %v11703_v39, %v1200_v7 }
 0x275   : > { %9402 = vmatprep.subr.mxu1 %v11560_v21  ;;  %vm12074_vm7 = vmand %vm18395_vm9, %vm1216_vm13  ;;  %vm18399_vm5 = vcmp.le.f32.partialorder %v11698_v63, %v11815_v37 }
 0x276   : > { %9403 = vmatpush3.msra.mxu1 %v11560_v21  ;;  %v18397_v50 = vsel %vm12074_vm7, 4294967295, %v18396_v50  ;;  %vm12083_vm10 = vmand %vm18399_vm5, %vm1217_vm11  ;;  %v12096_v6 = vsel %vm12074_vm7, 1e+30, %v11685_v9  ;;  %vm18403_vm5 = vcmp.le.f32.partialorder %v11695_v57, %v11813_v1 }
 0x277   : > { %9404 = vmatprep.subr.mxu1 %v11572_v2  ;;  %9320 = vmatmul.mubr.msk.f32.gmra.mxu1 %vm12035_vm12, %v17608_v30  ;;  %18398 = vst [vmem:[#allocation54_spill] sm:$0xff] %v18397_v50  ;;  %v18401_v52 = vsel %vm12083_vm10, 4294967295, %v18400_v52  ;;  %v1202_v61 = vpop.xlane.xlu1 %1201  ;;  %v12102_v37 = vsel %vm12083_vm10, 1e+30, %v11698_v63 }
 0x278   : > { %9405 = vmatpush3.msra.mxu1 %v11572_v2  ;;  %1321 = vmin.xlane.f32.xlu1 %v12057_v38  ;;  %18402 = vst [vmem:[#allocation55_spill] sm:$0xff] %v18401_v52  ;;  %vm1218_vm13 = vcmp.eq.f32.partialorder %v11703_v39, %v1202_v61 }
 0x279   : > { %1323 = vmin.xlane.f32.xlu0 %v12064_v28  ;;  %9322 = vmatprep.mubr.msk.f32.mxu1 %vm12045_vm3, %v17608_v30  ;;  %vm12111_vm11 = vmand %vm18403_vm5, %vm1218_vm13 }
 0x27a   : > { %9406 = vmatprep.subr.mxu1 %v11588_v25  ;;  %v18405_v40 = vsel %vm12111_vm11, 4294967295, %v18404_v40  ;;  %v12125_v9 = vsel %vm12111_vm11, 1e+30, %v11695_v57 }
 0x27b   : > { %9407 = vmatpush3.msra.mxu1 %v11588_v25  ;;  %18406 = vst [vmem:[#allocation56_spill] sm:$0xff] %v18405_v40 }
 0x27c   : > { %9408 = vmatprep.subr.mxu1 %v11597_v8  ;;  %9323 = vmatmul.mubr.msk.f32.gmra.mxu1 %vm12074_vm7, %v17608_v30 }
 0x27d   : > { %9409 = vmatpush3.msra.mxu1 %v11597_v8  ;;  %1325 = vmin.xlane.f32.xlu1 %v12096_v6 }
 0x27e   : > { %1327 = vmin.xlane.f32.xlu0 %v12102_v37  ;;  %9325 = vmatprep.mubr.msk.f32.mxu1 %vm12083_vm10, %v17608_v30 }
 0x27f   : > { %9410 = vmatprep.subr.mxu1 %v11614_v44 }
 0x280   : > { %9411 = vmatpush3.msra.mxu1 %v11614_v44 }
 0x281   : > { %9412 = vmatprep.subr.mxu1 %v11622_v55  ;;  %9326 = vmatmul.mubr.msk.f32.gmra.mxu1 %vm12111_vm11, %v17608_v30 }
 0x282   : > { %9413 = vmatpush3.msra.mxu1 %v11622_v55  ;;  %1329 = vmin.xlane.f32.xlu1 %v12125_v9 }
 0x283   : > { %9414 = vmatprep.subr.mxu1 %v11640_v42 }
 0x284   : > { %9415 = vmatpush3.msra.mxu1 %v11640_v42 }
 0x285   : > { %9496 = vmatprep.subr.mxu1 %v11488_v34 }
 0x2e4   : > { %v12137_v57 = vpop.xlane.xlu0 %1299 }
 0x2e5   : > { %vm17602_vm9 = vcmp.le.f32.partialorder %v11847_v48, %v12137_v57  ;;  %vm18407_vm11 = vcmp.le.f32.partialorder %v11847_v48, %v12137_v57  ;;  %v18413_v57 = vmov 0 }
 0x2e6   : > { %v1347_v63 = vsel %vm17602_vm9, %v11703_v39, 128.0 }
 0x2e7   : > { %1363 = vmin.xlane.f32.xlu0 %v1347_v63 }
 0x2e8   : > { %v12145_v1 = vpop.xlane.xlu0 %1303 }
 0x2e9   : > { %v12147_v16 = vpop.xlane.xlu1 %1301  ;;  %vm17603_vm13 = vcmp.le.f32.partialorder %v11869_v43, %v12145_v1 }
 0x2ea   : > { %vm17604_vm5 = vcmp.le.f32.partialorder %v11877_v18, %v12147_v16  ;;  %v1349_v20 = vsel %vm17603_vm13, %v11703_v39, 128.0  ;;  %vm18416_vm7 = vcmp.le.f32.partialorder %v11877_v18, %v12147_v16 }
 0x2eb   : > { %v1348_v35 = vsel %vm17604_vm5, %v11703_v39, 128.0  ;;  %1367 = vmin.xlane.f32.xlu0 %v1349_v20 }
 0x2ec   : > { %1365 = vmin.xlane.f32.xlu1 %v1348_v35 }
 0x2ed   : > { %v12161_v3 = vpop.xlane.xlu1 %1305 }
 0x2ee   : > { %v12163_v60 = vpop.xlane.xlu0 %1307  ;;  %vm17605_vm9 = vcmp.le.f32.partialorder %v11910_v41, %v12161_v3 }
 0x2ef   : > { %v1350_v31 = vsel %vm17605_vm9, %v11703_v39, 128.0  ;;  %vm17606_vm13 = vcmp.le.f32.partialorder %v11917_v5, %v12163_v60  ;;  %vm18424_vm12 = vcmp.le.f32.partialorder %v11917_v5, %v12163_v60 }
 0x2f0   : > { %1369 = vmin.xlane.f32.xlu1 %v1350_v31  ;;  %v1351_v0 = vsel %vm17606_vm13, %v11703_v39, 128.0 }
 0x2f1   : > { %1371 = vmin.xlane.f32.xlu0 %v1351_v0 }
 0x2f2   : > { %v12177_v7 = vpop.xlane.xlu1 %1309 }
 0x2f3   : > { %v12179_v61 = vpop.xlane.xlu0 %1311  ;;  %vm17607_vm5 = vcmp.le.f32.partialorder %v11944_v51, %v12177_v7 }
 0x2f4   : > { %v1352_v63 = vsel %vm17607_vm5, %v11703_v39, 128.0  ;;  %vm17610_vm9 = vcmp.le.f32.partialorder %v11953_v27, %v12179_v61  ;;  %vm18432_vm1 = vcmp.le.f32.partialorder %v11953_v27, %v12179_v61 }
 0x2f5   : > { %1373 = vmin.xlane.f32.xlu1 %v1352_v63  ;;  %v1353_v20 = vsel %vm17610_vm9, %v11703_v39, 128.0 }
 0x2f6   : > { %1375 = vmin.xlane.f32.xlu0 %v1353_v20 }
 0x2f7   : > { %v12193_v35 = vpop.xlane.xlu1 %1313 }
 0x2f8   : > { %v12195_v31 = vpop.xlane.xlu0 %1315  ;;  %vm17612_vm13 = vcmp.le.f32.partialorder %v11981_v10, %v12193_v35 }
 0x2f9   : > { %v1354_v0 = vsel %vm17612_vm13, %v11703_v39, 128.0  ;;  %vm17614_vm5 = vcmp.le.f32.partialorder %v11987_v56, %v12195_v31 }
 0x2fa   : > { %1377 = vmin.xlane.f32.xlu1 %v1354_v0  ;;  %v1355_v63 = vsel %vm17614_vm5, %v11703_v39, 128.0 }
 0x2fb   : > { %1379 = vmin.xlane.f32.xlu0 %v1355_v63 }
 0x2fc   : > { %v12209_v20 = vpop.xlane.xlu1 %1317 }
 0x2fd   : > { %v12211_v30 = vpop.xlane.xlu0 %1319  ;;  %vm17617_vm9 = vcmp.le.f32.partialorder %v12019_v4, %v12209_v20 }
 0x2fe   : > { %v1356_v23 = vsel %vm17617_vm9, %v11703_v39, 128.0  ;;  %vm17620_vm13 = vcmp.le.f32.partialorder %v12026_v12, %v12211_v30 }
 0x2ff   : > { %1381 = vmin.xlane.f32.xlu1 %v1356_v23  ;;  %v1357_v0 = vsel %vm17620_vm13, %v11703_v39, 128.0 }
 0x300   : > { %1383 = vmin.xlane.f32.xlu0 %v1357_v0 }
 0x301   : > { %v12225_v63 = vpop.xlane.xlu1 %1321 }
 0x302   : > { %v12227_v45 = vpop.xlane.xlu0 %1323  ;;  %vm17623_vm5 = vcmp.le.f32.partialorder %v12057_v38, %v12225_v63 }
 0x303   : > { %v1358_v40 = vsel %vm17623_vm5, %v11703_v39, 128.0  ;;  %vm17624_vm9 = vcmp.le.f32.partialorder %v12064_v28, %v12227_v45 }
 0x304   : > { %1385 = vmin.xlane.f32.xlu1 %v1358_v40  ;;  %v1359_v23 = vsel %vm17624_vm9, %v11703_v39, 128.0 }
 0x305   : > { %1387 = vmin.xlane.f32.xlu0 %v1359_v23 }
 0x306   : > { %v12241_v0 = vpop.xlane.xlu1 %1325 }
 0x307   : > { %v12243_v52 = vpop.xlane.xlu0 %1327  ;;  %vm17629_vm13 = vcmp.le.f32.partialorder %v12096_v6, %v12241_v0 }
 0x308   : > { %v1360_v50 = vsel %vm17629_vm13, %v11703_v39, 128.0  ;;  %vm17637_vm5 = vcmp.le.f32.partialorder %v12102_v37, %v12243_v52 }
 0x309   : > { %1389 = vmin.xlane.f32.xlu1 %v1360_v50  ;;  %v1361_v40 = vsel %vm17637_vm5, %v11703_v39, 128.0  ;;  %v18408_v50 = vmov 0 }
 0x30a   : > { %1391 = vmin.xlane.f32.xlu0 %v1361_v40  ;;  %v18411_v40 = vmov 1.0  }
 0x30b   : > { %v12257_v23 = vpop.xlane.xlu1 %1329 }
 0x30c   : > { %vm17636_vm9 = vcmp.le.f32.partialorder %v12125_v9, %v12257_v23 }
 0x30d   : > { %v1362_v62 = vsel %vm17636_vm9, %v11703_v39, 128.0 }
 0x30e   : > { %1393 = vmin.xlane.f32.xlu1 %v1362_v62 }
 0x370   : > { %v1364_v14 = vpop.xlane.xlu0 %1363 }
 0x371   : > { %vm1395_vm13 = vcmp.eq.f32.partialorder %v11703_v39, %v1364_v14 }
 0x372   : > { %vm12269_vm10 = vmand %vm18407_vm11, %vm1395_vm13  ;;  %vm18412_vm13 = vcmp.le.f32.partialorder %v11869_v43, %v12145_v1 }
 0x373   : > { %v18409_v50 = vsel %vm12269_vm10, 4294967295, %v18408_v50  ;;  %9360 = vmatprep.mubr.msk.f32.mxu0 %vm12269_vm10, %v18411_v40  ;;  %v12279_v15 = vsel %vm12269_vm10, 1e+30, %v11847_v48  ;;  %v18417_v48 = vmov 0 }
 0x374   : > { %18410 = vst [vmem:[#allocation57_spill] sm:$0xff] %v18409_v50  ;;  %1492 = vmin.xlane.f32.xlu0 %v12279_v15  ;;  %v1368_v62 = vpop.xlane.xlu0 %1367 }
 0x375   : > { %v1366_v14 = vpop.xlane.xlu1 %1365  ;;  %vm1397_vm9 = vcmp.eq.f32.partialorder %v11703_v39, %v1368_v62 }
 0x376   : > { %vm1396_vm11 = vcmp.eq.f32.partialorder %v11703_v39, %v1366_v14  ;;  %vm12287_vm5 = vmand %vm18412_vm13, %vm1397_vm9  ;;  %vm18420_vm9 = vcmp.le.f32.partialorder %v11910_v41, %v12161_v3  ;;  %v18425_v14 = vmov 0 }
 0x377   : > { %v18414_v57 = vsel %vm12287_vm5, 4294967295, %v18413_v57  ;;  %vm12294_vm3 = vmand %vm18416_vm7, %vm1396_vm11  ;;  %v12301_v62 = vsel %vm12287_vm5, 1e+30, %v11869_v43 }
 0x378   : > { %18415 = vst [vmem:[#allocation58_spill] sm:$0xff] %v18414_v57  ;;  %v18418_v48 = vsel %vm12294_vm3, 4294967295, %v18417_v48  ;;  %9361 = vmatmul.mubr.msk.f32.vlgmr.msra.gmra.mxu0 %vm12294_vm3, %v18411_v40  ;;  %v12309_v1 = vsel %vm12294_vm3, 1e+30, %v11877_v18  ;;  %1496 = vmin.xlane.f32.xlu0 %v12301_v62  ;;  %v18421_v18 = vmov 0 }
 0x379   : > { %18419 = vst [vmem:[#allocation59_spill] sm:$0xff] %v18418_v48  ;;  %9441 = vmatpush3.msra.mxu0 %v11488_v34  ;;  %1494 = vmin.xlane.f32.xlu1 %v12309_v1  ;;  %v1370_v16 = vpop.xlane.xlu1 %1369 }
 0x37a   : > { %vm1398_vm7 = vcmp.eq.f32.partialorder %v11703_v39, %v1370_v16  ;;  %v1372_v43 = vpop.xlane.xlu0 %1371  ;;  %9363 = vmatprep.mubr.msk.f32.mxu0 %vm12287_vm5, %v18411_v40  ;;  %9442 = vmatprep.subr.mxu0 %v11495_v47 }
 0x37b   : > { %vm12322_vm11 = vmand %vm18420_vm9, %vm1398_vm7  ;;  %vm1399_vm13 = vcmp.eq.f32.partialorder %v11703_v39, %v1372_v43  ;;  %9443 = vmatpush3.msra.mxu0 %v11495_v47  ;;  %vm18428_vm7 = vcmp.le.f32.partialorder %v11944_v51, %v12177_v7  ;;  %v18429_v43 = vmov 0 }
 0x37c   : > { %v18422_v18 = vsel %vm12322_vm11, 4294967295, %v18421_v18  ;;  %vm12331_vm8 = vmand %vm18424_vm12, %vm1399_vm13  ;;  %9444 = vmatprep.subr.mxu0 %v11506_v53  ;;  %9364 = vmatmul.mubr.msk.f32.gmra.mxu0 %vm12322_vm11, %v18411_v40  ;;  %v12342_v3 = vsel %vm12322_vm11, 1e+30, %v11910_v41 }
 0x37d   : > { %18423 = vst [vmem:[#allocation60_spill] sm:$0xff] %v18422_v18  ;;  %v18426_v14 = vsel %vm12331_vm8, 4294967295, %v18425_v14  ;;  %9445 = vmatpush3.msra.mxu0 %v11506_v53  ;;  %1498 = vmin.xlane.f32.xlu1 %v12342_v3  ;;  %v12349_v60 = vsel %vm12331_vm8, 1e+30, %v11917_v5  ;;  %v18433_v5 = vmov 0 }
 0x37e   : > { %18427 = vst [vmem:[#allocation61_spill] sm:$0xff] %v18426_v14  ;;  %v1374_v16 = vpop.xlane.xlu1 %1373  ;;  %1500 = vmin.xlane.f32.xlu0 %v12349_v60  ;;  %9366 = vmatprep.mubr.msk.f32.mxu0 %vm12331_vm8, %v18411_v40 }
 0x37f   : > { %vm1400_vm12 = vcmp.eq.f32.partialorder %v11703_v39, %v1374_v16  ;;  %v1376_v41 = vpop.xlane.xlu0 %1375  ;;  %9446 = vmatprep.subr.mxu0 %v11514_v13 }
 0x380   : > { %vm12360_vm9 = vmand %vm18428_vm7, %vm1400_vm12  ;;  %vm1401_vm13 = vcmp.eq.f32.partialorder %v11703_v39, %v1376_v41  ;;  %9447 = vmatpush3.msra.mxu0 %v11514_v13  ;;  %vm18436_vm12 = vcmp.le.f32.partialorder %v11981_v10, %v12193_v35  ;;  %v18437_v41 = vmov 0 }
 0x381   : > { %v18430_v43 = vsel %vm12360_vm9, 4294967295, %v18429_v43  ;;  %vm12369_vm6 = vmand %vm18432_vm1, %vm1401_vm13  ;;  %9448 = vmatprep.subr.mxu0 %v11521_v19  ;;  %9367 = vmatmul.mubr.msk.f32.gmra.mxu0 %vm12360_vm9, %v18411_v40  ;;  %v12380_v7 = vsel %vm12360_vm9, 1e+30, %v11944_v51  ;;  %vm18440_vm9 = vcmp.le.f32.partialorder %v11987_v56, %v12195_v31 }
 0x382   : > { %18431 = vst [vmem:[#allocation62_spill] sm:$0xff] %v18430_v43  ;;  %v18434_v5 = vsel %vm12369_vm6, 4294967295, %v18433_v5  ;;  %9449 = vmatpush3.msra.mxu0 %v11521_v19  ;;  %1502 = vmin.xlane.f32.xlu1 %v12380_v7  ;;  %v12387_v61 = vsel %vm12369_vm6, 1e+30, %v11953_v27  ;;  %v18441_v27 = vmov 0 }
 0x383   : > { %18435 = vst [vmem:[#allocation63_spill] sm:$0xff] %v18434_v5  ;;  %v1378_v16 = vpop.xlane.xlu1 %1377  ;;  %1504 = vmin.xlane.f32.xlu0 %v12387_v61  ;;  %9369 = vmatprep.mubr.msk.f32.mxu0 %vm12369_vm6, %v18411_v40 }
 0x384   : > { %vm1402_vm1 = vcmp.eq.f32.partialorder %v11703_v39, %v1378_v16  ;;  %v1380_v51 = vpop.xlane.xlu0 %1379  ;;  %9450 = vmatprep.subr.mxu0 %v11528_v36 }
 0x385   : > { %vm12398_vm7 = vmand %vm18436_vm12, %vm1402_vm1  ;;  %vm1403_vm13 = vcmp.eq.f32.partialorder %v11703_v39, %v1380_v51  ;;  %9451 = vmatpush3.msra.mxu0 %v11528_v36  ;;  %vm18444_vm1 = vcmp.le.f32.partialorder %v12019_v4, %v12209_v20  ;;  %v18445_v51 = vmov 0 }
 0x386   : > { %v18438_v41 = vsel %vm12398_vm7, 4294967295, %v18437_v41  ;;  %vm12407_vm6 = vmand %vm18440_vm9, %vm1403_vm13  ;;  %9452 = vmatprep.subr.mxu0 %v11536_v32  ;;  %9370 = vmatmul.mubr.msk.f32.gmra.mxu0 %vm12398_vm7, %v18411_v40  ;;  %v12418_v35 = vsel %vm12398_vm7, 1e+30, %v11981_v10  ;;  %vm18448_vm7 = vcmp.le.f32.partialorder %v12026_v12, %v12211_v30 }
 0x387   : > { %18439 = vst [vmem:[#allocation64_spill] sm:$0xff] %v18438_v41  ;;  %v18442_v27 = vsel %vm12407_vm6, 4294967295, %v18441_v27  ;;  %9453 = vmatpush3.msra.mxu0 %v11536_v32  ;;  %1506 = vmin.xlane.f32.xlu1 %v12418_v35  ;;  %v12425_v31 = vsel %vm12407_vm6, 1e+30, %v11987_v56  ;;  %v18449_v56 = vmov 0 }
 0x388   : > { %18443 = vst [vmem:[#allocation65_spill] sm:$0xff] %v18442_v27  ;;  %v1382_v16 = vpop.xlane.xlu1 %1381  ;;  %1508 = vmin.xlane.f32.xlu0 %v12425_v31  ;;  %9372 = vmatprep.mubr.msk.f32.mxu0 %vm12407_vm6, %v18411_v40 }
 0x389   : > { %vm1404_vm9 = vcmp.eq.f32.partialorder %v11703_v39, %v1382_v16  ;;  %v1384_v10 = vpop.xlane.xlu0 %1383  ;;  %9454 = vmatprep.subr.mxu0 %v11544_v11 }
 0x38a   : > { %vm12436_vm12 = vmand %vm18444_vm1, %vm1404_vm9  ;;  %vm1405_vm13 = vcmp.eq.f32.partialorder %v11703_v39, %v1384_v10  ;;  %9455 = vmatpush3.msra.mxu0 %v11544_v11  ;;  %vm18452_vm9 = vcmp.le.f32.partialorder %v12057_v38, %v12225_v63  ;;  %v18453_v10 = vmov 0 }
 0x38b   : > { %v18446_v51 = vsel %vm12436_vm12, 4294967295, %v18445_v51  ;;  %vm12445_vm6 = vmand %vm18448_vm7, %vm1405_vm13  ;;  %9456 = vmatprep.subr.mxu0 %v11552_v29  ;;  %9373 = vmatmul.mubr.msk.f32.gmra.mxu0 %vm12436_vm12, %v18411_v40  ;;  %v12456_v20 = vsel %vm12436_vm12, 1e+30, %v12019_v4  ;;  %vm18456_vm12 = vcmp.le.f32.partialorder %v12064_v28, %v12227_v45 }
 0x38c   : > { %18447 = vst [vmem:[#allocation66_spill] sm:$0xff] %v18446_v51  ;;  %v18450_v56 = vsel %vm12445_vm6, 4294967295, %v18449_v56  ;;  %9457 = vmatpush3.msra.mxu0 %v11552_v29  ;;  %1510 = vmin.xlane.f32.xlu1 %v12456_v20  ;;  %v12463_v30 = vsel %vm12445_vm6, 1e+30, %v12026_v12  ;;  %v18457_v12 = vmov 0 }
 0x38d   : > { %18451 = vst [vmem:[#allocation67_spill] sm:$0xff] %v18450_v56  ;;  %v1386_v16 = vpop.xlane.xlu1 %1385  ;;  %1512 = vmin.xlane.f32.xlu0 %v12463_v30  ;;  %9375 = vmatprep.mubr.msk.f32.mxu0 %vm12445_vm6, %v18411_v40 }
 0x38e   : > { %vm1406_vm7 = vcmp.eq.f32.partialorder %v11703_v39, %v1386_v16  ;;  %v1388_v4 = vpop.xlane.xlu0 %1387  ;;  %9458 = vmatprep.subr.mxu0 %v11560_v21 }
 0x38f   : > { %vm12474_vm1 = vmand %vm18452_vm9, %vm1406_vm7  ;;  %vm1407_vm13 = vcmp.eq.f32.partialorder %v11703_v39, %v1388_v4  ;;  %9459 = vmatpush3.msra.mxu0 %v11560_v21  ;;  %vm18460_vm7 = vcmp.le.f32.partialorder %v12096_v6, %v12241_v0  ;;  %v18461_v4 = vmov 0 }
 0x390   : > { %v18454_v10 = vsel %vm12474_vm1, 4294967295, %v18453_v10  ;;  %vm12483_vm6 = vmand %vm18456_vm12, %vm1407_vm13  ;;  %9460 = vmatprep.subr.mxu0 %v11572_v2  ;;  %9376 = vmatmul.mubr.msk.f32.gmra.mxu0 %vm12474_vm1, %v18411_v40  ;;  %v12494_v63 = vsel %vm12474_vm1, 1e+30, %v12057_v38  ;;  %vm18464_vm1 = vcmp.le.f32.partialorder %v12102_v37, %v12243_v52 }
 0x391   : > { %18455 = vst [vmem:[#allocation68_spill] sm:$0xff] %v18454_v10  ;;  %v18458_v12 = vsel %vm12483_vm6, 4294967295, %v18457_v12  ;;  %9461 = vmatpush3.msra.mxu0 %v11572_v2  ;;  %1514 = vmin.xlane.f32.xlu1 %v12494_v63  ;;  %v12501_v45 = vsel %vm12483_vm6, 1e+30, %v12064_v28  ;;  %v18465_v28 = vmov 0 }
 0x392   : > { %18459 = vst [vmem:[#allocation69_spill] sm:$0xff] %v18458_v12  ;;  %v1390_v16 = vpop.xlane.xlu1 %1389  ;;  %1516 = vmin.xlane.f32.xlu0 %v12501_v45  ;;  %9378 = vmatprep.mubr.msk.f32.mxu0 %vm12483_vm6, %v18411_v40 }
 0x393   : > { %vm1408_vm12 = vcmp.eq.f32.partialorder %v11703_v39, %v1390_v16  ;;  %v1392_v38 = vpop.xlane.xlu0 %1391  ;;  %9462 = vmatprep.subr.mxu0 %v11588_v25 }
 0x394   : > { %vm12512_vm9 = vmand %vm18460_vm7, %vm1408_vm12  ;;  %vm1409_vm13 = vcmp.eq.f32.partialorder %v11703_v39, %v1392_v38  ;;  %9463 = vmatpush3.msra.mxu0 %v11588_v25  ;;  %vm18468_vm12 = vcmp.le.f32.partialorder %v12125_v9, %v12257_v23 }
 0x395   : > { %v18462_v4 = vsel %vm12512_vm9, 4294967295, %v18461_v4  ;;  %vm12521_vm6 = vmand %vm18464_vm1, %vm1409_vm13  ;;  %9464 = vmatprep.subr.mxu0 %v11597_v8  ;;  %9379 = vmatmul.mubr.msk.f32.gmra.mxu0 %vm12512_vm9, %v18411_v40  ;;  %v12532_v0 = vsel %vm12512_vm9, 1e+30, %v12096_v6  ;;  %v18469_v6 = vmov 0 }
 0x396   : > { %18463 = vst [vmem:[#allocation70_spill] sm:$0xff] %v18462_v4  ;;  %v18466_v28 = vsel %vm12521_vm6, 4294967295, %v18465_v28  ;;  %9465 = vmatpush3.msra.mxu0 %v11597_v8  ;;  %1518 = vmin.xlane.f32.xlu1 %v12532_v0  ;;  %v12539_v52 = vsel %vm12521_vm6, 1e+30, %v12102_v37 }
 0x397   : > { %18467 = vst [vmem:[#allocation71_spill] sm:$0xff] %v18466_v28  ;;  %v1394_v16 = vpop.xlane.xlu1 %1393  ;;  %1520 = vmin.xlane.f32.xlu0 %v12539_v52  ;;  %9381 = vmatprep.mubr.msk.f32.mxu0 %vm12521_vm6, %v18411_v40 }
 0x398   : > { %vm1410_vm1 = vcmp.eq.f32.partialorder %v11703_v39, %v1394_v16  ;;  %9466 = vmatprep.subr.mxu0 %v11614_v44 }
 0x399   : > { %vm12550_vm7 = vmand %vm18468_vm12, %vm1410_vm1  ;;  %9467 = vmatpush3.msra.mxu0 %v11614_v44 }
 0x39a   : > { %v18470_v6 = vsel %vm12550_vm7, 4294967295, %v18469_v6  ;;  %9468 = vmatprep.subr.mxu0 %v11622_v55  ;;  %9382 = vmatmul.mubr.msk.f32.gmra.mxu0 %vm12550_vm7, %v18411_v40  ;;  %v12562_v37 = vsel %vm12550_vm7, 1e+30, %v12125_v9 }
 0x39b   : > { %18471 = vst [vmem:[#allocation72_spill] sm:$0xff] %v18470_v6  ;;  %9469 = vmatpush3.msra.mxu0 %v11622_v55  ;;  %1522 = vmin.xlane.f32.xlu1 %v12562_v37 }
 0x39c   : > { %9470 = vmatprep.subr.mxu0 %v11640_v42 }
 0x39d   : > { %9471 = vmatpush3.msra.mxu0 %v11640_v42 }
 0x39e   : > { %9552 = vmatprep.subr.mxu0 %v11488_v34 }
 0x3fd   : > { %v12569_v23 = vpop.xlane.xlu0 %1492 }
 0x3fe   : > { %vm17672_vm13 = vcmp.le.f32.partialorder %v12279_v15, %v12569_v23  ;;  %vm18472_vm7 = vcmp.le.f32.partialorder %v12279_v15, %v12569_v23  ;;  %v18477_v23 = vmov 0 }
 0x3ff   : > { %v1540_v9 = vsel %vm17672_vm13, %v11703_v39, 128.0 }
 0x400   : > { %1556 = vmin.xlane.f32.xlu0 %v1540_v9 }
 0x401   : > { %v12577_v38 = vpop.xlane.xlu0 %1496 }
 0x402   : > { %v12579_v16 = vpop.xlane.xlu1 %1494  ;;  %vm17675_vm1 = vcmp.le.f32.partialorder %v12301_v62, %v12577_v38 }
 0x403   : > { %vm17678_vm12 = vcmp.le.f32.partialorder %v12309_v1, %v12579_v16  ;;  %v1542_v6 = vsel %vm17675_vm1, %v11703_v39, 128.0  ;;  %vm18480_vm9 = vcmp.le.f32.partialorder %v12309_v1, %v12579_v16 }
 0x404   : > { %v1541_v9 = vsel %vm17678_vm12, %v11703_v39, 128.0  ;;  %1560 = vmin.xlane.f32.xlu0 %v1542_v6 }
 0x405   : > { %1558 = vmin.xlane.f32.xlu1 %v1541_v9 }
 0x406   : > { %v12593_v28 = vpop.xlane.xlu1 %1498 }
 0x407   : > { %v12595_v4 = vpop.xlane.xlu0 %1500  ;;  %vm17681_vm13 = vcmp.le.f32.partialorder %v12342_v3, %v12593_v28 }
 0x408   : > { %v1543_v12 = vsel %vm17681_vm13, %v11703_v39, 128.0  ;;  %vm17684_vm1 = vcmp.le.f32.partialorder %v12349_v60, %v12595_v4 }
 0x409   : > { %1562 = vmin.xlane.f32.xlu1 %v1543_v12  ;;  %v1544_v6 = vsel %vm17684_vm1, %v11703_v39, 128.0 }
 0x40a   : > { %1564 = vmin.xlane.f32.xlu0 %v1544_v6 }
 0x40b   : > { %v12609_v9 = vpop.xlane.xlu1 %1502 }
 0x40c   : > { %v12611_v10 = vpop.xlane.xlu0 %1504  ;;  %vm17687_vm12 = vcmp.le.f32.partialorder %v12380_v7, %v12609_v9 }
 0x40d   : > { %v1545_v56 = vsel %vm17687_vm12, %v11703_v39, 128.0  ;;  %vm17690_vm13 = vcmp.le.f32.partialorder %v12387_v61, %v12611_v10 }
 0x40e   : > { %1566 = vmin.xlane.f32.xlu1 %v1545_v56  ;;  %v1546_v12 = vsel %vm17690_vm13, %v11703_v39, 128.0 }
 0x40f   : > { %1568 = vmin.xlane.f32.xlu0 %v1546_v12 }
 0x410   : > { %v12625_v6 = vpop.xlane.xlu1 %1506 }
 0x411   : > { %v12627_v51 = vpop.xlane.xlu0 %1508  ;;  %vm17693_vm1 = vcmp.le.f32.partialorder %v12418_v35, %v12625_v6 }
 0x412   : > { %v1547_v22 = vsel %vm17693_vm1, %v11703_v39, 128.0  ;;  %vm17696_vm12 = vcmp.le.f32.partialorder %v12425_v31, %v12627_v51 }
 0x413   : > { %1570 = vmin.xlane.f32.xlu1 %v1547_v22  ;;  %v1548_v56 = vsel %vm17696_vm12, %v11703_v39, 128.0 }
 0x414   : > { %1572 = vmin.xlane.f32.xlu0 %v1548_v56 }
 0x415   : > { %v12641_v12 = vpop.xlane.xlu1 %1510 }
 0x416   : > { %v12643_v27 = vpop.xlane.xlu0 %1512  ;;  %vm17699_vm13 = vcmp.le.f32.partialorder %v12456_v20, %v12641_v12 }
 0x417   : > { %v1549_v49 = vsel %vm17699_vm13, %v11703_v39, 128.0  ;;  %vm17702_vm1 = vcmp.le.f32.partialorder %v12463_v30, %v12643_v27 }
 0x418   : > { %1574 = vmin.xlane.f32.xlu1 %v1549_v49  ;;  %v1550_v22 = vsel %vm17702_vm1, %v11703_v39, 128.0 }
 0x419   : > { %1576 = vmin.xlane.f32.xlu0 %v1550_v22 }
 0x41a   : > { %v12657_v56 = vpop.xlane.xlu1 %1514 }
 0x41b   : > { %v12659_v41 = vpop.xlane.xlu0 %1516  ;;  %vm17705_vm12 = vcmp.le.f32.partialorder %v12494_v63, %v12657_v56 }
 0x41c   : > { %v1551_v46 = vsel %vm17705_vm12, %v11703_v39, 128.0  ;;  %vm17706_vm13 = vcmp.le.f32.partialorder %v12501_v45, %v12659_v41 }
 0x41d   : > { %1578 = vmin.xlane.f32.xlu1 %v1551_v46  ;;  %v1552_v49 = vsel %vm17706_vm13, %v11703_v39, 128.0 }
 0x41e   : > { %1580 = vmin.xlane.f32.xlu0 %v1552_v49 }
 0x41f   : > { %v12673_v22 = vpop.xlane.xlu1 %1518 }
 0x420   : > { %v12675_v5 = vpop.xlane.xlu0 %1520  ;;  %vm17711_vm1 = vcmp.le.f32.partialorder %v12532_v0, %v12673_v22 }
 0x421   : > { %v1553_v17 = vsel %vm17711_vm1, %v11703_v39, 128.0  ;;  %vm17717_vm12 = vcmp.le.f32.partialorder %v12539_v52, %v12675_v5 }
 0x422   : > { %1582 = vmin.xlane.f32.xlu1 %v1553_v17  ;;  %v1554_v46 = vsel %vm17717_vm12, %v11703_v39, 128.0  ;;  %v18473_v17 = vmov 0 }
 0x423   : > { %1584 = vmin.xlane.f32.xlu0 %v1554_v46 }
 0x424   : > { %v12689_v49 = vpop.xlane.xlu1 %1522 }
 0x425   : > { %vm17716_vm13 = vcmp.le.f32.partialorder %v12562_v37, %v12689_v49 }
 0x426   : > { %v1555_v43 = vsel %vm17716_vm13, %v11703_v39, 128.0 }
 0x427   : > { %1586 = vmin.xlane.f32.xlu1 %v1555_v43 }
 0x438   : > { %v9362_v54 = vpop.f32.mrf.mxu0 }
 0x489   : > { %v1557_v26 = vpop.xlane.xlu0 %1556 }
 0x48a   : > { %vm1588_vm1 = vcmp.eq.f32.partialorder %v11703_v39, %v1557_v26 }
 0x48b   : > { %vm12701_vm6 = vmand %vm18472_vm7, %vm1588_vm1  ;;  %vm18476_vm1 = vcmp.le.f32.partialorder %v12301_v62, %v12577_v38 }
 0x48c   : > { %v18474_v17 = vsel %vm12701_vm6, 4294967295, %v18473_v17  ;;  %9416 = vmatprep.mubr.msk.f32.mxu1 %vm12701_vm6, %v18411_v40  ;;  %v12711_v46 = vsel %vm12701_vm6, 1e+30, %v12279_v15  ;;  %v18481_v15 = vmov 0 }
 0x48d   : > { %18475 = vst [vmem:[#allocation73_spill] sm:$0xff] %v18474_v17  ;;  %1685 = vmin.xlane.f32.xlu0 %v12711_v46  ;;  %v1561_v43 = vpop.xlane.xlu0 %1560 }
 0x48e   : > { %v1559_v26 = vpop.xlane.xlu1 %1558  ;;  %vm1590_vm13 = vcmp.eq.f32.partialorder %v11703_v39, %v1561_v43 }
 0x48f   : > { %vm1589_vm7 = vcmp.eq.f32.partialorder %v11703_v39, %v1559_v26  ;;  %vm12719_vm12 = vmand %vm18476_vm1, %vm1590_vm13  ;;  %vm18484_vm13 = vcmp.le.f32.partialorder %v12342_v3, %v12593_v28  ;;  %v18489_v26 = vmov 0 }
 0x490   : > { %v18478_v23 = vsel %vm12719_vm12, 4294967295, %v18477_v23  ;;  %vm12726_vm6 = vmand %vm18480_vm9, %vm1589_vm7  ;;  %v12733_v43 = vsel %vm12719_vm12, 1e+30, %v12301_v62 }
 0x491   : > { %18479 = vst [vmem:[#allocation74_spill] sm:$0xff] %v18478_v23  ;;  %v18482_v15 = vsel %vm12726_vm6, 4294967295, %v18481_v15  ;;  %9417 = vmatmul.mubr.msk.f32.vlgmr.msra.gmra.mxu1 %vm12726_vm6, %v18411_v40  ;;  %v12741_v38 = vsel %vm12726_vm6, 1e+30, %v12309_v1  ;;  %1689 = vmin.xlane.f32.xlu0 %v12733_v43  ;;  %v18485_v1 = vmov 0  ;;  %vm18488_vm6 = vcmp.le.f32.partialorder %v12349_v60, %v12595_v4 }
 0x492   : > { %18483 = vst [vmem:[#allocation75_spill] sm:$0xff] %v18482_v15  ;;  %9497 = vmatpush3.msra.mxu1 %v11488_v34  ;;  %1687 = vmin.xlane.f32.xlu1 %v12741_v38  ;;  %v1563_v16 = vpop.xlane.xlu1 %1562 }
 0x493   : > { %vm1591_vm9 = vcmp.eq.f32.partialorder %v11703_v39, %v1563_v16  ;;  %v1565_v62 = vpop.xlane.xlu0 %1564  ;;  %9419 = vmatprep.mubr.msk.f32.mxu1 %vm12719_vm12, %v18411_v40  ;;  %9498 = vmatprep.subr.mxu1 %v11495_v47 }
 0x494   : > { %vm12754_vm7 = vmand %vm18484_vm13, %vm1591_vm9  ;;  %vm1592_vm1 = vcmp.eq.f32.partialorder %v11703_v39, %v1565_v62  ;;  %9499 = vmatpush3.msra.mxu1 %v11495_v47  ;;  %vm18492_vm9 = vcmp.le.f32.partialorder %v12380_v7, %v12609_v9  ;;  %v18493_v62 = vmov 0 }
 0x495   : > { %v18486_v1 = vsel %vm12754_vm7, 4294967295, %v18485_v1  ;;  %vm12763_vm8 = vmand %vm18488_vm6, %vm1592_vm1  ;;  %9500 = vmatprep.subr.mxu1 %v11506_v53  ;;  %9420 = vmatmul.mubr.msk.f32.gmra.mxu1 %vm12754_vm7, %v18411_v40  ;;  %v12774_v28 = vsel %vm12754_vm7, 1e+30, %v12342_v3  ;;  %vm18496_vm7 = vcmp.le.f32.partialorder %v12387_v61, %v12611_v10 }
 0x496   : > { %18487 = vst [vmem:[#allocation76_spill] sm:$0xff] %v18486_v1  ;;  %v18490_v26 = vsel %vm12763_vm8, 4294967295, %v18489_v26  ;;  %9501 = vmatpush3.msra.mxu1 %v11506_v53  ;;  %1691 = vmin.xlane.f32.xlu1 %v12774_v28  ;;  %v12781_v4 = vsel %vm12763_vm8, 1e+30, %v12349_v60  ;;  %v18497_v60 = vmov 0 }
 0x497   : > { %18491 = vst [vmem:[#allocation77_spill] sm:$0xff] %v18490_v26  ;;  %v1567_v16 = vpop.xlane.xlu1 %1566  ;;  %1693 = vmin.xlane.f32.xlu0 %v12781_v4  ;;  %9422 = vmatprep.mubr.msk.f32.mxu1 %vm12763_vm8, %v18411_v40 }
 0x498   : > { %vm1593_vm6 = vcmp.eq.f32.partialorder %v11703_v39, %v1567_v16  ;;  %v1569_v3 = vpop.xlane.xlu0 %1568  ;;  %9502 = vmatprep.subr.mxu1 %v11514_v13 }
 0x499   : > { %vm12792_vm13 = vmand %vm18492_vm9, %vm1593_vm6  ;;  %vm1594_vm1 = vcmp.eq.f32.partialorder %v11703_v39, %v1569_v3  ;;  %9503 = vmatpush3.msra.mxu1 %v11514_v13  ;;  %vm18500_vm6 = vcmp.le.f32.partialorder %v12418_v35, %v12625_v6  ;;  %v18501_v3 = vmov 0 }
 0x49a   : > { %v18494_v62 = vsel %vm12792_vm13, 4294967295, %v18493_v62  ;;  %vm12801_vm8 = vmand %vm18496_vm7, %vm1594_vm1  ;;  %9504 = vmatprep.subr.mxu1 %v11521_v19  ;;  %9423 = vmatmul.mubr.msk.f32.gmra.mxu1 %vm12792_vm13, %v18411_v40  ;;  %v12812_v9 = vsel %vm12792_vm13, 1e+30, %v12380_v7  ;;  %vm18504_vm13 = vcmp.le.f32.partialorder %v12425_v31, %v12627_v51 }
 0x49b   : > { %18495 = vst [vmem:[#allocation78_spill] sm:$0xff] %v18494_v62  ;;  %v18498_v60 = vsel %vm12801_vm8, 4294967295, %v18497_v60  ;;  %9505 = vmatpush3.msra.mxu1 %v11521_v19  ;;  %1695 = vmin.xlane.f32.xlu1 %v12812_v9  ;;  %v12819_v10 = vsel %vm12801_vm8, 1e+30, %v12387_v61  ;;  %v18505_v61 = vmov 0 }
 0x49c   : > { %18499 = vst [vmem:[#allocation79_spill] sm:$0xff] %v18498_v60  ;;  %v1571_v16 = vpop.xlane.xlu1 %1570  ;;  %1697 = vmin.xlane.f32.xlu0 %v12819_v10  ;;  %9425 = vmatprep.mubr.msk.f32.mxu1 %vm12801_vm8, %v18411_v40 }
 0x49d   : > { %vm1595_vm7 = vcmp.eq.f32.partialorder %v11703_v39, %v1571_v16  ;;  %v1573_v7 = vpop.xlane.xlu0 %1572  ;;  %9506 = vmatprep.subr.mxu1 %v11528_v36 }
 0x49e   : > { %vm12830_vm9 = vmand %vm18500_vm6, %vm1595_vm7  ;;  %vm1596_vm1 = vcmp.eq.f32.partialorder %v11703_v39, %v1573_v7  ;;  %9507 = vmatpush3.msra.mxu1 %v11528_v36  ;;  %vm18508_vm7 = vcmp.le.f32.partialorder %v12456_v20, %v12641_v12  ;;  %v18509_v7 = vmov 0 }
 0x49f   : > { %v18502_v3 = vsel %vm12830_vm9, 4294967295, %v18501_v3  ;;  %vm12839_vm8 = vmand %vm18504_vm13, %vm1596_vm1  ;;  %9508 = vmatprep.subr.mxu1 %v11536_v32  ;;  %9426 = vmatmul.mubr.msk.f32.gmra.mxu1 %vm12830_vm9, %v18411_v40  ;;  %v12850_v6 = vsel %vm12830_vm9, 1e+30, %v12418_v35  ;;  %vm18512_vm9 = vcmp.le.f32.partialorder %v12463_v30, %v12643_v27 }
 0x4a0   : > { %18503 = vst [vmem:[#allocation80_spill] sm:$0xff] %v18502_v3  ;;  %v18506_v61 = vsel %vm12839_vm8, 4294967295, %v18505_v61  ;;  %9509 = vmatpush3.msra.mxu1 %v11536_v32  ;;  %1699 = vmin.xlane.f32.xlu1 %v12850_v6  ;;  %v12857_v51 = vsel %vm12839_vm8, 1e+30, %v12425_v31  ;;  %v18513_v31 = vmov 0 }
 0x4a1   : > { %18507 = vst [vmem:[#allocation81_spill] sm:$0xff] %v18506_v61  ;;  %v1575_v16 = vpop.xlane.xlu1 %1574  ;;  %1701 = vmin.xlane.f32.xlu0 %v12857_v51  ;;  %9428 = vmatprep.mubr.msk.f32.mxu1 %vm12839_vm8, %v18411_v40 }
 0x4a2   : > { %vm1597_vm13 = vcmp.eq.f32.partialorder %v11703_v39, %v1575_v16  ;;  %v1577_v35 = vpop.xlane.xlu0 %1576  ;;  %9510 = vmatprep.subr.mxu1 %v11544_v11 }
 0x4a3   : > { %vm12868_vm6 = vmand %vm18508_vm7, %vm1597_vm13  ;;  %vm1598_vm1 = vcmp.eq.f32.partialorder %v11703_v39, %v1577_v35  ;;  %9511 = vmatpush3.msra.mxu1 %v11544_v11  ;;  %vm18516_vm13 = vcmp.le.f32.partialorder %v12494_v63, %v12657_v56  ;;  %v18517_v35 = vmov 0 }
 0x4a4   : > { %v18510_v7 = vsel %vm12868_vm6, 4294967295, %v18509_v7  ;;  %vm12877_vm8 = vmand %vm18512_vm9, %vm1598_vm1  ;;  %9512 = vmatprep.subr.mxu1 %v11552_v29  ;;  %9429 = vmatmul.mubr.msk.f32.gmra.mxu1 %vm12868_vm6, %v18411_v40  ;;  %v12888_v12 = vsel %vm12868_vm6, 1e+30, %v12456_v20  ;;  %vm18520_vm6 = vcmp.le.f32.partialorder %v12501_v45, %v12659_v41 }
 0x4a5   : > { %18511 = vst [vmem:[#allocation82_spill] sm:$0xff] %v18510_v7  ;;  %v18514_v31 = vsel %vm12877_vm8, 4294967295, %v18513_v31  ;;  %9513 = vmatpush3.msra.mxu1 %v11552_v29  ;;  %1703 = vmin.xlane.f32.xlu1 %v12888_v12  ;;  %v12895_v27 = vsel %vm12877_vm8, 1e+30, %v12463_v30  ;;  %v18521_v30 = vmov 0 }
 0x4a6   : > { %18515 = vst [vmem:[#allocation83_spill] sm:$0xff] %v18514_v31  ;;  %v1579_v16 = vpop.xlane.xlu1 %1578  ;;  %1705 = vmin.xlane.f32.xlu0 %v12895_v27  ;;  %9431 = vmatprep.mubr.msk.f32.mxu1 %vm12877_vm8, %v18411_v40 }
 0x4a7   : > { %vm1599_vm9 = vcmp.eq.f32.partialorder %v11703_v39, %v1579_v16  ;;  %v1581_v20 = vpop.xlane.xlu0 %1580  ;;  %9514 = vmatprep.subr.mxu1 %v11560_v21 }
 0x4a8   : > { %vm12906_vm7 = vmand %vm18516_vm13, %vm1599_vm9  ;;  %vm1600_vm1 = vcmp.eq.f32.partialorder %v11703_v39, %v1581_v20  ;;  %9515 = vmatpush3.msra.mxu1 %v11560_v21  ;;  %vm18524_vm9 = vcmp.le.f32.partialorder %v12532_v0, %v12673_v22  ;;  %v18525_v20 = vmov 0 }
 0x4a9   : > { %v18518_v35 = vsel %vm12906_vm7, 4294967295, %v18517_v35  ;;  %vm12915_vm8 = vmand %vm18520_vm6, %vm1600_vm1  ;;  %9516 = vmatprep.subr.mxu1 %v11572_v2  ;;  %9432 = vmatmul.mubr.msk.f32.gmra.mxu1 %vm12906_vm7, %v18411_v40  ;;  %v12926_v56 = vsel %vm12906_vm7, 1e+30, %v12494_v63  ;;  %vm18528_vm7 = vcmp.le.f32.partialorder %v12539_v52, %v12675_v5 }
 0x4aa   : > { %18519 = vst [vmem:[#allocation84_spill] sm:$0xff] %v18518_v35  ;;  %v18522_v30 = vsel %vm12915_vm8, 4294967295, %v18521_v30  ;;  %9517 = vmatpush3.msra.mxu1 %v11572_v2  ;;  %1707 = vmin.xlane.f32.xlu1 %v12926_v56  ;;  %v12933_v41 = vsel %vm12915_vm8, 1e+30, %v12501_v45  ;;  %v18529_v45 = vmov 0 }
 0x4ab   : > { %18523 = vst [vmem:[#allocation85_spill] sm:$0xff] %v18522_v30  ;;  %v1583_v16 = vpop.xlane.xlu1 %1582  ;;  %1709 = vmin.xlane.f32.xlu0 %v12933_v41  ;;  %9434 = vmatprep.mubr.msk.f32.mxu1 %vm12915_vm8, %v18411_v40 }
 0x4ac   : > { %vm1601_vm6 = vcmp.eq.f32.partialorder %v11703_v39, %v1583_v16  ;;  %v1585_v63 = vpop.xlane.xlu0 %1584  ;;  %9518 = vmatprep.subr.mxu1 %v11588_v25 }
 0x4ad   : > { %vm12944_vm13 = vmand %vm18524_vm9, %vm1601_vm6  ;;  %vm1602_vm1 = vcmp.eq.f32.partialorder %v11703_v39, %v1585_v63  ;;  %9519 = vmatpush3.msra.mxu1 %v11588_v25  ;;  %vm18533_vm6 = vcmp.le.f32.partialorder %v12562_v37, %v12689_v49  ;;  %v13001_v49 = vpop.f32.mrf.mxu1 }
 0x4ae   : > { %v18526_v20 = vsel %vm12944_vm13, 4294967295, %v18525_v20  ;;  %vm12953_vm8 = vmand %vm18528_vm7, %vm1602_vm1  ;;  %9520 = vmatprep.subr.mxu1 %v11597_v8  ;;  %9435 = vmatmul.mubr.msk.f32.gmra.mxu1 %vm12944_vm13, %v18411_v40  ;;  %v12964_v22 = vsel %vm12944_vm13, 1e+30, %v12532_v0  ;;  %v18534_v0 = vmov 0 }
 0x4af   : > { %18527 = vst [vmem:[#allocation86_spill] sm:$0xff] %v18526_v20  ;;  %v18530_v45 = vsel %vm12953_vm8, 4294967295, %v18529_v45  ;;  %9521 = vmatpush3.msra.mxu1 %v11597_v8  ;;  %1711 = vmin.xlane.f32.xlu1 %v12964_v22  ;;  %v12971_v5 = vsel %vm12953_vm8, 1e+30, %v12539_v52 }
 0x4b0   : > { %18531 = vst [vmem:[#allocation87_spill] sm:$0xff] %v18530_v45  ;;  %18532 = vst [vmem:[#allocation88_spill] sm:$0xff] %v12971_v5  ;;  %v1587_v16 = vpop.xlane.xlu1 %1586  ;;  %1713 = vmin.xlane.f32.xlu0 %v12971_v5  ;;  %9437 = vmatprep.mubr.msk.f32.mxu1 %vm12953_vm8, %v18411_v40 }
 0x4b1   : > { %vm1603_vm7 = vcmp.eq.f32.partialorder %v11703_v39, %v1587_v16  ;;  %9522 = vmatprep.subr.mxu1 %v11614_v44  ;;  %v13005_v16 = vpop.f32.mrf.mxu1 }
 0x4b2   : > { %vm12982_vm9 = vmand %vm18533_vm6, %vm1603_vm7  ;;  %9523 = vmatpush3.msra.mxu1 %v11614_v44  ;;  %18538 = vst [vmem:[#allocation91_spill] sm:$0xff] %v13005_v16 }
 0x4b3   : > { %v18535_v0 = vsel %vm12982_vm9, 4294967295, %v18534_v0  ;;  %9524 = vmatprep.subr.mxu1 %v11622_v55  ;;  %9438 = vmatmul.mubr.msk.f32.gmra.mxu1 %vm12982_vm9, %v18411_v40  ;;  %v12994_v52 = vsel %vm12982_vm9, 1e+30, %v12562_v37  ;;  %v13015_v45 = vpop.f32.mrf.mxu1 }
 0x4b4   : > { %18536 = vst [vmem:[#allocation89_spill] sm:$0xff] %v18535_v0  ;;  %18537 = vst [vmem:[#allocation90_spill] sm:$0xff] %v12994_v52  ;;  %9525 = vmatpush3.msra.mxu1 %v11622_v55  ;;  %1715 = vmin.xlane.f32.xlu1 %v12994_v52 }
 0x4b5   : > { %9526 = vmatprep.subr.mxu1 %v11640_v42  ;;  %v13031_v35 = vpop.f32.mrf.mxu1 }
 0x4b6   : > { %9527 = vmatpush3.msra.mxu1 %v11640_v42  ;;  %18539 = vst [vmem:[#allocation92_spill] sm:$0xff] %v13031_v35 }
 0x4b7   : > { %9608 = vmatprep.subr.mxu1 %v11488_v34 }
 0x516   : > { %v13003_v63 = vpop.xlane.xlu0 %1685 }
 0x517   : > { %vm17758_vm1 = vcmp.le.f32.partialorder %v12711_v46, %v13003_v63 }
 0x518   : > { %v1733_v37 = vsel %vm17758_vm1, %v11703_v39, 128.0 }
 0x519   : > { %1749 = vmin.xlane.f32.xlu0 %v1733_v37 }
 0x51a   : > { %v13013_v0 = vpop.xlane.xlu0 %1689 }
 0x51b   : > { %v13017_v20 = vpop.xlane.xlu1 %1687  ;;  %vm17770_vm7 = vcmp.le.f32.partialorder %v12733_v43, %v13013_v0 }
 0x51c   : > { %vm17767_vm6 = vcmp.le.f32.partialorder %v12741_v38, %v13017_v20  ;;  %v1735_v30 = vsel %vm17770_vm7, %v11703_v39, 128.0  ;;  %vm18574_vm13 = vcmp.le.f32.partialorder %v12741_v38, %v13017_v20 }
 0x51d   : > { %v1734_v37 = vsel %vm17767_vm6, %v11703_v39, 128.0  ;;  %1753 = vmin.xlane.f32.xlu0 %v1735_v30 }
 0x51e   : > { %1751 = vmin.xlane.f32.xlu1 %v1734_v37  ;;  %v13049_v37 = vpop.f32.mrf.mxu1 }
 0x51f   : > { %v13033_v31 = vpop.xlane.xlu1 %1691 }
 0x520   : > { %vm17788_vm1 = vcmp.le.f32.partialorder %v12774_v28, %v13033_v31  ;;  %v13037_v7 = vpop.xlane.xlu0 %1693  ;;  %v13063_v62 = vpop.f32.mrf.mxu1 }
 0x521   : > { %vm17775_vm9 = vcmp.le.f32.partialorder %v12781_v4, %v13037_v7  ;;  %v1736_v61 = vsel %vm17788_vm1, %v11703_v39, 128.0  ;;  %18540 = vst [vmem:[#allocation93_spill] sm:$0xff] %v13063_v62  ;;  %v13141_v62 = vpop.f32.mrf.mxu0 }
 0x522   : > { %1755 = vmin.xlane.f32.xlu1 %v1736_v61  ;;  %v1737_v30 = vsel %vm17775_vm9, %v11703_v39, 128.0  ;;  %v13075_v23 = vpop.f32.mrf.mxu1  ;;  %18546 = vst [vmem:[#allocation99_spill] sm:$0xff] %v13141_v62 }
 0x523   : > { %1757 = vmin.xlane.f32.xlu0 %v1737_v30 }
 0x524   : > { %v13051_v3 = vpop.xlane.xlu1 %1695  ;;  %v13089_v17 = vpop.f32.mrf.mxu1 }
 0x525   : > { %vm17780_vm6 = vcmp.le.f32.partialorder %v12812_v9, %v13051_v3  ;;  %v13055_v60 = vpop.xlane.xlu0 %1697  ;;  %18541 = vst [vmem:[#allocation94_spill] sm:$0xff] %v13089_v17 }
 0x526   : > { %vm17785_vm7 = vcmp.le.f32.partialorder %v12819_v10, %v13055_v60  ;;  %v1738_v61 = vsel %vm17780_vm6, %v11703_v39, 128.0  ;;  %v9318_v58 = vpop.f32.mrf.mxu1 }
 0x527   : > { %1759 = vmin.xlane.f32.xlu1 %v1738_v61  ;;  %v1739_v30 = vsel %vm17785_vm7, %v11703_v39, 128.0 }
 0x528   : > { %1761 = vmin.xlane.f32.xlu0 %v1739_v30  ;;  %v13121_v57 = vpop.f32.mrf.mxu1 }
 0x529   : > { %v13069_v26 = vpop.xlane.xlu1 %1699  ;;  %18542 = vst [vmem:[#allocation95_spill] sm:$0xff] %v13121_v57  ;;  %v9365_v57 = vpop.f32.mrf.mxu0 }
 0x52a   : > { %vm17796_vm9 = vcmp.le.f32.partialorder %v12850_v6, %v13069_v26  ;;  %v13073_v1 = vpop.xlane.xlu0 %1701  ;;  %v9321_v16 = vpop.f32.mrf.mxu1 }
 0x52b   : > { %vm17793_vm6 = vcmp.le.f32.partialorder %v12857_v51, %v13073_v1  ;;  %v1740_v61 = vsel %vm17796_vm9, %v11703_v39, 128.0  ;;  %v13151_v33 = vpop.f32.mrf.mxu0 }
 0x52c   : > { %1763 = vmin.xlane.f32.xlu1 %v1740_v61  ;;  %v1741_v30 = vsel %vm17793_vm6, %v11703_v39, 128.0  ;;  %v13145_v17 = vpop.f32.mrf.mxu1  ;;  %18548 = vst [vmem:[#allocation101_spill] sm:$0xff] %v13151_v33 }
 0x52d   : > { %1765 = vmin.xlane.f32.xlu0 %v1741_v30  ;;  %18547 = vst [vmem:[#allocation100_spill] sm:$0xff] %v13145_v17  ;;  %v9368_v42 = vpop.f32.mrf.mxu0  ;;  %v2957_v17 = vmax.f32 %v13001_v49, %v9362_v54 }
 0x52e   : > { %v13087_v15 = vpop.xlane.xlu1 %1703  ;;  %v9324_v50 = vpop.f32.mrf.mxu1 }
 0x52f   : > { %vm17830_vm7 = vcmp.le.f32.partialorder %v12888_v12, %v13087_v15  ;;  %v13093_v14 = vpop.xlane.xlu0 %1705  ;;  %v13157_v62 = vpop.f32.mrf.mxu0 }
 0x530   : > { %vm17801_vm1 = vcmp.le.f32.partialorder %v12895_v27, %v13093_v14  ;;  %v1742_v61 = vsel %vm17830_vm7, %v11703_v39, 128.0  ;;  %18551 = vst [vmem:[#allocation104_spill] sm:$0xff] %v13157_v62  ;;  %v2961_v62 = vmax.f32 %v13049_v37, %v9368_v42 }
 0x531   : > { %1767 = vmin.xlane.f32.xlu1 %v1742_v61  ;;  %v1743_v30 = vsel %vm17801_vm1, %v11703_v39, 128.0 }
 0x532   : > { %1769 = vmin.xlane.f32.xlu0 %v1743_v30 }
 0x533   : > { %v13105_v18 = vpop.xlane.xlu1 %1707 }
 0x534   : > { %vm17806_vm6 = vcmp.le.f32.partialorder %v12926_v56, %v13105_v18  ;;  %v13109_v24 = vpop.xlane.xlu0 %1709 }
 0x535   : > { %vm17807_vm9 = vcmp.le.f32.partialorder %v12933_v41, %v13109_v24  ;;  %v1744_v61 = vsel %vm17806_vm6, %v11703_v39, 128.0 }
 0x536   : > { %1771 = vmin.xlane.f32.xlu1 %v1744_v61  ;;  %v1745_v30 = vsel %vm17807_vm9, %v11703_v39, 128.0 }
 0x537   : > { %1773 = vmin.xlane.f32.xlu0 %v1745_v30 }
 0x538   : > { %v13123_v59 = vpop.xlane.xlu1 %1711 }
 0x539   : > { %18543 = vst [vmem:[#allocation96_spill] sm:$0xff] %v13123_v59  ;;  %vm17829_vm1 = vcmp.le.f32.partialorder %v12964_v22, %v13123_v59  ;;  %v13127_v48 = vpop.xlane.xlu0 %1713 }
 0x53a   : > { %18544 = vst [vmem:[#allocation97_spill] sm:$0xff] %v13127_v48  ;;  %vm17828_vm6 = vcmp.le.f32.partialorder %v12971_v5, %v13127_v48  ;;  %v1746_v61 = vsel %vm17829_vm1, %v11703_v39, 128.0  ;;  %v9371_v48 = vpop.f32.mrf.mxu0 }
 0x53b   : > { %1775 = vmin.xlane.f32.xlu1 %v1746_v61  ;;  %v1747_v30 = vsel %vm17828_vm6, %v11703_v39, 128.0  ;;  %vm18566_vm6 = vcmp.le.f32.partialorder %v12711_v46, %v13003_v63  ;;  %v18571_v63 = vmov 0 }
 0x53c   : > { %1777 = vmin.xlane.f32.xlu0 %v1747_v30  ;;  %v13153_v30 = vpop.f32.mrf.mxu1  ;;  %v13167_v5 = vpop.f32.mrf.mxu0 }
 0x53d   : > { %v13139_v35 = vpop.xlane.xlu1 %1715  ;;  %18549 = vst [vmem:[#allocation102_spill] sm:$0xff] %v13153_v30  ;;  %18554 = vst [vmem:[#allocation107_spill] sm:$0xff] %v13167_v5 }
 0x53e   : > { %18545 = vst [vmem:[#allocation98_spill] sm:$0xff] %v13139_v35  ;;  %vm17827_vm9 = vcmp.le.f32.partialorder %v12994_v52, %v13139_v35  ;;  %v13155_v55 = vpop.f32.mrf.mxu1  ;;  %v2959_v52 = vmax.f32 %v13015_v45, %v9365_v57 }
 0x53f   : > { %v1748_v61 = vsel %vm17827_vm9, %v11703_v39, 128.0  ;;  %18550 = vst [vmem:[#allocation103_spill] sm:$0xff] %v13155_v55 }
 0x540   : > { %1779 = vmin.xlane.f32.xlu1 %v1748_v61  ;;  %v13159_v44 = vpop.f32.mrf.mxu1 }
 0x541   : > { %18552 = vst [vmem:[#allocation105_spill] sm:$0xff] %v13159_v44  ;;  %v9374_v44 = vpop.f32.mrf.mxu0 }
 0x551   : > { %v9418_v8 = vpop.f32.mrf.mxu1 }
 0x552   : > { %v13162_v35 = vmax.f32 %v2957_v17, %v9418_v8  ;;  %v2963_v8 = vmax.f32 %v13075_v23, %v9371_v48  ;;  %v13179_v17 = vpop.f32.mrf.mxu0 }
 0x553   : > { %v13164_v61 = vpop.f32.mrf.mxu1  ;;  %18557 = vst [vmem:[#allocation110_spill] sm:$0xff] %v13179_v17 }
 0x554   : > { %18553 = vst [vmem:[#allocation106_spill] sm:$0xff] %v13164_v61 }
 0x555   : > { %v9421_v33 = vpop.f32.mrf.mxu1 }
 0x556   : > { %v13169_v30 = vmax.f32 %v2959_v52, %v9421_v33  ;;  %v9377_v33 = vpop.f32.mrf.mxu0  ;;  %v2965_v52 = vmax.f32 %v9318_v58, %v9374_v44  ;;  %v18567_v44 = vmov 0 }
 0x557   : > { %v13171_v55 = vpop.f32.mrf.mxu1 }
 0x558   : > { %18555 = vst [vmem:[#allocation108_spill] sm:$0xff] %v13171_v55  ;;  %v13187_v42 = vpop.f32.mrf.mxu0 }
 0x559   : > { %18561 = vst [vmem:[#allocation114_spill] sm:$0xff] %v13187_v42 }
 0x55a   : > { %v9424_v59 = vpop.f32.mrf.mxu1 }
 0x55b   : > { %v13174_v54 = vmax.f32 %v2961_v62, %v9424_v59  ;;  %v2967_v62 = vmax.f32 %v9321_v16, %v9377_v33  ;;  %v18587_v33 = vmov 0 }
 0x55c   : > { %v13176_v49 = vpop.f32.mrf.mxu1 }
 0x55d   : > { %18556 = vst [vmem:[#allocation109_spill] sm:$0xff] %v13176_v49  ;;  %v9380_v49 = vpop.f32.mrf.mxu0 }
 0x55f   : > { %v9427_v57 = vpop.f32.mrf.mxu1 }
 0x560   : > { %v13181_v45 = vmax.f32 %v2963_v8, %v9427_v57  ;;  %v2969_v8 = vmax.f32 %v9324_v50, %v9380_v49 }
 0x561   : > { %v13183_v61 = vpop.f32.mrf.mxu1 }
 0x562   : > { %18558 = vst [vmem:[#allocation111_spill] sm:$0xff] %v13181_v45  ;;  %18559 = vst [vmem:[#allocation112_spill] sm:$0xff] %v13183_v61 }
 0x564   : > { %v9430_v55 = vpop.f32.mrf.mxu1 }
 0x565   : > { %v13185_v5 = vmax.f32 %v2965_v52, %v9430_v55 }
 0x566   : > { %v13189_v59 = vpop.f32.mrf.mxu1 }
 0x567   : > { %18560 = vst [vmem:[#allocation113_spill] sm:$0xff] %v13185_v5  ;;  %18562 = vst [vmem:[#allocation115_spill] sm:$0xff] %v13189_v59 }
 0x569   : > { %v9433_v37 = vpop.f32.mrf.mxu1 }
 0x56a   : > { %v13191_v48 = vmax.f32 %v2967_v62, %v9433_v37  ;;  %v18595_v62 = vmov 0 }
 0x56b   : > { %v13193_v23 = vpop.f32.mrf.mxu1 }
 0x56c   : > { %18563 = vst [vmem:[#allocation116_spill] sm:$0xff] %v13191_v48  ;;  %18564 = vst [vmem:[#allocation117_spill] sm:$0xff] %v13193_v23 }
 0x56e   : > { %v9436_v57 = vpop.f32.mrf.mxu1 }
 0x56f   : > { %v13195_v17 = vmax.f32 %v2969_v8, %v9436_v57  ;;  %v18603_v8 = vmov 0 }
 0x571   : > { %18565 = vst [vmem:[#allocation118_spill] sm:$0xff] %v13195_v17 }
 0x5a2   : > { %v1750_v61 = vpop.xlane.xlu0 %1749 }
 0x5a3   : > { %vm1781_vm9 = vcmp.eq.f32.partialorder %v11703_v39, %v1750_v61  ;;  %v18583_v61 = vmov 0 }
 0x5a4   : > { %vm13201_vm1 = vmand %vm18566_vm6, %vm1781_vm9  ;;  %vm18570_vm6 = vcmp.le.f32.partialorder %v12733_v43, %v13013_v0 }
 0x5a5   : > { %v18568_v44 = vsel %vm13201_vm1, 4294967295, %v18567_v44  ;;  %9472 = vmatprep.mubr.msk.f32.mxu0 %vm13201_vm1, %v18411_v40  ;;  %v13211_v55 = vsel %vm13201_vm1, 1e+30, %v12711_v46  ;;  %v18575_v46 = vmov 0 }
 0x5a6   : > { %18569 = vst [vmem:[#allocation119_spill] sm:$0xff] %v18568_v44  ;;  %1878 = vmin.xlane.f32.xlu0 %v13211_v55  ;;  %v1754_v58 = vpop.xlane.xlu0 %1753  ;;  %v13629_v44 = vpop.f32.mrf.mxu0 }
 0x5a7   : > { %v1752_v50 = vpop.xlane.xlu1 %1751  ;;  %vm1783_vm7 = vcmp.eq.f32.partialorder %v11703_v39, %v1754_v58  ;;  %v18611_v58 = vmov 0 }
 0x5a8   : > { %vm1782_vm9 = vcmp.eq.f32.partialorder %v11703_v39, %v1752_v50  ;;  %vm13219_vm8 = vmand %vm18570_vm6, %vm1783_vm7  ;;  %vm18578_vm7 = vcmp.le.f32.partialorder %v12774_v28, %v13033_v31 }
 0x5a9   : > { %v18572_v63 = vsel %vm13219_vm8, 4294967295, %v18571_v63  ;;  %vm13226_vm12 = vmand %vm18574_vm13, %vm1782_vm9  ;;  %v13233_v16 = vsel %vm13219_vm8, 1e+30, %v12733_v43 }
 0x5aa   : > { %18573 = vst [vmem:[#allocation120_spill] sm:$0xff] %v18572_v63  ;;  %v18576_v46 = vsel %vm13226_vm12, 4294967295, %v18575_v46  ;;  %9473 = vmatmul.mubr.msk.f32.vlgmr.msra.gmra.mxu0 %vm13226_vm12, %v18411_v40  ;;  %v13241_v0 = vsel %vm13226_vm12, 1e+30, %v12741_v38  ;;  %1882 = vmin.xlane.f32.xlu0 %v13233_v16  ;;  %v18579_v38 = vmov 0  ;;  %vm18582_vm12 = vcmp.le.f32.partialorder %v12781_v4, %v13037_v7 }
 0x5ab   : > { %18577 = vst [vmem:[#allocation121_spill] sm:$0xff] %v18576_v46  ;;  %9553 = vmatpush3.msra.mxu0 %v11488_v34  ;;  %1880 = vmin.xlane.f32.xlu1 %v13241_v0  ;;  %v1756_v20 = vpop.xlane.xlu1 %1755 }
 0x5ac   : > { %vm1784_vm13 = vcmp.eq.f32.partialorder %v11703_v39, %v1756_v20  ;;  %v1758_v43 = vpop.xlane.xlu0 %1757  ;;  %9475 = vmatprep.mubr.msk.f32.mxu0 %vm13219_vm8, %v18411_v40  ;;  %9554 = vmatprep.subr.mxu0 %v11495_v47  ;;  %v18618_v20 = vld [vmem:[#allocation96_spill] sm:$0xff] }
 0x5ad   : > { %vm13254_vm9 = vmand %vm18578_vm7, %vm1784_vm13  ;;  %vm1785_vm6 = vcmp.eq.f32.partialorder %v11703_v39, %v1758_v43  ;;  %9555 = vmatpush3.msra.mxu0 %v11495_v47  ;;  %vm18586_vm13 = vcmp.le.f32.partialorder %v12812_v9, %v13051_v3  ;;  %v18620_v43 = vmov 0 }
 0x5ae   : > { %v18580_v38 = vsel %vm13254_vm9, 4294967295, %v18579_v38  ;;  %vm13263_vm1 = vmand %vm18582_vm12, %vm1785_vm6  ;;  %9556 = vmatprep.subr.mxu0 %v11506_v53  ;;  %9476 = vmatmul.mubr.msk.f32.gmra.mxu0 %vm13254_vm9, %v18411_v40  ;;  %v13274_v31 = vsel %vm13254_vm9, 1e+30, %v12774_v28  ;;  %vm18590_vm9 = vcmp.le.f32.partialorder %v12819_v10, %v13055_v60 }
 0x5af   : > { %18581 = vst [vmem:[#allocation122_spill] sm:$0xff] %v18580_v38  ;;  %v18584_v61 = vsel %vm13263_vm1, 4294967295, %v18583_v61  ;;  %9557 = vmatpush3.msra.mxu0 %v11506_v53  ;;  %1884 = vmin.xlane.f32.xlu1 %v13274_v31  ;;  %v13281_v7 = vsel %vm13263_vm1, 1e+30, %v12781_v4  ;;  %v18591_v4 = vmov 0 }
 0x5b0   : > { %18585 = vst [vmem:[#allocation123_spill] sm:$0xff] %v18584_v61  ;;  %v1760_v49 = vpop.xlane.xlu1 %1759  ;;  %1886 = vmin.xlane.f32.xlu0 %v13281_v7  ;;  %9478 = vmatprep.mubr.msk.f32.mxu0 %vm13263_vm1, %v18411_v40 }
 0x5b1   : > { %vm1786_vm12 = vcmp.eq.f32.partialorder %v11703_v39, %v1760_v49  ;;  %v1762_v28 = vpop.xlane.xlu0 %1761  ;;  %9558 = vmatprep.subr.mxu0 %v11514_v13  ;;  %v18624_v49 = vld [vmem:[#allocation97_spill] sm:$0xff] }
 0x5b2   : > { %vm13292_vm7 = vmand %vm18586_vm13, %vm1786_vm12  ;;  %vm1787_vm6 = vcmp.eq.f32.partialorder %v11703_v39, %v1762_v28  ;;  %9559 = vmatpush3.msra.mxu0 %v11514_v13  ;;  %vm18594_vm12 = vcmp.le.f32.partialorder %v12850_v6, %v13069_v26  ;;  %v18626_v28 = vmov 0 }
 0x5b3   : > { %v18588_v33 = vsel %vm13292_vm7, 4294967295, %v18587_v33  ;;  %vm13301_vm1 = vmand %vm18590_vm9, %vm1787_vm6  ;;  %9560 = vmatprep.subr.mxu0 %v11521_v19  ;;  %9479 = vmatmul.mubr.msk.f32.gmra.mxu0 %vm13292_vm7, %v18411_v40  ;;  %v13312_v3 = vsel %vm13292_vm7, 1e+30, %v12812_v9  ;;  %vm18598_vm7 = vcmp.le.f32.partialorder %v12857_v51, %v13073_v1 }
 0x5b4   : > { %18589 = vst [vmem:[#allocation124_spill] sm:$0xff] %v18588_v33  ;;  %v18592_v4 = vsel %vm13301_vm1, 4294967295, %v18591_v4  ;;  %9561 = vmatpush3.msra.mxu0 %v11521_v19  ;;  %1888 = vmin.xlane.f32.xlu1 %v13312_v3  ;;  %v13319_v60 = vsel %vm13301_vm1, 1e+30, %v12819_v10  ;;  %v18599_v10 = vmov 0 }
 0x5b5   : > { %18593 = vst [vmem:[#allocation125_spill] sm:$0xff] %v18592_v4  ;;  %v1764_v52 = vpop.xlane.xlu1 %1763  ;;  %1890 = vmin.xlane.f32.xlu0 %v13319_v60  ;;  %9481 = vmatprep.mubr.msk.f32.mxu0 %vm13301_vm1, %v18411_v40 }
 0x5b6   : > { %vm1788_vm9 = vcmp.eq.f32.partialorder %v11703_v39, %v1764_v52  ;;  %v1766_v9 = vpop.xlane.xlu0 %1765  ;;  %9562 = vmatprep.subr.mxu0 %v11528_v36  ;;  %v18629_v52 = vld [vmem:[#allocation37_spill] sm:$0xff] }
 0x5b7   : > { %vm13330_vm13 = vmand %vm18594_vm12, %vm1788_vm9  ;;  %vm1789_vm6 = vcmp.eq.f32.partialorder %v11703_v39, %v1766_v9  ;;  %9563 = vmatpush3.msra.mxu0 %v11528_v36  ;;  %vm18602_vm9 = vcmp.le.f32.partialorder %v12888_v12, %v13087_v15 }
 0x5b8   : > { %v18596_v62 = vsel %vm13330_vm13, 4294967295, %v18595_v62  ;;  %vm13339_vm1 = vmand %vm18598_vm7, %vm1789_vm6  ;;  %9564 = vmatprep.subr.mxu0 %v11536_v32  ;;  %9482 = vmatmul.mubr.msk.f32.gmra.mxu0 %vm13330_vm13, %v18411_v40  ;;  %v13350_v26 = vsel %vm13330_vm13, 1e+30, %v12850_v6  ;;  %vm18606_vm13 = vcmp.le.f32.partialorder %v12895_v27, %v13093_v14 }
 0x5b9   : > { %18597 = vst [vmem:[#allocation126_spill] sm:$0xff] %v18596_v62  ;;  %v18600_v10 = vsel %vm13339_vm1, 4294967295, %v18599_v10  ;;  %9565 = vmatpush3.msra.mxu0 %v11536_v32  ;;  %1892 = vmin.xlane.f32.xlu1 %v13350_v26  ;;  %v13357_v1 = vsel %vm13339_vm1, 1e+30, %v12857_v51  ;;  %v18607_v51 = vmov 0 }
 0x5ba   : > { %18601 = vst [vmem:[#allocation127_spill] sm:$0xff] %v18600_v10  ;;  %v1768_v37 = vpop.xlane.xlu1 %1767  ;;  %1894 = vmin.xlane.f32.xlu0 %v13357_v1  ;;  %9484 = vmatprep.mubr.msk.f32.mxu0 %vm13339_vm1, %v18411_v40 }
 0x5bb   : > { %vm1790_vm7 = vcmp.eq.f32.partialorder %v11703_v39, %v1768_v37  ;;  %v1770_v6 = vpop.xlane.xlu0 %1769  ;;  %9566 = vmatprep.subr.mxu0 %v11544_v11 }
 0x5bc   : > { %vm13368_vm12 = vmand %vm18602_vm9, %vm1790_vm7  ;;  %vm1791_vm6 = vcmp.eq.f32.partialorder %v11703_v39, %v1770_v6  ;;  %9567 = vmatpush3.msra.mxu0 %v11544_v11  ;;  %vm18610_vm7 = vcmp.le.f32.partialorder %v12926_v56, %v13105_v18 }
 0x5bd   : > { %v18604_v8 = vsel %vm13368_vm12, 4294967295, %v18603_v8  ;;  %vm13377_vm1 = vmand %vm18606_vm13, %vm1791_vm6  ;;  %9568 = vmatprep.subr.mxu0 %v11552_v29  ;;  %9485 = vmatmul.mubr.msk.f32.gmra.mxu0 %vm13368_vm12, %v18411_v40  ;;  %v13388_v15 = vsel %vm13368_vm12, 1e+30, %v12888_v12  ;;  %vm18614_vm12 = vcmp.le.f32.partialorder %v12933_v41, %v13109_v24 }
 0x5be   : > { %18605 = vst [vmem:[#allocation128_spill] sm:$0xff] %v18604_v8  ;;  %v18608_v51 = vsel %vm13377_vm1, 4294967295, %v18607_v51  ;;  %9569 = vmatpush3.msra.mxu0 %v11552_v29  ;;  %1896 = vmin.xlane.f32.xlu1 %v13388_v15  ;;  %v13395_v14 = vsel %vm13377_vm1, 1e+30, %v12895_v27  ;;  %v18615_v27 = vmov 0 }
 0x5bf   : > { %18609 = vst [vmem:[#allocation129_spill] sm:$0xff] %v18608_v51  ;;  %v1772_v57 = vpop.xlane.xlu1 %1771  ;;  %1898 = vmin.xlane.f32.xlu0 %v13395_v14  ;;  %9487 = vmatprep.mubr.msk.f32.mxu0 %vm13377_vm1, %v18411_v40 }
 0x5c0   : > { %vm1792_vm13 = vcmp.eq.f32.partialorder %v11703_v39, %v1772_v57  ;;  %v1774_v12 = vpop.xlane.xlu0 %1773  ;;  %9570 = vmatprep.subr.mxu0 %v11560_v21  ;;  %v18631_v57 = vld [vmem:[#allocation90_spill] sm:$0xff] }
 0x5c1   : > { %vm13406_vm9 = vmand %vm18610_vm7, %vm1792_vm13  ;;  %vm1793_vm6 = vcmp.eq.f32.partialorder %v11703_v39, %v1774_v12  ;;  %9571 = vmatpush3.msra.mxu0 %v11560_v21  ;;  %vm18619_vm13 = vcmp.le.f32.partialorder %v12964_v22, %v18618_v20  ;;  %v18632_v12 = vld [vmem:[#allocation98_spill] sm:$0xff] }
 0x5c2   : > { %v18612_v58 = vsel %vm13406_vm9, 4294967295, %v18611_v58  ;;  %vm13415_vm1 = vmand %vm18614_vm12, %vm1793_vm6  ;;  %9572 = vmatprep.subr.mxu0 %v11572_v2  ;;  %9488 = vmatmul.mubr.msk.f32.gmra.mxu0 %vm13406_vm9, %v18411_v40  ;;  %v13426_v18 = vsel %vm13406_vm9, 1e+30, %v12926_v56  ;;  %18640 = vst [vmem:[#allocation98_spill] sm:$0xff] %v13629_v44 }
 0x5c3   : > { %18613 = vst [vmem:[#allocation130_spill] sm:$0xff] %v18612_v58  ;;  %v18616_v27 = vsel %vm13415_vm1, 4294967295, %v18615_v27  ;;  %9573 = vmatpush3.msra.mxu0 %v11572_v2  ;;  %1900 = vmin.xlane.f32.xlu1 %v13426_v18  ;;  %v13433_v24 = vsel %vm13415_vm1, 1e+30, %v12933_v41  ;;  %v18623_v41 = vld [vmem:[#allocation88_spill] sm:$0xff] }
 0x5c4   : > { %18617 = vst [vmem:[#allocation131_spill] sm:$0xff] %v18616_v27  ;;  %v1776_v50 = vpop.xlane.xlu1 %1775  ;;  %1902 = vmin.xlane.f32.xlu0 %v13433_v24  ;;  %9490 = vmatprep.mubr.msk.f32.mxu0 %vm13415_vm1, %v18411_v40  ;;  %vm18625_vm9 = vcmp.le.f32.partialorder %v18623_v41, %v18624_v49 }
 0x5c5   : > { %vm1794_vm12 = vcmp.eq.f32.partialorder %v11703_v39, %v1776_v50  ;;  %v1778_v56 = vpop.xlane.xlu0 %1777  ;;  %9574 = vmatprep.subr.mxu0 %v11588_v25  ;;  %v18634_v50 = vmov 0 }
 0x5c6   : > { %vm13444_vm7 = vmand %vm18619_vm13, %vm1794_vm12  ;;  %vm1795_vm6 = vcmp.eq.f32.partialorder %v11703_v39, %v1778_v56  ;;  %9575 = vmatpush3.msra.mxu0 %v11588_v25  ;;  %vm18633_vm12 = vcmp.le.f32.partialorder %v18631_v57, %v18632_v12  ;;  %v18637_v56 = vld [vmem:[#allocation39_spill] sm:$0xff] }
 0x5c7   : > { %v18621_v43 = vsel %vm13444_vm7, 4294967295, %v18620_v43  ;;  %vm13453_vm1 = vmand %vm18625_vm9, %vm1795_vm6  ;;  %9576 = vmatprep.subr.mxu0 %v18629_v52  ;;  %9491 = vmatmul.mubr.msk.f32.gmra.mxu0 %vm13444_vm7, %v18411_v40  ;;  %v13464_v9 = vsel %vm13444_vm7, 1e+30, %v12964_v22  ;;  %v18630_v22 = vld [vmem:[#allocation38_spill] sm:$0xff] }
 0x5c8   : > { %18622 = vst [vmem:[#allocation96_spill] sm:$0xff] %v18621_v43  ;;  %v18627_v28 = vsel %vm13453_vm1, 4294967295, %v18626_v28  ;;  %9577 = vmatpush3.msra.mxu0 %v18629_v52  ;;  %1904 = vmin.xlane.f32.xlu1 %v13464_v9  ;;  %v13471_v37 = vsel %vm13453_vm1, 1e+30, %v18623_v41  ;;  %v18638_v41 = vld [vmem:[#allocation40_spill] sm:$0xff] }
 0x5c9   : > { %18628 = vst [vmem:[#allocation88_spill] sm:$0xff] %v18627_v28  ;;  %v1780_v6 = vpop.xlane.xlu1 %1779  ;;  %1906 = vmin.xlane.f32.xlu0 %v13471_v37  ;;  %9493 = vmatprep.mubr.msk.f32.mxu0 %vm13453_vm1, %v18411_v40 }
 0x5ca   : > { %vm1796_vm9 = vcmp.eq.f32.partialorder %v11703_v39, %v1780_v6  ;;  %9578 = vmatprep.subr.mxu0 %v18630_v22 }
 0x5cb   : > { %vm13482_vm13 = vmand %vm18633_vm12, %vm1796_vm9  ;;  %9579 = vmatpush3.msra.mxu0 %v18630_v22 }
 0x5cc   : > { %v18635_v50 = vsel %vm13482_vm13, 4294967295, %v18634_v50  ;;  %9580 = vmatprep.subr.mxu0 %v18637_v56  ;;  %9494 = vmatmul.mubr.msk.f32.gmra.mxu0 %vm13482_vm13, %v18411_v40  ;;  %v13494_v20 = vsel %vm13482_vm13, 1e+30, %v18631_v57 }
 0x5cd   : > { %18636 = vst [vmem:[#allocation97_spill] sm:$0xff] %v18635_v50  ;;  %9581 = vmatpush3.msra.mxu0 %v18637_v56  ;;  %1908 = vmin.xlane.f32.xlu1 %v13494_v20  ;;  %v18657_v56 = vmov 0 }
 0x5ce   : > { %9582 = vmatprep.subr.mxu0 %v18638_v41 }
 0x5cf   : > { %9583 = vmatpush3.msra.mxu0 %v18638_v41 }
 0x5d0   : > { %9664 = vmatprep.subr.mxu0 %v11488_v34 }
 0x62f   : > { %v13501_v49 = vpop.xlane.xlu0 %1878 }
 0x630   : > { %vm17865_vm6 = vcmp.le.f32.partialorder %v13211_v55, %v13501_v49 }
 0x631   : > { %v1926_v6 = vsel %vm17865_vm6, %v11703_v39, 128.0 }
 0x632   : > { %1942 = vmin.xlane.f32.xlu0 %v1926_v6 }
 0x633   : > { %v13509_v57 = vpop.xlane.xlu0 %1882 }
 0x634   : > { %v13511_v12 = vpop.xlane.xlu1 %1880  ;;  %vm17875_vm9 = vcmp.le.f32.partialorder %v13233_v16, %v13509_v57 }
 0x635   : > { %vm17872_vm12 = vcmp.le.f32.partialorder %v13241_v0, %v13511_v12  ;;  %v1928_v50 = vsel %vm17875_vm9, %v11703_v39, 128.0  ;;  %vm18664_vm7 = vcmp.le.f32.partialorder %v13241_v0, %v13511_v12 }
 0x636   : > { %v1927_v6 = vsel %vm17872_vm12, %v11703_v39, 128.0  ;;  %1946 = vmin.xlane.f32.xlu0 %v1928_v50 }
 0x637   : > { %1944 = vmin.xlane.f32.xlu1 %v1927_v6 }
 0x638   : > { %v13525_v28 = vpop.xlane.xlu1 %1884 }
 0x639   : > { %vm17881_vm6 = vcmp.le.f32.partialorder %v13274_v31, %v13525_v28  ;;  %v13529_v43 = vpop.xlane.xlu0 %1886 }
 0x63a   : > { %vm17878_vm13 = vcmp.le.f32.partialorder %v13281_v7, %v13529_v43  ;;  %v1929_v27 = vsel %vm17881_vm6, %v11703_v39, 128.0 }
 0x63b   : > { %1948 = vmin.xlane.f32.xlu1 %v1929_v27  ;;  %v1930_v50 = vsel %vm17878_vm13, %v11703_v39, 128.0 }
 0x63c   : > { %1950 = vmin.xlane.f32.xlu0 %v1930_v50 }
 0x63d   : > { %v13541_v6 = vpop.xlane.xlu1 %1888 }
 0x63e   : > { %vm17887_vm12 = vcmp.le.f32.partialorder %v13312_v3, %v13541_v6  ;;  %v13545_v58 = vpop.xlane.xlu0 %1890 }
 0x63f   : > { %vm17884_vm9 = vcmp.le.f32.partialorder %v13319_v60, %v13545_v58  ;;  %v1931_v27 = vsel %vm17887_vm12, %v11703_v39, 128.0 }
 0x640   : > { %1952 = vmin.xlane.f32.xlu1 %v1931_v27  ;;  %v1932_v50 = vsel %vm17884_vm9, %v11703_v39, 128.0 }
 0x641   : > { %1954 = vmin.xlane.f32.xlu0 %v1932_v50 }
 0x642   : > { %v13557_v51 = vpop.xlane.xlu1 %1892 }
 0x643   : > { %vm17893_vm13 = vcmp.le.f32.partialorder %v13350_v26, %v13557_v51  ;;  %v13561_v8 = vpop.xlane.xlu0 %1894 }
 0x644   : > { %vm17890_vm6 = vcmp.le.f32.partialorder %v13357_v1, %v13561_v8  ;;  %v1933_v27 = vsel %vm17893_vm13, %v11703_v39, 128.0 }
 0x645   : > { %1956 = vmin.xlane.f32.xlu1 %v1933_v27  ;;  %v1934_v50 = vsel %vm17890_vm6, %v11703_v39, 128.0 }
 0x646   : > { %1958 = vmin.xlane.f32.xlu0 %v1934_v50 }
 0x647   : > { %v13573_v10 = vpop.xlane.xlu1 %1896 }
 0x648   : > { %vm17899_vm9 = vcmp.le.f32.partialorder %v13388_v15, %v13573_v10  ;;  %v13577_v62 = vpop.xlane.xlu0 %1898 }
 0x649   : > { %vm17896_vm12 = vcmp.le.f32.partialorder %v13395_v14, %v13577_v62  ;;  %v1935_v27 = vsel %vm17899_vm9, %v11703_v39, 128.0 }
 0x64a   : > { %1960 = vmin.xlane.f32.xlu1 %v1935_v27  ;;  %v1936_v50 = vsel %vm17896_vm12, %v11703_v39, 128.0 }
 0x64b   : > { %1962 = vmin.xlane.f32.xlu0 %v1936_v50 }
 0x64c   : > { %v13589_v4 = vpop.xlane.xlu1 %1900 }
 0x64d   : > { %vm17917_vm6 = vcmp.le.f32.partialorder %v13426_v18, %v13589_v4  ;;  %v13593_v33 = vpop.xlane.xlu0 %1902 }
 0x64e   : > { %vm17902_vm13 = vcmp.le.f32.partialorder %v13433_v24, %v13593_v33  ;;  %v1937_v27 = vsel %vm17917_vm6, %v11703_v39, 128.0 }
 0x64f   : > { %1964 = vmin.xlane.f32.xlu1 %v1937_v27  ;;  %v1938_v50 = vsel %vm17902_vm13, %v11703_v39, 128.0 }
 0x650   : > { %1966 = vmin.xlane.f32.xlu0 %v1938_v50 }
 0x651   : > { %v13605_v61 = vpop.xlane.xlu1 %1904 }
 0x652   : > { %vm17916_vm12 = vcmp.le.f32.partialorder %v13464_v9, %v13605_v61  ;;  %v13609_v38 = vpop.xlane.xlu0 %1906 }
 0x653   : > { %vm17915_vm9 = vcmp.le.f32.partialorder %v13471_v37, %v13609_v38  ;;  %v1939_v27 = vsel %vm17916_vm12, %v11703_v39, 128.0 }
 0x654   : > { %1968 = vmin.xlane.f32.xlu1 %v1939_v27  ;;  %v1940_v50 = vsel %vm17915_vm9, %v11703_v39, 128.0  ;;  %v13631_v27 = vpop.f32.mrf.mxu0  ;;  %vm18656_vm9 = vcmp.le.f32.partialorder %v13211_v55, %v13501_v49  ;;  %v18661_v49 = vmov 0 }
 0x655   : > { %1970 = vmin.xlane.f32.xlu0 %v1940_v50  ;;  %18641 = vst [vmem:[#allocation132_spill] sm:$0xff] %v13631_v27 }
 0x656   : > { %v13621_v63 = vpop.xlane.xlu1 %1908  ;;  %v13633_v59 = vpop.f32.mrf.mxu0 }
 0x657   : > { %18639 = vst [vmem:[#allocation90_spill] sm:$0xff] %v13621_v63  ;;  %vm17914_vm13 = vcmp.le.f32.partialorder %v13494_v20, %v13621_v63  ;;  %18642 = vst [vmem:[#allocation133_spill] sm:$0xff] %v13633_v59 }
 0x658   : > { %v1941_v46 = vsel %vm17914_vm13, %v11703_v39, 128.0 }
 0x659   : > { %1972 = vmin.xlane.f32.xlu1 %v1941_v46 }
 0x66a   : > { %v13635_v23 = vpop.f32.mrf.mxu0 }
 0x66b   : > { %18643 = vst [vmem:[#allocation134_spill] sm:$0xff] %v13635_v23 }
 0x66c   : > { %v13639_v42 = vpop.f32.mrf.mxu0 }
 0x66d   : > { %18644 = vst [vmem:[#allocation135_spill] sm:$0xff] %v13639_v42 }
 0x66e   : > { %v13641_v41 = vpop.f32.mrf.mxu0 }
 0x66f   : > { %18645 = vst [vmem:[#allocation136_spill] sm:$0xff] %v13641_v41 }
 0x670   : > { %v13645_v63 = vpop.f32.mrf.mxu0 }
 0x671   : > { %18646 = vst [vmem:[#allocation137_spill] sm:$0xff] %v13645_v63 }
 0x673   : > { %v13647_v46 = vpop.f32.mrf.mxu0 }
 0x674   : > { %18647 = vst [vmem:[#allocation138_spill] sm:$0xff] %v13647_v46 }
 0x675   : > { %v13651_v59 = vpop.f32.mrf.mxu0 }
 0x676   : > { %18648 = vst [vmem:[#allocation139_spill] sm:$0xff] %v13651_v59  ;;  %v18732_v17 = vld [vmem:[#allocation136_spill] sm:$0xff] }
 0x678   : > { %v13653_v27 = vpop.f32.mrf.mxu0 }
 0x679   : > { %18649 = vst [vmem:[#allocation140_spill] sm:$0xff] %v13653_v27 }
 0x67a   : > { %v13657_v42 = vpop.f32.mrf.mxu0 }
 0x67b   : > { %18650 = vst [vmem:[#allocation141_spill] sm:$0xff] %v13657_v42 }
 0x67d   : > { %v13659_v23 = vpop.f32.mrf.mxu0 }
 0x67e   : > { %18651 = vst [vmem:[#allocation142_spill] sm:$0xff] %v13659_v23  ;;  %v14106_v23 = vpop.f32.mrf.mxu1 }
 0x67f   : > { %v13663_v63 = vpop.f32.mrf.mxu0  ;;  %18725 = vst [vmem:[#allocation164_spill] sm:$0xff] %v14106_v23 }
 0x680   : > { %18652 = vst [vmem:[#allocation143_spill] sm:$0xff] %v13663_v63  ;;  %v14108_v5 = vpop.f32.mrf.mxu1 }
 0x681   : > { %18726 = vst [vmem:[#allocation165_spill] sm:$0xff] %v14108_v5  ;;  %v18736_v5 = vld [vmem:[#allocation138_spill] sm:$0xff] }
 0x682   : > { %v13665_v41 = vpop.f32.mrf.mxu0  ;;  %v14110_v63 = vpop.f32.mrf.mxu1 }
 0x683   : > { %18653 = vst [vmem:[#allocation144_spill] sm:$0xff] %v13665_v41  ;;  %18727 = vst [vmem:[#allocation166_spill] sm:$0xff] %v14110_v63  ;;  %v18737_v63 = vmax.f32 %v13174_v54, %v18736_v5 }
 0x684   : > { %v13669_v59 = vpop.f32.mrf.mxu0 }
 0x685   : > { %18654 = vst [vmem:[#allocation145_spill] sm:$0xff] %v13669_v59 }
 0x687   : > { %v13671_v46 = vpop.f32.mrf.mxu0 }
 0x688   : > { %18655 = vst [vmem:[#allocation146_spill] sm:$0xff] %v13671_v46 }
 0x6bb   : > { %v1943_v27 = vpop.xlane.xlu0 %1942 }
 0x6bc   : > { %vm1974_vm13 = vcmp.eq.f32.partialorder %v11703_v39, %v1943_v27 }
 0x6bd   : > { %vm13679_vm12 = vmand %vm18656_vm9, %vm1974_vm13  ;;  %vm18660_vm9 = vcmp.le.f32.partialorder %v13233_v16, %v13509_v57 }
 0x6be   : > { %v18658_v56 = vsel %vm13679_vm12, 4294967295, %v18657_v56  ;;  %9528 = vmatprep.mubr.msk.f32.mxu1 %vm13679_vm12, %v18411_v40  ;;  %v13689_v44 = vsel %vm13679_vm12, 1e+30, %v13211_v55  ;;  %v18665_v55 = vmov 0 }
 0x6bf   : > { %18659 = vst [vmem:[#allocation147_spill] sm:$0xff] %v18658_v56  ;;  %2071 = vmin.xlane.f32.xlu0 %v13689_v44  ;;  %v1947_v50 = vpop.xlane.xlu0 %1946 }
 0x6c0   : > { %v1945_v27 = vpop.xlane.xlu1 %1944  ;;  %vm1976_vm6 = vcmp.eq.f32.partialorder %v11703_v39, %v1947_v50 }
 0x6c1   : > { %vm1975_vm13 = vcmp.eq.f32.partialorder %v11703_v39, %v1945_v27  ;;  %vm13697_vm1 = vmand %vm18660_vm9, %vm1976_vm6  ;;  %vm18668_vm6 = vcmp.le.f32.partialorder %v13274_v31, %v13525_v28  ;;  %v18673_v27 = vmov 0 }
 0x6c2   : > { %v18662_v49 = vsel %vm13697_vm1, 4294967295, %v18661_v49  ;;  %vm13704_vm12 = vmand %vm18664_vm7, %vm1975_vm13  ;;  %v13711_v50 = vsel %vm13697_vm1, 1e+30, %v13233_v16 }
 0x6c3   : > { %18663 = vst [vmem:[#allocation148_spill] sm:$0xff] %v18662_v49  ;;  %v18666_v55 = vsel %vm13704_vm12, 4294967295, %v18665_v55  ;;  %9529 = vmatmul.mubr.msk.f32.vlgmr.msra.gmra.mxu1 %vm13704_vm12, %v18411_v40  ;;  %v13719_v57 = vsel %vm13704_vm12, 1e+30, %v13241_v0  ;;  %2075 = vmin.xlane.f32.xlu0 %v13711_v50  ;;  %v18669_v0 = vmov 0  ;;  %vm18672_vm12 = vcmp.le.f32.partialorder %v13281_v7, %v13529_v43 }
 0x6c4   : > { %18667 = vst [vmem:[#allocation149_spill] sm:$0xff] %v18666_v55  ;;  %9609 = vmatpush3.msra.mxu1 %v11488_v34  ;;  %2073 = vmin.xlane.f32.xlu1 %v13719_v57  ;;  %v1949_v12 = vpop.xlane.xlu1 %1948 }
 0x6c5   : > { %vm1977_vm7 = vcmp.eq.f32.partialorder %v11703_v39, %v1949_v12  ;;  %v1951_v16 = vpop.xlane.xlu0 %1950  ;;  %9531 = vmatprep.mubr.msk.f32.mxu1 %vm13697_vm1, %v18411_v40  ;;  %9610 = vmatprep.subr.mxu1 %v11495_v47 }
 0x6c6   : > { %vm13732_vm13 = vmand %vm18668_vm6, %vm1977_vm7  ;;  %vm1978_vm9 = vcmp.eq.f32.partialorder %v11703_v39, %v1951_v16  ;;  %9611 = vmatpush3.msra.mxu1 %v11495_v47  ;;  %vm18676_vm7 = vcmp.le.f32.partialorder %v13312_v3, %v13541_v6  ;;  %v18677_v16 = vmov 0 }
 0x6c7   : > { %v18670_v0 = vsel %vm13732_vm13, 4294967295, %v18669_v0  ;;  %vm13741_vm8 = vmand %vm18672_vm12, %vm1978_vm9  ;;  %9612 = vmatprep.subr.mxu1 %v11506_v53  ;;  %9532 = vmatmul.mubr.msk.f32.gmra.mxu1 %vm13732_vm13, %v18411_v40  ;;  %v13752_v28 = vsel %vm13732_vm13, 1e+30, %v13274_v31  ;;  %vm18680_vm13 = vcmp.le.f32.partialorder %v13319_v60, %v13545_v58 }
 0x6c8   : > { %18671 = vst [vmem:[#allocation150_spill] sm:$0xff] %v18670_v0  ;;  %v18674_v27 = vsel %vm13741_vm8, 4294967295, %v18673_v27  ;;  %9613 = vmatpush3.msra.mxu1 %v11506_v53  ;;  %2077 = vmin.xlane.f32.xlu1 %v13752_v28  ;;  %v13759_v43 = vsel %vm13741_vm8, 1e+30, %v13281_v7  ;;  %v18681_v7 = vmov 0 }
 0x6c9   : > { %18675 = vst [vmem:[#allocation151_spill] sm:$0xff] %v18674_v27  ;;  %v1953_v12 = vpop.xlane.xlu1 %1952  ;;  %2079 = vmin.xlane.f32.xlu0 %v13759_v43  ;;  %9534 = vmatprep.mubr.msk.f32.mxu1 %vm13741_vm8, %v18411_v40 }
 0x6ca   : > { %vm1979_vm12 = vcmp.eq.f32.partialorder %v11703_v39, %v1953_v12  ;;  %v1955_v31 = vpop.xlane.xlu0 %1954  ;;  %9614 = vmatprep.subr.mxu1 %v11514_v13 }
 0x6cb   : > { %vm13770_vm6 = vmand %vm18676_vm7, %vm1979_vm12  ;;  %vm1980_vm9 = vcmp.eq.f32.partialorder %v11703_v39, %v1955_v31  ;;  %9615 = vmatpush3.msra.mxu1 %v11514_v13  ;;  %vm18684_vm12 = vcmp.le.f32.partialorder %v13350_v26, %v13557_v51  ;;  %v18685_v31 = vmov 0 }
 0x6cc   : > { %v18678_v16 = vsel %vm13770_vm6, 4294967295, %v18677_v16  ;;  %vm13779_vm8 = vmand %vm18680_vm13, %vm1980_vm9  ;;  %9616 = vmatprep.subr.mxu1 %v11521_v19  ;;  %9535 = vmatmul.mubr.msk.f32.gmra.mxu1 %vm13770_vm6, %v18411_v40  ;;  %v13790_v6 = vsel %vm13770_vm6, 1e+30, %v13312_v3  ;;  %vm18688_vm6 = vcmp.le.f32.partialorder %v13357_v1, %v13561_v8 }
 0x6cd   : > { %18679 = vst [vmem:[#allocation152_spill] sm:$0xff] %v18678_v16  ;;  %v18682_v7 = vsel %vm13779_vm8, 4294967295, %v18681_v7  ;;  %9617 = vmatpush3.msra.mxu1 %v11521_v19  ;;  %2081 = vmin.xlane.f32.xlu1 %v13790_v6  ;;  %v13797_v58 = vsel %vm13779_vm8, 1e+30, %v13319_v60  ;;  %v18689_v60 = vmov 0 }
 0x6ce   : > { %18683 = vst [vmem:[#allocation153_spill] sm:$0xff] %v18682_v7  ;;  %v1957_v12 = vpop.xlane.xlu1 %1956  ;;  %2083 = vmin.xlane.f32.xlu0 %v13797_v58  ;;  %9537 = vmatprep.mubr.msk.f32.mxu1 %vm13779_vm8, %v18411_v40 }
 0x6cf   : > { %vm1981_vm13 = vcmp.eq.f32.partialorder %v11703_v39, %v1957_v12  ;;  %v1959_v3 = vpop.xlane.xlu0 %1958  ;;  %9618 = vmatprep.subr.mxu1 %v11528_v36 }
 0x6d0   : > { %vm13808_vm7 = vmand %vm18684_vm12, %vm1981_vm13  ;;  %vm1982_vm9 = vcmp.eq.f32.partialorder %v11703_v39, %v1959_v3  ;;  %9619 = vmatpush3.msra.mxu1 %v11528_v36  ;;  %vm18692_vm13 = vcmp.le.f32.partialorder %v13388_v15, %v13573_v10  ;;  %v18693_v3 = vmov 0 }
 0x6d1   : > { %v18686_v31 = vsel %vm13808_vm7, 4294967295, %v18685_v31  ;;  %vm13817_vm8 = vmand %vm18688_vm6, %vm1982_vm9  ;;  %9620 = vmatprep.subr.mxu1 %v11536_v32  ;;  %9538 = vmatmul.mubr.msk.f32.gmra.mxu1 %vm13808_vm7, %v18411_v40  ;;  %v13828_v51 = vsel %vm13808_vm7, 1e+30, %v13350_v26  ;;  %vm18696_vm7 = vcmp.le.f32.partialorder %v13395_v14, %v13577_v62 }
 0x6d2   : > { %18687 = vst [vmem:[#allocation154_spill] sm:$0xff] %v18686_v31  ;;  %v18690_v60 = vsel %vm13817_vm8, 4294967295, %v18689_v60  ;;  %9621 = vmatpush3.msra.mxu1 %v11536_v32  ;;  %2085 = vmin.xlane.f32.xlu1 %v13828_v51  ;;  %v13835_v8 = vsel %vm13817_vm8, 1e+30, %v13357_v1  ;;  %v18697_v1 = vmov 0 }
 0x6d3   : > { %18691 = vst [vmem:[#allocation155_spill] sm:$0xff] %v18690_v60  ;;  %v1961_v12 = vpop.xlane.xlu1 %1960  ;;  %2087 = vmin.xlane.f32.xlu0 %v13835_v8  ;;  %9540 = vmatprep.mubr.msk.f32.mxu1 %vm13817_vm8, %v18411_v40 }
 0x6d4   : > { %vm1983_vm6 = vcmp.eq.f32.partialorder %v11703_v39, %v1961_v12  ;;  %v1963_v26 = vpop.xlane.xlu0 %1962  ;;  %9622 = vmatprep.subr.mxu1 %v11544_v11 }
 0x6d5   : > { %vm13846_vm12 = vmand %vm18692_vm13, %vm1983_vm6  ;;  %vm1984_vm9 = vcmp.eq.f32.partialorder %v11703_v39, %v1963_v26  ;;  %9623 = vmatpush3.msra.mxu1 %v11544_v11  ;;  %vm18700_vm6 = vcmp.le.f32.partialorder %v13426_v18, %v13589_v4  ;;  %v18701_v26 = vmov 0 }
 0x6d6   : > { %v18694_v3 = vsel %vm13846_vm12, 4294967295, %v18693_v3  ;;  %vm13855_vm8 = vmand %vm18696_vm7, %vm1984_vm9  ;;  %9624 = vmatprep.subr.mxu1 %v11552_v29  ;;  %9541 = vmatmul.mubr.msk.f32.gmra.mxu1 %vm13846_vm12, %v18411_v40  ;;  %v13866_v10 = vsel %vm13846_vm12, 1e+30, %v13388_v15  ;;  %vm18704_vm12 = vcmp.le.f32.partialorder %v13433_v24, %v13593_v33 }
 0x6d7   : > { %18695 = vst [vmem:[#allocation156_spill] sm:$0xff] %v18694_v3  ;;  %v18698_v1 = vsel %vm13855_vm8, 4294967295, %v18697_v1  ;;  %9625 = vmatpush3.msra.mxu1 %v11552_v29  ;;  %2089 = vmin.xlane.f32.xlu1 %v13866_v10  ;;  %v13873_v62 = vsel %vm13855_vm8, 1e+30, %v13395_v14  ;;  %v18705_v14 = vmov 0 }
 0x6d8   : > { %18699 = vst [vmem:[#allocation157_spill] sm:$0xff] %v18698_v1  ;;  %v1965_v12 = vpop.xlane.xlu1 %1964  ;;  %2091 = vmin.xlane.f32.xlu0 %v13873_v62  ;;  %9543 = vmatprep.mubr.msk.f32.mxu1 %vm13855_vm8, %v18411_v40 }
 0x6d9   : > { %vm1985_vm7 = vcmp.eq.f32.partialorder %v11703_v39, %v1965_v12  ;;  %v1967_v15 = vpop.xlane.xlu0 %1966  ;;  %9626 = vmatprep.subr.mxu1 %v11560_v21 }
 0x6da   : > { %vm13884_vm13 = vmand %vm18700_vm6, %vm1985_vm7  ;;  %vm1986_vm9 = vcmp.eq.f32.partialorder %v11703_v39, %v1967_v15  ;;  %9627 = vmatpush3.msra.mxu1 %v11560_v21  ;;  %vm18708_vm7 = vcmp.le.f32.partialorder %v13464_v9, %v13605_v61  ;;  %v18709_v15 = vmov 0 }
 0x6db   : > { %v18702_v26 = vsel %vm13884_vm13, 4294967295, %v18701_v26  ;;  %vm13893_vm8 = vmand %vm18704_vm12, %vm1986_vm9  ;;  %9628 = vmatprep.subr.mxu1 %v11572_v2  ;;  %9544 = vmatmul.mubr.msk.f32.gmra.mxu1 %vm13884_vm13, %v18411_v40  ;;  %v13904_v4 = vsel %vm13884_vm13, 1e+30, %v13426_v18  ;;  %vm18712_vm13 = vcmp.le.f32.partialorder %v13471_v37, %v13609_v38 }
 0x6dc   : > { %18703 = vst [vmem:[#allocation158_spill] sm:$0xff] %v18702_v26  ;;  %v18706_v14 = vsel %vm13893_vm8, 4294967295, %v18705_v14  ;;  %9629 = vmatpush3.msra.mxu1 %v11572_v2  ;;  %2093 = vmin.xlane.f32.xlu1 %v13904_v4  ;;  %v13911_v33 = vsel %vm13893_vm8, 1e+30, %v13433_v24  ;;  %v18713_v24 = vmov 0 }
 0x6dd   : > { %18707 = vst [vmem:[#allocation159_spill] sm:$0xff] %v18706_v14  ;;  %v1969_v12 = vpop.xlane.xlu1 %1968  ;;  %2095 = vmin.xlane.f32.xlu0 %v13911_v33  ;;  %9546 = vmatprep.mubr.msk.f32.mxu1 %vm13893_vm8, %v18411_v40 }
 0x6de   : > { %vm1987_vm12 = vcmp.eq.f32.partialorder %v11703_v39, %v1969_v12  ;;  %v1971_v18 = vpop.xlane.xlu0 %1970  ;;  %9630 = vmatprep.subr.mxu1 %v11588_v25 }
 0x6df   : > { %vm13922_vm6 = vmand %vm18708_vm7, %vm1987_vm12  ;;  %vm1988_vm9 = vcmp.eq.f32.partialorder %v11703_v39, %v1971_v18  ;;  %9631 = vmatpush3.msra.mxu1 %v11588_v25  ;;  %v18718_v18 = vmov 0 }
 0x6e0   : > { %v18710_v15 = vsel %vm13922_vm6, 4294967295, %v18709_v15  ;;  %vm13931_vm8 = vmand %vm18712_vm13, %vm1988_vm9  ;;  %9632 = vmatprep.subr.mxu1 %v18629_v52  ;;  %9547 = vmatmul.mubr.msk.f32.gmra.mxu1 %vm13922_vm6, %v18411_v40  ;;  %v13942_v61 = vsel %vm13922_vm6, 1e+30, %v13464_v9  ;;  %v18716_v9 = vld [vmem:[#allocation90_spill] sm:$0xff] }
 0x6e1   : > { %18711 = vst [vmem:[#allocation160_spill] sm:$0xff] %v18710_v15  ;;  %v18714_v24 = vsel %vm13931_vm8, 4294967295, %v18713_v24  ;;  %9633 = vmatpush3.msra.mxu1 %v18629_v52  ;;  %2097 = vmin.xlane.f32.xlu1 %v13942_v61  ;;  %v13949_v38 = vsel %vm13931_vm8, 1e+30, %v13471_v37  ;;  %vm18717_vm12 = vcmp.le.f32.partialorder %v13494_v20, %v18716_v9  ;;  %v18721_v37 = vld [vmem:[#allocation39_spill] sm:$0xff]  ;;  %v18723_v9 = vld [vmem:[#allocation40_spill] sm:$0xff] }
 0x6e2   : > { %18715 = vst [vmem:[#allocation161_spill] sm:$0xff] %v18714_v24  ;;  %v1973_v12 = vpop.xlane.xlu1 %1972  ;;  %2099 = vmin.xlane.f32.xlu0 %v13949_v38  ;;  %9549 = vmatprep.mubr.msk.f32.mxu1 %vm13931_vm8, %v18411_v40 }
 0x6e3   : > { %vm1989_vm13 = vcmp.eq.f32.partialorder %v11703_v39, %v1973_v12  ;;  %9634 = vmatprep.subr.mxu1 %v18630_v22 }
 0x6e4   : > { %vm13960_vm7 = vmand %vm18717_vm12, %vm1989_vm13  ;;  %9635 = vmatpush3.msra.mxu1 %v18630_v22 }
 0x6e5   : > { %v18719_v18 = vsel %vm13960_vm7, 4294967295, %v18718_v18  ;;  %9636 = vmatprep.subr.mxu1 %v18721_v37  ;;  %9550 = vmatmul.mubr.msk.f32.gmra.mxu1 %vm13960_vm7, %v18411_v40  ;;  %v13972_v12 = vsel %vm13960_vm7, 1e+30, %v13494_v20 }
 0x6e6   : > { %18720 = vst [vmem:[#allocation90_spill] sm:$0xff] %v18719_v18  ;;  %18722 = vst [vmem:[#allocation162_spill] sm:$0xff] %v13972_v12  ;;  %9637 = vmatpush3.msra.mxu1 %v18721_v37  ;;  %2101 = vmin.xlane.f32.xlu1 %v13972_v12 }
 0x6e7   : > { %9638 = vmatprep.subr.mxu1 %v18723_v9 }
 0x6e8   : > { %9639 = vmatpush3.msra.mxu1 %v18723_v9  ;;  %v18733_v9 = vmax.f32 %v13169_v30, %v18732_v17  ;;  %v18743_v17 = vmov 0 }
 0x748   : > { %v13978_v24 = vpop.xlane.xlu0 %2071 }
 0x749   : > { %vm17958_vm9 = vcmp.le.f32.partialorder %v13689_v44, %v13978_v24 }
 0x74a   : > { %v2119_v18 = vsel %vm17958_vm9, %v11703_v39, 128.0 }
 0x74b   : > { %2135 = vmin.xlane.f32.xlu0 %v2119_v18 }
 0x74c   : > { %v13986_v20 = vpop.xlane.xlu0 %2075 }
 0x74d   : > { %v13988_v15 = vpop.xlane.xlu1 %2073  ;;  %vm17963_vm13 = vcmp.le.f32.partialorder %v13711_v50, %v13986_v20 }
 0x74e   : > { %vm17964_vm12 = vcmp.le.f32.partialorder %v13719_v57, %v13988_v15  ;;  %v2121_v14 = vsel %vm17963_vm13, %v11703_v39, 128.0  ;;  %vm18746_vm6 = vcmp.le.f32.partialorder %v13719_v57, %v13988_v15 }
 0x74f   : > { %v2120_v18 = vsel %vm17964_vm12, %v11703_v39, 128.0  ;;  %2139 = vmin.xlane.f32.xlu0 %v2121_v14 }
 0x750   : > { %2137 = vmin.xlane.f32.xlu1 %v2120_v18 }
 0x751   : > { %v14002_v26 = vpop.xlane.xlu1 %2077 }
 0x752   : > { %vm17969_vm9 = vcmp.le.f32.partialorder %v13752_v28, %v14002_v26  ;;  %v14006_v1 = vpop.xlane.xlu0 %2079 }
 0x753   : > { %v2122_v3 = vsel %vm17969_vm9, %v11703_v39, 128.0  ;;  %vm17970_vm13 = vcmp.le.f32.partialorder %v13759_v43, %v14006_v1 }
 0x754   : > { %v2123_v14 = vsel %vm17970_vm13, %v11703_v39, 128.0  ;;  %2141 = vmin.xlane.f32.xlu1 %v2122_v3 }
 0x755   : > { %2143 = vmin.xlane.f32.xlu0 %v2123_v14 }
 0x756   : > { %v14018_v18 = vpop.xlane.xlu1 %2081 }
 0x757   : > { %vm17975_vm12 = vcmp.le.f32.partialorder %v13790_v6, %v14018_v18  ;;  %v14022_v60 = vpop.xlane.xlu0 %2083 }
 0x758   : > { %v2124_v31 = vsel %vm17975_vm12, %v11703_v39, 128.0  ;;  %vm17976_vm9 = vcmp.le.f32.partialorder %v13797_v58, %v14022_v60 }
 0x759   : > { %v2125_v3 = vsel %vm17976_vm9, %v11703_v39, 128.0  ;;  %2145 = vmin.xlane.f32.xlu1 %v2124_v31 }
 0x75a   : > { %2147 = vmin.xlane.f32.xlu0 %v2125_v3 }
 0x75b   : > { %v14034_v14 = vpop.xlane.xlu1 %2085 }
 0x75c   : > { %vm17981_vm13 = vcmp.le.f32.partialorder %v13828_v51, %v14034_v14  ;;  %v14038_v7 = vpop.xlane.xlu0 %2087 }
 0x75d   : > { %v2126_v16 = vsel %vm17981_vm13, %v11703_v39, 128.0  ;;  %vm17982_vm12 = vcmp.le.f32.partialorder %v13835_v8, %v14038_v7 }
 0x75e   : > { %v2127_v31 = vsel %vm17982_vm12, %v11703_v39, 128.0  ;;  %2149 = vmin.xlane.f32.xlu1 %v2126_v16 }
 0x75f   : > { %2151 = vmin.xlane.f32.xlu0 %v2127_v31 }
 0x760   : > { %v14050_v3 = vpop.xlane.xlu1 %2089 }
 0x761   : > { %vm17987_vm9 = vcmp.le.f32.partialorder %v13866_v10, %v14050_v3  ;;  %v14054_v27 = vpop.xlane.xlu0 %2091 }
 0x762   : > { %v2128_v0 = vsel %vm17987_vm9, %v11703_v39, 128.0  ;;  %vm17988_vm13 = vcmp.le.f32.partialorder %v13873_v62, %v14054_v27 }
 0x763   : > { %v2129_v16 = vsel %vm17988_vm13, %v11703_v39, 128.0  ;;  %2153 = vmin.xlane.f32.xlu1 %v2128_v0 }
 0x764   : > { %2155 = vmin.xlane.f32.xlu0 %v2129_v16 }
 0x765   : > { %v14066_v31 = vpop.xlane.xlu1 %2093 }
 0x766   : > { %vm17992_vm12 = vcmp.le.f32.partialorder %v13904_v4, %v14066_v31  ;;  %v14070_v49 = vpop.xlane.xlu0 %2095 }
 0x767   : > { %v2130_v55 = vsel %vm17992_vm12, %v11703_v39, 128.0  ;;  %vm17993_vm9 = vcmp.le.f32.partialorder %v13911_v33, %v14070_v49 }
 0x768   : > { %v2131_v0 = vsel %vm17993_vm9, %v11703_v39, 128.0  ;;  %2157 = vmin.xlane.f32.xlu1 %v2130_v55 }
 0x769   : > { %2159 = vmin.xlane.f32.xlu0 %v2131_v0 }
 0x76a   : > { %v14082_v16 = vpop.xlane.xlu1 %2097 }
 0x76b   : > { %vm18007_vm13 = vcmp.le.f32.partialorder %v13942_v61, %v14082_v16  ;;  %v14086_v56 = vpop.xlane.xlu0 %2099 }
 0x76c   : > { %v2132_v45 = vsel %vm18007_vm13, %v11703_v39, 128.0  ;;  %vm18006_vm12 = vcmp.le.f32.partialorder %v13949_v38, %v14086_v56 }
 0x76d   : > { %v2133_v55 = vsel %vm18006_vm12, %v11703_v39, 128.0  ;;  %2161 = vmin.xlane.f32.xlu1 %v2132_v45  ;;  %v18728_v45 = vld [vmem:[#allocation134_spill] sm:$0xff]  ;;  %vm18738_vm12 = vcmp.le.f32.partialorder %v13689_v44, %v13978_v24  ;;  %v18759_v24 = vmov 0 }
 0x76e   : > { %2163 = vmin.xlane.f32.xlu0 %v2133_v55  ;;  %v18729_v55 = vmax.f32 %v13162_v35, %v18728_v45  ;;  %v18739_v35 = vmov 0  ;;  %v18775_v45 = vmov 0 }
 0x76f   : > { %v14098_v0 = vpop.xlane.xlu1 %2101 }
 0x770   : > { %18724 = vst [vmem:[#allocation163_spill] sm:$0xff] %v14098_v0  ;;  %vm18005_vm9 = vcmp.le.f32.partialorder %v13972_v12, %v14098_v0 }
 0x771   : > { %v2134_v42 = vsel %vm18005_vm9, %v11703_v39, 128.0 }
 0x772   : > { %2165 = vmin.xlane.f32.xlu1 %v2134_v42 }
 0x783   : > { %v9530_v41 = vpop.f32.mrf.mxu1 }
 0x784   : > { %v14115_v48 = vmax.f32 %v18729_v55, %v9530_v41 }
 0x785   : > { %v14117_v59 = vpop.f32.mrf.mxu1 }
 0x786   : > { %18730 = vst [vmem:[#allocation134_spill] sm:$0xff] %v14115_v48  ;;  %18731 = vst [vmem:[#allocation167_spill] sm:$0xff] %v14117_v59  ;;  %v18956_v48 = vld [vmem:[#allocation166_spill] sm:$0xff] }
 0x787   : > { %v9533_v46 = vpop.f32.mrf.mxu1  ;;  %v18958_v59 = vld [vmem:[#allocation102_spill] sm:$0xff] }
 0x788   : > { %v14122_v37 = vmax.f32 %v18733_v9, %v9533_v46 }
 0x789   : > { %v14124_v42 = vpop.f32.mrf.mxu1 }
 0x78a   : > { %18734 = vst [vmem:[#allocation136_spill] sm:$0xff] %v14122_v37  ;;  %18735 = vst [vmem:[#allocation168_spill] sm:$0xff] %v14124_v42  ;;  %v18959_v37 = vld [vmem:[#allocation164_spill] sm:$0xff] }
 0x78c   : > { %v9536_v23 = vpop.f32.mrf.mxu1 }
 0x78d   : > { %v14129_v0 = vmax.f32 %v18737_v63, %v9536_v23  ;;  %v18747_v23 = vmov 0 }
 0x7d4   : > { %v2136_v12 = vpop.xlane.xlu0 %2135 }
 0x7d5   : > { %vm2167_vm9 = vcmp.eq.f32.partialorder %v11703_v39, %v2136_v12 }
 0x7d6   : > { %vm14135_vm13 = vmand %vm18738_vm12, %vm2167_vm9  ;;  %vm18742_vm12 = vcmp.le.f32.partialorder %v13711_v50, %v13986_v20  ;;  %v18767_v20 = vmov 0 }
 0x7d7   : > { %v18740_v35 = vsel %vm14135_vm13, 4294967295, %v18739_v35  ;;  %9584 = vmatprep.mubr.msk.f32.mxu0 %vm14135_vm13, %v18411_v40  ;;  %v14145_v5 = vsel %vm14135_vm13, 1e+30, %v13689_v44 }
 0x7d8   : > { %18741 = vst [vmem:[#allocation138_spill] sm:$0xff] %v18740_v35  ;;  %2264 = vmin.xlane.f32.xlu0 %v14145_v5  ;;  %v2140_v30 = vpop.xlane.xlu0 %2139 }
 0x7d9   : > { %v2138_v54 = vpop.xlane.xlu1 %2137  ;;  %vm2169_vm7 = vcmp.eq.f32.partialorder %v11703_v39, %v2140_v30  ;;  %v18783_v30 = vmov 0 }
 0x7da   : > { %vm2168_vm9 = vcmp.eq.f32.partialorder %v11703_v39, %v2138_v54  ;;  %vm14153_vm8 = vmand %vm18742_vm12, %vm2169_vm7  ;;  %vm18750_vm7 = vcmp.le.f32.partialorder %v13752_v28, %v14002_v26 }
 0x7db   : > { %v18744_v17 = vsel %vm14153_vm8, 4294967295, %v18743_v17  ;;  %vm14160_vm1 = vmand %vm18746_vm6, %vm2168_vm9  ;;  %v14167_v44 = vsel %vm14153_vm8, 1e+30, %v13711_v50  ;;  %v18751_v50 = vmov 0 }
 0x7dc   : > { %18745 = vst [vmem:[#allocation169_spill] sm:$0xff] %v18744_v17  ;;  %v18748_v23 = vsel %vm14160_vm1, 4294967295, %v18747_v23  ;;  %9585 = vmatmul.mubr.msk.f32.vlgmr.msra.gmra.mxu0 %vm14160_vm1, %v18411_v40  ;;  %v14175_v63 = vsel %vm14160_vm1, 1e+30, %v13719_v57  ;;  %2268 = vmin.xlane.f32.xlu0 %v14167_v44  ;;  %vm18754_vm1 = vcmp.le.f32.partialorder %v13759_v43, %v14006_v1  ;;  %v18755_v57 = vmov 0 }
 0x7dd   : > { %18749 = vst [vmem:[#allocation170_spill] sm:$0xff] %v18748_v23  ;;  %9665 = vmatpush3.msra.mxu0 %v11488_v34  ;;  %2266 = vmin.xlane.f32.xlu1 %v14175_v63  ;;  %v2142_v41 = vpop.xlane.xlu1 %2141 }
 0x7de   : > { %vm2170_vm6 = vcmp.eq.f32.partialorder %v11703_v39, %v2142_v41  ;;  %v2144_v46 = vpop.xlane.xlu0 %2143  ;;  %9587 = vmatprep.mubr.msk.f32.mxu0 %vm14153_vm8, %v18411_v40  ;;  %9666 = vmatprep.subr.mxu0 %v11495_v47  ;;  %v18791_v41 = vmov 0 }
 0x7df   : > { %vm14188_vm9 = vmand %vm18750_vm7, %vm2170_vm6  ;;  %vm2171_vm12 = vcmp.eq.f32.partialorder %v11703_v39, %v2144_v46  ;;  %9667 = vmatpush3.msra.mxu0 %v11495_v47  ;;  %vm18758_vm6 = vcmp.le.f32.partialorder %v13790_v6, %v14018_v18 }
 0x7e0   : > { %v18752_v50 = vsel %vm14188_vm9, 4294967295, %v18751_v50  ;;  %vm14197_vm13 = vmand %vm18754_vm1, %vm2171_vm12  ;;  %9668 = vmatprep.subr.mxu0 %v11506_v53  ;;  %9588 = vmatmul.mubr.msk.f32.gmra.mxu0 %vm14188_vm9, %v18411_v40  ;;  %v14208_v26 = vsel %vm14188_vm9, 1e+30, %v13752_v28  ;;  %vm18762_vm9 = vcmp.le.f32.partialorder %v13797_v58, %v14022_v60 }
 0x7e1   : > { %18753 = vst [vmem:[#allocation171_spill] sm:$0xff] %v18752_v50  ;;  %v18756_v57 = vsel %vm14197_vm13, 4294967295, %v18755_v57  ;;  %9669 = vmatpush3.msra.mxu0 %v11506_v53  ;;  %2270 = vmin.xlane.f32.xlu1 %v14208_v26  ;;  %v14215_v1 = vsel %vm14197_vm13, 1e+30, %v13759_v43  ;;  %v18763_v43 = vmov 0  ;;  %v18952_v50 = vld [vmem:[#allocation103_spill] sm:$0xff] }
 0x7e2   : > { %18757 = vst [vmem:[#allocation172_spill] sm:$0xff] %v18756_v57  ;;  %v2146_v15 = vpop.xlane.xlu1 %2145  ;;  %2272 = vmin.xlane.f32.xlu0 %v14215_v1  ;;  %9590 = vmatprep.mubr.msk.f32.mxu0 %vm14197_vm13, %v18411_v40  ;;  %v18951_v57 = vld [vmem:[#allocation132_spill] sm:$0xff] }
 0x7e3   : > { %vm2172_vm1 = vcmp.eq.f32.partialorder %v11703_v39, %v2146_v15  ;;  %v2148_v28 = vpop.xlane.xlu0 %2147  ;;  %9670 = vmatprep.subr.mxu0 %v11514_v13  ;;  %v18799_v15 = vld [vmem:[#allocation163_spill] sm:$0xff]  ;;  %v2971_v17 = vmax.f32 %v18952_v50, %v18951_v57 }
 0x7e4   : > { %vm14226_vm7 = vmand %vm18758_vm6, %vm2172_vm1  ;;  %vm2173_vm12 = vcmp.eq.f32.partialorder %v11703_v39, %v2148_v28  ;;  %9671 = vmatpush3.msra.mxu0 %v11514_v13  ;;  %vm18766_vm1 = vcmp.le.f32.partialorder %v13828_v51, %v14034_v14  ;;  %v18801_v28 = vmov 0 }
 0x7e5   : > { %v18760_v24 = vsel %vm14226_vm7, 4294967295, %v18759_v24  ;;  %vm14235_vm13 = vmand %vm18762_vm9, %vm2173_vm12  ;;  %9672 = vmatprep.subr.mxu0 %v11521_v19  ;;  %9591 = vmatmul.mubr.msk.f32.gmra.mxu0 %vm14226_vm7, %v18411_v40  ;;  %v14246_v12 = vsel %vm14226_vm7, 1e+30, %v13790_v6  ;;  %vm18770_vm7 = vcmp.le.f32.partialorder %v13835_v8, %v14038_v7 }
 0x7e6   : > { %18761 = vst [vmem:[#allocation173_spill] sm:$0xff] %v18760_v24  ;;  %v18764_v43 = vsel %vm14235_vm13, 4294967295, %v18763_v43  ;;  %9673 = vmatpush3.msra.mxu0 %v11521_v19  ;;  %2274 = vmin.xlane.f32.xlu1 %v14246_v12  ;;  %v14253_v60 = vsel %vm14235_vm13, 1e+30, %v13797_v58  ;;  %v18771_v58 = vmov 0 }
 0x7e7   : > { %18765 = vst [vmem:[#allocation174_spill] sm:$0xff] %v18764_v43  ;;  %v2150_v9 = vpop.xlane.xlu1 %2149  ;;  %2276 = vmin.xlane.f32.xlu0 %v14253_v60  ;;  %9593 = vmatprep.mubr.msk.f32.mxu0 %vm14235_vm13, %v18411_v40 }
 0x7e8   : > { %vm2174_vm9 = vcmp.eq.f32.partialorder %v11703_v39, %v2150_v9  ;;  %v2152_v6 = vpop.xlane.xlu0 %2151  ;;  %9674 = vmatprep.subr.mxu0 %v11528_v36 }
 0x7e9   : > { %vm14264_vm6 = vmand %vm18766_vm1, %vm2174_vm9  ;;  %vm2175_vm12 = vcmp.eq.f32.partialorder %v11703_v39, %v2152_v6  ;;  %9675 = vmatpush3.msra.mxu0 %v11528_v36  ;;  %vm18774_vm9 = vcmp.le.f32.partialorder %v13866_v10, %v14050_v3  ;;  %v18805_v6 = vld [vmem:[#allocation40_spill] sm:$0xff] }
 0x7ea   : > { %v18768_v20 = vsel %vm14264_vm6, 4294967295, %v18767_v20  ;;  %vm14273_vm13 = vmand %vm18770_vm7, %vm2175_vm12  ;;  %9676 = vmatprep.subr.mxu0 %v11536_v32  ;;  %9594 = vmatmul.mubr.msk.f32.gmra.mxu0 %vm14264_vm6, %v18411_v40  ;;  %v14284_v18 = vsel %vm14264_vm6, 1e+30, %v13828_v51  ;;  %vm18778_vm6 = vcmp.le.f32.partialorder %v13873_v62, %v14054_v27 }
 0x7eb   : > { %18769 = vst [vmem:[#allocation175_spill] sm:$0xff] %v18768_v20  ;;  %v18772_v58 = vsel %vm14273_vm13, 4294967295, %v18771_v58  ;;  %9677 = vmatpush3.msra.mxu0 %v11536_v32  ;;  %2278 = vmin.xlane.f32.xlu1 %v14284_v18  ;;  %v14291_v7 = vsel %vm14273_vm13, 1e+30, %v13835_v8  ;;  %v18779_v8 = vmov 0 }
 0x7ec   : > { %18773 = vst [vmem:[#allocation176_spill] sm:$0xff] %v18772_v58  ;;  %v2154_v14 = vpop.xlane.xlu1 %2153  ;;  %2280 = vmin.xlane.f32.xlu0 %v14291_v7  ;;  %9596 = vmatprep.mubr.msk.f32.mxu0 %vm14273_vm13, %v18411_v40 }
 0x7ed   : > { %vm2176_vm7 = vcmp.eq.f32.partialorder %v11703_v39, %v2154_v14  ;;  %v2156_v51 = vpop.xlane.xlu0 %2155  ;;  %9678 = vmatprep.subr.mxu0 %v11544_v11 }
 0x7ee   : > { %vm14302_vm1 = vmand %vm18774_vm9, %vm2176_vm7  ;;  %vm2177_vm12 = vcmp.eq.f32.partialorder %v11703_v39, %v2156_v51  ;;  %9679 = vmatpush3.msra.mxu0 %v11544_v11  ;;  %vm18782_vm7 = vcmp.le.f32.partialorder %v13904_v4, %v14066_v31 }
 0x7ef   : > { %v18776_v45 = vsel %vm14302_vm1, 4294967295, %v18775_v45  ;;  %vm14311_vm13 = vmand %vm18778_vm6, %vm2177_vm12  ;;  %9680 = vmatprep.subr.mxu0 %v11552_v29  ;;  %9597 = vmatmul.mubr.msk.f32.gmra.mxu0 %vm14302_vm1, %v18411_v40  ;;  %v14322_v3 = vsel %vm14302_vm1, 1e+30, %v13866_v10  ;;  %vm18786_vm1 = vcmp.le.f32.partialorder %v13911_v33, %v14070_v49 }
 0x7f0   : > { %18777 = vst [vmem:[#allocation177_spill] sm:$0xff] %v18776_v45  ;;  %v18780_v8 = vsel %vm14311_vm13, 4294967295, %v18779_v8  ;;  %9681 = vmatpush3.msra.mxu0 %v11552_v29  ;;  %2282 = vmin.xlane.f32.xlu1 %v14322_v3  ;;  %v14329_v27 = vsel %vm14311_vm13, 1e+30, %v13873_v62  ;;  %v18787_v62 = vmov 0 }
 0x7f1   : > { %18781 = vst [vmem:[#allocation178_spill] sm:$0xff] %v18780_v8  ;;  %v2158_v55 = vpop.xlane.xlu1 %2157  ;;  %2284 = vmin.xlane.f32.xlu0 %v14329_v27  ;;  %9599 = vmatprep.mubr.msk.f32.mxu0 %vm14311_vm13, %v18411_v40 }
 0x7f2   : > { %vm2178_vm6 = vcmp.eq.f32.partialorder %v11703_v39, %v2158_v55  ;;  %v2160_v10 = vpop.xlane.xlu0 %2159  ;;  %9682 = vmatprep.subr.mxu0 %v11560_v21 }
 0x7f3   : > { %vm14340_vm9 = vmand %vm18782_vm7, %vm2178_vm6  ;;  %vm2179_vm12 = vcmp.eq.f32.partialorder %v11703_v39, %v2160_v10  ;;  %9683 = vmatpush3.msra.mxu0 %v11560_v21  ;;  %vm18790_vm6 = vcmp.le.f32.partialorder %v13942_v61, %v14082_v16 }
 0x7f4   : > { %v18784_v30 = vsel %vm14340_vm9, 4294967295, %v18783_v30  ;;  %vm14349_vm13 = vmand %vm18786_vm1, %vm2179_vm12  ;;  %9684 = vmatprep.subr.mxu0 %v11572_v2  ;;  %9600 = vmatmul.mubr.msk.f32.gmra.mxu0 %vm14340_vm9, %v18411_v40  ;;  %v14360_v31 = vsel %vm14340_vm9, 1e+30, %v13904_v4  ;;  %vm18794_vm9 = vcmp.le.f32.partialorder %v13949_v38, %v14086_v56 }
 0x7f5   : > { %18785 = vst [vmem:[#allocation179_spill] sm:$0xff] %v18784_v30  ;;  %v18788_v62 = vsel %vm14349_vm13, 4294967295, %v18787_v62  ;;  %9685 = vmatpush3.msra.mxu0 %v11572_v2  ;;  %2286 = vmin.xlane.f32.xlu1 %v14360_v31  ;;  %v14367_v49 = vsel %vm14349_vm13, 1e+30, %v13911_v33  ;;  %v18795_v33 = vmov 0  ;;  %v14562_v2 = vpop.f32.mrf.mxu0 }
 0x7f6   : > { %18789 = vst [vmem:[#allocation180_spill] sm:$0xff] %v18788_v62  ;;  %v2162_v54 = vpop.xlane.xlu1 %2161  ;;  %2288 = vmin.xlane.f32.xlu0 %v14367_v49  ;;  %9602 = vmatprep.mubr.msk.f32.mxu0 %vm14349_vm13, %v18411_v40 }
 0x7f7   : > { %vm2180_vm1 = vcmp.eq.f32.partialorder %v11703_v39, %v2162_v54  ;;  %v2164_v4 = vpop.xlane.xlu0 %2163  ;;  %9686 = vmatprep.subr.mxu0 %v11588_v25 }
 0x7f8   : > { %vm14378_vm7 = vmand %vm18790_vm6, %vm2180_vm1  ;;  %vm2181_vm12 = vcmp.eq.f32.partialorder %v11703_v39, %v2164_v4  ;;  %9687 = vmatpush3.msra.mxu0 %v11588_v25  ;;  %v14564_v25 = vpop.f32.mrf.mxu0 }
 0x7f9   : > { %v18792_v41 = vsel %vm14378_vm7, 4294967295, %v18791_v41  ;;  %vm14387_vm13 = vmand %vm18794_vm9, %vm2181_vm12  ;;  %9688 = vmatprep.subr.mxu0 %v18629_v52  ;;  %9603 = vmatmul.mubr.msk.f32.gmra.mxu0 %vm14378_vm7, %v18411_v40  ;;  %v14398_v16 = vsel %vm14378_vm7, 1e+30, %v13942_v61  ;;  %v18798_v61 = vld [vmem:[#allocation162_spill] sm:$0xff] }
 0x7fa   : > { %18793 = vst [vmem:[#allocation181_spill] sm:$0xff] %v18792_v41  ;;  %v18796_v33 = vsel %vm14387_vm13, 4294967295, %v18795_v33  ;;  %9689 = vmatpush3.msra.mxu0 %v18629_v52  ;;  %2290 = vmin.xlane.f32.xlu1 %v14398_v16  ;;  %v14405_v56 = vsel %vm14387_vm13, 1e+30, %v13949_v38  ;;  %vm18800_vm1 = vcmp.le.f32.partialorder %v18798_v61, %v18799_v15  ;;  %v18804_v38 = vld [vmem:[#allocation39_spill] sm:$0xff]  ;;  %v14566_v52 = vpop.f32.mrf.mxu0 }
 0x7fb   : > { %18797 = vst [vmem:[#allocation182_spill] sm:$0xff] %v18796_v33  ;;  %v2166_v46 = vpop.xlane.xlu1 %2165  ;;  %2292 = vmin.xlane.f32.xlu0 %v14405_v56  ;;  %9605 = vmatprep.mubr.msk.f32.mxu0 %vm14387_vm13, %v18411_v40 }
 0x7fc   : > { %vm2182_vm9 = vcmp.eq.f32.partialorder %v11703_v39, %v2166_v46  ;;  %9690 = vmatprep.subr.mxu0 %v18630_v22 }
 0x7fd   : > { %vm14416_vm6 = vmand %vm18800_vm1, %vm2182_vm9  ;;  %9691 = vmatpush3.msra.mxu0 %v18630_v22 }
 0x7fe   : > { %v18802_v28 = vsel %vm14416_vm6, 4294967295, %v18801_v28  ;;  %9692 = vmatprep.subr.mxu0 %v18804_v38  ;;  %9606 = vmatmul.mubr.msk.f32.gmra.mxu0 %vm14416_vm6, %v18411_v40  ;;  %v14428_v9 = vsel %vm14416_vm6, 1e+30, %v18798_v61 }
 0x7ff   : > { %18803 = vst [vmem:[#allocation162_spill] sm:$0xff] %v18802_v28  ;;  %9693 = vmatpush3.msra.mxu0 %v18804_v38  ;;  %2294 = vmin.xlane.f32.xlu1 %v14428_v9 }
 0x800   : > { %9694 = vmatprep.subr.mxu0 %v18805_v6 }
 0x801   : > { %9695 = vmatpush3.msra.mxu0 %v18805_v6 }
 0x861   : > { %v14434_v14 = vpop.xlane.xlu0 %2264 }
 0x862   : > { %vm18040_vm12 = vcmp.le.f32.partialorder %v14145_v5, %v14434_v14 }
 0x863   : > { %v2312_v51 = vsel %vm18040_vm12, %v11703_v39, 128.0 }
 0x864   : > { %2328 = vmin.xlane.f32.xlu0 %v2312_v51 }
 0x865   : > { %v14442_v55 = vpop.xlane.xlu0 %2268 }
 0x866   : > { %v14444_v10 = vpop.xlane.xlu1 %2266  ;;  %vm18041_vm9 = vcmp.le.f32.partialorder %v14167_v44, %v14442_v55 }
 0x867   : > { %vm18042_vm1 = vcmp.le.f32.partialorder %v14175_v63, %v14444_v10  ;;  %v2314_v54 = vsel %vm18041_vm9, %v11703_v39, 128.0  ;;  %vm18818_vm7 = vcmp.le.f32.partialorder %v14175_v63, %v14444_v10 }
 0x868   : > { %v2313_v4 = vsel %vm18042_vm1, %v11703_v39, 128.0  ;;  %2332 = vmin.xlane.f32.xlu0 %v2314_v54 }
 0x869   : > { %2330 = vmin.xlane.f32.xlu1 %v2313_v4 }
 0x86a   : > { %v14458_v46 = vpop.xlane.xlu1 %2270 }
 0x86b   : > { %vm18045_vm12 = vcmp.le.f32.partialorder %v14208_v26, %v14458_v46  ;;  %v14462_v61 = vpop.xlane.xlu0 %2272 }
 0x86c   : > { %v2315_v15 = vsel %vm18045_vm12, %v11703_v39, 128.0  ;;  %vm18046_vm9 = vcmp.le.f32.partialorder %v14215_v1, %v14462_v61 }
 0x86d   : > { %v2316_v51 = vsel %vm18046_vm9, %v11703_v39, 128.0  ;;  %2334 = vmin.xlane.f32.xlu1 %v2315_v15 }
 0x86e   : > { %2336 = vmin.xlane.f32.xlu0 %v2316_v51 }
 0x86f   : > { %v14474_v54 = vpop.xlane.xlu1 %2274 }
 0x870   : > { %vm18051_vm1 = vcmp.le.f32.partialorder %v14246_v12, %v14474_v54  ;;  %v14478_v4 = vpop.xlane.xlu0 %2276 }
 0x871   : > { %v2317_v34 = vsel %vm18051_vm1, %v11703_v39, 128.0  ;;  %vm18052_vm12 = vcmp.le.f32.partialorder %v14253_v60, %v14478_v4 }
 0x872   : > { %v2318_v15 = vsel %vm18052_vm12, %v11703_v39, 128.0  ;;  %2338 = vmin.xlane.f32.xlu1 %v2317_v34 }
 0x873   : > { %2340 = vmin.xlane.f32.xlu0 %v2318_v15 }
 0x874   : > { %v14490_v51 = vpop.xlane.xlu1 %2278 }
 0x875   : > { %vm18057_vm9 = vcmp.le.f32.partialorder %v14284_v18, %v14490_v51  ;;  %v14494_v47 = vpop.xlane.xlu0 %2280 }
 0x876   : > { %v2319_v53 = vsel %vm18057_vm9, %v11703_v39, 128.0  ;;  %vm18058_vm1 = vcmp.le.f32.partialorder %v14291_v7, %v14494_v47 }
 0x877   : > { %v2320_v34 = vsel %vm18058_vm1, %v11703_v39, 128.0  ;;  %2342 = vmin.xlane.f32.xlu1 %v2319_v53 }
 0x878   : > { %2344 = vmin.xlane.f32.xlu0 %v2320_v34 }
 0x879   : > { %v14506_v15 = vpop.xlane.xlu1 %2282 }
 0x87a   : > { %vm18063_vm12 = vcmp.le.f32.partialorder %v14322_v3, %v14506_v15  ;;  %v14510_v13 = vpop.xlane.xlu0 %2284 }
 0x87b   : > { %v2321_v19 = vsel %vm18063_vm12, %v11703_v39, 128.0  ;;  %vm18064_vm9 = vcmp.le.f32.partialorder %v14329_v27, %v14510_v13 }
 0x87c   : > { %v2322_v53 = vsel %vm18064_vm9, %v11703_v39, 128.0  ;;  %2346 = vmin.xlane.f32.xlu1 %v2321_v19 }
 0x87d   : > { %2348 = vmin.xlane.f32.xlu0 %v2322_v53 }
 0x87e   : > { %v14522_v34 = vpop.xlane.xlu1 %2286 }
 0x87f   : > { %vm18069_vm1 = vcmp.le.f32.partialorder %v14360_v31, %v14522_v34  ;;  %v14526_v36 = vpop.xlane.xlu0 %2288 }
 0x880   : > { %v2323_v32 = vsel %vm18069_vm1, %v11703_v39, 128.0  ;;  %vm18070_vm12 = vcmp.le.f32.partialorder %v14367_v49, %v14526_v36 }
 0x881   : > { %v2324_v19 = vsel %vm18070_vm12, %v11703_v39, 128.0  ;;  %2350 = vmin.xlane.f32.xlu1 %v2323_v32 }
 0x882   : > { %2352 = vmin.xlane.f32.xlu0 %v2324_v19 }
 0x883   : > { %v14538_v53 = vpop.xlane.xlu1 %2290 }
 0x884   : > { %vm18089_vm9 = vcmp.le.f32.partialorder %v14398_v16, %v14538_v53  ;;  %v14542_v11 = vpop.xlane.xlu0 %2292 }
 0x885   : > { %v2325_v29 = vsel %vm18089_vm9, %v11703_v39, 128.0  ;;  %vm18088_vm1 = vcmp.le.f32.partialorder %v14405_v56, %v14542_v11 }
 0x886   : > { %v2326_v32 = vsel %vm18088_vm1, %v11703_v39, 128.0  ;;  %2354 = vmin.xlane.f32.xlu1 %v2325_v29  ;;  %vm18810_vm1 = vcmp.le.f32.partialorder %v14145_v5, %v14434_v14  ;;  %v18811_v29 = vmov 0  ;;  %v18815_v14 = vmov 0 }
 0x887   : > { %2356 = vmin.xlane.f32.xlu0 %v2326_v32 }
 0x888   : > { %v14554_v19 = vpop.xlane.xlu1 %2294 }
 0x889   : > { %vm18087_vm12 = vcmp.le.f32.partialorder %v14428_v9, %v14554_v19 }
 0x88a   : > { %v2327_v21 = vsel %vm18087_vm12, %v11703_v39, 128.0 }
 0x88b   : > { %2358 = vmin.xlane.f32.xlu1 %v2327_v21 }
 0x89c   : > { %v14568_v22 = vpop.f32.mrf.mxu0 }
 0x89d   : > { %18806 = vst [vmem:[#allocation163_spill] sm:$0xff] %v14568_v22 }
 0x89e   : > { %v14572_v32 = vpop.f32.mrf.mxu0 }
 0x89f   : > { %18807 = vst [vmem:[#allocation183_spill] sm:$0xff] %v14572_v32 }
 0x8a0   : > { %v14574_v38 = vpop.f32.mrf.mxu0 }
 0x8a1   : > { %18808 = vst [vmem:[#allocation184_spill] sm:$0xff] %v14574_v38 }
 0x8a2   : > { %v14578_v28 = vpop.f32.mrf.mxu0 }
 0x8a3   : > { %18809 = vst [vmem:[#allocation185_spill] sm:$0xff] %v14578_v28 }
 0x8a5   : > { %v14580_v21 = vpop.f32.mrf.mxu0 }
 0x8ed   : > { %v2329_v41 = vpop.xlane.xlu0 %2328 }
 0x8ee   : > { %vm2360_vm12 = vcmp.eq.f32.partialorder %v11703_v39, %v2329_v41 }
 0x8ef   : > { %vm14588_vm9 = vmand %vm18810_vm1, %vm2360_vm12  ;;  %vm18814_vm1 = vcmp.le.f32.partialorder %v14167_v44, %v14442_v55 }
 0x8f0   : > { %v18812_v29 = vsel %vm14588_vm9, 4294967295, %v18811_v29  ;;  %9640 = vmatprep.mubr.msk.f32.mxu1 %vm14588_vm9, %v18411_v40  ;;  %v14598_v6 = vsel %vm14588_vm9, 1e+30, %v14145_v5  ;;  %v18819_v5 = vmov 0 }
 0x8f1   : > { %18813 = vst [vmem:[#allocation186_spill] sm:$0xff] %v18812_v29  ;;  %2457 = vmin.xlane.f32.xlu0 %v14598_v6  ;;  %v2333_v33 = vpop.xlane.xlu0 %2332 }
 0x8f2   : > { %v2331_v41 = vpop.xlane.xlu1 %2330  ;;  %vm2362_vm6 = vcmp.eq.f32.partialorder %v11703_v39, %v2333_v33 }
 0x8f3   : > { %vm2361_vm12 = vcmp.eq.f32.partialorder %v11703_v39, %v2331_v41  ;;  %vm14606_vm13 = vmand %vm18814_vm1, %vm2362_vm6  ;;  %vm18822_vm6 = vcmp.le.f32.partialorder %v14208_v26, %v14458_v46  ;;  %v18823_v41 = vmov 0 }
 0x8f4   : > { %v18816_v14 = vsel %vm14606_vm13, 4294967295, %v18815_v14  ;;  %vm14613_vm9 = vmand %vm18818_vm7, %vm2361_vm12  ;;  %v14620_v33 = vsel %vm14606_vm13, 1e+30, %v14167_v44 }
 0x8f5   : > { %18817 = vst [vmem:[#allocation187_spill] sm:$0xff] %v18816_v14  ;;  %v18820_v5 = vsel %vm14613_vm9, 4294967295, %v18819_v5  ;;  %9641 = vmatmul.mubr.msk.f32.vlgmr.msra.gmra.mxu1 %vm14613_vm9, %v18411_v40  ;;  %v14628_v55 = vsel %vm14613_vm9, 1e+30, %v14175_v63  ;;  %2461 = vmin.xlane.f32.xlu0 %v14620_v33  ;;  %vm18826_vm9 = vcmp.le.f32.partialorder %v14215_v1, %v14462_v61  ;;  %v18827_v63 = vmov 0 }
 0x8f6   : > { %18821 = vst [vmem:[#allocation188_spill] sm:$0xff] %v18820_v5  ;;  %2459 = vmin.xlane.f32.xlu1 %v14628_v55  ;;  %v2335_v10 = vpop.xlane.xlu1 %2334  ;;  %9643 = vmatprep.mubr.msk.f32.mxu1 %vm14606_vm13, %v18411_v40 }
 0x8f7   : > { %vm2363_vm7 = vcmp.eq.f32.partialorder %v11703_v39, %v2335_v10  ;;  %v2337_v44 = vpop.xlane.xlu0 %2336 }
 0x8f8   : > { %vm14639_vm12 = vmand %vm18822_vm6, %vm2363_vm7  ;;  %vm2364_vm1 = vcmp.eq.f32.partialorder %v11703_v39, %v2337_v44  ;;  %vm18830_vm7 = vcmp.le.f32.partialorder %v14246_v12, %v14474_v54 }
 0x8f9   : > { %v18824_v41 = vsel %vm14639_vm12, 4294967295, %v18823_v41  ;;  %vm14647_vm8 = vmand %vm18826_vm9, %vm2364_vm1  ;;  %9644 = vmatmul.mubr.msk.f32.gmra.mxu1 %vm14639_vm12, %v18411_v40  ;;  %v14657_v46 = vsel %vm14639_vm12, 1e+30, %v14208_v26  ;;  %v18831_v26 = vmov 0  ;;  %vm18834_vm12 = vcmp.le.f32.partialorder %v14253_v60, %v14478_v4 }
 0x8fa   : > { %18825 = vst [vmem:[#allocation189_spill] sm:$0xff] %v18824_v41  ;;  %v18828_v63 = vsel %vm14647_vm8, 4294967295, %v18827_v63  ;;  %2463 = vmin.xlane.f32.xlu1 %v14657_v46  ;;  %v14663_v10 = vsel %vm14647_vm8, 1e+30, %v14215_v1  ;;  %9646 = vmatprep.mubr.msk.f32.mxu1 %vm14647_vm8, %v18411_v40  ;;  %v18835_v1 = vmov 0 }
 0x8fb   : > { %18829 = vst [vmem:[#allocation190_spill] sm:$0xff] %v18828_v63  ;;  %v2339_v61 = vpop.xlane.xlu1 %2338  ;;  %2465 = vmin.xlane.f32.xlu0 %v14663_v10 }
 0x8fc   : > { %vm2365_vm9 = vcmp.eq.f32.partialorder %v11703_v39, %v2339_v61  ;;  %v2341_v44 = vpop.xlane.xlu0 %2340 }
 0x8fd   : > { %vm14673_vm6 = vmand %vm18830_vm7, %vm2365_vm9  ;;  %vm2366_vm1 = vcmp.eq.f32.partialorder %v11703_v39, %v2341_v44  ;;  %vm18838_vm9 = vcmp.le.f32.partialorder %v14284_v18, %v14490_v51 }
 0x8fe   : > { %v18832_v26 = vsel %vm14673_vm6, 4294967295, %v18831_v26  ;;  %vm14681_vm13 = vmand %vm18834_vm12, %vm2366_vm1  ;;  %9647 = vmatmul.mubr.msk.f32.gmra.mxu1 %vm14673_vm6, %v18411_v40  ;;  %v14691_v54 = vsel %vm14673_vm6, 1e+30, %v14246_v12  ;;  %v18839_v12 = vmov 0  ;;  %vm18842_vm6 = vcmp.le.f32.partialorder %v14291_v7, %v14494_v47 }
 0x8ff   : > { %18833 = vst [vmem:[#allocation191_spill] sm:$0xff] %v18832_v26  ;;  %v18836_v1 = vsel %vm14681_vm13, 4294967295, %v18835_v1  ;;  %2467 = vmin.xlane.f32.xlu1 %v14691_v54  ;;  %v14697_v61 = vsel %vm14681_vm13, 1e+30, %v14253_v60  ;;  %9649 = vmatprep.mubr.msk.f32.mxu1 %vm14681_vm13, %v18411_v40  ;;  %v18843_v60 = vmov 0 }
 0x900   : > { %18837 = vst [vmem:[#allocation192_spill] sm:$0xff] %v18836_v1  ;;  %v2343_v4 = vpop.xlane.xlu1 %2342  ;;  %2469 = vmin.xlane.f32.xlu0 %v14697_v61 }
 0x901   : > { %vm2367_vm12 = vcmp.eq.f32.partialorder %v11703_v39, %v2343_v4  ;;  %v2345_v44 = vpop.xlane.xlu0 %2344 }
 0x902   : > { %vm14707_vm7 = vmand %vm18838_vm9, %vm2367_vm12  ;;  %vm2368_vm1 = vcmp.eq.f32.partialorder %v11703_v39, %v2345_v44  ;;  %vm18846_vm12 = vcmp.le.f32.partialorder %v14322_v3, %v14506_v15 }
 0x903   : > { %v18840_v12 = vsel %vm14707_vm7, 4294967295, %v18839_v12  ;;  %vm14715_vm8 = vmand %vm18842_vm6, %vm2368_vm1  ;;  %9650 = vmatmul.mubr.msk.f32.gmra.mxu1 %vm14707_vm7, %v18411_v40  ;;  %v14725_v51 = vsel %vm14707_vm7, 1e+30, %v14284_v18  ;;  %v18847_v18 = vmov 0  ;;  %vm18850_vm7 = vcmp.le.f32.partialorder %v14329_v27, %v14510_v13 }
 0x904   : > { %18841 = vst [vmem:[#allocation193_spill] sm:$0xff] %v18840_v12  ;;  %v18844_v60 = vsel %vm14715_vm8, 4294967295, %v18843_v60  ;;  %2471 = vmin.xlane.f32.xlu1 %v14725_v51  ;;  %v14731_v4 = vsel %vm14715_vm8, 1e+30, %v14291_v7  ;;  %9652 = vmatprep.mubr.msk.f32.mxu1 %vm14715_vm8, %v18411_v40  ;;  %v18851_v7 = vmov 0 }
 0x905   : > { %18845 = vst [vmem:[#allocation194_spill] sm:$0xff] %v18844_v60  ;;  %v2347_v47 = vpop.xlane.xlu1 %2346  ;;  %2473 = vmin.xlane.f32.xlu0 %v14731_v4 }
 0x906   : > { %vm2369_vm6 = vcmp.eq.f32.partialorder %v11703_v39, %v2347_v47  ;;  %v2349_v44 = vpop.xlane.xlu0 %2348 }
 0x907   : > { %vm14741_vm9 = vmand %vm18846_vm12, %vm2369_vm6  ;;  %vm2370_vm1 = vcmp.eq.f32.partialorder %v11703_v39, %v2349_v44  ;;  %vm18854_vm6 = vcmp.le.f32.partialorder %v14360_v31, %v14522_v34 }
 0x908   : > { %v18848_v18 = vsel %vm14741_vm9, 4294967295, %v18847_v18  ;;  %vm14749_vm13 = vmand %vm18850_vm7, %vm2370_vm1  ;;  %9653 = vmatmul.mubr.msk.f32.gmra.mxu1 %vm14741_vm9, %v18411_v40  ;;  %v14759_v15 = vsel %vm14741_vm9, 1e+30, %v14322_v3  ;;  %v18855_v3 = vmov 0  ;;  %vm18858_vm9 = vcmp.le.f32.partialorder %v14367_v49, %v14526_v36 }
 0x909   : > { %18849 = vst [vmem:[#allocation195_spill] sm:$0xff] %v18848_v18  ;;  %v18852_v7 = vsel %vm14749_vm13, 4294967295, %v18851_v7  ;;  %2475 = vmin.xlane.f32.xlu1 %v14759_v15  ;;  %v14765_v47 = vsel %vm14749_vm13, 1e+30, %v14329_v27  ;;  %9655 = vmatprep.mubr.msk.f32.mxu1 %vm14749_vm13, %v18411_v40  ;;  %v18859_v27 = vmov 0 }
 0x90a   : > { %18853 = vst [vmem:[#allocation196_spill] sm:$0xff] %v18852_v7  ;;  %v2351_v13 = vpop.xlane.xlu1 %2350  ;;  %2477 = vmin.xlane.f32.xlu0 %v14765_v47 }
 0x90b   : > { %vm2371_vm7 = vcmp.eq.f32.partialorder %v11703_v39, %v2351_v13  ;;  %v2353_v44 = vpop.xlane.xlu0 %2352 }
 0x90c   : > { %vm14775_vm12 = vmand %vm18854_vm6, %vm2371_vm7  ;;  %vm2372_vm1 = vcmp.eq.f32.partialorder %v11703_v39, %v2353_v44  ;;  %vm18862_vm7 = vcmp.le.f32.partialorder %v14398_v16, %v14538_v53 }
 0x90d   : > { %v18856_v3 = vsel %vm14775_vm12, 4294967295, %v18855_v3  ;;  %vm14783_vm8 = vmand %vm18858_vm9, %vm2372_vm1  ;;  %9656 = vmatmul.mubr.msk.f32.gmra.mxu1 %vm14775_vm12, %v18411_v40  ;;  %v14793_v34 = vsel %vm14775_vm12, 1e+30, %v14360_v31  ;;  %v18863_v31 = vmov 0  ;;  %vm18866_vm12 = vcmp.le.f32.partialorder %v14405_v56, %v14542_v11 }
 0x90e   : > { %18857 = vst [vmem:[#allocation197_spill] sm:$0xff] %v18856_v3  ;;  %v18860_v27 = vsel %vm14783_vm8, 4294967295, %v18859_v27  ;;  %2479 = vmin.xlane.f32.xlu1 %v14793_v34  ;;  %v14799_v13 = vsel %vm14783_vm8, 1e+30, %v14367_v49  ;;  %9658 = vmatprep.mubr.msk.f32.mxu1 %vm14783_vm8, %v18411_v40  ;;  %v18867_v49 = vmov 0 }
 0x90f   : > { %18861 = vst [vmem:[#allocation198_spill] sm:$0xff] %v18860_v27  ;;  %v2355_v36 = vpop.xlane.xlu1 %2354  ;;  %2481 = vmin.xlane.f32.xlu0 %v14799_v13 }
 0x910   : > { %vm2373_vm9 = vcmp.eq.f32.partialorder %v11703_v39, %v2355_v36  ;;  %v2357_v44 = vpop.xlane.xlu0 %2356 }
 0x911   : > { %vm14809_vm6 = vmand %vm18862_vm7, %vm2373_vm9  ;;  %vm2374_vm1 = vcmp.eq.f32.partialorder %v11703_v39, %v2357_v44  ;;  %vm18870_vm9 = vcmp.le.f32.partialorder %v14428_v9, %v14554_v19 }
 0x912   : > { %v18864_v31 = vsel %vm14809_vm6, 4294967295, %v18863_v31  ;;  %vm14817_vm13 = vmand %vm18866_vm12, %vm2374_vm1  ;;  %9659 = vmatmul.mubr.msk.f32.gmra.mxu1 %vm14809_vm6, %v18411_v40  ;;  %v14827_v53 = vsel %vm14809_vm6, 1e+30, %v14398_v16  ;;  %v18871_v16 = vmov 0 }
 0x913   : > { %18865 = vst [vmem:[#allocation199_spill] sm:$0xff] %v18864_v31  ;;  %v18868_v49 = vsel %vm14817_vm13, 4294967295, %v18867_v49  ;;  %2483 = vmin.xlane.f32.xlu1 %v14827_v53  ;;  %v14833_v36 = vsel %vm14817_vm13, 1e+30, %v14405_v56  ;;  %9661 = vmatprep.mubr.msk.f32.mxu1 %vm14817_vm13, %v18411_v40 }
 0x914   : > { %18869 = vst [vmem:[#allocation200_spill] sm:$0xff] %v18868_v49  ;;  %v2359_v11 = vpop.xlane.xlu1 %2358  ;;  %2485 = vmin.xlane.f32.xlu0 %v14833_v36 }
 0x915   : > { %vm2375_vm12 = vcmp.eq.f32.partialorder %v11703_v39, %v2359_v11 }
 0x916   : > { %vm14843_vm7 = vmand %vm18870_vm9, %vm2375_vm12 }
 0x917   : > { %v18872_v16 = vsel %vm14843_vm7, 4294967295, %v18871_v16  ;;  %9662 = vmatmul.mubr.msk.f32.gmra.mxu1 %vm14843_vm7, %v18411_v40  ;;  %v14853_v56 = vsel %vm14843_vm7, 1e+30, %v14428_v9 }
 0x918   : > { %18873 = vst [vmem:[#allocation201_spill] sm:$0xff] %v18872_v16  ;;  %2487 = vmin.xlane.f32.xlu1 %v14853_v56  ;;  %9752 = vmatprep.mubr.msk.f32.mxu1 %vm11837_vm14, %v18411_v40 }
 0x97a   : > { %v14859_v19 = vpop.xlane.xlu0 %2457 }
 0x97b   : > { %vm18126_vm1 = vcmp.le.f32.partialorder %v14598_v6, %v14859_v19  ;;  %vm18875_vm14 = vcmp.le.f32.partialorder %v14598_v6, %v14859_v19  ;;  %v18884_v6 = vmov 0 }
 0x97c   : > { %v2505_v11 = vsel %vm18126_vm1, %v11703_v39, 128.0 }
 0x97d   : > { %2521 = vmin.xlane.f32.xlu0 %v2505_v11 }
 0x97e   : > { %v14867_v16 = vpop.xlane.xlu0 %2461 }
 0x97f   : > { %v14869_v9 = vpop.xlane.xlu1 %2459  ;;  %vm18131_vm12 = vcmp.le.f32.partialorder %v14620_v33, %v14867_v16  ;;  %vm18879_vm13 = vcmp.le.f32.partialorder %v14620_v33, %v14867_v16  ;;  %v18888_v33 = vmov 0 }
 0x980   : > { %vm18132_vm9 = vcmp.le.f32.partialorder %v14628_v55, %v14869_v9  ;;  %v2507_v44 = vsel %vm18131_vm12, %v11703_v39, 128.0 }
 0x981   : > { %v2506_v11 = vsel %vm18132_vm9, %v11703_v39, 128.0  ;;  %2525 = vmin.xlane.f32.xlu0 %v2507_v44 }
 0x982   : > { %2523 = vmin.xlane.f32.xlu1 %v2506_v11 }
 0x983   : > { %v14883_v49 = vpop.xlane.xlu1 %2463 }
 0x984   : > { %vm18137_vm1 = vcmp.le.f32.partialorder %v14657_v46, %v14883_v49  ;;  %v14887_v31 = vpop.xlane.xlu0 %2465 }
 0x985   : > { %v2508_v27 = vsel %vm18137_vm1, %v11703_v39, 128.0  ;;  %vm18138_vm12 = vcmp.le.f32.partialorder %v14663_v10, %v14887_v31 }
 0x986   : > { %v2509_v44 = vsel %vm18138_vm12, %v11703_v39, 128.0  ;;  %2527 = vmin.xlane.f32.xlu1 %v2508_v27 }
 0x987   : > { %2529 = vmin.xlane.f32.xlu0 %v2509_v44 }
 0x988   : > { %v14899_v11 = vpop.xlane.xlu1 %2467 }
 0x989   : > { %vm18143_vm9 = vcmp.le.f32.partialorder %v14691_v54, %v14899_v11  ;;  %v14903_v3 = vpop.xlane.xlu0 %2469 }
 0x98a   : > { %v2510_v7 = vsel %vm18143_vm9, %v11703_v39, 128.0  ;;  %vm18144_vm1 = vcmp.le.f32.partialorder %v14697_v61, %v14903_v3 }
 0x98b   : > { %v2511_v27 = vsel %vm18144_vm1, %v11703_v39, 128.0  ;;  %2531 = vmin.xlane.f32.xlu1 %v2510_v7 }
 0x98c   : > { %2533 = vmin.xlane.f32.xlu0 %v2511_v27 }
 0x98d   : > { %v14915_v44 = vpop.xlane.xlu1 %2471 }
 0x98e   : > { %vm18149_vm12 = vcmp.le.f32.partialorder %v14725_v51, %v14915_v44  ;;  %v14919_v18 = vpop.xlane.xlu0 %2473 }
 0x98f   : > { %v2512_v60 = vsel %vm18149_vm12, %v11703_v39, 128.0  ;;  %vm18150_vm9 = vcmp.le.f32.partialorder %v14731_v4, %v14919_v18 }
 0x990   : > { %v2513_v7 = vsel %vm18150_vm9, %v11703_v39, 128.0  ;;  %2535 = vmin.xlane.f32.xlu1 %v2512_v60 }
 0x991   : > { %2537 = vmin.xlane.f32.xlu0 %v2513_v7 }
 0x992   : > { %v14931_v27 = vpop.xlane.xlu1 %2475 }
 0x993   : > { %vm18155_vm1 = vcmp.le.f32.partialorder %v14759_v15, %v14931_v27  ;;  %v14935_v12 = vpop.xlane.xlu0 %2477 }
 0x994   : > { %v2514_v1 = vsel %vm18155_vm1, %v11703_v39, 128.0  ;;  %vm18156_vm12 = vcmp.le.f32.partialorder %v14765_v47, %v14935_v12 }
 0x995   : > { %v2515_v60 = vsel %vm18156_vm12, %v11703_v39, 128.0  ;;  %2539 = vmin.xlane.f32.xlu1 %v2514_v1 }
 0x996   : > { %2541 = vmin.xlane.f32.xlu0 %v2515_v60 }
 0x997   : > { %v14947_v7 = vpop.xlane.xlu1 %2479 }
 0x998   : > { %vm18161_vm9 = vcmp.le.f32.partialorder %v14793_v34, %v14947_v7  ;;  %v14951_v26 = vpop.xlane.xlu0 %2481 }
 0x999   : > { %v2516_v63 = vsel %vm18161_vm9, %v11703_v39, 128.0  ;;  %vm18162_vm1 = vcmp.le.f32.partialorder %v14799_v13, %v14951_v26 }
 0x99a   : > { %v2517_v1 = vsel %vm18162_vm1, %v11703_v39, 128.0  ;;  %2543 = vmin.xlane.f32.xlu1 %v2516_v63 }
 0x99b   : > { %2545 = vmin.xlane.f32.xlu0 %v2517_v1 }
 0x99c   : > { %v14963_v60 = vpop.xlane.xlu1 %2483 }
 0x99d   : > { %vm18167_vm12 = vcmp.le.f32.partialorder %v14827_v53, %v14963_v60  ;;  %v14967_v41 = vpop.xlane.xlu0 %2485 }
 0x99e   : > { %v2518_v14 = vsel %vm18167_vm12, %v11703_v39, 128.0  ;;  %vm18169_vm9 = vcmp.le.f32.partialorder %v14833_v36, %v14967_v41 }
 0x99f   : > { %v2519_v63 = vsel %vm18169_vm9, %v11703_v39, 128.0  ;;  %2547 = vmin.xlane.f32.xlu1 %v2518_v14  ;;  %v18876_v14 = vmov 0 }
 0x9a0   : > { %2549 = vmin.xlane.f32.xlu0 %v2519_v63 }
 0x9a1   : > { %v14979_v1 = vpop.xlane.xlu1 %2487 }
 0x9a2   : > { %vm18174_vm1 = vcmp.le.f32.partialorder %v14853_v56, %v14979_v1 }
 0x9a3   : > { %v2520_v5 = vsel %vm18174_vm1, %v11703_v39, 128.0 }
 0x9a4   : > { %2551 = vmin.xlane.f32.xlu1 %v2520_v5 }
 0xa06   : > { %v2522_v29 = vpop.xlane.xlu0 %2521 }
 0xa07   : > { %vm2553_vm12 = vcmp.eq.f32.partialorder %v11703_v39, %v2522_v29  ;;  %v18880_v29 = vmov 0 }
 0xa08   : > { %vm14991_vm9 = vmand %vm18875_vm14, %vm2553_vm12  ;;  %vm18883_vm14 = vcmp.le.f32.partialorder %v14628_v55, %v14869_v9  ;;  %v18892_v55 = vmov 0 }
 0xa09   : > { %v18877_v14 = vsel %vm14991_vm9, 4294967295, %v18876_v14  ;;  %9696 = vmatprep.mubr.msk.f32.mxu0 %vm14991_vm9, %v18411_v40 }
 0xa0a   : > { %18878 = vst [vmem:[#allocation202_spill] sm:$0xff] %v18877_v14  ;;  %v2526_v63 = vpop.xlane.xlu0 %2525 }
 0xa0b   : > { %v2524_v62 = vpop.xlane.xlu1 %2523  ;;  %vm2555_vm7 = vcmp.eq.f32.partialorder %v11703_v39, %v2526_v63 }
 0xa0c   : > { %vm2554_vm1 = vcmp.eq.f32.partialorder %v11703_v39, %v2524_v62  ;;  %vm15003_vm6 = vmand %vm18879_vm13, %vm2555_vm7  ;;  %vm18887_vm7 = vcmp.le.f32.partialorder %v14657_v46, %v14883_v49 }
 0xa0d   : > { %v18881_v29 = vsel %vm15003_vm6, 4294967295, %v18880_v29  ;;  %vm15010_vm12 = vmand %vm18883_vm14, %vm2554_vm1  ;;  %vm18891_vm14 = vcmp.le.f32.partialorder %v14663_v10, %v14887_v31  ;;  %v18896_v10 = vmov 0  ;;  %v18900_v31 = vmov 0 }
 0xa0e   : > { %18882 = vst [vmem:[#allocation203_spill] sm:$0xff] %v18881_v29  ;;  %v18885_v6 = vsel %vm15010_vm12, 4294967295, %v18884_v6  ;;  %9697 = vmatmul.mubr.msk.f32.vlgmr.msra.gmra.mxu0 %vm15010_vm12, %v18411_v40 }
 0xa0f   : > { %18886 = vst [vmem:[#allocation204_spill] sm:$0xff] %v18885_v6  ;;  %v2528_v5 = vpop.xlane.xlu1 %2527  ;;  %9699 = vmatprep.mubr.msk.f32.mxu0 %vm15003_vm6, %v18411_v40 }
 0xa10   : > { %vm2556_vm13 = vcmp.eq.f32.partialorder %v11703_v39, %v2528_v5  ;;  %v2530_v62 = vpop.xlane.xlu0 %2529  ;;  %v15180_v5 = vpop.f32.mrf.mxu0 }
 0xa11   : > { %vm15024_vm8 = vmand %vm18887_vm7, %vm2556_vm13  ;;  %vm2557_vm1 = vcmp.eq.f32.partialorder %v11703_v39, %v2530_v62  ;;  %vm18895_vm7 = vcmp.le.f32.partialorder %v14691_v54, %v14899_v11 }
 0xa12   : > { %v18889_v33 = vsel %vm15024_vm8, 4294967295, %v18888_v33  ;;  %vm15032_vm12 = vmand %vm18891_vm14, %vm2557_vm1  ;;  %9700 = vmatmul.mubr.msk.f32.gmra.mxu0 %vm15024_vm8, %v18411_v40  ;;  %vm18899_vm14 = vcmp.le.f32.partialorder %v14697_v61, %v14903_v3  ;;  %v18904_v61 = vmov 0  ;;  %v18908_v3 = vmov 0 }
 0xa13   : > { %18890 = vst [vmem:[#allocation205_spill] sm:$0xff] %v18889_v33  ;;  %v18893_v55 = vsel %vm15032_vm12, 4294967295, %v18892_v55  ;;  %9702 = vmatprep.mubr.msk.f32.mxu0 %vm15032_vm12, %v18411_v40 }
 0xa14   : > { %18894 = vst [vmem:[#allocation206_spill] sm:$0xff] %v18893_v55  ;;  %v2532_v46 = vpop.xlane.xlu1 %2531 }
 0xa15   : > { %vm2558_vm13 = vcmp.eq.f32.partialorder %v11703_v39, %v2532_v46  ;;  %v2534_v49 = vpop.xlane.xlu0 %2533  ;;  %v15182_v46 = vpop.f32.mrf.mxu0 }
 0xa16   : > { %vm15046_vm6 = vmand %vm18895_vm7, %vm2558_vm13  ;;  %vm2559_vm1 = vcmp.eq.f32.partialorder %v11703_v39, %v2534_v49  ;;  %vm18903_vm7 = vcmp.le.f32.partialorder %v14725_v51, %v14915_v44  ;;  %v15166_v44 = vpop.f32.mrf.mxu1 }
 0xa17   : > { %v18897_v10 = vsel %vm15046_vm6, 4294967295, %v18896_v10  ;;  %vm15054_vm8 = vmand %vm18899_vm14, %vm2559_vm1  ;;  %9703 = vmatmul.mubr.msk.f32.gmra.mxu0 %vm15046_vm6, %v18411_v40  ;;  %vm18907_vm14 = vcmp.le.f32.partialorder %v14731_v4, %v14919_v18  ;;  %v18912_v4 = vmov 0  ;;  %v18916_v18 = vmov 0 }
 0xa18   : > { %18898 = vst [vmem:[#allocation207_spill] sm:$0xff] %v18897_v10  ;;  %v18901_v31 = vsel %vm15054_vm8, 4294967295, %v18900_v31  ;;  %9705 = vmatprep.mubr.msk.f32.mxu0 %vm15054_vm8, %v18411_v40 }
 0xa19   : > { %18902 = vst [vmem:[#allocation208_spill] sm:$0xff] %v18901_v31  ;;  %v2536_v54 = vpop.xlane.xlu1 %2535 }
 0xa1a   : > { %vm2560_vm13 = vcmp.eq.f32.partialorder %v11703_v39, %v2536_v54  ;;  %v2538_v16 = vpop.xlane.xlu0 %2537  ;;  %v15184_v54 = vpop.f32.mrf.mxu0 }
 0xa1b   : > { %vm15068_vm12 = vmand %vm18903_vm7, %vm2560_vm13  ;;  %vm2561_vm1 = vcmp.eq.f32.partialorder %v11703_v39, %v2538_v16  ;;  %vm18911_vm7 = vcmp.le.f32.partialorder %v14759_v15, %v14931_v27  ;;  %v15168_v27 = vpop.f32.mrf.mxu1 }
 0xa1c   : > { %v18905_v61 = vsel %vm15068_vm12, 4294967295, %v18904_v61  ;;  %vm15076_vm6 = vmand %vm18907_vm14, %vm2561_vm1  ;;  %9706 = vmatmul.mubr.msk.f32.gmra.mxu0 %vm15068_vm12, %v18411_v40  ;;  %vm18915_vm14 = vcmp.le.f32.partialorder %v14765_v47, %v14935_v12  ;;  %v18920_v12 = vmov 0  ;;  %v18924_v47 = vmov 0 }
 0xa1d   : > { %18906 = vst [vmem:[#allocation209_spill] sm:$0xff] %v18905_v61  ;;  %v18909_v3 = vsel %vm15076_vm6, 4294967295, %v18908_v3  ;;  %9708 = vmatprep.mubr.msk.f32.mxu0 %vm15076_vm6, %v18411_v40 }
 0xa1e   : > { %18910 = vst [vmem:[#allocation210_spill] sm:$0xff] %v18909_v3  ;;  %v2540_v51 = vpop.xlane.xlu1 %2539 }
 0xa1f   : > { %vm2562_vm13 = vcmp.eq.f32.partialorder %v11703_v39, %v2540_v51  ;;  %v2542_v19 = vpop.xlane.xlu0 %2541  ;;  %v15186_v51 = vpop.f32.mrf.mxu0 }
 0xa20   : > { %vm15090_vm8 = vmand %vm18911_vm7, %vm2562_vm13  ;;  %vm2563_vm1 = vcmp.eq.f32.partialorder %v11703_v39, %v2542_v19  ;;  %vm18919_vm7 = vcmp.le.f32.partialorder %v14793_v34, %v14947_v7 }
 0xa21   : > { %v18913_v4 = vsel %vm15090_vm8, 4294967295, %v18912_v4  ;;  %vm15098_vm12 = vmand %vm18915_vm14, %vm2563_vm1  ;;  %9709 = vmatmul.mubr.msk.f32.gmra.mxu0 %vm15090_vm8, %v18411_v40  ;;  %vm18923_vm14 = vcmp.le.f32.partialorder %v14799_v13, %v14951_v26  ;;  %v18928_v26 = vmov 0  ;;  %v18932_v13 = vmov 0 }
 0xa22   : > { %18914 = vst [vmem:[#allocation211_spill] sm:$0xff] %v18913_v4  ;;  %v18917_v18 = vsel %vm15098_vm12, 4294967295, %v18916_v18  ;;  %9711 = vmatprep.mubr.msk.f32.mxu0 %vm15098_vm12, %v18411_v40 }
 0xa23   : > { %18918 = vst [vmem:[#allocation212_spill] sm:$0xff] %v18917_v18  ;;  %v2544_v15 = vpop.xlane.xlu1 %2543 }
 0xa24   : > { %vm2564_vm13 = vcmp.eq.f32.partialorder %v11703_v39, %v2544_v15  ;;  %v2546_v9 = vpop.xlane.xlu0 %2545  ;;  %v15190_v15 = vpop.f32.mrf.mxu0 }
 0xa25   : > { %vm15112_vm6 = vmand %vm18919_vm7, %vm2564_vm13  ;;  %vm2565_vm1 = vcmp.eq.f32.partialorder %v11703_v39, %v2546_v9  ;;  %vm18927_vm7 = vcmp.le.f32.partialorder %v14827_v53, %v14963_v60 }
 0xa26   : > { %v18921_v12 = vsel %vm15112_vm6, 4294967295, %v18920_v12  ;;  %vm15120_vm8 = vmand %vm18923_vm14, %vm2565_vm1  ;;  %9712 = vmatmul.mubr.msk.f32.gmra.mxu0 %vm15112_vm6, %v18411_v40  ;;  %vm18931_vm14 = vcmp.le.f32.partialorder %v14833_v36, %v14967_v41  ;;  %v18936_v41 = vmov 0 }
 0xa27   : > { %18922 = vst [vmem:[#allocation213_spill] sm:$0xff] %v18921_v12  ;;  %v18925_v47 = vsel %vm15120_vm8, 4294967295, %v18924_v47  ;;  %9714 = vmatprep.mubr.msk.f32.mxu0 %vm15120_vm8, %v18411_v40 }
 0xa28   : > { %18926 = vst [vmem:[#allocation214_spill] sm:$0xff] %v18925_v47  ;;  %v2548_v34 = vpop.xlane.xlu1 %2547 }
 0xa29   : > { %vm2566_vm13 = vcmp.eq.f32.partialorder %v11703_v39, %v2548_v34  ;;  %v2550_v11 = vpop.xlane.xlu0 %2549  ;;  %v15194_v34 = vpop.f32.mrf.mxu0 }
 0xa2a   : > { %vm15134_vm12 = vmand %vm18927_vm7, %vm2566_vm13  ;;  %vm2567_vm1 = vcmp.eq.f32.partialorder %v11703_v39, %v2550_v11  ;;  %vm18935_vm7 = vcmp.le.f32.partialorder %v14853_v56, %v14979_v1 }
 0xa2b   : > { %v18929_v26 = vsel %vm15134_vm12, 4294967295, %v18928_v26  ;;  %vm15142_vm6 = vmand %vm18931_vm14, %vm2567_vm1  ;;  %9715 = vmatmul.mubr.msk.f32.gmra.mxu0 %vm15134_vm12, %v18411_v40 }
 0xa2c   : > { %18930 = vst [vmem:[#allocation215_spill] sm:$0xff] %v18929_v26  ;;  %v18933_v13 = vsel %vm15142_vm6, 4294967295, %v18932_v13  ;;  %9717 = vmatprep.mubr.msk.f32.mxu0 %vm15142_vm6, %v18411_v40 }
 0xa2d   : > { %18934 = vst [vmem:[#allocation216_spill] sm:$0xff] %v18933_v13  ;;  %v2552_v53 = vpop.xlane.xlu1 %2551 }
 0xa2e   : > { %vm2568_vm13 = vcmp.eq.f32.partialorder %v11703_v39, %v2552_v53  ;;  %v15170_v39 = vpop.f32.mrf.mxu1  ;;  %v15198_v53 = vpop.f32.mrf.mxu0 }
 0xa2f   : > { %vm15156_vm8 = vmand %vm18935_vm7, %vm2568_vm13 }
 0xa30   : > { %v18937_v41 = vsel %vm15156_vm8, 4294967295, %v18936_v41  ;;  %9718 = vmatmul.mubr.msk.f32.gmra.mxu0 %vm15156_vm8, %v18411_v40  ;;  %v15172_v7 = vpop.f32.mrf.mxu1 }
 0xa31   : > { %18938 = vst [vmem:[#allocation217_spill] sm:$0xff] %v18937_v41  ;;  %9808 = vmatprep.mubr.msk.f32.mxu0 %vm12269_vm10, %v18411_v40  ;;  %v9604_v41 = vpop.f32.mrf.mxu0  ;;  %v18953_v40 = vld [vmem:[#allocation133_spill] sm:$0xff] }
 0xa32   : > { %v15174_v56 = vpop.f32.mrf.mxu1 }
 0xa33   : > { %v15204_v26 = vpop.f32.mrf.mxu0 }
 0xa34   : > { %v15176_v60 = vpop.f32.mrf.mxu1 }
 0xa35   : > { %v9607_v12 = vpop.f32.mrf.mxu0 }
 0xa36   : > { %v15178_v1 = vpop.f32.mrf.mxu1 }
 0xa37   : > { %v3655_v4 = vpop.f32.mrf.mxu0 }
 0xa38   : > { %v9548_v63 = vpop.f32.mrf.mxu1 }
 0xa3a   : > { %v3468_v62 = vpop.f32.mrf.mxu1 }
 0xa3c   : > { %v9551_v49 = vpop.f32.mrf.mxu1 }
 0xa3e   : > { %v3478_v16 = vpop.f32.mrf.mxu1 }
 0xa40   : > { %v15188_v19 = vpop.f32.mrf.mxu1 }
 0xa41   : > { %18940 = vst [vmem:[#allocation218_spill] sm:$0xff] %v15188_v19 }
 0xa42   : > { %v15192_v9 = vpop.f32.mrf.mxu1 }
 0xa43   : > { %18941 = vst [vmem:[#allocation219_spill] sm:$0xff] %v15192_v9  ;;  %v18955_v9 = vld [vmem:[#allocation165_spill] sm:$0xff] }
 0xa44   : > { %v15196_v11 = vpop.f32.mrf.mxu1 }
 0xa45   : > { %18942 = vst [vmem:[#allocation220_spill] sm:$0xff] %v15196_v11 }
 0xa46   : > { %v15200_v36 = vpop.f32.mrf.mxu1 }
 0xa47   : > { %18943 = vst [vmem:[#allocation221_spill] sm:$0xff] %v15200_v36  ;;  %v18957_v36 = vld [vmem:[#allocation98_spill] sm:$0xff] }
 0xa48   : > { %v15202_v13 = vpop.f32.mrf.mxu1 }
 0xa4a   : > { %v15206_v47 = vpop.f32.mrf.mxu1 }
 0xa4b   : > { %18944 = vst [vmem:[#allocation222_spill] sm:$0xff] %v15206_v47 }
 0xa4c   : > { %v15208_v18 = vpop.f32.mrf.mxu1 }
 0xa4e   : > { %v15210_v3 = vpop.f32.mrf.mxu1 }
 0xa50   : > { %v15216_v10 = vpop.f32.mrf.mxu1 }
 0xa52   : > { %v15222_v29 = vpop.f32.mrf.mxu1 }
 0xa54   : > { %v9657_v30 = vpop.f32.mrf.mxu1 }
 0xa56   : > { %v15230_v45 = vpop.f32.mrf.mxu1 }
 0xa58   : > { %v9660_v43 = vpop.f32.mrf.mxu1 }
 0xa5a   : > { %v3822_v23 = vpop.f32.mrf.mxu1 }
 0xace   : > { %v15212_v61 = vpop.f32.mrf.mxu0 }
 0xacf   : > { %18945 = vst [vmem:[#allocation223_spill] sm:$0xff] %v15212_v61 }
 0xad0   : > { %v15214_v31 = vpop.f32.mrf.mxu0 }
 0xad1   : > { %18946 = vst [vmem:[#allocation224_spill] sm:$0xff] %v15214_v31  ;;  %v18954_v31 = vld [vmem:[#allocation105_spill] sm:$0xff] }
 0xad2   : > { %v15218_v55 = vpop.f32.mrf.mxu0  ;;  %v2970_v61 = vmax.f32 %v18954_v31, %v18953_v40 }
 0xad3   : > { %18947 = vst [vmem:[#allocation225_spill] sm:$0xff] %v15218_v55  ;;  %v9663_v55 = vpop.f32.mrf.mxu1 }
 0xad4   : > { %v15220_v33 = vpop.f32.mrf.mxu0  ;;  %v3147_v19 = vmax.f32 %v2970_v61, %v18956_v48 }
 0xad5   : > { %18948 = vst [vmem:[#allocation226_spill] sm:$0xff] %v15220_v33  ;;  %v3148_v33 = vmax.f32 %v2971_v17, %v18955_v9  ;;  %v18960_v17 = vld [vmem:[#allocation114_spill] sm:$0xff]  ;;  %v18961_v9 = vld [vmem:[#allocation100_spill] sm:$0xff]  ;;  %v3832_v47 = vpop.f32.mrf.mxu1 }
 0xad6   : > { %v3324_v38 = vmax.f32 %v3147_v19, %v14566_v52  ;;  %v18965_v52 = vld [vmem:[#allocation117_spill] sm:$0xff] }
 0xad7   : > { %v15224_v6 = vpop.f32.mrf.mxu0  ;;  %v3325_v32 = vmax.f32 %v3148_v33, %v14564_v25  ;;  %v18962_v25 = vld [vmem:[#allocation118_spill] sm:$0xff] }
 0xad8   : > { %18949 = vst [vmem:[#allocation227_spill] sm:$0xff] %v15224_v6  ;;  %v3501_v28 = vmax.f32 %v3324_v38, %v3478_v16  ;;  %v2966_v6 = vmax.f32 %v18961_v9, %v18960_v17  ;;  %v18963_v33 = vld [vmem:[#allocation146_spill] sm:$0xff]  ;;  %v18968_v16 = vld [vmem:[#allocation95_spill] sm:$0xff]  ;;  %v18969_v17 = vld [vmem:[#allocation145_spill] sm:$0xff] }
 0xad9   : > { %v15226_v14 = vpop.f32.mrf.mxu0  ;;  %v3502_v50 = vmax.f32 %v3325_v32, %v9551_v49  ;;  %v18964_v61 = vmax.f32 %v18962_v25, %v18963_v33  ;;  %v18978_v33 = vld [vmem:[#allocation143_spill] sm:$0xff] }
 0xada   : > { %18950 = vst [vmem:[#allocation228_spill] sm:$0xff] %v15226_v14  ;;  %v2968_v14 = vmax.f32 %v18958_v59, %v18957_v36  ;;  %v3678_v59 = vmax.f32 %v3501_v28, %v3655_v4  ;;  %v3143_v32 = vmax.f32 %v2966_v6, %v18965_v52 }
 0xadb   : > { %v3679_v40 = vmax.f32 %v3502_v50, %v9607_v12  ;;  %v3500_v42 = vmax.f32 %v18964_v61, %v9548_v63  ;;  %v18967_v12 = vld [vmem:[#allocation110_spill] sm:$0xff] }
 0xadc   : > { %v15228_v8 = vpop.f32.mrf.mxu0  ;;  %v3145_v11 = vmax.f32 %v2968_v14, %v18959_v37  ;;  %v3855_v38 = vmax.f32 %v3678_v59, %v3832_v47  ;;  %v2964_v50 = vmax.f32 %v18968_v16, %v18967_v12  ;;  %v3320_v9 = vmax.f32 %v3143_v32, %v18969_v17  ;;  %v18980_v59 = vld [vmem:[#allocation142_spill] sm:$0xff]  ;;  %v18983_v32 = vld [vmem:[#allocation112_spill] sm:$0xff]  ;;  %v18987_v12 = vld [vmem:[#allocation141_spill] sm:$0xff] }
 0xadd   : > { %v3856_v36 = vmax.f32 %v3679_v40, %v9663_v55  ;;  %v3677_v37 = vmax.f32 %v3500_v42, %v9604_v41  ;;  %v18974_v42 = vld [vmem:[#allocation115_spill] sm:$0xff] }
 0xade   : > { %v15232_v58 = vpop.f32.mrf.mxu0  ;;  %v3322_v48 = vmax.f32 %v3145_v11, %v14562_v2  ;;  %v18970_v2 = vld [vmem:[#allocation116_spill] sm:$0xff]  ;;  %v3141_v47 = vmax.f32 %v2964_v50, %v18974_v42  ;;  %v3497_v41 = vmax.f32 %v3320_v9, %v15178_v1  ;;  %v18979_v1 = vld [vmem:[#allocation113_spill] sm:$0xff] }
 0xadf   : > { %v18971_v11 = vld [vmem:[#allocation144_spill] sm:$0xff]  ;;  %v3854_v6 = vmax.f32 %v3677_v37, %v9660_v43  ;;  %v18976_v43 = vld [vmem:[#allocation107_spill] sm:$0xff] }
 0xae0   : > { %v3499_v19 = vmax.f32 %v3322_v48, %v3468_v62  ;;  %v18972_v25 = vmax.f32 %v18970_v2, %v18971_v11  ;;  %v3318_v61 = vmax.f32 %v3141_v47, %v18978_v33  ;;  %v18989_v50 = vld [vmem:[#allocation140_spill] sm:$0xff]  ;;  %v18992_v2 = vld [vmem:[#allocation109_spill] sm:$0xff] }
 0xae1   : > { %v15234_v20 = vpop.f32.mrf.mxu0 }
 0xae2   : > { %v3498_v63 = vmax.f32 %v18972_v25, %v15176_v60  ;;  %v3676_v55 = vmax.f32 %v3499_v19, %v15204_v26  ;;  %v18977_v26 = vld [vmem:[#allocation94_spill] sm:$0xff]  ;;  %v3495_v19 = vmax.f32 %v3318_v61, %v15174_v56  ;;  %v18988_v56 = vld [vmem:[#allocation111_spill] sm:$0xff]  ;;  %v19006_v61 = vld [vmem:[#allocation168_spill] sm:$0xff] }
 0xae3   : > { %v15236_v24 = vpop.f32.mrf.mxu0  ;;  %v2962_v48 = vmax.f32 %v18977_v26, %v18976_v43  ;;  %v18990_v17 = vmax.f32 %v18988_v56, %v18989_v50  ;;  %v19022_v50 = vld [vmem:[#allocation183_spill] sm:$0xff] }
 0xae4   : > { %v3675_v60 = vmax.f32 %v3498_v63, %v15194_v34  ;;  %v3853_v62 = vmax.f32 %v3676_v55, %v3822_v23  ;;  %v3674_v23 = vmax.f32 %v3497_v41, %v15198_v53  ;;  %v18995_v63 = vld [vmem:[#allocation92_spill] sm:$0xff]  ;;  %v18996_v55 = vld [vmem:[#allocation139_spill] sm:$0xff] }
 0xae5   : > { %v3494_v9 = vmax.f32 %v18990_v17, %v15168_v27 }
 0xae6   : > { %v9713_v35 = vpop.f32.mrf.mxu0  ;;  %v3852_v34 = vmax.f32 %v3675_v60, %v9657_v30  ;;  %v3851_v37 = vmax.f32 %v3674_v23, %v15230_v45  ;;  %v18985_v30 = vld [vmem:[#allocation104_spill] sm:$0xff] }
 0xae7   : > { %v3671_v27 = vmax.f32 %v3494_v9, %v15182_v46  ;;  %v19012_v23 = vld [vmem:[#allocation220_spill] sm:$0xff]  ;;  %v19023_v9 = vld [vmem:[#allocation218_spill] sm:$0xff] }
 0xae8   : > { %v15243_v22 = vpop.f32.mrf.mxu0  ;;  %v15301_v53 = vmax.f32 %v3852_v34, %v9713_v35  ;;  %v3672_v35 = vmax.f32 %v3495_v19, %v15190_v15  ;;  %v19013_v34 = vld [vmem:[#allocation136_spill] sm:$0xff] }
 0xaea   : > { %18984 = vst [vmem:[#allocation165_spill] sm:$0xff] %v15301_v53  ;;  %v3849_v15 = vmax.f32 %v3672_v35, %v15222_v29  ;;  %v3848_v29 = vmax.f32 %v3671_v27, %v15208_v18  ;;  %v19001_v18 = vld [vmem:[#allocation91_spill] sm:$0xff]  ;;  %v19024_v35 = vld [vmem:[#allocation134_spill] sm:$0xff] }
 0xaeb   : > { %v9716_v57 = vpop.f32.mrf.mxu0 }
 0xaec   : > { %v15277_v40 = vmax.f32 %v3854_v6, %v9716_v57  ;;  %v18998_v6 = vld [vmem:[#allocation108_spill] sm:$0xff] }
 0xaed   : > { %v3999_v31 = vpop.f32.mrf.mxu0 }
 0xaee   : > { %18975 = vst [vmem:[#allocation133_spill] sm:$0xff] %v15277_v40  ;;  %v15291_v57 = vmax.f32 %v3853_v62, %v3999_v31  ;;  %v18986_v31 = vld [vmem:[#allocation93_spill] sm:$0xff] }
 0xaef   : > { %v19002_v62 = vld [vmem:[#allocation137_spill] sm:$0xff] }
 0xaf0   : > { %v9719_v49 = vpop.f32.mrf.mxu0  ;;  %18982 = vst [vmem:[#allocation105_spill] sm:$0xff] %v15291_v57 }
 0xaf1   : > { %v15258_v14 = vmax.f32 %v3856_v36, %v9719_v49  ;;  %v18981_v36 = vmax.f32 %v18979_v1, %v18980_v59  ;;  %v3139_v49 = vmax.f32 %v2962_v48, %v18983_v32  ;;  %v19005_v48 = vld [vmem:[#allocation106_spill] sm:$0xff]  ;;  %v19014_v32 = vld [vmem:[#allocation184_spill] sm:$0xff] }
 0xaf2   : > { %v4009_v28 = vpop.f32.mrf.mxu0  ;;  %v19007_v1 = vld [vmem:[#allocation222_spill] sm:$0xff] }
 0xaf3   : > { %18966 = vst [vmem:[#allocation132_spill] sm:$0xff] %v15258_v14  ;;  %v15268_v4 = vmax.f32 %v3855_v38, %v4009_v28  ;;  %9720 = vmatprep.subr.mxu1 %v15258_v14  ;;  %9776 = vmatprep.subr.mxu0 %v15258_v14  ;;  %v3496_v52 = vmax.f32 %v18981_v36, %v15172_v7  ;;  %v19008_v36 = vld [vmem:[#allocation227_spill] sm:$0xff] }
 0xaf4   : > { %9721 = vmatpush3.msra.mxu1 %v15258_v14  ;;  %9777 = vmatpush3.msra.mxu0 %v15258_v14  ;;  %v2960_v38 = vmax.f32 %v18986_v31, %v18985_v30  ;;  %v3316_v16 = vmax.f32 %v3139_v49, %v18987_v12  ;;  %v19015_v49 = vmax.f32 %v19013_v34, %v19014_v32  ;;  %v19018_v30 = vld [vmem:[#allocation167_spill] sm:$0xff]  ;;  %v19078_v34 = vld [vmem:[#allocation70_spill] sm:$0xff] }
 0xaf5   : > { %18973 = vst [vmem:[#allocation103_spill] sm:$0xff] %v15268_v4  ;;  %9722 = vmatprep.subr.mxu1 %v15268_v4  ;;  %9778 = vmatprep.subr.mxu0 %v15268_v4  ;;  %v3673_v7 = vmax.f32 %v3496_v52, %v15186_v51  ;;  %v15317_v51 = vmax.f32 %v3851_v37, %v15243_v22  ;;  %v18994_v22 = vld [vmem:[#allocation101_spill] sm:$0xff]  ;;  %v19080_v32 = vld [vmem:[#allocation55_spill] sm:$0xff] }
 0xaf6   : > { %9723 = vmatpush3.msra.mxu1 %v15268_v4  ;;  %9779 = vmatpush3.msra.mxu0 %v15268_v4  ;;  %v3137_v11 = vmax.f32 %v2960_v38, %v18992_v2  ;;  %v3493_v25 = vmax.f32 %v3316_v16, %v15170_v39  ;;  %v2958_v28 = vmax.f32 %v18995_v63, %v18994_v22  ;;  %v19019_v38 = vld [vmem:[#allocation221_spill] sm:$0xff]  ;;  %v19030_v63 = vld [vmem:[#allocation223_spill] sm:$0xff] }
 0xaf7   : > { %9724 = vmatprep.subr.mxu1 %v15277_v40  ;;  %9780 = vmatprep.subr.mxu0 %v15277_v40  ;;  %v3850_v45 = vmax.f32 %v3673_v7, %v15216_v10  ;;  %18991 = vst [vmem:[#allocation166_spill] sm:$0xff] %v15317_v51  ;;  %v3844_v19 = vmax.f32 %v19015_v49, %v19012_v23  ;;  %v19016_v7 = vld [vmem:[#allocation228_spill] sm:$0xff]  ;;  %v19020_v16 = vld [vmem:[#allocation225_spill] sm:$0xff]  ;;  %v19076_v23 = vld [vmem:[#allocation54_spill] sm:$0xff] }
 0xaf8   : > { %9725 = vmatpush3.msra.mxu1 %v15277_v40  ;;  %9781 = vmatpush3.msra.mxu0 %v15277_v40  ;;  %v3314_v39 = vmax.f32 %v3137_v11, %v18996_v55  ;;  %v3670_v46 = vmax.f32 %v3493_v25, %v15184_v54  ;;  %v3135_v42 = vmax.f32 %v2958_v28, %v18998_v6  ;;  %v19027_v25 = vld [vmem:[#allocation226_spill] sm:$0xff]  ;;  %v19032_v55 = vld [vmem:[#allocation224_spill] sm:$0xff]  ;;  %v19082_v49 = vld [vmem:[#allocation71_spill] sm:$0xff] }
 0xaf9   : > { %9726 = vmatprep.subr.mxu1 %v15291_v57  ;;  %9782 = vmatprep.subr.mxu0 %v15291_v57  ;;  %v15328_v10 = vmax.f32 %v3850_v45, %v15234_v20  ;;  %v15340_v20 = vmax.f32 %v3849_v15, %v15236_v24  ;;  %v15350_v54 = vmax.f32 %v3848_v29, %v15228_v8  ;;  %v19000_v24 = vld [vmem:[#allocation99_spill] sm:$0xff] }
 0xafa   : > { %9727 = vmatpush3.msra.mxu1 %v15291_v57  ;;  %9783 = vmatpush3.msra.mxu0 %v15291_v57  ;;  %v3491_v47 = vmax.f32 %v3314_v39, %v15166_v44  ;;  %v3847_v41 = vmax.f32 %v3670_v46, %v15210_v3  ;;  %v2956_v60 = vmax.f32 %v19001_v18, %v19000_v24  ;;  %v19025_v45 = vld [vmem:[#allocation163_spill] sm:$0xff]  ;;  %v19034_v46 = vmov 1.0  }
 0xafb   : > { %9728 = vmatprep.subr.mxu1 %v15301_v53  ;;  %9784 = vmatprep.subr.mxu0 %v15301_v53  ;;  %18993 = vst [vmem:[#allocation98_spill] sm:$0xff] %v15328_v10  ;;  %18997 = vst [vmem:[#allocation102_spill] sm:$0xff] %v15340_v20  ;;  %v3312_v43 = vmax.f32 %v3135_v42, %v19002_v62  ;;  %v19003_v8 = vmax.f32 %v14129_v0, %v14580_v21  ;;  %v19029_v15 = vld [vmem:[#allocation219_spill] sm:$0xff]  ;;  %v19044_v62 = vld [vmem:[#allocation46_spill] sm:$0xff] }
 0xafc   : > { %9729 = vmatpush3.msra.mxu1 %v15301_v53  ;;  %9785 = vmatpush3.msra.mxu0 %v15301_v53  ;;  %18999 = vst [vmem:[#allocation164_spill] sm:$0xff] %v15350_v54  ;;  %v3668_v44 = vmax.f32 %v3491_v47, %v15180_v5  ;;  %v15365_v26 = vmax.f32 %v3847_v41, %v15232_v58  ;;  %v19010_v58 = vld [vmem:[#allocation135_spill] sm:$0xff]  ;;  %vm19045_vm14 = vnez %v19044_v62 }
 0xafd   : > { %9730 = vmatprep.subr.mxu1 %v15317_v51  ;;  %9786 = vmatprep.subr.mxu0 %v15317_v51  ;;  %v3846_v3 = vmax.f32 %v19003_v8, %v15202_v13  ;;  %v3133_v33 = vmax.f32 %v2956_v60, %v19005_v48  ;;  %v3489_v5 = vmax.f32 %v3312_v43, %v19006_v61  ;;  %v19011_v13 = vld [vmem:[#allocation185_spill] sm:$0xff]  ;;  %v19046_v43 = vld [vmem:[#allocation62_spill] sm:$0xff]  ;;  %v19050_v8 = vld [vmem:[#allocation63_spill] sm:$0xff] }
 0xafe   : > { %9731 = vmatpush3.msra.mxu1 %v15317_v51  ;;  %9787 = vmatpush3.msra.mxu0 %v15317_v51  ;;  %19004 = vst [vmem:[#allocation114_spill] sm:$0xff] %v15365_v26  ;;  %v3845_v59 = vmax.f32 %v3668_v44, %v19007_v1  ;;  %v15397_v56 = vmax.f32 %v3844_v19, %v19020_v16  ;;  %v19042_v60 = vld [vmem:[#allocation61_spill] sm:$0xff]  ;;  %vm19047_vm13 = vnez %v19046_v43  ;;  %v19048_v44 = vld [vmem:[#allocation47_spill] sm:$0xff]  ;;  %v19054_v48 = vld [vmem:[#allocation64_spill] sm:$0xff] }
 0xaff   : > { %9732 = vmatprep.subr.mxu1 %v15328_v10  ;;  %9788 = vmatprep.subr.mxu0 %v15328_v10  ;;  %v15375_v0 = vmax.f32 %v3846_v3, %v19008_v36  ;;  %v3310_v21 = vmax.f32 %v3133_v33, %v19010_v58  ;;  %v3666_v52 = vmax.f32 %v3489_v5, %v19011_v13  ;;  %v19052_v3 = vld [vmem:[#allocation48_spill] sm:$0xff]  ;;  %v19056_v33 = vld [vmem:[#allocation49_spill] sm:$0xff]  ;;  %v19060_v5 = vld [vmem:[#allocation50_spill] sm:$0xff] }
 0xb00   : > { %9733 = vmatpush3.msra.mxu1 %v15328_v10  ;;  %9789 = vmatpush3.msra.mxu0 %v15328_v10  ;;  %v15388_v37 = vmax.f32 %v3845_v59, %v19016_v7  ;;  %19021 = vst [vmem:[#allocation146_spill] sm:$0xff] %v15397_v56  ;;  %v19026_v2 = vmax.f32 %v19024_v35, %v19025_v45  ;;  %vm19043_vm1 = vnez %v19042_v60  ;;  %v19058_v61 = vld [vmem:[#allocation65_spill] sm:$0xff]  ;;  %v19062_v1 = vld [vmem:[#allocation66_spill] sm:$0xff]  ;;  %v19064_v59 = vld [vmem:[#allocation51_spill] sm:$0xff] }
 0xb01   : > { %9734 = vmatprep.subr.mxu1 %v15340_v20  ;;  %9790 = vmatprep.subr.mxu0 %v15340_v20  ;;  %19009 = vst [vmem:[#allocation100_spill] sm:$0xff] %v15375_v0  ;;  %v3487_v31 = vmax.f32 %v3310_v21, %v19018_v30  ;;  %v3843_v12 = vmax.f32 %v3666_v52, %v19019_v38  ;;  %vm19049_vm7 = vnez %v19048_v44  ;;  %v19066_v36 = vld [vmem:[#allocation67_spill] sm:$0xff]  ;;  %v19068_v58 = vld [vmem:[#allocation52_spill] sm:$0xff]  ;;  %v19072_v13 = vld [vmem:[#allocation53_spill] sm:$0xff] }
 0xb02   : > { %9735 = vmatpush3.msra.mxu1 %v15340_v20  ;;  %9791 = vmatpush3.msra.mxu0 %v15340_v20  ;;  %19017 = vst [vmem:[#allocation118_spill] sm:$0xff] %v15388_v37  ;;  %v3842_v11 = vmax.f32 %v19026_v2, %v19023_v9  ;;  %v19070_v21 = vld [vmem:[#allocation68_spill] sm:$0xff]  ;;  %v19074_v52 = vld [vmem:[#allocation69_spill] sm:$0xff]  ;;  %v19092_v38 = vld [vmem:[#allocation75_spill] sm:$0xff] }
 0xb03   : > { %9736 = vmatprep.subr.mxu1 %v15350_v54  ;;  %9792 = vmatprep.subr.mxu0 %v15350_v54  ;;  %v3664_v17 = vmax.f32 %v3487_v31, %v19022_v50  ;;  %v15409_v27 = vmax.f32 %v3843_v12, %v19027_v25  ;;  %v19084_v19 = vld [vmem:[#allocation56_spill] sm:$0xff]  ;;  %v19088_v30 = vld [vmem:[#allocation73_spill] sm:$0xff]  ;;  %v19090_v31 = vld [vmem:[#allocation119_spill] sm:$0xff] }
 0xb04   : > { %9737 = vmatpush3.msra.mxu1 %v15350_v54  ;;  %9793 = vmatpush3.msra.mxu0 %v15350_v54  ;;  %v15417_v28 = vmax.f32 %v3842_v11, %v19030_v63  ;;  %v19086_v7 = vld [vmem:[#allocation72_spill] sm:$0xff]  ;;  %v19094_v12 = vld [vmem:[#allocation121_spill] sm:$0xff]  ;;  %v19096_v16 = vld [vmem:[#allocation74_spill] sm:$0xff] }
 0xb05   : > { %9738 = vmatprep.subr.mxu1 %v15365_v26  ;;  %9794 = vmatprep.subr.mxu0 %v15365_v26  ;;  %19028 = vst [vmem:[#allocation117_spill] sm:$0xff] %v15409_v27  ;;  %v3841_v22 = vmax.f32 %v3664_v17, %v19029_v15  ;;  %v19098_v50 = vld [vmem:[#allocation120_spill] sm:$0xff]  ;;  %v19102_v9 = vld [vmem:[#allocation122_spill] sm:$0xff]  ;;  %v19104_v35 = vld [vmem:[#allocation77_spill] sm:$0xff] }
 0xb06   : > { %9739 = vmatpush3.msra.mxu1 %v15365_v26  ;;  %9795 = vmatpush3.msra.mxu0 %v15365_v26  ;;  %19031 = vst [vmem:[#allocation110_spill] sm:$0xff] %v15417_v28  ;;  %v19100_v17 = vld [vmem:[#allocation76_spill] sm:$0xff]  ;;  %v19106_v45 = vld [vmem:[#allocation123_spill] sm:$0xff]  ;;  %v19108_v2 = vld [vmem:[#allocation78_spill] sm:$0xff] }
 0xb07   : > { %9740 = vmatprep.subr.mxu1 %v15375_v0  ;;  %9796 = vmatprep.subr.mxu0 %v15375_v0  ;;  %v15424_v39 = vmax.f32 %v3841_v22, %v19032_v55  ;;  %v19110_v11 = vld [vmem:[#allocation124_spill] sm:$0xff]  ;;  %v19112_v25 = vld [vmem:[#allocation79_spill] sm:$0xff]  ;;  %v19114_v15 = vld [vmem:[#allocation125_spill] sm:$0xff] }
 0xb08   : > { %9741 = vmatpush3.msra.mxu1 %v15375_v0  ;;  %9797 = vmatpush3.msra.mxu0 %v15375_v0  ;;  %v19116_v22 = vld [vmem:[#allocation80_spill] sm:$0xff]  ;;  %v19118_v63 = vld [vmem:[#allocation126_spill] sm:$0xff]  ;;  %v19120_v55 = vld [vmem:[#allocation81_spill] sm:$0xff] }
 0xb09   : > { %9742 = vmatprep.subr.mxu1 %v15388_v37  ;;  %9798 = vmatprep.subr.mxu0 %v15388_v37  ;;  %19033 = vst [vmem:[#allocation95_spill] sm:$0xff] %v15424_v39 }
 0xb0a   : > { %9743 = vmatpush3.msra.mxu1 %v15388_v37  ;;  %9799 = vmatpush3.msra.mxu0 %v15388_v37 }
 0xb0b   : > { %9744 = vmatprep.subr.mxu1 %v15397_v56  ;;  %9800 = vmatprep.subr.mxu0 %v15397_v56 }
 0xb0c   : > { %9745 = vmatpush3.msra.mxu1 %v15397_v56  ;;  %9801 = vmatpush3.msra.mxu0 %v15397_v56 }
 0xb0d   : > { %9746 = vmatprep.subr.mxu1 %v15409_v27  ;;  %9802 = vmatprep.subr.mxu0 %v15409_v27 }
 0xb0e   : > { %9747 = vmatpush3.msra.mxu1 %v15409_v27  ;;  %9803 = vmatpush3.msra.mxu0 %v15409_v27 }
 0xb0f   : > { %9748 = vmatprep.subr.mxu1 %v15417_v28  ;;  %9804 = vmatprep.subr.mxu0 %v15417_v28 }
 0xb10   : > { %9749 = vmatpush3.msra.mxu1 %v15417_v28  ;;  %9805 = vmatpush3.msra.mxu0 %v15417_v28 }
 0xb11   : > { %9750 = vmatprep.subr.mxu1 %v15424_v39  ;;  %9806 = vmatprep.subr.mxu0 %v15424_v39 }
 0xb12   : > { %9751 = vmatpush3.msra.mxu1 %v15424_v39  ;;  %9807 = vmatpush3.msra.mxu0 %v15424_v39 }
 0xb13   : > { %9753 = vmatmul.mubr.msk.f32.vlgmr.msra.gmra.mxu1 %vm11862_vm0, %v19034_v46  ;;  %9809 = vmatmul.mubr.msk.f32.vlgmr.msra.gmra.mxu0 %vm12294_vm3, %v19034_v46 }
 0xb14   : > { %9832 = vmatprep.subr.mxu1 %v15258_v14  ;;  %9888 = vmatprep.subr.mxu0 %v15258_v14 }
 0xb15   : > { %9755 = vmatprep.mubr.msk.f32.mxu1 %vm11855_vm15, %v19034_v46  ;;  %9811 = vmatprep.mubr.msk.f32.mxu0 %vm12287_vm5, %v19034_v46 }
 0xb16   : > { %9833 = vmatpush3.msra.mxu1 %v15258_v14  ;;  %9889 = vmatpush3.msra.mxu0 %v15258_v14 }
 0xb17   : > { %9834 = vmatprep.subr.mxu1 %v15268_v4  ;;  %9890 = vmatprep.subr.mxu0 %v15268_v4 }
 0xb18   : > { %9835 = vmatpush3.msra.mxu1 %v15268_v4  ;;  %9891 = vmatpush3.msra.mxu0 %v15268_v4 }
 0xb19   : > { %9756 = vmatmul.mubr.msk.f32.gmra.mxu1 %vm11890_vm4, %v19034_v46  ;;  %9812 = vmatmul.mubr.msk.f32.gmra.mxu0 %vm12322_vm11, %v19034_v46 }
 0xb1a   : > { %9836 = vmatprep.subr.mxu1 %v15277_v40  ;;  %9892 = vmatprep.subr.mxu0 %v15277_v40 }
 0xb1b   : > { %9758 = vmatprep.mubr.msk.f32.mxu1 %vm11899_vm2, %v19034_v46  ;;  %9814 = vmatprep.mubr.msk.f32.mxu0 %vm19043_vm1, %v19034_v46  ;;  %vm19051_vm1 = vnez %v19050_v8 }
 0xb1c   : > { %9837 = vmatpush3.msra.mxu1 %v15277_v40  ;;  %9893 = vmatpush3.msra.mxu0 %v15277_v40 }
 0xb1d   : > { %9838 = vmatprep.subr.mxu1 %v15291_v57  ;;  %9894 = vmatprep.subr.mxu0 %v15291_v57 }
 0xb1e   : > { %9839 = vmatpush3.msra.mxu1 %v15291_v57  ;;  %9895 = vmatpush3.msra.mxu0 %v15291_v57 }
 0xb1f   : > { %9759 = vmatmul.mubr.msk.f32.gmra.mxu1 %vm19045_vm14, %v19034_v46  ;;  %9815 = vmatmul.mubr.msk.f32.gmra.mxu0 %vm19047_vm13, %v19034_v46  ;;  %vm19053_vm13 = vnez %v19052_v3  ;;  %vm19059_vm14 = vnez %v19058_v61 }
 0xb20   : > { %9840 = vmatprep.subr.mxu1 %v15301_v53  ;;  %9896 = vmatprep.subr.mxu0 %v15301_v53 }
 0xb21   : > { %9761 = vmatprep.mubr.msk.f32.mxu1 %vm19049_vm7, %v19034_v46  ;;  %9817 = vmatprep.mubr.msk.f32.mxu0 %vm19051_vm1, %v19034_v46  ;;  %vm19055_vm7 = vnez %v19054_v48  ;;  %vm19057_vm1 = vnez %v19056_v33 }
 0xb22   : > { %9841 = vmatpush3.msra.mxu1 %v15301_v53  ;;  %9897 = vmatpush3.msra.mxu0 %v15301_v53 }
 0xb23   : > { %9842 = vmatprep.subr.mxu1 %v15317_v51  ;;  %9898 = vmatprep.subr.mxu0 %v15317_v51 }
 0xb24   : > { %9843 = vmatpush3.msra.mxu1 %v15317_v51  ;;  %9899 = vmatpush3.msra.mxu0 %v15317_v51 }
 0xb25   : > { %9762 = vmatmul.mubr.msk.f32.gmra.mxu1 %vm19053_vm13, %v19034_v46  ;;  %9818 = vmatmul.mubr.msk.f32.gmra.mxu0 %vm19055_vm7, %v19034_v46  ;;  %vm19061_vm7 = vnez %v19060_v5  ;;  %vm19067_vm13 = vnez %v19066_v36 }
 0xb26   : > { %9844 = vmatprep.subr.mxu1 %v15328_v10  ;;  %9900 = vmatprep.subr.mxu0 %v15328_v10 }
 0xb27   : > { %9764 = vmatprep.mubr.msk.f32.mxu1 %vm19057_vm1, %v19034_v46  ;;  %9820 = vmatprep.mubr.msk.f32.mxu0 %vm19059_vm14, %v19034_v46  ;;  %vm19063_vm1 = vnez %v19062_v1  ;;  %vm19065_vm14 = vnez %v19064_v59 }
 0xb28   : > { %9845 = vmatpush3.msra.mxu1 %v15328_v10  ;;  %9901 = vmatpush3.msra.mxu0 %v15328_v10 }
 0xb29   : > { %9846 = vmatprep.subr.mxu1 %v15340_v20  ;;  %9902 = vmatprep.subr.mxu0 %v15340_v20 }
 0xb2a   : > { %9847 = vmatpush3.msra.mxu1 %v15340_v20  ;;  %9903 = vmatpush3.msra.mxu0 %v15340_v20 }
 0xb2b   : > { %9765 = vmatmul.mubr.msk.f32.gmra.mxu1 %vm19061_vm7, %v19034_v46  ;;  %9821 = vmatmul.mubr.msk.f32.gmra.mxu0 %vm19063_vm1, %v19034_v46  ;;  %vm19069_vm1 = vnez %v19068_v58  ;;  %vm19075_vm7 = vnez %v19074_v52 }
 0xb2c   : > { %9848 = vmatprep.subr.mxu1 %v15350_v54  ;;  %9904 = vmatprep.subr.mxu0 %v15350_v54 }
 0xb2d   : > { %9767 = vmatprep.mubr.msk.f32.mxu1 %vm19065_vm14, %v19034_v46  ;;  %9823 = vmatprep.mubr.msk.f32.mxu0 %vm19067_vm13, %v19034_v46  ;;  %vm19071_vm14 = vnez %v19070_v21  ;;  %vm19073_vm13 = vnez %v19072_v13 }
 0xb2e   : > { %9849 = vmatpush3.msra.mxu1 %v15350_v54  ;;  %9905 = vmatpush3.msra.mxu0 %v15350_v54 }
 0xb2f   : > { %9850 = vmatprep.subr.mxu1 %v15365_v26  ;;  %9906 = vmatprep.subr.mxu0 %v15365_v26 }
 0xb30   : > { %9851 = vmatpush3.msra.mxu1 %v15365_v26  ;;  %9907 = vmatpush3.msra.mxu0 %v15365_v26 }
 0xb31   : > { %9768 = vmatmul.mubr.msk.f32.gmra.mxu1 %vm19069_vm1, %v19034_v46  ;;  %9824 = vmatmul.mubr.msk.f32.gmra.mxu0 %vm19071_vm14, %v19034_v46  ;;  %vm19077_vm14 = vnez %v19076_v23  ;;  %vm19083_vm1 = vnez %v19082_v49 }
 0xb32   : > { %9852 = vmatprep.subr.mxu1 %v15375_v0  ;;  %9908 = vmatprep.subr.mxu0 %v15375_v0 }
 0xb33   : > { %9770 = vmatprep.mubr.msk.f32.mxu1 %vm19073_vm13, %v19034_v46  ;;  %9826 = vmatprep.mubr.msk.f32.mxu0 %vm19075_vm7, %v19034_v46  ;;  %vm19079_vm13 = vnez %v19078_v34  ;;  %vm19081_vm7 = vnez %v19080_v32 }
 0xb34   : > { %9853 = vmatpush3.msra.mxu1 %v15375_v0  ;;  %9909 = vmatpush3.msra.mxu0 %v15375_v0 }
 0xb35   : > { %9854 = vmatprep.subr.mxu1 %v15388_v37  ;;  %9910 = vmatprep.subr.mxu0 %v15388_v37 }
 0xb36   : > { %9855 = vmatpush3.msra.mxu1 %v15388_v37  ;;  %9911 = vmatpush3.msra.mxu0 %v15388_v37 }
 0xb37   : > { %9771 = vmatmul.mubr.msk.f32.gmra.mxu1 %vm19077_vm14, %v19034_v46  ;;  %9827 = vmatmul.mubr.msk.f32.gmra.mxu0 %vm19079_vm13, %v19034_v46  ;;  %vm19085_vm13 = vnez %v19084_v19  ;;  %vm19091_vm14 = vnez %v19090_v31 }
 0xb38   : > { %9856 = vmatprep.subr.mxu1 %v15397_v56  ;;  %9912 = vmatprep.subr.mxu0 %v15397_v56 }
 0xb39   : > { %9773 = vmatprep.mubr.msk.f32.mxu1 %vm19081_vm7, %v19034_v46  ;;  %9829 = vmatprep.mubr.msk.f32.mxu0 %vm19083_vm1, %v19034_v46  ;;  %vm19087_vm7 = vnez %v19086_v7  ;;  %vm19089_vm1 = vnez %v19088_v30 }
 0xb3a   : > { %9857 = vmatpush3.msra.mxu1 %v15397_v56  ;;  %9913 = vmatpush3.msra.mxu0 %v15397_v56 }
 0xb3b   : > { %9858 = vmatprep.subr.mxu1 %v15409_v27  ;;  %9914 = vmatprep.subr.mxu0 %v15409_v27 }
 0xb3c   : > { %9859 = vmatpush3.msra.mxu1 %v15409_v27  ;;  %9915 = vmatpush3.msra.mxu0 %v15409_v27 }
 0xb3d   : > { %9774 = vmatmul.mubr.msk.f32.gmra.mxu1 %vm19085_vm13, %v19034_v46  ;;  %9830 = vmatmul.mubr.msk.f32.gmra.mxu0 %vm19087_vm7, %v19034_v46  ;;  %vm19093_vm7 = vnez %v19092_v38  ;;  %vm19099_vm13 = vnez %v19098_v50 }
 0xb3e   : > { %9860 = vmatprep.subr.mxu1 %v15417_v28  ;;  %9916 = vmatprep.subr.mxu0 %v15417_v28 }
 0xb3f   : > { %9861 = vmatpush3.msra.mxu1 %v15417_v28  ;;  %9864 = vmatprep.mubr.msk.f32.mxu1 %vm19089_vm1, %v19034_v46  ;;  %vm19095_vm1 = vnez %v19094_v12 }
 0xb40   : > { %9917 = vmatpush3.msra.mxu0 %v15417_v28  ;;  %9920 = vmatprep.mubr.msk.f32.mxu0 %vm19091_vm14, %v19034_v46  ;;  %vm19097_vm14 = vnez %v19096_v16 }
 0xb41   : > { %9862 = vmatprep.subr.mxu1 %v15424_v39  ;;  %9918 = vmatprep.subr.mxu0 %v15424_v39 }
 0xb42   : > { %9863 = vmatpush3.msra.mxu1 %v15424_v39  ;;  %9919 = vmatpush3.msra.mxu0 %v15424_v39 }
 0xb43   : > { %9865 = vmatmul.mubr.msk.f32.vlgmr.msra.gmra.mxu1 %vm19093_vm7, %v19034_v46  ;;  %9921 = vmatmul.mubr.msk.f32.vlgmr.msra.gmra.mxu0 %vm19095_vm1, %v19034_v46  ;;  %vm19101_vm1 = vnez %v19100_v17  ;;  %vm19107_vm7 = vnez %v19106_v45 }
 0xb44   : > { %9944 = vmatprep.subr.mxu1 %v15258_v14  ;;  %10000 = vmatprep.subr.mxu0 %v15258_v14 }
 0xb45   : > { %9867 = vmatprep.mubr.msk.f32.mxu1 %vm19097_vm14, %v19034_v46  ;;  %9923 = vmatprep.mubr.msk.f32.mxu0 %vm19099_vm13, %v19034_v46  ;;  %vm19103_vm14 = vnez %v19102_v9  ;;  %vm19105_vm13 = vnez %v19104_v35 }
 0xb46   : > { %9945 = vmatpush3.msra.mxu1 %v15258_v14  ;;  %10001 = vmatpush3.msra.mxu0 %v15258_v14 }
 0xb47   : > { %9946 = vmatprep.subr.mxu1 %v15268_v4  ;;  %10002 = vmatprep.subr.mxu0 %v15268_v4 }
 0xb48   : > { %9947 = vmatpush3.msra.mxu1 %v15268_v4  ;;  %10003 = vmatpush3.msra.mxu0 %v15268_v4 }
 0xb49   : > { %9868 = vmatmul.mubr.msk.f32.gmra.mxu1 %vm19101_vm1, %v19034_v46  ;;  %9924 = vmatmul.mubr.msk.f32.gmra.mxu0 %vm19103_vm14, %v19034_v46  ;;  %vm19109_vm14 = vnez %v19108_v2  ;;  %vm19115_vm1 = vnez %v19114_v15  ;;  %v19122_v15 = vld [vmem:[#allocation127_spill] sm:$0xff] }
 0xb4a   : > { %9948 = vmatprep.subr.mxu1 %v15277_v40  ;;  %10004 = vmatprep.subr.mxu0 %v15277_v40 }
 0xb4b   : > { %9870 = vmatprep.mubr.msk.f32.mxu1 %vm19105_vm13, %v19034_v46  ;;  %9926 = vmatprep.mubr.msk.f32.mxu0 %vm19107_vm7, %v19034_v46  ;;  %vm19111_vm13 = vnez %v19110_v11  ;;  %vm19113_vm7 = vnez %v19112_v25 }
 0xb4c   : > { %9949 = vmatpush3.msra.mxu1 %v15277_v40  ;;  %10005 = vmatpush3.msra.mxu0 %v15277_v40 }
 0xb4d   : > { %9950 = vmatprep.subr.mxu1 %v15291_v57  ;;  %10006 = vmatprep.subr.mxu0 %v15291_v57 }
 0xb4e   : > { %9951 = vmatpush3.msra.mxu1 %v15291_v57  ;;  %10007 = vmatpush3.msra.mxu0 %v15291_v57 }
 0xb4f   : > { %9871 = vmatmul.mubr.msk.f32.gmra.mxu1 %vm19109_vm14, %v19034_v46  ;;  %9927 = vmatmul.mubr.msk.f32.gmra.mxu0 %vm19111_vm13, %v19034_v46  ;;  %vm19117_vm13 = vnez %v19116_v22  ;;  %vm19123_vm14 = vnez %v19122_v15  ;;  %v19128_v15 = vld [vmem:[#allocation83_spill] sm:$0xff]  ;;  %v19130_v22 = vld [vmem:[#allocation129_spill] sm:$0xff] }
 0xb50   : > { %9952 = vmatprep.subr.mxu1 %v15301_v53  ;;  %10008 = vmatprep.subr.mxu0 %v15301_v53 }
 0xb51   : > { %9873 = vmatprep.mubr.msk.f32.mxu1 %vm19113_vm7, %v19034_v46  ;;  %9929 = vmatprep.mubr.msk.f32.mxu0 %vm19115_vm1, %v19034_v46  ;;  %vm19119_vm7 = vnez %v19118_v63  ;;  %vm19121_vm1 = vnez %v19120_v55  ;;  %v19124_v63 = vld [vmem:[#allocation82_spill] sm:$0xff]  ;;  %v19126_v55 = vld [vmem:[#allocation128_spill] sm:$0xff] }
 0xb52   : > { %9953 = vmatpush3.msra.mxu1 %v15301_v53  ;;  %10009 = vmatpush3.msra.mxu0 %v15301_v53 }
 0xb53   : > { %9954 = vmatprep.subr.mxu1 %v15317_v51  ;;  %10010 = vmatprep.subr.mxu0 %v15317_v51 }
 0xb54   : > { %9955 = vmatpush3.msra.mxu1 %v15317_v51  ;;  %10011 = vmatpush3.msra.mxu0 %v15317_v51 }
 0xb55   : > { %9874 = vmatmul.mubr.msk.f32.gmra.mxu1 %vm19117_vm13, %v19034_v46  ;;  %9930 = vmatmul.mubr.msk.f32.gmra.mxu0 %vm19119_vm7, %v19034_v46  ;;  %vm19125_vm7 = vnez %v19124_v63  ;;  %vm19131_vm13 = vnez %v19130_v22  ;;  %v19136_v22 = vld [vmem:[#allocation85_spill] sm:$0xff]  ;;  %v19138_v63 = vld [vmem:[#allocation131_spill] sm:$0xff] }
 0xb56   : > { %9956 = vmatprep.subr.mxu1 %v15328_v10  ;;  %10012 = vmatprep.subr.mxu0 %v15328_v10 }
 0xb57   : > { %9876 = vmatprep.mubr.msk.f32.mxu1 %vm19121_vm1, %v19034_v46  ;;  %9932 = vmatprep.mubr.msk.f32.mxu0 %vm19123_vm14, %v19034_v46  ;;  %vm19127_vm1 = vnez %v19126_v55  ;;  %vm19129_vm14 = vnez %v19128_v15  ;;  %v19132_v55 = vld [vmem:[#allocation84_spill] sm:$0xff]  ;;  %v19134_v15 = vld [vmem:[#allocation130_spill] sm:$0xff] }
 0xb58   : > { %9957 = vmatpush3.msra.mxu1 %v15328_v10  ;;  %10013 = vmatpush3.msra.mxu0 %v15328_v10 }
 0xb59   : > { %9958 = vmatprep.subr.mxu1 %v15340_v20  ;;  %10014 = vmatprep.subr.mxu0 %v15340_v20 }
 0xb5a   : > { %9959 = vmatpush3.msra.mxu1 %v15340_v20  ;;  %10015 = vmatpush3.msra.mxu0 %v15340_v20 }
 0xb5b   : > { %9877 = vmatmul.mubr.msk.f32.gmra.mxu1 %vm19125_vm7, %v19034_v46  ;;  %9933 = vmatmul.mubr.msk.f32.gmra.mxu0 %vm19127_vm1, %v19034_v46  ;;  %vm19133_vm1 = vnez %v19132_v55  ;;  %vm19139_vm7 = vnez %v19138_v63  ;;  %v19144_v63 = vld [vmem:[#allocation87_spill] sm:$0xff]  ;;  %v19146_v55 = vld [vmem:[#allocation88_spill] sm:$0xff] }
 0xb5c   : > { %9960 = vmatprep.subr.mxu1 %v15350_v54  ;;  %10016 = vmatprep.subr.mxu0 %v15350_v54 }
 0xb5d   : > { %9879 = vmatprep.mubr.msk.f32.mxu1 %vm19129_vm14, %v19034_v46  ;;  %9935 = vmatprep.mubr.msk.f32.mxu0 %vm19131_vm13, %v19034_v46  ;;  %vm19135_vm14 = vnez %v19134_v15  ;;  %vm19137_vm13 = vnez %v19136_v22  ;;  %v19140_v15 = vld [vmem:[#allocation86_spill] sm:$0xff]  ;;  %v19142_v22 = vld [vmem:[#allocation96_spill] sm:$0xff] }
 0xb5e   : > { %9961 = vmatpush3.msra.mxu1 %v15350_v54  ;;  %10017 = vmatpush3.msra.mxu0 %v15350_v54 }
 0xb5f   : > { %9962 = vmatprep.subr.mxu1 %v15365_v26  ;;  %10018 = vmatprep.subr.mxu0 %v15365_v26 }
 0xb60   : > { %9963 = vmatpush3.msra.mxu1 %v15365_v26  ;;  %10019 = vmatpush3.msra.mxu0 %v15365_v26 }
 0xb61   : > { %9880 = vmatmul.mubr.msk.f32.gmra.mxu1 %vm19133_vm1, %v19034_v46  ;;  %9936 = vmatmul.mubr.msk.f32.gmra.mxu0 %vm19135_vm14, %v19034_v46  ;;  %vm19141_vm14 = vnez %v19140_v15  ;;  %vm19147_vm1 = vnez %v19146_v55  ;;  %v19152_v55 = vld [vmem:[#allocation147_spill] sm:$0xff]  ;;  %v19154_v15 = vld [vmem:[#allocation138_spill] sm:$0xff] }
 0xb62   : > { %9964 = vmatprep.subr.mxu1 %v15375_v0  ;;  %10020 = vmatprep.subr.mxu0 %v15375_v0 }
 0xb63   : > { %9882 = vmatprep.mubr.msk.f32.mxu1 %vm19137_vm13, %v19034_v46  ;;  %9938 = vmatprep.mubr.msk.f32.mxu0 %vm19139_vm7, %v19034_v46  ;;  %vm19143_vm13 = vnez %v19142_v22  ;;  %vm19145_vm7 = vnez %v19144_v63  ;;  %v19148_v22 = vld [vmem:[#allocation89_spill] sm:$0xff] }
 0xb64   : > { %9965 = vmatpush3.msra.mxu1 %v15375_v0  ;;  %10021 = vmatpush3.msra.mxu0 %v15375_v0  ;;  %v19150_v63 = vld [vmem:[#allocation97_spill] sm:$0xff] }
 0xb65   : > { %9966 = vmatprep.subr.mxu1 %v15388_v37  ;;  %10022 = vmatprep.subr.mxu0 %v15388_v37 }
 0xb66   : > { %9967 = vmatpush3.msra.mxu1 %v15388_v37  ;;  %10023 = vmatpush3.msra.mxu0 %v15388_v37 }
 0xb67   : > { %9883 = vmatmul.mubr.msk.f32.gmra.mxu1 %vm19141_vm14, %v19034_v46  ;;  %9939 = vmatmul.mubr.msk.f32.gmra.mxu0 %vm19143_vm13, %v19034_v46  ;;  %vm19149_vm13 = vnez %v19148_v22  ;;  %vm19155_vm14 = vnez %v19154_v15  ;;  %v19160_v15 = vld [vmem:[#allocation148_spill] sm:$0xff]  ;;  %v19162_v22 = vld [vmem:[#allocation169_spill] sm:$0xff] }
 0xb68   : > { %9968 = vmatprep.subr.mxu1 %v15397_v56  ;;  %10024 = vmatprep.subr.mxu0 %v15397_v56 }
 0xb69   : > { %9885 = vmatprep.mubr.msk.f32.mxu1 %vm19145_vm7, %v19034_v46  ;;  %9941 = vmatprep.mubr.msk.f32.mxu0 %vm19147_vm1, %v19034_v46  ;;  %vm19151_vm7 = vnez %v19150_v63  ;;  %vm19153_vm1 = vnez %v19152_v55  ;;  %v19156_v63 = vld [vmem:[#allocation149_spill] sm:$0xff]  ;;  %v19158_v55 = vld [vmem:[#allocation170_spill] sm:$0xff] }
 0xb6a   : > { %9969 = vmatpush3.msra.mxu1 %v15397_v56  ;;  %10025 = vmatpush3.msra.mxu0 %v15397_v56 }
 0xb6b   : > { %9970 = vmatprep.subr.mxu1 %v15409_v27  ;;  %10026 = vmatprep.subr.mxu0 %v15409_v27 }
 0xb6c   : > { %9971 = vmatpush3.msra.mxu1 %v15409_v27  ;;  %10027 = vmatpush3.msra.mxu0 %v15409_v27 }
 0xb6d   : > { %9886 = vmatmul.mubr.msk.f32.gmra.mxu1 %vm19149_vm13, %v19034_v46  ;;  %9942 = vmatmul.mubr.msk.f32.gmra.mxu0 %vm19151_vm7, %v19034_v46  ;;  %vm19157_vm7 = vnez %v19156_v63  ;;  %vm19163_vm13 = vnez %v19162_v22  ;;  %v19170_v22 = vld [vmem:[#allocation172_spill] sm:$0xff] }
 0xb6e   : > { %9972 = vmatprep.subr.mxu1 %v15417_v28  ;;  %10028 = vmatprep.subr.mxu0 %v15417_v28 }
 0xb6f   : > { %9973 = vmatpush3.msra.mxu1 %v15417_v28  ;;  %9976 = vmatprep.mubr.msk.f32.mxu1 %vm19153_vm1, %v19034_v46  ;;  %vm19159_vm1 = vnez %v19158_v55  ;;  %v19164_v55 = vld [vmem:[#allocation150_spill] sm:$0xff] }
 0xb70   : > { %10029 = vmatpush3.msra.mxu0 %v15417_v28  ;;  %10032 = vmatprep.mubr.msk.f32.mxu0 %vm19155_vm14, %v19034_v46  ;;  %vm19161_vm14 = vnez %v19160_v15  ;;  %v19166_v15 = vld [vmem:[#allocation171_spill] sm:$0xff] }
 0xb71   : > { %9974 = vmatprep.subr.mxu1 %v15424_v39  ;;  %10030 = vmatprep.subr.mxu0 %v15424_v39 }
 0xb72   : > { %9975 = vmatpush3.msra.mxu1 %v15424_v39  ;;  %10031 = vmatpush3.msra.mxu0 %v15424_v39 }
 0xb73   : > { %9977 = vmatmul.mubr.msk.f32.vlgmr.msra.gmra.mxu1 %vm19157_vm7, %v19034_v46  ;;  %10033 = vmatmul.mubr.msk.f32.vlgmr.msra.gmra.mxu0 %vm19159_vm1, %v19034_v46  ;;  %vm19165_vm1 = vnez %v19164_v55  ;;  %vm19171_vm7 = vnez %v19170_v22  ;;  %v19178_v22 = vld [vmem:[#allocation174_spill] sm:$0xff] }
 0xb74   : > { %10056 = vmatprep.subr.mxu1 %v15258_v14  ;;  %10112 = vmatprep.subr.mxu0 %v15258_v14 }
 0xb75   : > { %9979 = vmatprep.mubr.msk.f32.mxu1 %vm19161_vm14, %v19034_v46  ;;  %10035 = vmatprep.mubr.msk.f32.mxu0 %vm19163_vm13, %v19034_v46  ;;  %vm19167_vm14 = vnez %v19166_v15 }
 0xb76   : > { %10057 = vmatpush3.msra.mxu1 %v15258_v14  ;;  %10113 = vmatpush3.msra.mxu0 %v15258_v14  ;;  %v19168_v14 = vld [vmem:[#allocation151_spill] sm:$0xff] }
 0xb77   : > { %10058 = vmatprep.subr.mxu1 %v15268_v4  ;;  %10114 = vmatprep.subr.mxu0 %v15268_v4  ;;  %vm19169_vm13 = vnez %v19168_v14  ;;  %v19174_v14 = vld [vmem:[#allocation173_spill] sm:$0xff] }
 0xb78   : > { %10059 = vmatpush3.msra.mxu1 %v15268_v4  ;;  %10115 = vmatpush3.msra.mxu0 %v15268_v4  ;;  %v19172_v4 = vld [vmem:[#allocation152_spill] sm:$0xff] }
 0xb79   : > { %9980 = vmatmul.mubr.msk.f32.gmra.mxu1 %vm19165_vm1, %v19034_v46  ;;  %10036 = vmatmul.mubr.msk.f32.gmra.mxu0 %vm19167_vm14, %v19034_v46  ;;  %vm19173_vm14 = vnez %v19172_v4  ;;  %vm19179_vm1 = vnez %v19178_v22  ;;  %v19186_v22 = vld [vmem:[#allocation176_spill] sm:$0xff] }
 0xb7a   : > { %10060 = vmatprep.subr.mxu1 %v15277_v40  ;;  %10116 = vmatprep.subr.mxu0 %v15277_v40 }
 0xb7b   : > { %9982 = vmatprep.mubr.msk.f32.mxu1 %vm19169_vm13, %v19034_v46  ;;  %10038 = vmatprep.mubr.msk.f32.mxu0 %vm19171_vm7, %v19034_v46  ;;  %vm19175_vm13 = vnez %v19174_v14 }
 0xb7c   : > { %10061 = vmatpush3.msra.mxu1 %v15277_v40  ;;  %10117 = vmatpush3.msra.mxu0 %v15277_v40  ;;  %v19176_v40 = vld [vmem:[#allocation153_spill] sm:$0xff] }
 0xb7d   : > { %10062 = vmatprep.subr.mxu1 %v15291_v57  ;;  %10118 = vmatprep.subr.mxu0 %v15291_v57  ;;  %vm19177_vm7 = vnez %v19176_v40  ;;  %v19182_v40 = vld [vmem:[#allocation175_spill] sm:$0xff] }
 0xb7e   : > { %10063 = vmatpush3.msra.mxu1 %v15291_v57  ;;  %10119 = vmatpush3.msra.mxu0 %v15291_v57  ;;  %v19180_v57 = vld [vmem:[#allocation154_spill] sm:$0xff] }
 0xb7f   : > { %9983 = vmatmul.mubr.msk.f32.gmra.mxu1 %vm19173_vm14, %v19034_v46  ;;  %10039 = vmatmul.mubr.msk.f32.gmra.mxu0 %vm19175_vm13, %v19034_v46  ;;  %vm19181_vm13 = vnez %v19180_v57  ;;  %vm19187_vm14 = vnez %v19186_v22  ;;  %v19194_v22 = vld [vmem:[#allocation178_spill] sm:$0xff] }
 0xb80   : > { %10064 = vmatprep.subr.mxu1 %v15301_v53  ;;  %10120 = vmatprep.subr.mxu0 %v15301_v53 }
 0xb81   : > { %9985 = vmatprep.mubr.msk.f32.mxu1 %vm19177_vm7, %v19034_v46  ;;  %10041 = vmatprep.mubr.msk.f32.mxu0 %vm19179_vm1, %v19034_v46  ;;  %vm19183_vm7 = vnez %v19182_v40 }
 0xb82   : > { %10065 = vmatpush3.msra.mxu1 %v15301_v53  ;;  %10121 = vmatpush3.msra.mxu0 %v15301_v53  ;;  %v19184_v53 = vld [vmem:[#allocation155_spill] sm:$0xff] }
 0xb83   : > { %10066 = vmatprep.subr.mxu1 %v15317_v51  ;;  %10122 = vmatprep.subr.mxu0 %v15317_v51  ;;  %vm19185_vm1 = vnez %v19184_v53  ;;  %v19190_v53 = vld [vmem:[#allocation177_spill] sm:$0xff] }
 0xb84   : > { %10067 = vmatpush3.msra.mxu1 %v15317_v51  ;;  %10123 = vmatpush3.msra.mxu0 %v15317_v51  ;;  %v19188_v51 = vld [vmem:[#allocation156_spill] sm:$0xff] }
 0xb85   : > { %9986 = vmatmul.mubr.msk.f32.gmra.mxu1 %vm19181_vm13, %v19034_v46  ;;  %10042 = vmatmul.mubr.msk.f32.gmra.mxu0 %vm19183_vm7, %v19034_v46  ;;  %vm19189_vm7 = vnez %v19188_v51  ;;  %vm19195_vm13 = vnez %v19194_v22  ;;  %v19202_v22 = vld [vmem:[#allocation180_spill] sm:$0xff] }
 0xb86   : > { %10068 = vmatprep.subr.mxu1 %v15328_v10  ;;  %10124 = vmatprep.subr.mxu0 %v15328_v10 }
 0xb87   : > { %9988 = vmatprep.mubr.msk.f32.mxu1 %vm19185_vm1, %v19034_v46  ;;  %10044 = vmatprep.mubr.msk.f32.mxu0 %vm19187_vm14, %v19034_v46  ;;  %vm19191_vm1 = vnez %v19190_v53 }
 0xb88   : > { %10069 = vmatpush3.msra.mxu1 %v15328_v10  ;;  %10125 = vmatpush3.msra.mxu0 %v15328_v10  ;;  %v19192_v10 = vld [vmem:[#allocation157_spill] sm:$0xff] }
 0xb89   : > { %10070 = vmatprep.subr.mxu1 %v15340_v20  ;;  %10126 = vmatprep.subr.mxu0 %v15340_v20  ;;  %vm19193_vm14 = vnez %v19192_v10  ;;  %v19198_v10 = vld [vmem:[#allocation179_spill] sm:$0xff] }
 0xb8a   : > { %10071 = vmatpush3.msra.mxu1 %v15340_v20  ;;  %10127 = vmatpush3.msra.mxu0 %v15340_v20  ;;  %v19196_v20 = vld [vmem:[#allocation158_spill] sm:$0xff] }
 0xb8b   : > { %9989 = vmatmul.mubr.msk.f32.gmra.mxu1 %vm19189_vm7, %v19034_v46  ;;  %10045 = vmatmul.mubr.msk.f32.gmra.mxu0 %vm19191_vm1, %v19034_v46  ;;  %vm19197_vm1 = vnez %v19196_v20  ;;  %vm19203_vm7 = vnez %v19202_v22  ;;  %v19210_v22 = vld [vmem:[#allocation182_spill] sm:$0xff] }
 0xb8c   : > { %10072 = vmatprep.subr.mxu1 %v15350_v54  ;;  %10128 = vmatprep.subr.mxu0 %v15350_v54 }
 0xb8d   : > { %9991 = vmatprep.mubr.msk.f32.mxu1 %vm19193_vm14, %v19034_v46  ;;  %10047 = vmatprep.mubr.msk.f32.mxu0 %vm19195_vm13, %v19034_v46  ;;  %vm19199_vm14 = vnez %v19198_v10 }
 0xb8e   : > { %10073 = vmatpush3.msra.mxu1 %v15350_v54  ;;  %10129 = vmatpush3.msra.mxu0 %v15350_v54  ;;  %v19200_v54 = vld [vmem:[#allocation159_spill] sm:$0xff] }
 0xb8f   : > { %10074 = vmatprep.subr.mxu1 %v15365_v26  ;;  %10130 = vmatprep.subr.mxu0 %v15365_v26  ;;  %vm19201_vm13 = vnez %v19200_v54  ;;  %v19206_v54 = vld [vmem:[#allocation181_spill] sm:$0xff] }
 0xb90   : > { %10075 = vmatpush3.msra.mxu1 %v15365_v26  ;;  %10131 = vmatpush3.msra.mxu0 %v15365_v26  ;;  %v19204_v26 = vld [vmem:[#allocation160_spill] sm:$0xff] }
 0xb91   : > { %9992 = vmatmul.mubr.msk.f32.gmra.mxu1 %vm19197_vm1, %v19034_v46  ;;  %10048 = vmatmul.mubr.msk.f32.gmra.mxu0 %vm19199_vm14, %v19034_v46  ;;  %vm19205_vm14 = vnez %v19204_v26  ;;  %vm19211_vm1 = vnez %v19210_v22 }
 0xb92   : > { %10076 = vmatprep.subr.mxu1 %v15375_v0  ;;  %10132 = vmatprep.subr.mxu0 %v15375_v0 }
 0xb93   : > { %9994 = vmatprep.mubr.msk.f32.mxu1 %vm19201_vm13, %v19034_v46  ;;  %10050 = vmatprep.mubr.msk.f32.mxu0 %vm19203_vm7, %v19034_v46  ;;  %vm19207_vm13 = vnez %v19206_v54 }
 0xb94   : > { %10077 = vmatpush3.msra.mxu1 %v15375_v0  ;;  %10133 = vmatpush3.msra.mxu0 %v15375_v0  ;;  %v19208_v0 = vld [vmem:[#allocation161_spill] sm:$0xff] }
 0xb95   : > { %10078 = vmatprep.subr.mxu1 %v15388_v37  ;;  %10134 = vmatprep.subr.mxu0 %v15388_v37  ;;  %vm19209_vm7 = vnez %v19208_v0  ;;  %v19214_v0 = vld [vmem:[#allocation162_spill] sm:$0xff] }
 0xb96   : > { %10079 = vmatpush3.msra.mxu1 %v15388_v37  ;;  %10135 = vmatpush3.msra.mxu0 %v15388_v37  ;;  %v19212_v37 = vld [vmem:[#allocation90_spill] sm:$0xff] }
 0xb97   : > { %9995 = vmatmul.mubr.msk.f32.gmra.mxu1 %vm19205_vm14, %v19034_v46  ;;  %10051 = vmatmul.mubr.msk.f32.gmra.mxu0 %vm19207_vm13, %v19034_v46  ;;  %vm19213_vm13 = vnez %v19212_v37  ;;  %v19227_v37 = vld [vmem:[#allocation189_spill] sm:$0xff] }
 0xb98   : > { %10080 = vmatprep.subr.mxu1 %v15397_v56  ;;  %10136 = vmatprep.subr.mxu0 %v15397_v56  ;;  %vm19228_vm14 = vnez %v19227_v37  ;;  %v19239_v37 = vld [vmem:[#allocation192_spill] sm:$0xff] }
 0xb99   : > { %9997 = vmatprep.mubr.msk.f32.mxu1 %vm19209_vm7, %v19034_v46  ;;  %10053 = vmatprep.mubr.msk.f32.mxu0 %vm19211_vm1, %v19034_v46  ;;  %vm19215_vm7 = vnez %v19214_v0  ;;  %v19219_v0 = vld [vmem:[#allocation188_spill] sm:$0xff] }
 0xb9a   : > { %10081 = vmatpush3.msra.mxu1 %v15397_v56  ;;  %10137 = vmatpush3.msra.mxu0 %v15397_v56  ;;  %v19216_v56 = vld [vmem:[#allocation186_spill] sm:$0xff] }
 0xb9b   : > { %10082 = vmatprep.subr.mxu1 %v15409_v27  ;;  %10138 = vmatprep.subr.mxu0 %v15409_v27  ;;  %vm19217_vm1 = vnez %v19216_v56  ;;  %v19221_v56 = vld [vmem:[#allocation204_spill] sm:$0xff] }
 0xb9c   : > { %10083 = vmatpush3.msra.mxu1 %v15409_v27  ;;  %10139 = vmatpush3.msra.mxu0 %v15409_v27  ;;  %v19225_v27 = vld [vmem:[#allocation203_spill] sm:$0xff] }
 0xb9d   : > { %9998 = vmatmul.mubr.msk.f32.gmra.mxu1 %vm19213_vm13, %v19034_v46  ;;  %10054 = vmatmul.mubr.msk.f32.gmra.mxu0 %vm19215_vm7, %v19034_v46  ;;  %vm19220_vm7 = vnez %v19219_v0  ;;  %v19231_v0 = vld [vmem:[#allocation190_spill] sm:$0xff] }
 0xb9e   : > { %10084 = vmatprep.subr.mxu1 %v15417_v28  ;;  %10140 = vmatprep.subr.mxu0 %v15417_v28 }
 0xb9f   : > { %10085 = vmatpush3.msra.mxu1 %v15417_v28  ;;  %10088 = vmatprep.mubr.msk.f32.mxu1 %vm19217_vm1, %v19034_v46  ;;  %vm19222_vm1 = vnez %v19221_v56  ;;  %v19233_v56 = vld [vmem:[#allocation206_spill] sm:$0xff] }
 0xba0   : > { %10141 = vmatpush3.msra.mxu0 %v15417_v28  ;;  %10144 = vmatprep.mubr.msk.f32.mxu0 %vm14991_vm9, %v19034_v46  ;;  %v19223_v28 = vld [vmem:[#allocation187_spill] sm:$0xff]  ;;  %vm19226_vm9 = vnez %v19225_v27 }
 0xba1   : > { %10086 = vmatprep.subr.mxu1 %v15424_v39  ;;  %10142 = vmatprep.subr.mxu0 %v15424_v39  ;;  %vm19224_vm13 = vnez %v19223_v28  ;;  %v19235_v28 = vld [vmem:[#allocation191_spill] sm:$0xff] }
 0xba2   : > { %10087 = vmatpush3.msra.mxu1 %v15424_v39  ;;  %10143 = vmatpush3.msra.mxu0 %v15424_v39  ;;  %v19229_v39 = vld [vmem:[#allocation205_spill] sm:$0xff]  ;;  %v19237_v27 = vld [vmem:[#allocation207_spill] sm:$0xff] }
 0xba3   : > { %10089 = vmatmul.mubr.msk.f32.vlgmr.msra.gmra.mxu1 %vm19220_vm7, %v19034_v46  ;;  %10145 = vmatmul.mubr.msk.f32.vlgmr.msra.gmra.mxu0 %vm19222_vm1, %v19034_v46  ;;  %vm19230_vm2 = vnez %v19229_v39  ;;  %vm19232_vm7 = vnez %v19231_v0  ;;  %vm19234_vm1 = vnez %v19233_v56  ;;  %v19241_v39 = vld [vmem:[#allocation208_spill] sm:$0xff]  ;;  %v19243_v0 = vld [vmem:[#allocation193_spill] sm:$0xff] }
 0xba4   : > { %10091 = vmatprep.mubr.msk.f32.mxu1 %vm19224_vm13, %v19034_v46  ;;  %10147 = vmatprep.mubr.msk.f32.mxu0 %vm19226_vm9, %v19034_v46  ;;  %vm19236_vm13 = vnez %v19235_v28  ;;  %vm19238_vm9 = vnez %v19237_v27  ;;  %v19245_v56 = vld [vmem:[#allocation209_spill] sm:$0xff]  ;;  %v19247_v28 = vld [vmem:[#allocation194_spill] sm:$0xff] }
 0xba5   : > { %v19249_v27 = vld [vmem:[#allocation210_spill] sm:$0xff] }
 0xba7   : > { %10092 = vmatmul.mubr.msk.f32.gmra.mxu1 %vm19228_vm14, %v19034_v46  ;;  %10148 = vmatmul.mubr.msk.f32.gmra.mxu0 %vm19230_vm2, %v19034_v46  ;;  %vm19240_vm14 = vnez %v19239_v37  ;;  %vm19242_vm2 = vnez %v19241_v39  ;;  %v19251_v37 = vld [vmem:[#allocation195_spill] sm:$0xff] }
 0xba8   : > { %10094 = vmatprep.mubr.msk.f32.mxu1 %vm19232_vm7, %v19034_v46  ;;  %10150 = vmatprep.mubr.msk.f32.mxu0 %vm19234_vm1, %v19034_v46  ;;  %vm19244_vm7 = vnez %v19243_v0  ;;  %vm19246_vm1 = vnez %v19245_v56  ;;  %v19253_v39 = vld [vmem:[#allocation211_spill] sm:$0xff]  ;;  %v19255_v0 = vld [vmem:[#allocation196_spill] sm:$0xff] }
 0xba9   : > { %v19257_v56 = vld [vmem:[#allocation212_spill] sm:$0xff] }
 0xbab   : > { %10095 = vmatmul.mubr.msk.f32.gmra.mxu1 %vm19236_vm13, %v19034_v46  ;;  %10151 = vmatmul.mubr.msk.f32.gmra.mxu0 %vm19238_vm9, %v19034_v46  ;;  %vm19248_vm13 = vnez %v19247_v28  ;;  %vm19250_vm9 = vnez %v19249_v27  ;;  %v19259_v28 = vld [vmem:[#allocation197_spill] sm:$0xff] }
 0xbac   : > { %10097 = vmatprep.mubr.msk.f32.mxu1 %vm19240_vm14, %v19034_v46  ;;  %10153 = vmatprep.mubr.msk.f32.mxu0 %vm19242_vm2, %v19034_v46  ;;  %vm19252_vm14 = vnez %v19251_v37  ;;  %vm19254_vm2 = vnez %v19253_v39  ;;  %v19261_v27 = vld [vmem:[#allocation213_spill] sm:$0xff]  ;;  %v19263_v37 = vld [vmem:[#allocation198_spill] sm:$0xff] }
 0xbad   : > { %v19265_v39 = vld [vmem:[#allocation214_spill] sm:$0xff] }
 0xbaf   : > { %10098 = vmatmul.mubr.msk.f32.gmra.mxu1 %vm19244_vm7, %v19034_v46  ;;  %10154 = vmatmul.mubr.msk.f32.gmra.mxu0 %vm19246_vm1, %v19034_v46  ;;  %vm19256_vm7 = vnez %v19255_v0  ;;  %vm19258_vm1 = vnez %v19257_v56  ;;  %v19267_v0 = vld [vmem:[#allocation199_spill] sm:$0xff] }
 0xbb0   : > { %10100 = vmatprep.mubr.msk.f32.mxu1 %vm19248_vm13, %v19034_v46  ;;  %10156 = vmatprep.mubr.msk.f32.mxu0 %vm19250_vm9, %v19034_v46  ;;  %vm19260_vm13 = vnez %v19259_v28  ;;  %vm19262_vm9 = vnez %v19261_v27  ;;  %v19270_v28 = vld [vmem:[#allocation200_spill] sm:$0xff] }
 0xbb3   : > { %10101 = vmatmul.mubr.msk.f32.gmra.mxu1 %vm19252_vm14, %v19034_v46  ;;  %10157 = vmatmul.mubr.msk.f32.gmra.mxu0 %vm19254_vm2, %v19034_v46  ;;  %vm19264_vm14 = vnez %v19263_v37  ;;  %vm19266_vm2 = vnez %v19265_v39  ;;  %v19273_v37 = vld [vmem:[#allocation201_spill] sm:$0xff] }
 0xbb4   : > { %10103 = vmatprep.mubr.msk.f32.mxu1 %vm19256_vm7, %v19034_v46  ;;  %10159 = vmatprep.mubr.msk.f32.mxu0 %vm19258_vm1, %v19034_v46  ;;  %vm19268_vm7 = vnez %v19267_v0  ;;  %v19276_v0 = vld [vmem:[#allocation41_spill] sm:$0xff] }
 0xbb7   : > { %10104 = vmatmul.mubr.msk.f32.gmra.mxu1 %vm19260_vm13, %v19034_v46  ;;  %10160 = vmatmul.mubr.msk.f32.gmra.mxu0 %vm19262_vm9, %v19034_v46  ;;  %vm19271_vm13 = vnez %v19270_v28 }
 0xbb8   : > { %10106 = vmatprep.mubr.msk.f32.mxu1 %vm19264_vm14, %v19034_v46  ;;  %10162 = vmatprep.mubr.msk.f32.mxu0 %vm19266_vm2, %v19034_v46  ;;  %vm19274_vm14 = vnez %v19273_v37 }
 0xbbb   : > { %10107 = vmatmul.mubr.msk.f32.gmra.mxu1 %vm19268_vm7, %v19034_v46  ;;  %10163 = vmatmul.mubr.msk.f32.gmra.mxu0 %vm15134_vm12, %v19034_v46  ;;  %vm19277_vm7 = vnez %v19276_v0 }
 0xbbc   : > { %10109 = vmatprep.mubr.msk.f32.mxu1 %vm19271_vm13, %v19034_v46  ;;  %10165 = vmatprep.mubr.msk.f32.mxu0 %vm15142_vm6, %v19034_v46 }
 0xbbf   : > { %10110 = vmatmul.mubr.msk.f32.gmra.mxu1 %vm19274_vm14, %v19034_v46  ;;  %10166 = vmatmul.mubr.msk.f32.gmra.mxu0 %vm15156_vm8, %v19034_v46 }
 0xbc0   : > { %10200 = vmatprep.mubr.msk.f32.mxu1 %vm19277_vm7, %v19034_v46  ;;  %10256 = vmatprep.mubr.msk.f32.mxu0 %vm12269_vm10, %v19034_v46 }
 0xbd3   : > { %v9754_v28 = vpop.f32.mrf.mxu1  ;;  %v9810_v22 = vpop.f32.mrf.mxu0 }
 0xbd4   : > { %v4325_v27 = vmax.f32 %v9754_v28, %v9810_v22 }
 0xbd5   : > { %v16010_v54 = vpop.f32.mrf.mxu1  ;;  %v16012_v26 = vpop.f32.mrf.mxu0 }
 0xbd6   : > { %19279 = vst [vmem:[#allocation145_spill] sm:$0xff] %v16010_v54  ;;  %19280 = vst [vmem:[#allocation116_spill] sm:$0xff] %v16012_v26 }
 0xbd9   : > { %v9757_v37 = vpop.f32.mrf.mxu1  ;;  %v9813_v10 = vpop.f32.mrf.mxu0 }
 0xbda   : > { %v4327_v20 = vmax.f32 %v9757_v37, %v9813_v10 }
 0xbdb   : > { %v16014_v39 = vpop.f32.mrf.mxu1  ;;  %v16016_v53 = vpop.f32.mrf.mxu0 }
 0xbdf   : > { %v9760_v0 = vpop.f32.mrf.mxu1  ;;  %v9816_v51 = vpop.f32.mrf.mxu0 }
 0xbe0   : > { %v4329_v40 = vmax.f32 %v9760_v0, %v9816_v51 }
 0xbe1   : > { %v16018_v57 = vpop.f32.mrf.mxu1  ;;  %v16020_v56 = vpop.f32.mrf.mxu0 }
 0xbe5   : > { %v9763_v14 = vpop.f32.mrf.mxu1  ;;  %v9819_v28 = vpop.f32.mrf.mxu0 }
 0xbe6   : > { %v4331_v22 = vmax.f32 %v9763_v14, %v9819_v28 }
 0xbe7   : > { %v16022_v4 = vpop.f32.mrf.mxu1  ;;  %v16024_v15 = vpop.f32.mrf.mxu0 }
 0xbeb   : > { %v9766_v55 = vpop.f32.mrf.mxu1  ;;  %v9822_v10 = vpop.f32.mrf.mxu0 }
 0xbec   : > { %v4333_v37 = vmax.f32 %v9766_v55, %v9822_v10 }
 0xbed   : > { %v16026_v63 = vpop.f32.mrf.mxu1  ;;  %v16028_v25 = vpop.f32.mrf.mxu0 }
 0xbf1   : > { %v9769_v11 = vpop.f32.mrf.mxu1  ;;  %v9825_v51 = vpop.f32.mrf.mxu0 }
 0xbf2   : > { %v4335_v0 = vmax.f32 %v9769_v11, %v9825_v51 }
 0xbf3   : > { %v16030_v2 = vpop.f32.mrf.mxu1  ;;  %v16032_v45 = vpop.f32.mrf.mxu0 }
 0xbf7   : > { %v9772_v35 = vpop.f32.mrf.mxu1  ;;  %v9828_v14 = vpop.f32.mrf.mxu0 }
 0xbf8   : > { %v4337_v28 = vmax.f32 %v9772_v35, %v9828_v14 }
 0xbf9   : > { %v16034_v9 = vpop.f32.mrf.mxu1  ;;  %v16036_v17 = vpop.f32.mrf.mxu0 }
 0xbfd   : > { %v16038_v50 = vpop.f32.mrf.mxu1  ;;  %v16040_v55 = vpop.f32.mrf.mxu0 }
 0xbff   : > { %v16044_v16 = vpop.f32.mrf.mxu1  ;;  %v16046_v11 = vpop.f32.mrf.mxu0 }
 0xc03   : > { %v9866_v51 = vpop.f32.mrf.mxu1  ;;  %v9922_v12 = vpop.f32.mrf.mxu0 }
 0xc04   : > { %v4486_v38 = vmax.f32 %v4325_v27, %v9866_v51 }
 0xc05   : > { %v16048_v31 = vpop.f32.mrf.mxu1  ;;  %v16050_v35 = vpop.f32.mrf.mxu0 }
 0xc06   : > { %19281 = vst [vmem:[#allocation144_spill] sm:$0xff] %v16048_v31  ;;  %19282 = vst [vmem:[#allocation115_spill] sm:$0xff] %v16050_v35  ;;  %v4647_v14 = vmax.f32 %v4486_v38, %v9922_v12 }
 0xc09   : > { %v9869_v30 = vpop.f32.mrf.mxu1  ;;  %v9925_v7 = vpop.f32.mrf.mxu0 }
 0xc0a   : > { %v4488_v19 = vmax.f32 %v4327_v20, %v9869_v30 }
 0xc0b   : > { %v16052_v49 = vpop.f32.mrf.mxu1  ;;  %v16054_v32 = vpop.f32.mrf.mxu0 }
 0xc0c   : > { %19283 = vst [vmem:[#allocation107_spill] sm:$0xff] %v16052_v49  ;;  %19284 = vst [vmem:[#allocation94_spill] sm:$0xff] %v16054_v32  ;;  %v4649_v10 = vmax.f32 %v4488_v19, %v9925_v7 }
 0xc0f   : > { %v9872_v34 = vpop.f32.mrf.mxu1  ;;  %v9928_v23 = vpop.f32.mrf.mxu0 }
 0xc10   : > { %v4490_v52 = vmax.f32 %v4329_v40, %v9872_v34 }
 0xc11   : > { %v16056_v13 = vpop.f32.mrf.mxu1  ;;  %v16058_v21 = vpop.f32.mrf.mxu0 }
 0xc12   : > { %19285 = vst [vmem:[#allocation143_spill] sm:$0xff] %v16058_v21  ;;  %v4651_v27 = vmax.f32 %v4490_v52, %v9928_v23 }
 0xc15   : > { %v9875_v51 = vpop.f32.mrf.mxu1  ;;  %v16060_v58 = vpop.f32.mrf.mxu0 }
 0xc16   : > { %v16062_v38 = vmax.f32 %v4331_v22, %v9875_v51 }
 0xc17   : > { %v16064_v12 = vpop.f32.mrf.mxu1  ;;  %v16066_v20 = vpop.f32.mrf.mxu0 }
 0xc1b   : > { %v9878_v7 = vpop.f32.mrf.mxu1  ;;  %v16070_v30 = vpop.f32.mrf.mxu0 }
 0xc1c   : > { %v16072_v40 = vmax.f32 %v4333_v37, %v9878_v7 }
 0xc1d   : > { %v16074_v34 = vpop.f32.mrf.mxu1  ;;  %v16076_v52 = vpop.f32.mrf.mxu0 }
 0xc21   : > { %v9881_v22 = vpop.f32.mrf.mxu1  ;;  %v16080_v51 = vpop.f32.mrf.mxu0 }
 0xc22   : > { %v16082_v36 = vmax.f32 %v4335_v0, %v9881_v22 }
 0xc23   : > { %v16084_v59 = vpop.f32.mrf.mxu1  ;;  %v16086_v19 = vpop.f32.mrf.mxu0 }
 0xc27   : > { %v9884_v7 = vpop.f32.mrf.mxu1  ;;  %v16090_v1 = vpop.f32.mrf.mxu0 }
 0xc28   : > { %v16092_v5 = vmax.f32 %v4337_v28, %v9884_v7 }
 0xc29   : > { %v16094_v61 = vpop.f32.mrf.mxu1  ;;  %v16096_v23 = vpop.f32.mrf.mxu0 }
 0xc2d   : > { %v9887_v22 = vpop.f32.mrf.mxu1  ;;  %v16100_v33 = vpop.f32.mrf.mxu0 }
 0xc2f   : > { %v16102_v48 = vpop.f32.mrf.mxu1  ;;  %v16104_v3 = vpop.f32.mrf.mxu0 }
 0xc33   : > { %v9978_v37 = vpop.f32.mrf.mxu1  ;;  %v16106_v8 = vpop.f32.mrf.mxu0 }
 0xc34   : > { %19286 = vst [vmem:[#allocation113_spill] sm:$0xff] %v16106_v8  ;;  %v16108_v44 = vmax.f32 %v4647_v14, %v9978_v37 }
 0xc35   : > { %v16110_v28 = vpop.f32.mrf.mxu1  ;;  %v16112_v7 = vpop.f32.mrf.mxu0 }
 0xc36   : > { %19287 = vst [vmem:[#allocation142_spill] sm:$0xff] %v16108_v44  ;;  %19288 = vst [vmem:[#allocation112_spill] sm:$0xff] %v16110_v28 }
 0xc37   : > { %19289 = vst [vmem:[#allocation104_spill] sm:$0xff] %v16112_v7 }
 0xc39   : > { %v9981_v0 = vpop.f32.mrf.mxu1  ;;  %v16116_v62 = vpop.f32.mrf.mxu0 }
 0xc3a   : > { %19290 = vst [vmem:[#allocation93_spill] sm:$0xff] %v16116_v62  ;;  %v16118_v60 = vmax.f32 %v4649_v10, %v9981_v0 }
 0xc3b   : > { %v16120_v18 = vpop.f32.mrf.mxu1  ;;  %v16122_v24 = vpop.f32.mrf.mxu0 }
 0xc3c   : > { %19291 = vst [vmem:[#allocation141_spill] sm:$0xff] %v16118_v60  ;;  %19292 = vst [vmem:[#allocation111_spill] sm:$0xff] %v16120_v18 }
 0xc3d   : > { %19293 = vst [vmem:[#allocation140_spill] sm:$0xff] %v16122_v24 }
 0xc3f   : > { %v9984_v37 = vpop.f32.mrf.mxu1  ;;  %v16126_v41 = vpop.f32.mrf.mxu0 }
 0xc40   : > { %19294 = vst [vmem:[#allocation109_spill] sm:$0xff] %v16126_v41  ;;  %v16128_v47 = vmax.f32 %v4651_v27, %v9984_v37 }
 0xc41   : > { %v16130_v42 = vpop.f32.mrf.mxu1  ;;  %v16132_v43 = vpop.f32.mrf.mxu0 }
 0xc42   : > { %19295 = vst [vmem:[#allocation101_spill] sm:$0xff] %v16128_v47  ;;  %19296 = vst [vmem:[#allocation92_spill] sm:$0xff] %v16130_v42 }
 0xc43   : > { %19297 = vst [vmem:[#allocation139_spill] sm:$0xff] %v16132_v43 }
 0xc45   : > { %v16136_v0 = vpop.f32.mrf.mxu1  ;;  %v16138_v6 = vpop.f32.mrf.mxu0 }
 0xc46   : > { %19298 = vst [vmem:[#allocation108_spill] sm:$0xff] %v16138_v6 }
 0xc47   : > { %v16140_v29 = vpop.f32.mrf.mxu1  ;;  %v16142_v46 = vpop.f32.mrf.mxu0 }
 0xc48   : > { %19299 = vst [vmem:[#allocation99_spill] sm:$0xff] %v16140_v29  ;;  %19300 = vst [vmem:[#allocation91_spill] sm:$0xff] %v16142_v46 }
 0xc4b   : > { %v16144_v14 = vpop.f32.mrf.mxu1  ;;  %v16146_v8 = vpop.f32.mrf.mxu0 }
 0xc4d   : > { %v16148_v27 = vpop.f32.mrf.mxu1  ;;  %v16150_v37 = vpop.f32.mrf.mxu0 }
 0xc4e   : > { %19301 = vst [vmem:[#allocation137_spill] sm:$0xff] %v16150_v37 }
 0xc51   : > { %v9993_v44 = vpop.f32.mrf.mxu1  ;;  %v16152_v7 = vpop.f32.mrf.mxu0 }
 0xc53   : > { %v16154_v10 = vpop.f32.mrf.mxu1  ;;  %v16156_v62 = vpop.f32.mrf.mxu0 }
 0xc57   : > { %v9996_v60 = vpop.f32.mrf.mxu1  ;;  %v16158_v24 = vpop.f32.mrf.mxu0 }
 0xc59   : > { %v4788_v28 = vpop.f32.mrf.mxu1  ;;  %v16160_v35 = vpop.f32.mrf.mxu0 }
 0xc5d   : > { %v9999_v41 = vpop.f32.mrf.mxu1  ;;  %v10055_v47 = vpop.f32.mrf.mxu0 }
 0xc5f   : > { %v4798_v43 = vpop.f32.mrf.mxu1  ;;  %v4959_v18 = vpop.f32.mrf.mxu0 }
 0xc63   : > { %v16162_v32 = vpop.f32.mrf.mxu1  ;;  %v16164_v31 = vpop.f32.mrf.mxu0 }
 0xc64   : > { %19302 = vst [vmem:[#allocation106_spill] sm:$0xff] %v16162_v32  ;;  %19303 = vst [vmem:[#allocation168_spill] sm:$0xff] %v16164_v31 }
 0xc65   : > { %v16166_v46 = vpop.f32.mrf.mxu1  ;;  %v16168_v42 = vpop.f32.mrf.mxu0 }
 0xc66   : > { %19304 = vst [vmem:[#allocation222_spill] sm:$0xff] %v16166_v46  ;;  %19305 = vst [vmem:[#allocation227_spill] sm:$0xff] %v16168_v42 }
 0xc67   : > { %v16170_v54 = vpop.f32.mrf.mxu1  ;;  %v16172_v26 = vpop.f32.mrf.mxu0 }
 0xc68   : > { %19306 = vst [vmem:[#allocation135_spill] sm:$0xff] %v16170_v54  ;;  %19307 = vst [vmem:[#allocation185_spill] sm:$0xff] %v16172_v26 }
 0xc69   : > { %v16174_v6 = vpop.f32.mrf.mxu1  ;;  %v16176_v21 = vpop.f32.mrf.mxu0 }
 0xc6a   : > { %19308 = vst [vmem:[#allocation220_spill] sm:$0xff] %v16174_v6  ;;  %19309 = vst [vmem:[#allocation136_spill] sm:$0xff] %v16176_v21  ;;  %v4338_v21 = vmax.f32 %v16044_v16, %v16046_v11 }
 0xc6b   : > { %v16178_v49 = vpop.f32.mrf.mxu1  ;;  %v16180_v37 = vpop.f32.mrf.mxu0 }
 0xc6c   : > { %19310 = vst [vmem:[#allocation184_spill] sm:$0xff] %v16178_v49  ;;  %19311 = vst [vmem:[#allocation228_spill] sm:$0xff] %v16180_v37  ;;  %v19319_v37 = vmax.f32 %v16038_v50, %v16040_v55  ;;  %v4334_v50 = vmax.f32 %v16030_v2, %v16032_v45 }
 0xc6d   : > { %v16182_v29 = vpop.f32.mrf.mxu1  ;;  %v16184_v32 = vpop.f32.mrf.mxu0 }
 0xc6e   : > { %19312 = vst [vmem:[#allocation167_spill] sm:$0xff] %v16182_v29  ;;  %19313 = vst [vmem:[#allocation221_spill] sm:$0xff] %v16184_v32  ;;  %v4500_v29 = vmax.f32 %v19319_v37, %v9887_v22 }
 0xc6f   : > { %v16186_v31 = vpop.f32.mrf.mxu1  ;;  %v16188_v46 = vpop.f32.mrf.mxu0 }
 0xc70   : > { %19314 = vst [vmem:[#allocation225_spill] sm:$0xff] %v16186_v31  ;;  %19315 = vst [vmem:[#allocation183_spill] sm:$0xff] %v16188_v46  ;;  %v4336_v46 = vmax.f32 %v16034_v9, %v16036_v17  ;;  %v4661_v16 = vmax.f32 %v4500_v29, %v16100_v33  ;;  %v4495_v17 = vmax.f32 %v4334_v50, %v16084_v59 }
 0xc71   : > { %v16190_v42 = vpop.f32.mrf.mxu1  ;;  %v16192_v54 = vpop.f32.mrf.mxu0  ;;  %v4332_v33 = vmax.f32 %v16026_v63, %v16028_v25 }
 0xc72   : > { %19316 = vst [vmem:[#allocation218_spill] sm:$0xff] %v16190_v42  ;;  %19317 = vst [vmem:[#allocation134_spill] sm:$0xff] %v16192_v54  ;;  %v4499_v54 = vmax.f32 %v4338_v21, %v16102_v48  ;;  %v4822_v37 = vmax.f32 %v4661_v16, %v9999_v41  ;;  %v4656_v41 = vmax.f32 %v4495_v17, %v16086_v19  ;;  %v19333_v17 = vld [vmem:[#allocation145_spill] sm:$0xff] }
 0xc73   : > { %v16194_v26 = vpop.f32.mrf.mxu1  ;;  %v16196_v6 = vpop.f32.mrf.mxu0 }
 0xc74   : > { %19318 = vst [vmem:[#allocation163_spill] sm:$0xff] %v16196_v6  ;;  %v4497_v6 = vmax.f32 %v4336_v46, %v16094_v61  ;;  %v4660_v22 = vmax.f32 %v4499_v54, %v16104_v3  ;;  %v19322_v46 = vmax.f32 %v16092_v5, %v16090_v1  ;;  %v4493_v54 = vmax.f32 %v4332_v33, %v16074_v34 }
 0xc75   : > { %v16203_v32 = vpop.f32.mrf.mxu1  ;;  %v16205_v49 = vpop.f32.mrf.mxu0  ;;  %v4330_v1 = vmax.f32 %v16022_v4, %v16024_v15  ;;  %v4817_v25 = vmax.f32 %v4656_v41, %v16154_v10  ;;  %v19339_v41 = vld [vmem:[#allocation94_spill] sm:$0xff] }
 0xc76   : > { %19320 = vst [vmem:[#allocation226_spill] sm:$0xff] %v16205_v49  ;;  %v4658_v21 = vmax.f32 %v4497_v6, %v16096_v23  ;;  %v4820_v61 = vmax.f32 %v19322_v46, %v9996_v60  ;;  %v4821_v29 = vmax.f32 %v4660_v22, %v4798_v43  ;;  %v19323_v6 = vmax.f32 %v16082_v36, %v16080_v51  ;;  %v19335_v46 = vld [vmem:[#allocation91_spill] sm:$0xff] }
 0xc77   : > { %v10105_v42 = vpop.f32.mrf.mxu1  ;;  %v16210_v31 = vpop.f32.mrf.mxu0  ;;  %v4491_v16 = vmax.f32 %v4330_v1, %v16064_v12  ;;  %v4978_v12 = vmax.f32 %v4817_v25, %v16156_v62  ;;  %v19343_v1 = vld [vmem:[#allocation139_spill] sm:$0xff] }
 0xc78   : > { %v4819_v49 = vmax.f32 %v4658_v21, %v4788_v28  ;;  %v4818_v23 = vmax.f32 %v19323_v6, %v9993_v44  ;;  %v4981_v60 = vmax.f32 %v4820_v61, %v16158_v24  ;;  %v4982_v43 = vmax.f32 %v4821_v29, %v4959_v18  ;;  %v19336_v29 = vld [vmem:[#allocation225_spill] sm:$0xff] }
 0xc79   : > { %v5100_v55 = vpop.f32.mrf.mxu1  ;;  %v16216_v11 = vpop.f32.mrf.mxu0  ;;  %v4654_v44 = vmax.f32 %v4493_v54, %v16076_v52  ;;  %v19324_v24 = vmax.f32 %v16072_v40, %v16070_v30 }
 0xc7a   : > { %19321 = vst [vmem:[#allocation219_spill] sm:$0xff] %v16216_v11  ;;  %v4983_v11 = vmax.f32 %v4822_v37, %v10055_v47  ;;  %v4980_v63 = vmax.f32 %v4819_v49, %v16160_v35  ;;  %v4979_v4 = vmax.f32 %v4818_v23, %v16152_v7  ;;  %v4328_v49 = vmax.f32 %v16018_v57, %v16020_v56 }
 0xc7b   : > { %v10108_v9 = vpop.f32.mrf.mxu1  ;;  %v10164_v48 = vpop.f32.mrf.mxu0  ;;  %v4816_v18 = vmax.f32 %v19324_v24, %v16144_v14  ;;  %v4815_v35 = vmax.f32 %v4654_v44, %v16148_v27  ;;  %v4652_v7 = vmax.f32 %v4491_v16, %v16066_v20  ;;  %v19325_v57 = vmax.f32 %v16062_v38, %v16060_v58  ;;  %v19326_v20 = vld [vmem:[#allocation99_spill] sm:$0xff]  ;;  %v19327_v58 = vld [vmem:[#allocation137_spill] sm:$0xff] }
 0xc7c   : > { %v5142_v34 = vmax.f32 %v4981_v60, %v10108_v9  ;;  %v5140_v30 = vmax.f32 %v4979_v4, %v10105_v42  ;;  %v4489_v52 = vmax.f32 %v4328_v49, %v16056_v13  ;;  %v5139_v62 = vmax.f32 %v4978_v12, %v5100_v55  ;;  %v19328_v27 = vld [vmem:[#allocation107_spill] sm:$0xff]  ;;  %v19330_v55 = vld [vmem:[#allocation108_spill] sm:$0xff]  ;;  %v19351_v49 = vld [vmem:[#allocation134_spill] sm:$0xff] }
 0xc7d   : > { %v5110_v45 = vpop.f32.mrf.mxu1  ;;  %v5271_v2 = vpop.f32.mrf.mxu0  ;;  %v4814_v56 = vmax.f32 %v19325_v57, %v16136_v0  ;;  %v4977_v42 = vmax.f32 %v4816_v18, %v16146_v8  ;;  %v4326_v13 = vmax.f32 %v16014_v39, %v16016_v53  ;;  %v4813_v10 = vmax.f32 %v4652_v7, %v19326_v20  ;;  %v19329_v53 = vld [vmem:[#allocation143_spill] sm:$0xff]  ;;  %v19341_v23 = vld [vmem:[#allocation226_spill] sm:$0xff]  ;;  %v19352_v12 = vld [vmem:[#allocation112_spill] sm:$0xff] }
 0xc7e   : > { %v5141_v15 = vmax.f32 %v4980_v63, %v5110_v45  ;;  %v16255_v40 = vmax.f32 %v5142_v34, %v10164_v48  ;;  %v4976_v38 = vmax.f32 %v4815_v35, %v19327_v58  ;;  %v16280_v0 = vmax.f32 %v5140_v30, %v16210_v31  ;;  %v19332_v31 = vld [vmem:[#allocation116_spill] sm:$0xff]  ;;  %v19337_v33 = vld [vmem:[#allocation163_spill] sm:$0xff]  ;;  %v19345_v63 = vld [vmem:[#allocation101_spill] sm:$0xff] }
 0xc7f   : > { %v10111_v3 = vpop.f32.mrf.mxu1  ;;  %v10167_v59 = vpop.f32.mrf.mxu0  ;;  %v5138_v8 = vmax.f32 %v4977_v42, %v16194_v26  ;;  %v4487_v50 = vmax.f32 %v4326_v13, %v19328_v27  ;;  %v4650_v39 = vmax.f32 %v4489_v52, %v19329_v53  ;;  %v4324_v9 = vmax.f32 %v19333_v17, %v19332_v31  ;;  %v19334_v48 = vld [vmem:[#allocation92_spill] sm:$0xff]  ;;  %v19346_v34 = vld [vmem:[#allocation109_spill] sm:$0xff]  ;;  %v19348_v44 = vld [vmem:[#allocation183_spill] sm:$0xff] }
 0xc80   : > { %v5144_v5 = vmax.f32 %v4983_v11, %v10111_v3  ;;  %v16268_v14 = vmax.f32 %v5141_v15, %v5271_v2  ;;  %v4975_v11 = vmax.f32 %v4814_v56, %v19330_v55  ;;  %v5137_v22 = vmax.f32 %v4976_v38, %v16203_v32  ;;  %v19338_v2 = vld [vmem:[#allocation144_spill] sm:$0xff]  ;;  %v19349_v18 = vld [vmem:[#allocation115_spill] sm:$0xff]  ;;  %v19355_v56 = vld [vmem:[#allocation141_spill] sm:$0xff] }
 0xc81   : > { %v5120_v47 = vpop.f32.mrf.mxu1  ;;  %v5281_v36 = vpop.f32.mrf.mxu0  ;;  %v19331_v26 = vld [vmem:[#allocation219_spill] sm:$0xff]  ;;  %v4811_v21 = vmax.f32 %v4650_v39, %v19334_v48  ;;  %v4974_v61 = vmax.f32 %v4813_v10, %v19335_v46  ;;  %v16303_v45 = vmax.f32 %v5138_v8, %v19337_v33  ;;  %v4485_v54 = vmax.f32 %v4324_v9, %v19338_v2  ;;  %v19353_v52 = vld [vmem:[#allocation140_spill] sm:$0xff]  ;;  %v19356_v42 = vld [vmem:[#allocation93_spill] sm:$0xff] }
 0xc82   : > { %v16236_v19 = vmax.f32 %v5144_v5, %v10167_v59  ;;  %v5143_v28 = vmax.f32 %v4982_v43, %v5120_v47  ;;  %v16291_v37 = vmax.f32 %v5139_v62, %v19331_v26  ;;  %v5136_v32 = vmax.f32 %v4975_v11, %v19336_v29  ;;  %v19340_v59 = vld [vmem:[#allocation218_spill] sm:$0xff]  ;;  %v19342_v43 = vld [vmem:[#allocation111_spill] sm:$0xff]  ;;  %v19344_v47 = vld [vmem:[#allocation184_spill] sm:$0xff] }
 0xc83   : > { %v4648_v3 = vmax.f32 %v4487_v50, %v19339_v41  ;;  %v5135_v6 = vmax.f32 %v4974_v61, %v19340_v59  ;;  %v16313_v60 = vmax.f32 %v5137_v22, %v19341_v23  ;;  %v4972_v25 = vmax.f32 %v4811_v21, %v19343_v1  ;;  %v19350_v4 = vld [vmem:[#allocation167_spill] sm:$0xff]  ;;  %v19358_v20 = vld [vmem:[#allocation228_spill] sm:$0xff]  ;;  %v19360_v8 = vld [vmem:[#allocation221_spill] sm:$0xff] }
 0xc84   : > { %v16245_v51 = vmax.f32 %v5143_v28, %v5281_v36  ;;  %10168 = vmatprep.subr.mxu1 %v16236_v19  ;;  %10224 = vmatprep.subr.mxu0 %v16236_v19  ;;  %v19347_v28 = vmax.f32 %v19345_v63, %v19346_v34  ;;  %v16326_v24 = vmax.f32 %v5136_v32, %v19348_v44  ;;  %v19354_v57 = vld [vmem:[#allocation135_spill] sm:$0xff]  ;;  %v19359_v58 = vld [vmem:[#allocation220_spill] sm:$0xff]  ;;  %v19362_v39 = vld [vmem:[#allocation106_spill] sm:$0xff]  ;;  %v19371_v2 = vmov 1.0  }
 0xc85   : > { %10169 = vmatpush3.msra.mxu1 %v16236_v19  ;;  %10225 = vmatpush3.msra.mxu0 %v16236_v19  ;;  %v4809_v5 = vmax.f32 %v4648_v3, %v19342_v43  ;;  %v4646_v36 = vmax.f32 %v4485_v54, %v19349_v18  ;;  %v5133_v15 = vmax.f32 %v4972_v25, %v19350_v4  ;;  %v19361_v50 = vld [vmem:[#allocation104_spill] sm:$0xff]  ;;  %v19363_v55 = vld [vmem:[#allocation142_spill] sm:$0xff]  ;;  %v19364_v11 = vld [vmem:[#allocation113_spill] sm:$0xff] }
 0xc86   : > { %10170 = vmatprep.subr.mxu1 %v16245_v51  ;;  %10226 = vmatprep.subr.mxu0 %v16245_v51  ;;  %v5134_v16 = vmax.f32 %v19347_v28, %v19344_v47  ;;  %v16335_v35 = vmax.f32 %v5135_v6, %v19351_v49  ;;  %v19357_v62 = vmax.f32 %v19355_v56, %v19356_v42  ;;  %v19366_v31 = vld [vmem:[#allocation185_spill] sm:$0xff]  ;;  %v19367_v9 = vld [vmem:[#allocation222_spill] sm:$0xff]  ;;  %v19368_v21 = vld [vmem:[#allocation136_spill] sm:$0xff] }
 0xc87   : > { %10171 = vmatpush3.msra.mxu1 %v16245_v51  ;;  %10227 = vmatpush3.msra.mxu0 %v16245_v51  ;;  %v4807_v30 = vmax.f32 %v4646_v36, %v19352_v12  ;;  %v4970_v7 = vmax.f32 %v4809_v5, %v19353_v52  ;;  %v16356_v27 = vmax.f32 %v5133_v15, %v19360_v8  ;;  %v19369_v61 = vld [vmem:[#allocation168_spill] sm:$0xff]  ;;  %v19370_v32 = vld [vmem:[#allocation227_spill] sm:$0xff]  ;;  %v19378_v43 = vld [vmem:[#allocation45_spill] sm:$0xff] }
 0xc88   : > { %10172 = vmatprep.subr.mxu1 %v16255_v40  ;;  %10228 = vmatprep.subr.mxu0 %v16255_v40  ;;  %v5132_v13 = vmax.f32 %v19357_v62, %v19354_v57  ;;  %v16348_v10 = vmax.f32 %v5134_v16, %v19358_v20  ;;  %v19365_v22 = vmax.f32 %v19363_v55, %v19364_v11  ;;  %v19380_v5 = vld [vmem:[#allocation61_spill] sm:$0xff]  ;;  %v19382_v1 = vld [vmem:[#allocation46_spill] sm:$0xff]  ;;  %v19386_v47 = vld [vmem:[#allocation47_spill] sm:$0xff] }
 0xc89   : > { %10173 = vmatpush3.msra.mxu1 %v16255_v40  ;;  %10229 = vmatpush3.msra.mxu0 %v16255_v40  ;;  %v5131_v38 = vmax.f32 %v4970_v7, %v19359_v58  ;;  %v4968_v53 = vmax.f32 %v4807_v30, %v19361_v50  ;;  %v19384_v25 = vld [vmem:[#allocation62_spill] sm:$0xff]  ;;  %vm19387_vm10 = vnez %v19386_v47  ;;  %v19388_v63 = vld [vmem:[#allocation63_spill] sm:$0xff]  ;;  %v19390_v34 = vld [vmem:[#allocation48_spill] sm:$0xff] }
 0xc8a   : > { %10174 = vmatprep.subr.mxu1 %v16268_v14  ;;  %10230 = vmatprep.subr.mxu0 %v16268_v14  ;;  %v5130_v26 = vmax.f32 %v19365_v22, %v19362_v39  ;;  %v16368_v17 = vmax.f32 %v5132_v13, %v19366_v31  ;;  %v19392_v28 = vld [vmem:[#allocation64_spill] sm:$0xff]  ;;  %v19394_v16 = vld [vmem:[#allocation49_spill] sm:$0xff]  ;;  %v19398_v18 = vld [vmem:[#allocation50_spill] sm:$0xff] }
 0xc8b   : > { %10175 = vmatpush3.msra.mxu1 %v16268_v14  ;;  %10231 = vmatpush3.msra.mxu0 %v16268_v14  ;;  %v5129_v48 = vmax.f32 %v4968_v53, %v19367_v9  ;;  %v16376_v46 = vmax.f32 %v5131_v38, %v19368_v21  ;;  %vm19393_vm7 = vnez %v19392_v28  ;;  %v19396_v44 = vld [vmem:[#allocation65_spill] sm:$0xff]  ;;  %v19400_v36 = vld [vmem:[#allocation66_spill] sm:$0xff]  ;;  %v19402_v4 = vld [vmem:[#allocation51_spill] sm:$0xff] }
 0xc8c   : > { %10176 = vmatprep.subr.mxu1 %v16280_v0  ;;  %10232 = vmatprep.subr.mxu0 %v16280_v0  ;;  %v16383_v29 = vmax.f32 %v5130_v26, %v19369_v61  ;;  %v19404_v15 = vld [vmem:[#allocation67_spill] sm:$0xff]  ;;  %v19406_v49 = vld [vmem:[#allocation52_spill] sm:$0xff]  ;;  %v19410_v30 = vld [vmem:[#allocation53_spill] sm:$0xff] }
 0xc8d   : > { %10177 = vmatpush3.msra.mxu1 %v16280_v0  ;;  %10233 = vmatpush3.msra.mxu0 %v16280_v0  ;;  %v16390_v33 = vmax.f32 %v5129_v48, %v19370_v32  ;;  %v19408_v12 = vld [vmem:[#allocation68_spill] sm:$0xff]  ;;  %v19412_v52 = vld [vmem:[#allocation69_spill] sm:$0xff]  ;;  %v19414_v7 = vld [vmem:[#allocation54_spill] sm:$0xff] }
 0xc8e   : > { %10178 = vmatprep.subr.mxu1 %v16291_v37  ;;  %10234 = vmatprep.subr.mxu0 %v16291_v37  ;;  %v19416_v57 = vld [vmem:[#allocation70_spill] sm:$0xff]  ;;  %v19418_v56 = vld [vmem:[#allocation55_spill] sm:$0xff]  ;;  %v19422_v62 = vld [vmem:[#allocation56_spill] sm:$0xff] }
 0xc8f   : > { %10179 = vmatpush3.msra.mxu1 %v16291_v37  ;;  %10235 = vmatpush3.msra.mxu0 %v16291_v37  ;;  %v19420_v42 = vld [vmem:[#allocation71_spill] sm:$0xff]  ;;  %v19424_v13 = vld [vmem:[#allocation72_spill] sm:$0xff]  ;;  %v19426_v20 = vld [vmem:[#allocation73_spill] sm:$0xff] }
 0xc90   : > { %10180 = vmatprep.subr.mxu1 %v16303_v45  ;;  %10236 = vmatprep.subr.mxu0 %v16303_v45  ;;  %v19428_v58 = vld [vmem:[#allocation119_spill] sm:$0xff]  ;;  %v19432_v8 = vld [vmem:[#allocation121_spill] sm:$0xff]  ;;  %v19434_v50 = vld [vmem:[#allocation74_spill] sm:$0xff] }
 0xc91   : > { %10181 = vmatpush3.msra.mxu1 %v16303_v45  ;;  %10237 = vmatpush3.msra.mxu0 %v16303_v45  ;;  %v19430_v38 = vld [vmem:[#allocation75_spill] sm:$0xff]  ;;  %v19436_v53 = vld [vmem:[#allocation120_spill] sm:$0xff]  ;;  %v19440_v55 = vld [vmem:[#allocation122_spill] sm:$0xff] }
 0xc92   : > { %10182 = vmatprep.subr.mxu1 %v16313_v60  ;;  %10238 = vmatprep.subr.mxu0 %v16313_v60  ;;  %v19438_v39 = vld [vmem:[#allocation76_spill] sm:$0xff]  ;;  %v19442_v11 = vld [vmem:[#allocation77_spill] sm:$0xff]  ;;  %v19444_v22 = vld [vmem:[#allocation123_spill] sm:$0xff] }
 0xc93   : > { %10183 = vmatpush3.msra.mxu1 %v16313_v60  ;;  %10239 = vmatpush3.msra.mxu0 %v16313_v60  ;;  %v19446_v26 = vld [vmem:[#allocation78_spill] sm:$0xff]  ;;  %v19448_v31 = vld [vmem:[#allocation124_spill] sm:$0xff]  ;;  %v19450_v9 = vld [vmem:[#allocation79_spill] sm:$0xff] }
 0xc94   : > { %10184 = vmatprep.subr.mxu1 %v16326_v24  ;;  %10240 = vmatprep.subr.mxu0 %v16326_v24  ;;  %v19452_v48 = vld [vmem:[#allocation125_spill] sm:$0xff]  ;;  %v19454_v21 = vld [vmem:[#allocation80_spill] sm:$0xff]  ;;  %v19456_v61 = vld [vmem:[#allocation126_spill] sm:$0xff] }
 0xc95   : > { %10185 = vmatpush3.msra.mxu1 %v16326_v24  ;;  %10241 = vmatpush3.msra.mxu0 %v16326_v24  ;;  %v19458_v32 = vld [vmem:[#allocation81_spill] sm:$0xff]  ;;  %v19460_v54 = vld [vmem:[#allocation127_spill] sm:$0xff]  ;;  %v19462_v41 = vld [vmem:[#allocation82_spill] sm:$0xff] }
 0xc96   : > { %10186 = vmatprep.subr.mxu1 %v16335_v35  ;;  %10242 = vmatprep.subr.mxu0 %v16335_v35  ;;  %v19464_v3 = vld [vmem:[#allocation128_spill] sm:$0xff]  ;;  %v19466_v59 = vld [vmem:[#allocation83_spill] sm:$0xff]  ;;  %v19468_v6 = vld [vmem:[#allocation129_spill] sm:$0xff] }
 0xc97   : > { %10187 = vmatpush3.msra.mxu1 %v16335_v35  ;;  %10243 = vmatpush3.msra.mxu0 %v16335_v35  ;;  %v19470_v23 = vld [vmem:[#allocation84_spill] sm:$0xff]  ;;  %v19486_v28 = vld [vmem:[#allocation89_spill] sm:$0xff] }
 0xc98   : > { %10188 = vmatprep.subr.mxu1 %v16348_v10  ;;  %10244 = vmatprep.subr.mxu0 %v16348_v10  ;;  %v19480_v47 = vld [vmem:[#allocation96_spill] sm:$0xff] }
 0xc99   : > { %10189 = vmatpush3.msra.mxu1 %v16348_v10  ;;  %10245 = vmatpush3.msra.mxu0 %v16348_v10 }
 0xc9a   : > { %10190 = vmatprep.subr.mxu1 %v16356_v27  ;;  %10246 = vmatprep.subr.mxu0 %v16356_v27 }
 0xc9b   : > { %10191 = vmatpush3.msra.mxu1 %v16356_v27  ;;  %10247 = vmatpush3.msra.mxu0 %v16356_v27 }
 0xc9c   : > { %10192 = vmatprep.subr.mxu1 %v16368_v17  ;;  %10248 = vmatprep.subr.mxu0 %v16368_v17 }
 0xc9d   : > { %10193 = vmatpush3.msra.mxu1 %v16368_v17  ;;  %10249 = vmatpush3.msra.mxu0 %v16368_v17 }
 0xc9e   : > { %10194 = vmatprep.subr.mxu1 %v16376_v46  ;;  %10250 = vmatprep.subr.mxu0 %v16376_v46 }
 0xc9f   : > { %10195 = vmatpush3.msra.mxu1 %v16376_v46  ;;  %10251 = vmatpush3.msra.mxu0 %v16376_v46 }
 0xca0   : > { %10196 = vmatprep.subr.mxu1 %v16383_v29  ;;  %10252 = vmatprep.subr.mxu0 %v16383_v29 }
 0xca1   : > { %10197 = vmatpush3.msra.mxu1 %v16383_v29  ;;  %10253 = vmatpush3.msra.mxu0 %v16383_v29 }
 0xca2   : > { %10198 = vmatprep.subr.mxu1 %v16390_v33  ;;  %10254 = vmatprep.subr.mxu0 %v16390_v33 }
 0xca3   : > { %10199 = vmatpush3.msra.mxu1 %v16390_v33  ;;  %10255 = vmatpush3.msra.mxu0 %v16390_v33 }
 0xca4   : > { %10201 = vmatmul.mubr.msk.f32.vlgmr.msra.gmra.mxu1 %vm11862_vm0, %v19371_v2  ;;  %10257 = vmatmul.mubr.msk.f32.vlgmr.msra.gmra.mxu0 %vm12294_vm3, %v19371_v2  ;;  %vm19379_vm0 = vnez %v19378_v43  ;;  %vm19385_vm3 = vnez %v19384_v25  ;;  %v19472_v43 = vld [vmem:[#allocation130_spill] sm:$0xff] }
 0xca5   : > { %10280 = vmatprep.subr.mxu1 %v16236_v19  ;;  %10336 = vmatprep.subr.mxu0 %v16236_v19  ;;  %v19478_v25 = vld [vmem:[#allocation86_spill] sm:$0xff] }
 0xca6   : > { %10203 = vmatprep.mubr.msk.f32.mxu1 %vm11855_vm15, %v19371_v2  ;;  %10259 = vmatprep.mubr.msk.f32.mxu0 %vm12287_vm5, %v19371_v2  ;;  %vm19381_vm15 = vnez %v19380_v5  ;;  %vm19389_vm5 = vnez %v19388_v63  ;;  %v19474_v5 = vld [vmem:[#allocation85_spill] sm:$0xff]  ;;  %v19482_v63 = vld [vmem:[#allocation87_spill] sm:$0xff] }
 0xca7   : > { %10281 = vmatpush3.msra.mxu1 %v16236_v19  ;;  %10337 = vmatpush3.msra.mxu0 %v16236_v19 }
 0xca8   : > { %10282 = vmatprep.subr.mxu1 %v16245_v51  ;;  %10338 = vmatprep.subr.mxu0 %v16245_v51 }
 0xca9   : > { %10283 = vmatpush3.msra.mxu1 %v16245_v51  ;;  %10339 = vmatpush3.msra.mxu0 %v16245_v51 }
 0xcaa   : > { %10204 = vmatmul.mubr.msk.f32.gmra.mxu1 %vm11890_vm4, %v19371_v2  ;;  %10260 = vmatmul.mubr.msk.f32.gmra.mxu0 %vm12322_vm11, %v19371_v2  ;;  %vm19383_vm4 = vnez %v19382_v1  ;;  %vm19391_vm11 = vnez %v19390_v34  ;;  %v19476_v1 = vld [vmem:[#allocation131_spill] sm:$0xff]  ;;  %v19484_v34 = vld [vmem:[#allocation88_spill] sm:$0xff] }
 0xcab   : > { %10284 = vmatprep.subr.mxu1 %v16255_v40  ;;  %10340 = vmatprep.subr.mxu0 %v16255_v40 }
 0xcac   : > { %10206 = vmatprep.mubr.msk.f32.mxu1 %vm19379_vm0, %v19371_v2  ;;  %10262 = vmatprep.mubr.msk.f32.mxu0 %vm19381_vm15, %v19371_v2  ;;  %vm19395_vm0 = vnez %v19394_v16  ;;  %vm19397_vm15 = vnez %v19396_v44  ;;  %v19488_v16 = vld [vmem:[#allocation97_spill] sm:$0xff]  ;;  %v19490_v44 = vld [vmem:[#allocation147_spill] sm:$0xff] }
 0xcad   : > { %10285 = vmatpush3.msra.mxu1 %v16255_v40  ;;  %10341 = vmatpush3.msra.mxu0 %v16255_v40 }
 0xcae   : > { %10286 = vmatprep.subr.mxu1 %v16268_v14  ;;  %10342 = vmatprep.subr.mxu0 %v16268_v14 }
 0xcaf   : > { %10287 = vmatpush3.msra.mxu1 %v16268_v14  ;;  %10343 = vmatpush3.msra.mxu0 %v16268_v14 }
 0xcb0   : > { %10207 = vmatmul.mubr.msk.f32.gmra.mxu1 %vm19383_vm4, %v19371_v2  ;;  %10263 = vmatmul.mubr.msk.f32.gmra.mxu0 %vm19385_vm3, %v19371_v2  ;;  %vm19399_vm4 = vnez %v19398_v18  ;;  %vm19401_vm3 = vnez %v19400_v36  ;;  %v19492_v18 = vld [vmem:[#allocation138_spill] sm:$0xff]  ;;  %v19494_v36 = vld [vmem:[#allocation149_spill] sm:$0xff] }
 0xcb1   : > { %10288 = vmatprep.subr.mxu1 %v16280_v0  ;;  %10344 = vmatprep.subr.mxu0 %v16280_v0 }
 0xcb2   : > { %10209 = vmatprep.mubr.msk.f32.mxu1 %vm19387_vm10, %v19371_v2  ;;  %10265 = vmatprep.mubr.msk.f32.mxu0 %vm19389_vm5, %v19371_v2  ;;  %vm19403_vm10 = vnez %v19402_v4  ;;  %vm19405_vm5 = vnez %v19404_v15  ;;  %v19496_v4 = vld [vmem:[#allocation170_spill] sm:$0xff]  ;;  %v19498_v15 = vld [vmem:[#allocation148_spill] sm:$0xff] }
 0xcb3   : > { %10289 = vmatpush3.msra.mxu1 %v16280_v0  ;;  %10345 = vmatpush3.msra.mxu0 %v16280_v0 }
 0xcb4   : > { %10290 = vmatprep.subr.mxu1 %v16291_v37  ;;  %10346 = vmatprep.subr.mxu0 %v16291_v37 }
 0xcb5   : > { %10291 = vmatpush3.msra.mxu1 %v16291_v37  ;;  %10347 = vmatpush3.msra.mxu0 %v16291_v37 }
 0xcb6   : > { %10210 = vmatmul.mubr.msk.f32.gmra.mxu1 %vm19391_vm11, %v19371_v2  ;;  %10266 = vmatmul.mubr.msk.f32.gmra.mxu0 %vm19393_vm7, %v19371_v2  ;;  %vm19407_vm11 = vnez %v19406_v49  ;;  %vm19409_vm7 = vnez %v19408_v12  ;;  %v19500_v49 = vld [vmem:[#allocation169_spill] sm:$0xff]  ;;  %v19502_v12 = vld [vmem:[#allocation150_spill] sm:$0xff] }
 0xcb7   : > { %10292 = vmatprep.subr.mxu1 %v16303_v45  ;;  %10348 = vmatprep.subr.mxu0 %v16303_v45 }
 0xcb8   : > { %10212 = vmatprep.mubr.msk.f32.mxu1 %vm19395_vm0, %v19371_v2  ;;  %10268 = vmatprep.mubr.msk.f32.mxu0 %vm19397_vm15, %v19371_v2  ;;  %vm19411_vm0 = vnez %v19410_v30  ;;  %vm19413_vm15 = vnez %v19412_v52  ;;  %v19504_v30 = vld [vmem:[#allocation171_spill] sm:$0xff] }
 0xcb9   : > { %10293 = vmatpush3.msra.mxu1 %v16303_v45  ;;  %10349 = vmatpush3.msra.mxu0 %v16303_v45  ;;  %v19506_v52 = vld [vmem:[#allocation151_spill] sm:$0xff] }
 0xcba   : > { %10294 = vmatprep.subr.mxu1 %v16313_v60  ;;  %10350 = vmatprep.subr.mxu0 %v16313_v60 }
 0xcbb   : > { %10295 = vmatpush3.msra.mxu1 %v16313_v60  ;;  %10351 = vmatpush3.msra.mxu0 %v16313_v60 }
 0xcbc   : > { %10213 = vmatmul.mubr.msk.f32.gmra.mxu1 %vm19399_vm4, %v19371_v2  ;;  %10269 = vmatmul.mubr.msk.f32.gmra.mxu0 %vm19401_vm3, %v19371_v2  ;;  %vm19415_vm4 = vnez %v19414_v7  ;;  %vm19417_vm3 = vnez %v19416_v57  ;;  %v19508_v7 = vld [vmem:[#allocation172_spill] sm:$0xff] }
 0xcbd   : > { %10296 = vmatprep.subr.mxu1 %v16326_v24  ;;  %10352 = vmatprep.subr.mxu0 %v16326_v24  ;;  %v19510_v57 = vld [vmem:[#allocation152_spill] sm:$0xff] }
 0xcbe   : > { %10215 = vmatprep.mubr.msk.f32.mxu1 %vm19403_vm10, %v19371_v2  ;;  %10271 = vmatprep.mubr.msk.f32.mxu0 %vm19405_vm5, %v19371_v2  ;;  %vm19419_vm10 = vnez %v19418_v56  ;;  %vm19421_vm5 = vnez %v19420_v42  ;;  %v19512_v56 = vld [vmem:[#allocation173_spill] sm:$0xff] }
 0xcbf   : > { %10297 = vmatpush3.msra.mxu1 %v16326_v24  ;;  %10353 = vmatpush3.msra.mxu0 %v16326_v24  ;;  %v19514_v42 = vld [vmem:[#allocation153_spill] sm:$0xff] }
 0xcc0   : > { %10298 = vmatprep.subr.mxu1 %v16335_v35  ;;  %10354 = vmatprep.subr.mxu0 %v16335_v35 }
 0xcc1   : > { %10299 = vmatpush3.msra.mxu1 %v16335_v35  ;;  %10355 = vmatpush3.msra.mxu0 %v16335_v35 }
 0xcc2   : > { %10216 = vmatmul.mubr.msk.f32.gmra.mxu1 %vm19407_vm11, %v19371_v2  ;;  %10272 = vmatmul.mubr.msk.f32.gmra.mxu0 %vm19409_vm7, %v19371_v2  ;;  %vm19423_vm11 = vnez %v19422_v62  ;;  %vm19425_vm7 = vnez %v19424_v13  ;;  %v19516_v62 = vld [vmem:[#allocation174_spill] sm:$0xff] }
 0xcc3   : > { %10300 = vmatprep.subr.mxu1 %v16348_v10  ;;  %10356 = vmatprep.subr.mxu0 %v16348_v10  ;;  %v19518_v13 = vld [vmem:[#allocation154_spill] sm:$0xff] }
 0xcc4   : > { %10218 = vmatprep.mubr.msk.f32.mxu1 %vm19411_vm0, %v19371_v2  ;;  %10274 = vmatprep.mubr.msk.f32.mxu0 %vm19413_vm15, %v19371_v2  ;;  %vm19427_vm0 = vnez %v19426_v20  ;;  %vm19429_vm15 = vnez %v19428_v58  ;;  %v19520_v20 = vld [vmem:[#allocation175_spill] sm:$0xff] }
 0xcc5   : > { %10301 = vmatpush3.msra.mxu1 %v16348_v10  ;;  %10357 = vmatpush3.msra.mxu0 %v16348_v10  ;;  %v19522_v58 = vld [vmem:[#allocation155_spill] sm:$0xff] }
 0xcc6   : > { %10302 = vmatprep.subr.mxu1 %v16356_v27  ;;  %10358 = vmatprep.subr.mxu0 %v16356_v27 }
 0xcc7   : > { %10303 = vmatpush3.msra.mxu1 %v16356_v27  ;;  %10359 = vmatpush3.msra.mxu0 %v16356_v27 }
 0xcc8   : > { %10219 = vmatmul.mubr.msk.f32.gmra.mxu1 %vm19415_vm4, %v19371_v2  ;;  %10275 = vmatmul.mubr.msk.f32.gmra.mxu0 %vm19417_vm3, %v19371_v2  ;;  %vm19431_vm4 = vnez %v19430_v38  ;;  %vm19433_vm3 = vnez %v19432_v8  ;;  %v19524_v38 = vld [vmem:[#allocation176_spill] sm:$0xff] }
 0xcc9   : > { %10304 = vmatprep.subr.mxu1 %v16368_v17  ;;  %10360 = vmatprep.subr.mxu0 %v16368_v17  ;;  %v19526_v8 = vld [vmem:[#allocation156_spill] sm:$0xff] }
 0xcca   : > { %10221 = vmatprep.mubr.msk.f32.mxu1 %vm19419_vm10, %v19371_v2  ;;  %10277 = vmatprep.mubr.msk.f32.mxu0 %vm19421_vm5, %v19371_v2  ;;  %vm19435_vm10 = vnez %v19434_v50  ;;  %vm19437_vm5 = vnez %v19436_v53  ;;  %v19528_v50 = vld [vmem:[#allocation177_spill] sm:$0xff] }
 0xccb   : > { %10305 = vmatpush3.msra.mxu1 %v16368_v17  ;;  %10361 = vmatpush3.msra.mxu0 %v16368_v17  ;;  %v19530_v53 = vld [vmem:[#allocation157_spill] sm:$0xff] }
 0xccc   : > { %10306 = vmatprep.subr.mxu1 %v16376_v46  ;;  %10362 = vmatprep.subr.mxu0 %v16376_v46 }
 0xccd   : > { %10307 = vmatpush3.msra.mxu1 %v16376_v46  ;;  %10363 = vmatpush3.msra.mxu0 %v16376_v46 }
 0xcce   : > { %10222 = vmatmul.mubr.msk.f32.gmra.mxu1 %vm19423_vm11, %v19371_v2  ;;  %10278 = vmatmul.mubr.msk.f32.gmra.mxu0 %vm19425_vm7, %v19371_v2  ;;  %vm19439_vm11 = vnez %v19438_v39  ;;  %vm19441_vm7 = vnez %v19440_v55  ;;  %v19532_v39 = vld [vmem:[#allocation178_spill] sm:$0xff] }
 0xccf   : > { %10308 = vmatprep.subr.mxu1 %v16383_v29  ;;  %10364 = vmatprep.subr.mxu0 %v16383_v29  ;;  %v19534_v55 = vld [vmem:[#allocation158_spill] sm:$0xff] }
 0xcd0   : > { %10309 = vmatpush3.msra.mxu1 %v16383_v29  ;;  %10312 = vmatprep.mubr.msk.f32.mxu1 %vm19427_vm0, %v19371_v2  ;;  %vm19443_vm0 = vnez %v19442_v11  ;;  %v19536_v11 = vld [vmem:[#allocation179_spill] sm:$0xff] }
 0xcd1   : > { %10365 = vmatpush3.msra.mxu0 %v16383_v29  ;;  %10368 = vmatprep.mubr.msk.f32.mxu0 %vm19429_vm15, %v19371_v2  ;;  %vm19445_vm15 = vnez %v19444_v22  ;;  %v19538_v22 = vld [vmem:[#allocation159_spill] sm:$0xff] }
 0xcd2   : > { %10310 = vmatprep.subr.mxu1 %v16390_v33  ;;  %10366 = vmatprep.subr.mxu0 %v16390_v33 }
 0xcd3   : > { %10311 = vmatpush3.msra.mxu1 %v16390_v33  ;;  %10367 = vmatpush3.msra.mxu0 %v16390_v33 }
 0xcd4   : > { %10313 = vmatmul.mubr.msk.f32.vlgmr.msra.gmra.mxu1 %vm19431_vm4, %v19371_v2  ;;  %10369 = vmatmul.mubr.msk.f32.vlgmr.msra.gmra.mxu0 %vm19433_vm3, %v19371_v2  ;;  %vm19447_vm4 = vnez %v19446_v26  ;;  %vm19449_vm3 = vnez %v19448_v31  ;;  %v19540_v26 = vld [vmem:[#allocation180_spill] sm:$0xff] }
 0xcd5   : > { %10392 = vmatprep.subr.mxu1 %v16236_v19  ;;  %10448 = vmatprep.subr.mxu0 %v16236_v19  ;;  %v19542_v31 = vld [vmem:[#allocation160_spill] sm:$0xff] }
 0xcd6   : > { %10315 = vmatprep.mubr.msk.f32.mxu1 %vm19435_vm10, %v19371_v2  ;;  %10371 = vmatprep.mubr.msk.f32.mxu0 %vm19437_vm5, %v19371_v2  ;;  %vm19451_vm10 = vnez %v19450_v9  ;;  %vm19453_vm5 = vnez %v19452_v48  ;;  %v19544_v9 = vld [vmem:[#allocation181_spill] sm:$0xff] }
 0xcd7   : > { %10393 = vmatpush3.msra.mxu1 %v16236_v19  ;;  %10449 = vmatpush3.msra.mxu0 %v16236_v19  ;;  %v19546_v48 = vld [vmem:[#allocation161_spill] sm:$0xff] }
 0xcd8   : > { %10394 = vmatprep.subr.mxu1 %v16245_v51  ;;  %10450 = vmatprep.subr.mxu0 %v16245_v51 }
 0xcd9   : > { %10395 = vmatpush3.msra.mxu1 %v16245_v51  ;;  %10451 = vmatpush3.msra.mxu0 %v16245_v51 }
 0xcda   : > { %10316 = vmatmul.mubr.msk.f32.gmra.mxu1 %vm19439_vm11, %v19371_v2  ;;  %10372 = vmatmul.mubr.msk.f32.gmra.mxu0 %vm19441_vm7, %v19371_v2  ;;  %vm19455_vm11 = vnez %v19454_v21  ;;  %vm19457_vm7 = vnez %v19456_v61  ;;  %v19548_v21 = vld [vmem:[#allocation182_spill] sm:$0xff] }
 0xcdb   : > { %10396 = vmatprep.subr.mxu1 %v16255_v40  ;;  %10452 = vmatprep.subr.mxu0 %v16255_v40  ;;  %v19550_v61 = vld [vmem:[#allocation90_spill] sm:$0xff] }
 0xcdc   : > { %10318 = vmatprep.mubr.msk.f32.mxu1 %vm19443_vm0, %v19371_v2  ;;  %10374 = vmatprep.mubr.msk.f32.mxu0 %vm19445_vm15, %v19371_v2  ;;  %vm19459_vm0 = vnez %v19458_v32  ;;  %vm19461_vm15 = vnez %v19460_v54  ;;  %v19552_v32 = vld [vmem:[#allocation162_spill] sm:$0xff] }
 0xcdd   : > { %10397 = vmatpush3.msra.mxu1 %v16255_v40  ;;  %10453 = vmatpush3.msra.mxu0 %v16255_v40  ;;  %v19554_v54 = vld [vmem:[#allocation186_spill] sm:$0xff] }
 0xcde   : > { %10398 = vmatprep.subr.mxu1 %v16268_v14  ;;  %10454 = vmatprep.subr.mxu0 %v16268_v14 }
 0xcdf   : > { %10399 = vmatpush3.msra.mxu1 %v16268_v14  ;;  %10455 = vmatpush3.msra.mxu0 %v16268_v14 }
 0xce0   : > { %10319 = vmatmul.mubr.msk.f32.gmra.mxu1 %vm19447_vm4, %v19371_v2  ;;  %10375 = vmatmul.mubr.msk.f32.gmra.mxu0 %vm19449_vm3, %v19371_v2  ;;  %vm19463_vm4 = vnez %v19462_v41  ;;  %vm19465_vm3 = vnez %v19464_v3  ;;  %v19556_v41 = vld [vmem:[#allocation202_spill] sm:$0xff]  ;;  %v6626_v3 = vld [vmem:[#allocation3 + $0x78] sm:$0xff] }
 0xce1   : > { %10400 = vmatprep.subr.mxu1 %v16280_v0  ;;  %10456 = vmatprep.subr.mxu0 %v16280_v0 }
 0xce2   : > { %10321 = vmatprep.mubr.msk.f32.mxu1 %vm19451_vm10, %v19371_v2  ;;  %10377 = vmatprep.mubr.msk.f32.mxu0 %vm19453_vm5, %v19371_v2  ;;  %vm19467_vm10 = vnez %v19466_v59  ;;  %vm19469_vm5 = vnez %v19468_v6  ;;  %v6601_v59 = vld [vmem:[#allocation3 + $0x38] sm:$0xff] }
 0xce3   : > { %10401 = vmatpush3.msra.mxu1 %v16280_v0  ;;  %10457 = vmatpush3.msra.mxu0 %v16280_v0  ;;  %v19558_v6 = vld [vmem:[#allocation188_spill] sm:$0xff] }
 0xce4   : > { %10402 = vmatprep.subr.mxu1 %v16291_v37  ;;  %10458 = vmatprep.subr.mxu0 %v16291_v37 }
 0xce5   : > { %10403 = vmatpush3.msra.mxu1 %v16291_v37  ;;  %10459 = vmatpush3.msra.mxu0 %v16291_v37 }
 0xce6   : > { %10322 = vmatmul.mubr.msk.f32.gmra.mxu1 %vm19455_vm11, %v19371_v2  ;;  %10378 = vmatmul.mubr.msk.f32.gmra.mxu0 %vm19457_vm7, %v19371_v2  ;;  %vm19471_vm11 = vnez %v19470_v23  ;;  %vm19473_vm7 = vnez %v19472_v43  ;;  %v19560_v23 = vld [vmem:[#allocation204_spill] sm:$0xff]  ;;  %v19562_v43 = vld [vmem:[#allocation187_spill] sm:$0xff] }
 0xce7   : > { %10404 = vmatprep.subr.mxu1 %v16303_v45  ;;  %10460 = vmatprep.subr.mxu0 %v16303_v45 }
 0xce8   : > { %10324 = vmatprep.mubr.msk.f32.mxu1 %vm19459_vm0, %v19371_v2  ;;  %10380 = vmatprep.mubr.msk.f32.mxu0 %vm19461_vm15, %v19371_v2  ;;  %vm19475_vm0 = vnez %v19474_v5  ;;  %vm19477_vm15 = vnez %v19476_v1  ;;  %v19564_v5 = vld [vmem:[#allocation203_spill] sm:$0xff] }
 0xce9   : > { %10405 = vmatpush3.msra.mxu1 %v16303_v45  ;;  %10461 = vmatpush3.msra.mxu0 %v16303_v45  ;;  %v6625_v1 = vld [vmem:[#allocation3 + $0x70] sm:$0xff] }
 0xcea   : > { %10406 = vmatprep.subr.mxu1 %v16313_v60  ;;  %10462 = vmatprep.subr.mxu0 %v16313_v60 }
 0xceb   : > { %10407 = vmatpush3.msra.mxu1 %v16313_v60  ;;  %10463 = vmatpush3.msra.mxu0 %v16313_v60 }
 0xcec   : > { %10325 = vmatmul.mubr.msk.f32.gmra.mxu1 %vm19463_vm4, %v19371_v2  ;;  %10381 = vmatmul.mubr.msk.f32.gmra.mxu0 %vm19465_vm3, %v19371_v2  ;;  %vm19479_vm4 = vnez %v19478_v25  ;;  %vm19481_vm3 = vnez %v19480_v47  ;;  %v6600_v25 = vld [vmem:[#allocation3 + $0x30] sm:$0xff]  ;;  %v19566_v47 = vld [vmem:[#allocation189_spill] sm:$0xff] }
 0xced   : > { %10408 = vmatprep.subr.mxu1 %v16326_v24  ;;  %10464 = vmatprep.subr.mxu0 %v16326_v24 }
 0xcee   : > { %10327 = vmatprep.mubr.msk.f32.mxu1 %vm19467_vm10, %v19371_v2  ;;  %10383 = vmatprep.mubr.msk.f32.mxu0 %vm19469_vm5, %v19371_v2  ;;  %vm19483_vm10 = vnez %v19482_v63  ;;  %vm19485_vm5 = vnez %v19484_v34  ;;  %v19568_v63 = vld [vmem:[#allocation205_spill] sm:$0xff]  ;;  %v19570_v34 = vld [vmem:[#allocation190_spill] sm:$0xff] }
 0xcef   : > { %10409 = vmatpush3.msra.mxu1 %v16326_v24  ;;  %10465 = vmatpush3.msra.mxu0 %v16326_v24 }
 0xcf0   : > { %10410 = vmatprep.subr.mxu1 %v16335_v35  ;;  %10466 = vmatprep.subr.mxu0 %v16335_v35 }
 0xcf1   : > { %10411 = vmatpush3.msra.mxu1 %v16335_v35  ;;  %10467 = vmatpush3.msra.mxu0 %v16335_v35 }
 0xcf2   : > { %10328 = vmatmul.mubr.msk.f32.gmra.mxu1 %vm19471_vm11, %v19371_v2  ;;  %10384 = vmatmul.mubr.msk.f32.gmra.mxu0 %vm19473_vm7, %v19371_v2  ;;  %vm19487_vm11 = vnez %v19486_v28  ;;  %vm19489_vm7 = vnez %v19488_v16  ;;  %v19572_v28 = vld [vmem:[#allocation206_spill] sm:$0xff] }
 0xcf3   : > { %10412 = vmatprep.subr.mxu1 %v16348_v10  ;;  %10468 = vmatprep.subr.mxu0 %v16348_v10  ;;  %v6624_v16 = vld [vmem:[#allocation3 + $0x68] sm:$0xff] }
 0xcf4   : > { %10330 = vmatprep.mubr.msk.f32.mxu1 %vm19475_vm0, %v19371_v2  ;;  %10386 = vmatprep.mubr.msk.f32.mxu0 %vm19477_vm15, %v19371_v2  ;;  %vm19491_vm0 = vnez %v19490_v44  ;;  %vm19493_vm15 = vnez %v19492_v18  ;;  %v6599_v44 = vld [vmem:[#allocation3 + $0x28] sm:$0xff]  ;;  %v19574_v18 = vld [vmem:[#allocation191_spill] sm:$0xff] }
 0xcf5   : > { %10413 = vmatpush3.msra.mxu1 %v16348_v10  ;;  %10469 = vmatpush3.msra.mxu0 %v16348_v10 }
 0xcf6   : > { %10414 = vmatprep.subr.mxu1 %v16356_v27  ;;  %10470 = vmatprep.subr.mxu0 %v16356_v27 }
 0xcf7   : > { %10415 = vmatpush3.msra.mxu1 %v16356_v27  ;;  %10471 = vmatpush3.msra.mxu0 %v16356_v27 }
 0xcf8   : > { %10331 = vmatmul.mubr.msk.f32.gmra.mxu1 %vm19479_vm4, %v19371_v2  ;;  %10387 = vmatmul.mubr.msk.f32.gmra.mxu0 %vm19481_vm3, %v19371_v2  ;;  %vm19495_vm4 = vnez %v19494_v36  ;;  %vm19497_vm3 = vnez %v19496_v4  ;;  %v19576_v36 = vld [vmem:[#allocation207_spill] sm:$0xff]  ;;  %v19578_v4 = vld [vmem:[#allocation192_spill] sm:$0xff] }
 0xcf9   : > { %10416 = vmatprep.subr.mxu1 %v16368_v17  ;;  %10472 = vmatprep.subr.mxu0 %v16368_v17 }
 0xcfa   : > { %10333 = vmatprep.mubr.msk.f32.mxu1 %vm19483_vm10, %v19371_v2  ;;  %10389 = vmatprep.mubr.msk.f32.mxu0 %vm19485_vm5, %v19371_v2  ;;  %vm19499_vm10 = vnez %v19498_v15  ;;  %vm19501_vm5 = vnez %v19500_v49  ;;  %v19580_v15 = vld [vmem:[#allocation208_spill] sm:$0xff]  ;;  %v6623_v49 = vld [vmem:[#allocation3 + $0x60] sm:$0xff] }
 0xcfb   : > { %10417 = vmatpush3.msra.mxu1 %v16368_v17  ;;  %10473 = vmatpush3.msra.mxu0 %v16368_v17 }
 0xcfc   : > { %10418 = vmatprep.subr.mxu1 %v16376_v46  ;;  %10474 = vmatprep.subr.mxu0 %v16376_v46 }
 0xcfd   : > { %10419 = vmatpush3.msra.mxu1 %v16376_v46  ;;  %10475 = vmatpush3.msra.mxu0 %v16376_v46 }
 0xcfe   : > { %10334 = vmatmul.mubr.msk.f32.gmra.mxu1 %vm19487_vm11, %v19371_v2  ;;  %10390 = vmatmul.mubr.msk.f32.gmra.mxu0 %vm19489_vm7, %v19371_v2  ;;  %vm19503_vm11 = vnez %v19502_v12  ;;  %vm19505_vm7 = vnez %v19504_v30  ;;  %v6598_v12 = vld [vmem:[#allocation3 + $0x20] sm:$0xff] }
 0xcff   : > { %10420 = vmatprep.subr.mxu1 %v16383_v29  ;;  %10476 = vmatprep.subr.mxu0 %v16383_v29  ;;  %v19582_v30 = vld [vmem:[#allocation193_spill] sm:$0xff] }
 0xd00   : > { %10421 = vmatpush3.msra.mxu1 %v16383_v29  ;;  %10424 = vmatprep.mubr.msk.f32.mxu1 %vm19491_vm0, %v19371_v2  ;;  %vm19507_vm0 = vnez %v19506_v52  ;;  %v19584_v52 = vld [vmem:[#allocation209_spill] sm:$0xff] }
 0xd01   : > { %10477 = vmatpush3.msra.mxu0 %v16383_v29  ;;  %10480 = vmatprep.mubr.msk.f32.mxu0 %vm19493_vm15, %v19371_v2  ;;  %vm19509_vm15 = vnez %v19508_v7  ;;  %v19586_v7 = vld [vmem:[#allocation194_spill] sm:$0xff] }
 0xd02   : > { %10422 = vmatprep.subr.mxu1 %v16390_v33  ;;  %10478 = vmatprep.subr.mxu0 %v16390_v33 }
 0xd03   : > { %10423 = vmatpush3.msra.mxu1 %v16390_v33  ;;  %10479 = vmatpush3.msra.mxu0 %v16390_v33 }
 0xd04   : > { %10425 = vmatmul.mubr.msk.f32.vlgmr.msra.gmra.mxu1 %vm19495_vm4, %v19371_v2  ;;  %10481 = vmatmul.mubr.msk.f32.vlgmr.msra.gmra.mxu0 %vm19497_vm3, %v19371_v2  ;;  %vm19511_vm4 = vnez %v19510_v57  ;;  %vm19513_vm3 = vnez %v19512_v56  ;;  %v19588_v57 = vld [vmem:[#allocation210_spill] sm:$0xff]  ;;  %v6622_v56 = vld [vmem:[#allocation3 + $0x58] sm:$0xff] }
 0xd05   : > { %10504 = vmatprep.subr.mxu1 %v16236_v19  ;;  %10560 = vmatprep.subr.mxu0 %v16236_v19 }
 0xd06   : > { %10427 = vmatprep.mubr.msk.f32.mxu1 %vm19499_vm10, %v19371_v2  ;;  %10483 = vmatprep.mubr.msk.f32.mxu0 %vm19501_vm5, %v19371_v2  ;;  %vm19515_vm10 = vnez %v19514_v42  ;;  %vm19517_vm5 = vnez %v19516_v62  ;;  %v6597_v42 = vld [vmem:[#allocation3 + $0x18] sm:$0xff]  ;;  %v19590_v62 = vld [vmem:[#allocation195_spill] sm:$0xff] }
 0xd07   : > { %10505 = vmatpush3.msra.mxu1 %v16236_v19  ;;  %10561 = vmatpush3.msra.mxu0 %v16236_v19 }
 0xd08   : > { %10506 = vmatprep.subr.mxu1 %v16245_v51  ;;  %10562 = vmatprep.subr.mxu0 %v16245_v51 }
 0xd09   : > { %10507 = vmatpush3.msra.mxu1 %v16245_v51  ;;  %10563 = vmatpush3.msra.mxu0 %v16245_v51 }
 0xd0a   : > { %10428 = vmatmul.mubr.msk.f32.gmra.mxu1 %vm19503_vm11, %v19371_v2  ;;  %10484 = vmatmul.mubr.msk.f32.gmra.mxu0 %vm19505_vm7, %v19371_v2  ;;  %vm19519_vm11 = vnez %v19518_v13  ;;  %vm19521_vm7 = vnez %v19520_v20  ;;  %v19592_v13 = vld [vmem:[#allocation211_spill] sm:$0xff]  ;;  %v19594_v20 = vld [vmem:[#allocation196_spill] sm:$0xff] }
 0xd0b   : > { %10508 = vmatprep.subr.mxu1 %v16255_v40  ;;  %10564 = vmatprep.subr.mxu0 %v16255_v40 }
 0xd0c   : > { %10430 = vmatprep.mubr.msk.f32.mxu1 %vm19507_vm0, %v19371_v2  ;;  %10486 = vmatprep.mubr.msk.f32.mxu0 %vm19509_vm15, %v19371_v2  ;;  %vm19523_vm0 = vnez %v19522_v58  ;;  %vm19525_vm15 = vnez %v19524_v38  ;;  %v6621_v38 = vld [vmem:[#allocation3 + $0x50] sm:$0xff] }
 0xd0d   : > { %10509 = vmatpush3.msra.mxu1 %v16255_v40  ;;  %10565 = vmatpush3.msra.mxu0 %v16255_v40 }
 0xd0e   : > { %10510 = vmatprep.subr.mxu1 %v16268_v14  ;;  %10566 = vmatprep.subr.mxu0 %v16268_v14 }
 0xd0f   : > { %10511 = vmatpush3.msra.mxu1 %v16268_v14  ;;  %10567 = vmatpush3.msra.mxu0 %v16268_v14 }
 0xd10   : > { %10431 = vmatmul.mubr.msk.f32.gmra.mxu1 %vm19511_vm4, %v19371_v2  ;;  %10487 = vmatmul.mubr.msk.f32.gmra.mxu0 %vm19513_vm3, %v19371_v2  ;;  %vm19527_vm4 = vnez %v19526_v8  ;;  %vm19529_vm3 = vnez %v19528_v50  ;;  %v6596_v8 = vld [vmem:[#allocation3 + $0x10] sm:$0xff]  ;;  %v19597_v50 = vld [vmem:[#allocation197_spill] sm:$0xff] }
 0xd11   : > { %10512 = vmatprep.subr.mxu1 %v16280_v0  ;;  %10568 = vmatprep.subr.mxu0 %v16280_v0 }
 0xd12   : > { %10433 = vmatprep.mubr.msk.f32.mxu1 %vm19515_vm10, %v19371_v2  ;;  %10489 = vmatprep.mubr.msk.f32.mxu0 %vm19517_vm5, %v19371_v2  ;;  %vm19531_vm10 = vnez %v19530_v53  ;;  %vm19533_vm5 = vnez %v19532_v39  ;;  %v19600_v39 = vld [vmem:[#allocation198_spill] sm:$0xff] }
 0xd13   : > { %10513 = vmatpush3.msra.mxu1 %v16280_v0  ;;  %10569 = vmatpush3.msra.mxu0 %v16280_v0  ;;  %v19629_v53 = vld [vmem:[#allocation98_spill] sm:$0xff] }
 0xd14   : > { %10514 = vmatprep.subr.mxu1 %v16291_v37  ;;  %10570 = vmatprep.subr.mxu0 %v16291_v37 }
 0xd15   : > { %10515 = vmatpush3.msra.mxu1 %v16291_v37  ;;  %10571 = vmatpush3.msra.mxu0 %v16291_v37 }
 0xd16   : > { %10434 = vmatmul.mubr.msk.f32.gmra.mxu1 %vm19519_vm11, %v19371_v2  ;;  %10490 = vmatmul.mubr.msk.f32.gmra.mxu0 %vm19521_vm7, %v19371_v2  ;;  %vm19535_vm11 = vnez %v19534_v55  ;;  %vm19537_vm7 = vnez %v19536_v11  ;;  %v6620_v11 = vld [vmem:[#allocation3 + $0x48] sm:$0xff] }
 0xd17   : > { %10516 = vmatprep.subr.mxu1 %v16303_v45  ;;  %10572 = vmatprep.subr.mxu0 %v16303_v45 }
 0xd18   : > { %10436 = vmatprep.mubr.msk.f32.mxu1 %vm19523_vm0, %v19371_v2  ;;  %10492 = vmatprep.mubr.msk.f32.mxu0 %vm19525_vm15, %v19371_v2  ;;  %vm19539_vm0 = vnez %v19538_v22  ;;  %vm19541_vm15 = vnez %v19540_v26  ;;  %v6595_v22 = vld [vmem:[#allocation3 + $0x8] sm:$0xff]  ;;  %v19603_v26 = vld [vmem:[#allocation199_spill] sm:$0xff] }
 0xd19   : > { %10517 = vmatpush3.msra.mxu1 %v16303_v45  ;;  %10573 = vmatpush3.msra.mxu0 %v16303_v45 }
 0xd1a   : > { %10518 = vmatprep.subr.mxu1 %v16313_v60  ;;  %10574 = vmatprep.subr.mxu0 %v16313_v60 }
 0xd1b   : > { %10519 = vmatpush3.msra.mxu1 %v16313_v60  ;;  %10575 = vmatpush3.msra.mxu0 %v16313_v60 }
 0xd1c   : > { %10437 = vmatmul.mubr.msk.f32.gmra.mxu1 %vm19527_vm4, %v19371_v2  ;;  %10493 = vmatmul.mubr.msk.f32.gmra.mxu0 %vm19529_vm3, %v19371_v2  ;;  %vm19543_vm4 = vnez %v19542_v31  ;;  %vm19545_vm3 = vnez %v19544_v9  ;;  %v7254_v31 = vld [vmem:[#allocation3 + $0xe8] sm:$0xff]  ;;  %v19632_v9 = vld [vmem:[#allocation29_spill] sm:$0xff] }
 0xd1d   : > { %10520 = vmatprep.subr.mxu1 %v16326_v24  ;;  %10576 = vmatprep.subr.mxu0 %v16326_v24 }
 0xd1e   : > { %10439 = vmatprep.mubr.msk.f32.mxu1 %vm19531_vm10, %v19371_v2  ;;  %10495 = vmatprep.mubr.msk.f32.mxu0 %vm19533_vm5, %v19371_v2  ;;  %vm19547_vm10 = vnez %v19546_v48  ;;  %vm19549_vm5 = vnez %v19548_v21  ;;  %v19608_v21 = vld [vmem:[#allocation40_spill] sm:$0xff]  ;;  %v6613_v48 = vsub.f32 %v16280_v0, %v19632_v9  ;;  %v19636_v0 = vld [vmem:[#allocation27_spill] sm:$0xff] }
 0xd1f   : > { %10521 = vmatpush3.msra.mxu1 %v16326_v24  ;;  %10577 = vmatpush3.msra.mxu0 %v16326_v24 }
 0xd20   : > { %10522 = vmatprep.subr.mxu1 %v16335_v35  ;;  %10578 = vmatprep.subr.mxu0 %v16335_v35 }
 0xd21   : > { %10523 = vmatpush3.msra.mxu1 %v16335_v35  ;;  %10579 = vmatpush3.msra.mxu0 %v16335_v35 }
 0xd22   : > { %10440 = vmatmul.mubr.msk.f32.gmra.mxu1 %vm19535_vm11, %v19371_v2  ;;  %10496 = vmatmul.mubr.msk.f32.gmra.mxu0 %vm19537_vm7, %v19371_v2  ;;  %vm19551_vm11 = vnez %v19550_v61  ;;  %vm19553_vm7 = vnez %v19552_v32  ;;  %v6602_v61 = vsub.f32 %v16390_v33, %v19608_v21  ;;  %v19609_v32 = vld [vmem:[#allocation95_spill] sm:$0xff] }
 0xd23   : > { %10524 = vmatprep.subr.mxu1 %v16348_v10  ;;  %10580 = vmatprep.subr.mxu0 %v16348_v10 }
 0xd24   : > { %10442 = vmatprep.mubr.msk.f32.mxu1 %vm19539_vm0, %v19371_v2  ;;  %10498 = vmatprep.mubr.msk.f32.mxu0 %vm19541_vm15, %v19371_v2  ;;  %vm19555_vm0 = vnez %v19554_v54  ;;  %vm19557_vm15 = vnez %v19556_v41  ;;  %v6578_v54 = vsub.f32 %v19609_v32, %v19608_v21  ;;  %v6619_v41 = vld [vmem:[#allocation3 + $0x40] sm:$0xff] }
 0xd25   : > { %10525 = vmatpush3.msra.mxu1 %v16348_v10  ;;  %10581 = vmatpush3.msra.mxu0 %v16348_v10 }
 0xd26   : > { %10526 = vmatprep.subr.mxu1 %v16356_v27  ;;  %10582 = vmatprep.subr.mxu0 %v16356_v27 }
 0xd27   : > { %10527 = vmatpush3.msra.mxu1 %v16356_v27  ;;  %10583 = vmatpush3.msra.mxu0 %v16356_v27 }
 0xd28   : > { %10443 = vmatmul.mubr.msk.f32.gmra.mxu1 %vm19543_vm4, %v19371_v2  ;;  %10499 = vmatmul.mubr.msk.f32.gmra.mxu0 %vm19545_vm3, %v19371_v2  ;;  %vm19559_vm4 = vnez %v19558_v6  ;;  %vm19561_vm3 = vnez %v19560_v23  ;;  %v19635_v6 = vld [vmem:[#allocation105_spill] sm:$0xff] }
 0xd29   : > { %10528 = vmatprep.subr.mxu1 %v16368_v17  ;;  %10584 = vmatprep.subr.mxu0 %v16368_v17 }
 0xd2a   : > { %10445 = vmatprep.mubr.msk.f32.mxu1 %vm19547_vm10, %v19371_v2  ;;  %10501 = vmatprep.mubr.msk.f32.mxu0 %vm19549_vm5, %v19371_v2  ;;  %vm19563_vm10 = vnez %v19562_v43  ;;  %vm19565_vm5 = vnez %v19564_v5  ;;  %v19613_v43 = vld [vmem:[#allocation110_spill] sm:$0xff] }
 0xd2b   : > { %10529 = vmatpush3.msra.mxu1 %v16368_v17  ;;  %10585 = vmatpush3.msra.mxu0 %v16368_v17 }
 0xd2c   : > { %10530 = vmatprep.subr.mxu1 %v16376_v46  ;;  %10586 = vmatprep.subr.mxu0 %v16376_v46 }
 0xd2d   : > { %10531 = vmatpush3.msra.mxu1 %v16376_v46  ;;  %10587 = vmatpush3.msra.mxu0 %v16376_v46 }
 0xd2e   : > { %10446 = vmatmul.mubr.msk.f32.gmra.mxu1 %vm19551_vm11, %v19371_v2  ;;  %10502 = vmatmul.mubr.msk.f32.gmra.mxu0 %vm19553_vm7, %v19371_v2  ;;  %vm19567_vm11 = vnez %v19566_v47  ;;  %vm19569_vm7 = vnez %v19568_v63  ;;  %v19615_v47 = vld [vmem:[#allocation117_spill] sm:$0xff] }
 0xd2f   : > { %10532 = vmatprep.subr.mxu1 %v16383_v29  ;;  %10588 = vmatprep.subr.mxu0 %v16383_v29  ;;  %v19616_v63 = vld [vmem:[#allocation37_spill] sm:$0xff] }
 0xd30   : > { %10533 = vmatpush3.msra.mxu1 %v16383_v29  ;;  %10536 = vmatprep.mubr.msk.f32.mxu1 %vm19555_vm0, %v19371_v2  ;;  %vm19571_vm0 = vnez %v19570_v34  ;;  %v6605_v34 = vsub.f32 %v16368_v17, %v19616_v63  ;;  %v7256_v17 = vld [vmem:[#allocation3 + $0xf8] sm:$0xff] }
 0xd31   : > { %10589 = vmatpush3.msra.mxu0 %v16383_v29  ;;  %10592 = vmatprep.mubr.msk.f32.mxu0 %vm19557_vm15, %v19371_v2  ;;  %vm19573_vm15 = vnez %v19572_v28  ;;  %v19617_v28 = vld [vmem:[#allocation146_spill] sm:$0xff] }
 0xd32   : > { %10534 = vmatprep.subr.mxu1 %v16390_v33  ;;  %10590 = vmatprep.subr.mxu0 %v16390_v33 }
 0xd33   : > { %10535 = vmatpush3.msra.mxu1 %v16390_v33  ;;  %10591 = vmatpush3.msra.mxu0 %v16390_v33  ;;  %v19612_v33 = vld [vmem:[#allocation39_spill] sm:$0xff] }
 0xd34   : > { %10537 = vmatmul.mubr.msk.f32.vlgmr.msra.gmra.mxu1 %vm19559_vm4, %v19371_v2  ;;  %10593 = vmatmul.mubr.msk.f32.vlgmr.msra.gmra.mxu0 %vm19561_vm3, %v19371_v2  ;;  %vm19575_vm4 = vnez %v19574_v18  ;;  %vm19577_vm3 = vnez %v19576_v36  ;;  %v6603_v23 = vsub.f32 %v16383_v29, %v19612_v33  ;;  %v6579_v5 = vsub.f32 %v19613_v43, %v19612_v33  ;;  %v7038_v29 = vld [vmem:[#allocation3 + $0xb8] sm:$0xff]  ;;  %v19619_v18 = vld [vmem:[#allocation118_spill] sm:$0xff] }
 0xd35   : > { %10539 = vmatprep.mubr.msk.f32.mxu1 %vm19563_vm10, %v19371_v2  ;;  %10595 = vmatprep.mubr.msk.f32.mxu0 %vm19565_vm5, %v19371_v2  ;;  %vm19579_vm10 = vnez %v19578_v4  ;;  %vm19581_vm5 = vnez %v19580_v15  ;;  %v19620_v4 = vld [vmem:[#allocation35_spill] sm:$0xff] }
 0xd36   : > { %10616 = vmatprep.subr.mxu1 %v6626_v3  ;;  %10656 = vmatprep.subr.mxu0 %v6601_v59  ;;  %v6607_v15 = vsub.f32 %v16348_v10, %v19620_v4  ;;  %v19624_v10 = vld [vmem:[#allocation33_spill] sm:$0xff] }
 0xd37   : > { %10617 = vmatpush3.msra.mxu1 %v6626_v3  ;;  %10657 = vmatpush3.msra.mxu0 %v6601_v59  ;;  %v6594_v3 = vld [vmem:[#allocation3] sm:$0xff] }
 0xd38   : > { %10540 = vmatmul.mubr.msk.f32.gmra.mxu1 %vm19567_vm11, %v19371_v2  ;;  %10596 = vmatmul.mubr.msk.f32.gmra.mxu0 %vm19569_vm7, %v19371_v2  ;;  %vm19583_vm11 = vnez %v19582_v30  ;;  %vm19585_vm7 = vnez %v19584_v52  ;;  %v19623_v52 = vld [vmem:[#allocation114_spill] sm:$0xff] }
 0xd39   : > { %10542 = vmatprep.mubr.msk.f32.mxu1 %vm19571_vm0, %v19371_v2  ;;  %10598 = vmatprep.mubr.msk.f32.mxu0 %vm19573_vm15, %v19371_v2  ;;  %vm19587_vm0 = vnez %v19586_v7  ;;  %vm19589_vm15 = vnez %v19588_v57  ;;  %v7037_v57 = vld [vmem:[#allocation3 + $0xb0] sm:$0xff] }
 0xd3a   : > { %10618 = vmatprep.subr.mxu1 %v6625_v1  ;;  %10658 = vmatprep.subr.mxu0 %v6600_v25 }
 0xd3b   : > { %10619 = vmatpush3.msra.mxu1 %v6625_v1  ;;  %10659 = vmatpush3.msra.mxu0 %v6600_v25  ;;  %v19614_v1 = vld [vmem:[#allocation38_spill] sm:$0xff] }
 0xd3c   : > { %10543 = vmatmul.mubr.msk.f32.gmra.mxu1 %vm19575_vm4, %v19371_v2  ;;  %10599 = vmatmul.mubr.msk.f32.gmra.mxu0 %vm19577_vm3, %v19371_v2  ;;  %vm19591_vm4 = vnez %v19590_v62  ;;  %vm19593_vm3 = vnez %v19592_v13  ;;  %v6604_v25 = vsub.f32 %v16376_v46, %v19614_v1  ;;  %v19618_v46 = vld [vmem:[#allocation36_spill] sm:$0xff] }
 0xd3d   : > { %10545 = vmatprep.mubr.msk.f32.mxu1 %vm19579_vm10, %v19371_v2  ;;  %10601 = vmatprep.mubr.msk.f32.mxu0 %vm19581_vm5, %v19371_v2  ;;  %vm19595_vm10 = vnez %v19594_v20  ;;  %vm19598_vm5 = vnez %v19597_v50  ;;  %v6582_v36 = vsub.f32 %v19619_v18, %v19618_v46  ;;  %v19627_v20 = vld [vmem:[#allocation102_spill] sm:$0xff] }
 0xd3e   : > { %10620 = vmatprep.subr.mxu1 %v6624_v16  ;;  %10660 = vmatprep.subr.mxu0 %v6599_v44 }
 0xd3f   : > { %10621 = vmatpush3.msra.mxu1 %v6624_v16  ;;  %10661 = vmatpush3.msra.mxu0 %v6599_v44  ;;  %v6581_v16 = vsub.f32 %v19617_v28, %v19616_v63  ;;  %v6606_v44 = vsub.f32 %v16356_v27, %v19618_v46  ;;  %v19622_v27 = vld [vmem:[#allocation34_spill] sm:$0xff] }
 0xd40   : > { %10546 = vmatmul.mubr.msk.f32.gmra.mxu1 %vm19583_vm11, %v19371_v2  ;;  %10602 = vmatmul.mubr.msk.f32.gmra.mxu0 %vm19585_vm7, %v19371_v2  ;;  %vm19601_vm11 = vnez %v19600_v39  ;;  %v6608_v30 = vsub.f32 %v16335_v35, %v19622_v27  ;;  %v6584_v7 = vsub.f32 %v19623_v52, %v19622_v27  ;;  %v19626_v35 = vld [vmem:[#allocation32_spill] sm:$0xff]  ;;  %v19630_v39 = vld [vmem:[#allocation30_spill] sm:$0xff] }
 0xd41   : > { %10548 = vmatprep.mubr.msk.f32.mxu1 %vm19587_vm0, %v19371_v2  ;;  %10604 = vmatprep.mubr.msk.f32.mxu0 %vm19589_vm15, %v19371_v2  ;;  %v6610_v13 = vsub.f32 %v16313_v60, %v19626_v35  ;;  %v6586_v58 = vsub.f32 %v19627_v20, %v19626_v35  ;;  %v6612_v55 = vsub.f32 %v16291_v37, %v19630_v39  ;;  %v7033_v20 = vld [vmem:[#allocation3 + $0x90] sm:$0xff] }
 0xd42   : > { %10622 = vmatprep.subr.mxu1 %v6623_v49  ;;  %10662 = vmatprep.subr.mxu0 %v6598_v12 }
 0xd43   : > { %10623 = vmatpush3.msra.mxu1 %v6623_v49  ;;  %10663 = vmatpush3.msra.mxu0 %v6598_v12  ;;  %v19621_v49 = vld [vmem:[#allocation100_spill] sm:$0xff] }
 0xd44   : > { %10549 = vmatmul.mubr.msk.f32.gmra.mxu1 %vm19591_vm4, %v19371_v2  ;;  %10605 = vmatmul.mubr.msk.f32.gmra.mxu0 %vm19593_vm3, %v19371_v2  ;;  %v6583_v12 = vsub.f32 %v19621_v49, %v19620_v4  ;;  %v19640_v49 = vld [vmem:[#allocation25_spill] sm:$0xff] }
 0xd45   : > { %10551 = vmatprep.mubr.msk.f32.mxu1 %vm19595_vm10, %v19371_v2  ;;  %10607 = vmatprep.mubr.msk.f32.mxu0 %vm19258_vm1, %v19371_v2  ;;  %vm19604_vm1 = vnez %v19603_v26 }
 0xd46   : > { %10624 = vmatprep.subr.mxu1 %v6622_v56  ;;  %10664 = vmatprep.subr.mxu0 %v6597_v42 }
 0xd47   : > { %10625 = vmatpush3.msra.mxu1 %v6622_v56  ;;  %10665 = vmatpush3.msra.mxu0 %v6597_v42  ;;  %v6609_v56 = vsub.f32 %v16326_v24, %v19624_v10  ;;  %v19625_v42 = vld [vmem:[#allocation164_spill] sm:$0xff]  ;;  %v7036_v24 = vld [vmem:[#allocation3 + $0xa8] sm:$0xff] }
 0xd48   : > { %10552 = vmatmul.mubr.msk.f32.gmra.mxu1 %vm19598_vm5, %v19371_v2  ;;  %10608 = vmatmul.mubr.msk.f32.gmra.mxu0 %vm19262_vm9, %v19371_v2  ;;  %v6585_v62 = vsub.f32 %v19625_v42, %v19624_v10  ;;  %v7252_v42 = vld [vmem:[#allocation3 + $0xd8] sm:$0xff] }
 0xd49   : > { %10554 = vmatprep.mubr.msk.f32.mxu1 %vm19601_vm11, %v19371_v2  ;;  %10610 = vmatprep.mubr.msk.f32.mxu0 %vm19266_vm2, %v19371_v2  ;;  %vm6627_vm2 = vcmask 523264  }
 0xd4a   : > { %10626 = vmatprep.subr.mxu1 %v6621_v38  ;;  %10666 = vmatprep.subr.mxu0 %v6596_v8 }
 0xd4b   : > { %10627 = vmatpush3.msra.mxu1 %v6621_v38  ;;  %10667 = vmatpush3.msra.mxu0 %v6596_v8  ;;  %v7255_v38 = vld [vmem:[#allocation3 + $0xf0] sm:$0xff] }
 0xd4c   : > { %10555 = vmatmul.mubr.msk.f32.gmra.mxu1 %vm19604_vm1, %v19371_v2  ;;  %10611 = vmatmul.mubr.msk.f32.gmra.mxu0 %vm15134_vm12, %v19371_v2  ;;  %v19628_v8 = vld [vmem:[#allocation31_spill] sm:$0xff] }
 0xd4d   : > { %10557 = vmatprep.mubr.msk.f32.mxu1 %vm19271_vm13, %v19371_v2  ;;  %10613 = vmatprep.mubr.msk.f32.mxu0 %vm15142_vm6, %v19371_v2  ;;  %v6611_v50 = vsub.f32 %v16303_v45, %v19628_v8  ;;  %v6587_v60 = vsub.f32 %v19629_v53, %v19628_v8 }
 0xd4e   : > { %10628 = vmatprep.subr.mxu1 %v6620_v11  ;;  %10668 = vmatprep.subr.mxu0 %v6595_v22 }
 0xd4f   : > { %10629 = vmatpush3.msra.mxu1 %v6620_v11  ;;  %10669 = vmatpush3.msra.mxu0 %v6595_v22  ;;  %v19631_v11 = vld [vmem:[#allocation166_spill] sm:$0xff] }
 0xd50   : > { %10558 = vmatmul.mubr.msk.f32.gmra.mxu1 %vm19274_vm14, %v19371_v2  ;;  %10614 = vmatmul.mubr.msk.f32.gmra.mxu0 %vm15156_vm8, %v19371_v2  ;;  %v6580_v2 = vsub.f32 %v19615_v47, %v19614_v1  ;;  %v6588_v22 = vsub.f32 %v19631_v11, %v19630_v39  ;;  %v7032_v11 = vld [vmem:[#allocation3 + $0x88] sm:$0xff] }
 0xd51   : > { %10632 = vmatprep.mubr.msk.f32.mxu1 %vm6627_vm2, %v6602_v61  ;;  %10672 = vmatprep.mubr.msk.f32.mxu0 %vm6627_vm2, %v6578_v54  ;;  %v19633_v61 = vld [vmem:[#allocation165_spill] sm:$0xff] }
 0xd52   : > { %10630 = vmatprep.subr.mxu1 %v6619_v41  ;;  %10670 = vmatprep.subr.mxu0 %v6594_v3  ;;  %v6589_v32 = vsub.f32 %v19633_v61, %v19632_v9 }
 0xd53   : > { %10631 = vmatpush3.msra.mxu1 %v6619_v41  ;;  %10671 = vmatpush3.msra.mxu0 %v6594_v3  ;;  %v19634_v3 = vld [vmem:[#allocation28_spill] sm:$0xff] }
 0xd54   : > { %10633 = vmatmul.mubr.msk.f32.vlgmr.msra.gmra.mxu1 %vm6627_vm2, %v6603_v23  ;;  %10673 = vmatmul.mubr.msk.f32.vlgmr.msra.gmra.mxu0 %vm6627_vm2, %v6579_v5  ;;  %v6614_v59 = vsub.f32 %v16268_v14, %v19634_v3  ;;  %v6590_v23 = vsub.f32 %v19635_v6, %v19634_v3  ;;  %v7035_v5 = vld [vmem:[#allocation3 + $0xa0] sm:$0xff] }
 0xd55   : > { %10635 = vmatprep.mubr.msk.f32.mxu1 %vm6627_vm2, %v6604_v25  ;;  %10675 = vmatprep.mubr.msk.f32.mxu0 %vm6627_vm2, %v6580_v2  ;;  %v6615_v25 = vsub.f32 %v16255_v40, %v19636_v0  ;;  %v19637_v14 = vld [vmem:[#allocation133_spill] sm:$0xff] }
 0xd56   : > { %10696 = vmatprep.subr.mxu1 %v7038_v29  ;;  %10736 = vmatprep.subr.mxu0 %v7256_v17  ;;  %v6591_v47 = vsub.f32 %v19637_v14, %v19636_v0 }
 0xd57   : > { %10697 = vmatpush3.msra.mxu1 %v7038_v29  ;;  %10737 = vmatpush3.msra.mxu0 %v7256_v17 }
 0xd58   : > { %10636 = vmatmul.mubr.msk.f32.gmra.mxu1 %vm6627_vm2, %v6605_v34  ;;  %10676 = vmatmul.mubr.msk.f32.gmra.mxu0 %vm6627_vm2, %v6581_v16  ;;  %v19638_v34 = vld [vmem:[#allocation26_spill] sm:$0xff]  ;;  %v19639_v16 = vld [vmem:[#allocation103_spill] sm:$0xff] }
 0xd59   : > { %10638 = vmatprep.mubr.msk.f32.mxu1 %vm6627_vm2, %v6606_v44  ;;  %10678 = vmatprep.mubr.msk.f32.mxu0 %vm6627_vm2, %v6582_v36  ;;  %v6616_v28 = vsub.f32 %v16245_v51, %v19638_v34  ;;  %v6592_v44 = vsub.f32 %v19639_v16, %v19638_v34  ;;  %v7253_v36 = vld [vmem:[#allocation3 + $0xe0] sm:$0xff] }
 0xd5a   : > { %10698 = vmatprep.subr.mxu1 %v7037_v57  ;;  %10738 = vmatprep.subr.mxu0 %v7255_v38 }
 0xd5b   : > { %10699 = vmatpush3.msra.mxu1 %v7037_v57  ;;  %10739 = vmatpush3.msra.mxu0 %v7255_v38 }
 0xd5c   : > { %10639 = vmatmul.mubr.msk.f32.gmra.mxu1 %vm6627_vm2, %v6607_v15  ;;  %10679 = vmatmul.mubr.msk.f32.gmra.mxu0 %vm6627_vm2, %v6583_v12  ;;  %v7034_v15 = vld [vmem:[#allocation3 + $0x98] sm:$0xff]  ;;  %v6617_v12 = vsub.f32 %v16236_v19, %v19640_v49 }
 0xd5d   : > { %10641 = vmatprep.mubr.msk.f32.mxu1 %vm6627_vm2, %v6608_v30  ;;  %10681 = vmatprep.mubr.msk.f32.mxu0 %vm6627_vm2, %v6584_v7  ;;  %v19641_v30 = vld [vmem:[#allocation132_spill] sm:$0xff] }
 0xd5e   : > { %10700 = vmatprep.subr.mxu1 %v7036_v24  ;;  %10740 = vmatprep.subr.mxu0 %v7254_v31  ;;  %v6593_v52 = vsub.f32 %v19641_v30, %v19640_v49 }
 0xd5f   : > { %10701 = vmatpush3.msra.mxu1 %v7036_v24  ;;  %10741 = vmatpush3.msra.mxu0 %v7254_v31  ;;  %v7031_v31 = vld [vmem:[#allocation3 + $0x80] sm:$0xff] }
 0xd60   : > { %10642 = vmatmul.mubr.msk.f32.gmra.mxu1 %vm6627_vm2, %v6609_v56  ;;  %10682 = vmatmul.mubr.msk.f32.gmra.mxu0 %vm6627_vm2, %v6585_v62 }
 0xd61   : > { %10644 = vmatprep.mubr.msk.f32.mxu1 %vm6627_vm2, %v6610_v13  ;;  %10684 = vmatprep.mubr.msk.f32.mxu0 %vm6627_vm2, %v6586_v58 }
 0xd62   : > { %10702 = vmatprep.subr.mxu1 %v7035_v5  ;;  %10742 = vmatprep.subr.mxu0 %v7253_v36 }
 0xd63   : > { %10703 = vmatpush3.msra.mxu1 %v7035_v5  ;;  %10743 = vmatpush3.msra.mxu0 %v7253_v36 }
 0xd64   : > { %10645 = vmatmul.mubr.msk.f32.gmra.mxu1 %vm6627_vm2, %v6611_v50  ;;  %10685 = vmatmul.mubr.msk.f32.gmra.mxu0 %vm6627_vm2, %v6587_v60  ;;  %v17034_v26 = vpop.f32.mrf.mxu1  ;;  %v17036_v45 = vpop.f32.mrf.mxu0  ;;  %v7251_v50 = vld [vmem:[#allocation3 + $0xd0] sm:$0xff] }
 0xd65   : > { %10647 = vmatprep.mubr.msk.f32.mxu1 %vm6627_vm2, %v6612_v55  ;;  %10687 = vmatprep.mubr.msk.f32.mxu0 %vm6627_vm2, %v6588_v22  ;;  %v7250_v22 = vld [vmem:[#allocation3 + $0xc8] sm:$0xff] }
 0xd66   : > { %v17046_v54 = vpop.f32.mrf.mxu1  ;;  %v17048_v41 = vpop.f32.mrf.mxu0  ;;  %10704 = vmatprep.subr.mxu1 %v7034_v15  ;;  %10744 = vmatprep.subr.mxu0 %v7252_v42 }
 0xd67   : > { %10705 = vmatpush3.msra.mxu1 %v7034_v15  ;;  %10745 = vmatpush3.msra.mxu0 %v7252_v42 }
 0xd68   : > { %10648 = vmatmul.mubr.msk.f32.gmra.mxu1 %vm6627_vm2, %v6613_v48  ;;  %10688 = vmatmul.mubr.msk.f32.gmra.mxu0 %vm6627_vm2, %v6589_v32  ;;  %v7249_v48 = vld [vmem:[#allocation3 + $0xc0] sm:$0xff] }
 0xd69   : > { %10650 = vmatprep.mubr.msk.f32.mxu1 %vm6627_vm2, %v6614_v59  ;;  %10690 = vmatprep.mubr.msk.f32.mxu0 %vm6627_vm2, %v6590_v23 }
 0xd6a   : > { %v17064_v2 = vpop.f32.mrf.mxu1  ;;  %v17066_v29 = vpop.f32.mrf.mxu0  ;;  %10706 = vmatprep.subr.mxu1 %v7033_v20  ;;  %10746 = vmatprep.subr.mxu0 %v7251_v50 }
 0xd6b   : > { %10707 = vmatpush3.msra.mxu1 %v7033_v20  ;;  %10747 = vmatpush3.msra.mxu0 %v7251_v50 }
 0xd6c   : > { %10651 = vmatmul.mubr.msk.f32.gmra.mxu1 %vm6627_vm2, %v6615_v25  ;;  %10691 = vmatmul.mubr.msk.f32.gmra.mxu0 %vm6627_vm2, %v6591_v47  ;;  %v17076_v40 = vpop.f32.mrf.mxu1  ;;  %v17078_v17 = vpop.f32.mrf.mxu0 }
 0xd6d   : > { %10653 = vmatprep.mubr.msk.f32.mxu1 %vm6627_vm2, %v6616_v28  ;;  %10693 = vmatprep.mubr.msk.f32.mxu0 %vm6627_vm2, %v6592_v44 }
 0xd6e   : > { %10708 = vmatprep.subr.mxu1 %v7032_v11  ;;  %10748 = vmatprep.subr.mxu0 %v7250_v22 }
 0xd6f   : > { %10709 = vmatpush3.msra.mxu1 %v7032_v11  ;;  %10749 = vmatpush3.msra.mxu0 %v7250_v22 }
 0xd70   : > { %10654 = vmatmul.mubr.msk.f32.gmra.mxu1 %vm6627_vm2, %v6617_v12  ;;  %10694 = vmatmul.mubr.msk.f32.gmra.mxu0 %vm6627_vm2, %v6593_v52  ;;  %v17090_v7 = vpop.f32.mrf.mxu1  ;;  %v17092_v57 = vpop.f32.mrf.mxu0 }
 0xd71   : > { %10710 = vmatprep.subr.mxu1 %v7031_v31  ;;  %10750 = vmatprep.subr.mxu0 %v7249_v48 }
 0xd72   : > { %v17096_v19 = vpop.f32.mrf.mxu1  ;;  %v17098_v62 = vpop.f32.mrf.mxu0  ;;  %10711 = vmatpush3.msra.mxu1 %v7031_v31  ;;  %10751 = vmatpush3.msra.mxu0 %v7249_v48 }
 0xd76   : > { %v17102_v58 = vpop.f32.mrf.mxu1  ;;  %v17104_v38 = vpop.f32.mrf.mxu0 }
 0xd78   : > { %v17108_v53 = vpop.f32.mrf.mxu1  ;;  %v17110_v60 = vpop.f32.mrf.mxu0 }
 0xd7c   : > { %v17114_v61 = vpop.f32.mrf.mxu1  ;;  %v17116_v32 = vpop.f32.mrf.mxu0 }
 0xd7e   : > { %v17120_v6 = vpop.f32.mrf.mxu1  ;;  %v17122_v23 = vpop.f32.mrf.mxu0 }
 0xd82   : > { %v17126_v25 = vpop.f32.mrf.mxu1  ;;  %v17128_v14 = vpop.f32.mrf.mxu0 }
 0xd83   : > { %19642 = vst [vmem:[#allocation223_spill] sm:$0xff] %v17126_v25  ;;  %19643 = vst [vmem:[#allocation224_spill] sm:$0xff] %v17128_v14 }
 0xd84   : > { %v17132_v28 = vpop.f32.mrf.mxu1  ;;  %v17134_v16 = vpop.f32.mrf.mxu0 }
 0xd85   : > { %19644 = vst [vmem:[#allocation41_spill] sm:$0xff] %v17132_v28  ;;  %19645 = vst [vmem:[#allocation57_spill] sm:$0xff] %v17134_v16 }
 0xd88   : > { %v17138_v36 = vpop.f32.mrf.mxu1  ;;  %v17140_v15 = vpop.f32.mrf.mxu0 }
 0xd89   : > { %19646 = vst [vmem:[#allocation99_spill] sm:$0xff] %v17138_v36  ;;  %19647 = vst [vmem:[#allocation137_spill] sm:$0xff] %v17140_v15 }
 0xd8a   : > { %v17144_v30 = vpop.f32.mrf.mxu1  ;;  %v17146_v52 = vpop.f32.mrf.mxu0 }
 0xd8b   : > { %19648 = vst [vmem:[#allocation107_spill] sm:$0xff] %v17144_v30  ;;  %19649 = vst [vmem:[#allocation143_spill] sm:$0xff] %v17146_v52 }
 0xd8e   : > { %v17150_v20 = vpop.f32.mrf.mxu1  ;;  %v17152_v50 = vpop.f32.mrf.mxu0 }
 0xd8f   : > { %19650 = vst [vmem:[#allocation108_spill] sm:$0xff] %v17150_v20  ;;  %19651 = vst [vmem:[#allocation219_spill] sm:$0xff] %v17152_v50 }
 0xd90   : > { %v17156_v22 = vpop.f32.mrf.mxu1  ;;  %v17158_v31 = vpop.f32.mrf.mxu0 }
 0xd91   : > { %19652 = vst [vmem:[#allocation116_spill] sm:$0xff] %v17156_v22  ;;  %19653 = vst [vmem:[#allocation145_spill] sm:$0xff] %v17158_v31 }
 0xd94   : > { %v10314_v12 = vpop.f32.mrf.mxu1  ;;  %v17162_v44 = vpop.f32.mrf.mxu0 }
 0xd96   : > { %v5678_v47 = vpop.f32.mrf.mxu1  ;;  %v17164_v5 = vpop.f32.mrf.mxu0 }
 0xd9a   : > { %v10317_v42 = vpop.f32.mrf.mxu1  ;;  %v17166_v59 = vpop.f32.mrf.mxu0 }
 0xd9c   : > { %v5688_v55 = vpop.f32.mrf.mxu1  ;;  %v17168_v24 = vpop.f32.mrf.mxu0 }
 0xda0   : > { %v10320_v11 = vpop.f32.mrf.mxu1  ;;  %v17170_v13 = vpop.f32.mrf.mxu0 }
 0xda2   : > { %v17172_v56 = vpop.f32.mrf.mxu1  ;;  %v17174_v51 = vpop.f32.mrf.mxu0 }
 0xda6   : > { %v17176_v48 = vpop.f32.mrf.mxu1  ;;  %v17178_v18 = vpop.f32.mrf.mxu0 }
 0xda8   : > { %v17180_v43 = vpop.f32.mrf.mxu1  ;;  %v17182_v37 = vpop.f32.mrf.mxu0 }
 0xdac   : > { %v17184_v49 = vpop.f32.mrf.mxu1  ;;  %v17186_v34 = vpop.f32.mrf.mxu0 }
 0xdae   : > { %v17188_v0 = vpop.f32.mrf.mxu1  ;;  %v17190_v3 = vpop.f32.mrf.mxu0 }
 0xdaf   : > { %19654 = vst [vmem:[#allocation92_spill] sm:$0xff] %v17190_v3 }
 0xdb2   : > { %v17192_v9 = vpop.f32.mrf.mxu1  ;;  %v17194_v39 = vpop.f32.mrf.mxu0 }
 0xdb3   : > { %19655 = vst [vmem:[#allocation91_spill] sm:$0xff] %v17194_v39 }
 0xdb4   : > { %v17196_v8 = vpop.f32.mrf.mxu1  ;;  %v17198_v35 = vpop.f32.mrf.mxu0 }
 0xdb5   : > { %19656 = vst [vmem:[#allocation225_spill] sm:$0xff] %v17196_v8  ;;  %19657 = vst [vmem:[#allocation163_spill] sm:$0xff] %v17198_v35 }
 0xdb8   : > { %v17200_v10 = vpop.f32.mrf.mxu1  ;;  %v17202_v27 = vpop.f32.mrf.mxu0 }
 0xdb9   : > { %19658 = vst [vmem:[#allocation144_spill] sm:$0xff] %v17200_v10  ;;  %19659 = vst [vmem:[#allocation94_spill] sm:$0xff] %v17202_v27 }
 0xdba   : > { %v17204_v31 = vpop.f32.mrf.mxu1  ;;  %v17206_v22 = vpop.f32.mrf.mxu0 }
 0xdbb   : > { %19660 = vst [vmem:[#allocation218_spill] sm:$0xff] %v17204_v31  ;;  %19661 = vst [vmem:[#allocation226_spill] sm:$0xff] %v17206_v22 }
 0xdbe   : > { %v17208_v4 = vpop.f32.mrf.mxu1  ;;  %v17210_v50 = vpop.f32.mrf.mxu0 }
 0xdbf   : > { %19662 = vst [vmem:[#allocation111_spill] sm:$0xff] %v17208_v4  ;;  %19663 = vst [vmem:[#allocation139_spill] sm:$0xff] %v17210_v50 }
 0xdc0   : > { %v17212_v20 = vpop.f32.mrf.mxu1  ;;  %v17214_v46 = vpop.f32.mrf.mxu0 }
 0xdc1   : > { %19664 = vst [vmem:[#allocation184_spill] sm:$0xff] %v17212_v20  ;;  %19665 = vst [vmem:[#allocation101_spill] sm:$0xff] %v17214_v46 }
 0xdc4   : > { %v10426_v52 = vpop.f32.mrf.mxu1  ;;  %v10482_v30 = vpop.f32.mrf.mxu0 }
 0xdc6   : > { %v6000_v63 = vpop.f32.mrf.mxu1  ;;  %v6161_v35 = vpop.f32.mrf.mxu0 }
 0xdca   : > { %v10429_v39 = vpop.f32.mrf.mxu1  ;;  %v17216_v1 = vpop.f32.mrf.mxu0 }
 0xdcc   : > { %v6010_v27 = vpop.f32.mrf.mxu1  ;;  %v17218_v15 = vpop.f32.mrf.mxu0 }
 0xdd0   : > { %v10432_v31 = vpop.f32.mrf.mxu1  ;;  %v17220_v22 = vpop.f32.mrf.mxu0 }
 0xdd2   : > { %v6020_v4 = vpop.f32.mrf.mxu1  ;;  %v17222_v36 = vpop.f32.mrf.mxu0 }
 0xdd3   : > { %19666 = vst [vmem:[#allocation109_spill] sm:$0xff] %v17222_v36 }
 0xdd6   : > { %v17224_v50 = vpop.f32.mrf.mxu1  ;;  %v17226_v20 = vpop.f32.mrf.mxu0 }
 0xdd7   : > { %19667 = vst [vmem:[#allocation183_spill] sm:$0xff] %v17226_v20 }
 0xdd8   : > { %v17228_v46 = vpop.f32.mrf.mxu1  ;;  %v17230_v10 = vpop.f32.mrf.mxu0 }
 0xdd9   : > { %19668 = vst [vmem:[#allocation115_spill] sm:$0xff] %v17228_v46  ;;  %19669 = vst [vmem:[#allocation167_spill] sm:$0xff] %v17230_v10  ;;  %v19680_v10 = vmax.f32 %v17034_v26, %v17036_v45  ;;  %v19683_v26 = vmax.f32 %v17076_v40, %v17078_v17 }
 0xddb   : > { %v5759_v45 = vmax.f32 %v19683_v26, %v5688_v55  ;;  %v19691_v26 = vld [vmem:[#allocation224_spill] sm:$0xff] }
 0xddc   : > { %v17232_v16 = vpop.f32.mrf.mxu1  ;;  %v17234_v28 = vpop.f32.mrf.mxu0 }
 0xddd   : > { %19670 = vst [vmem:[#allocation134_spill] sm:$0xff] %v17232_v16  ;;  %19671 = vst [vmem:[#allocation112_spill] sm:$0xff] %v17234_v28  ;;  %v5758_v28 = vmax.f32 %v19680_v10, %v10314_v12  ;;  %v5920_v40 = vmax.f32 %v5759_v45, %v17168_v24 }
 0xdde   : > { %v17236_v8 = vpop.f32.mrf.mxu1  ;;  %v17238_v3 = vpop.f32.mrf.mxu0 }
 0xddf   : > { %19672 = vst [vmem:[#allocation140_spill] sm:$0xff] %v17236_v8  ;;  %19673 = vst [vmem:[#allocation135_spill] sm:$0xff] %v17238_v3  ;;  %v19681_v3 = vmax.f32 %v17046_v54, %v17048_v41  ;;  %v19684_v54 = vmax.f32 %v17090_v7, %v17092_v57 }
 0xde1   : > { %v5762_v41 = vmax.f32 %v19684_v54, %v10320_v11  ;;  %v19694_v54 = vld [vmem:[#allocation39_spill] sm:$0xff] }
 0xde2   : > { %v17240_v33 = vpop.f32.mrf.mxu1  ;;  %v17242_v14 = vpop.f32.mrf.mxu0 }
 0xde3   : > { %19674 = vst [vmem:[#allocation141_spill] sm:$0xff] %v17240_v33  ;;  %19675 = vst [vmem:[#allocation93_spill] sm:$0xff] %v17242_v14  ;;  %v5757_v14 = vmax.f32 %v19681_v3, %v5678_v47 }
 0xde4   : > { %v17244_v36 = vpop.f32.mrf.mxu1  ;;  %v17246_v25 = vpop.f32.mrf.mxu0 }
 0xde5   : > { %19676 = vst [vmem:[#allocation228_spill] sm:$0xff] %v17244_v36  ;;  %19677 = vst [vmem:[#allocation220_spill] sm:$0xff] %v17246_v25  ;;  %v5919_v36 = vmax.f32 %v5758_v28, %v17162_v44  ;;  %v19682_v25 = vmax.f32 %v17064_v2, %v17066_v29  ;;  %v5918_v10 = vmax.f32 %v5757_v14, %v17164_v5 }
 0xde6   : > { %v19685_v5 = vmax.f32 %v17096_v19, %v17098_v62  ;;  %v5923_v14 = vmax.f32 %v5762_v41, %v17170_v13  ;;  %v19686_v28 = vmax.f32 %v17102_v58, %v17104_v38 }
 0xde7   : > { %v6080_v12 = vmax.f32 %v5919_v36, %v10426_v52  ;;  %v6079_v29 = vmax.f32 %v5918_v10, %v6000_v63  ;;  %v6081_v63 = vmax.f32 %v5920_v40, %v6010_v27  ;;  %v19690_v10 = vld [vmem:[#allocation223_spill] sm:$0xff]  ;;  %v19698_v40 = vld [vmem:[#allocation41_spill] sm:$0xff] }
 0xde8   : > { %v17248_v20 = vpop.f32.mrf.mxu1  ;;  %v17250_v46 = vpop.f32.mrf.mxu0  ;;  %v5764_v44 = vmax.f32 %v19686_v28, %v17176_v48  ;;  %v6084_v38 = vmax.f32 %v5923_v14, %v10432_v31  ;;  %v19701_v14 = vld [vmem:[#allocation144_spill] sm:$0xff] }
 0xde9   : > { %19678 = vst [vmem:[#allocation221_spill] sm:$0xff] %v17248_v20  ;;  %19679 = vst [vmem:[#allocation104_spill] sm:$0xff] %v17250_v46  ;;  %v5760_v20 = vmax.f32 %v19682_v25, %v10317_v42  ;;  %v5761_v25 = vmax.f32 %v19685_v5, %v17172_v56  ;;  %v6241_v17 = vmax.f32 %v6080_v12, %v10482_v30 }
 0xdea   : > { %v17255_v16 = vpop.f32.mrf.mxu1  ;;  %v17257_v8 = vpop.f32.mrf.mxu0  ;;  %v19687_v56 = vmax.f32 %v17108_v53, %v17110_v60  ;;  %v6242_v53 = vmax.f32 %v6081_v63, %v17218_v15  ;;  %v6245_v31 = vmax.f32 %v6084_v38, %v17220_v22  ;;  %v19709_v38 = vld [vmem:[#allocation140_spill] sm:$0xff] }
 0xdeb   : > { %v5921_v2 = vmax.f32 %v5760_v20, %v17166_v59  ;;  %v6240_v59 = vmax.f32 %v6079_v29, %v6161_v35  ;;  %v5922_v52 = vmax.f32 %v5761_v25, %v17174_v51  ;;  %v5925_v20 = vmax.f32 %v5764_v44, %v17178_v18  ;;  %v19697_v25 = vld [vmem:[#allocation225_spill] sm:$0xff] }
 0xdec   : > { %v5763_v19 = vmax.f32 %v19687_v56, %v17180_v43  ;;  %v19706_v56 = vld [vmem:[#allocation134_spill] sm:$0xff] }
 0xded   : > { %v6082_v55 = vmax.f32 %v5921_v2, %v10429_v39  ;;  %v19688_v39 = vmax.f32 %v17114_v61, %v17116_v32  ;;  %v6083_v27 = vmax.f32 %v5922_v52, %v6020_v4  ;;  %v6086_v48 = vmax.f32 %v5925_v20, %v17224_v50  ;;  %v19695_v2 = vld [vmem:[#allocation115_spill] sm:$0xff] }
 0xdee   : > { %v17266_v33 = vpop.f32.mrf.mxu1  ;;  %v17268_v46 = vpop.f32.mrf.mxu0  ;;  %v5924_v11 = vmax.f32 %v5763_v19, %v17182_v37  ;;  %v19692_v37 = vmax.f32 %v19690_v10, %v19691_v26 }
 0xdef   : > { %v5766_v62 = vmax.f32 %v19688_v39, %v17184_v49  ;;  %v6243_v58 = vmax.f32 %v6082_v55, %v17216_v1  ;;  %v19689_v1 = vmax.f32 %v17120_v6, %v17122_v23  ;;  %v19707_v39 = vld [vmem:[#allocation38_spill] sm:$0xff] }
 0xdf0   : > { %v17277_v3 = vpop.f32.mrf.mxu1  ;;  %v17279_v47 = vpop.f32.mrf.mxu0  ;;  %v5768_v45 = vmax.f32 %v19692_v37, %v17192_v9  ;;  %v6085_v29 = vmax.f32 %v5924_v11, %v19695_v2  ;;  %v19699_v9 = vld [vmem:[#allocation57_spill] sm:$0xff]  ;;  %v19718_v37 = vld [vmem:[#allocation112_spill] sm:$0xff]  ;;  %v19723_v2 = vld [vmem:[#allocation219_spill] sm:$0xff] }
 0xdf1   : > { %v5927_v49 = vmax.f32 %v5766_v62, %v17186_v34  ;;  %v5765_v61 = vmax.f32 %v19689_v1, %v17188_v0  ;;  %v19693_v34 = vld [vmem:[#allocation109_spill] sm:$0xff] }
 0xdf2   : > { %v6244_v12 = vmax.f32 %v6083_v27, %v19693_v34  ;;  %v19710_v27 = vld [vmem:[#allocation37_spill] sm:$0xff] }
 0xdf3   : > { %v6088_v19 = vmax.f32 %v5927_v49, %v19706_v56  ;;  %v19712_v49 = vld [vmem:[#allocation163_spill] sm:$0xff]  ;;  %v19719_v34 = vld [vmem:[#allocation141_spill] sm:$0xff] }
 0xdf4   : > { %v10538_v7 = vpop.f32.mrf.mxu1  ;;  %v10594_v57 = vpop.f32.mrf.mxu0 }
 0xdf5   : > { %v6402_v36 = vmax.f32 %v6241_v17, %v10538_v7  ;;  %v19700_v17 = vmax.f32 %v19698_v40, %v19699_v9  ;;  %v19702_v7 = vld [vmem:[#allocation99_spill] sm:$0xff] }
 0xdf6   : > { %v6322_v13 = vpop.f32.mrf.mxu1  ;;  %v6483_v24 = vpop.f32.mrf.mxu0 }
 0xdf7   : > { %v6401_v35 = vmax.f32 %v6240_v59, %v6322_v13  ;;  %v6563_v30 = vmax.f32 %v6402_v36, %v10594_v57  ;;  %v5767_v55 = vmax.f32 %v19700_v17, %v19697_v25  ;;  %v19703_v57 = vld [vmem:[#allocation137_spill] sm:$0xff]  ;;  %v19705_v36 = vld [vmem:[#allocation183_spill] sm:$0xff] }
 0xdf8   : > { %v10541_v42 = vpop.f32.mrf.mxu1  ;;  %v10597_v51 = vpop.f32.mrf.mxu0  ;;  %v19704_v28 = vmax.f32 %v19702_v7, %v19703_v57  ;;  %v6247_v52 = vmax.f32 %v6086_v48, %v19705_v36  ;;  %v19716_v48 = vld [vmem:[#allocation143_spill] sm:$0xff]  ;;  %v19731_v36 = vld [vmem:[#allocation145_spill] sm:$0xff] }
 0xdf9   : > { %v6562_v43 = vmax.f32 %v6401_v35, %v6483_v24  ;;  %v6404_v60 = vmax.f32 %v6243_v58, %v10541_v42  ;;  %v7015_v41 = vsub.f32 %v6563_v30, %v19694_v54  ;;  %v19708_v24 = vld [vmem:[#allocation91_spill] sm:$0xff]  ;;  %v5928_v1 = vmax.f32 %v5767_v55, %v19712_v49  ;;  %v19720_v54 = vld [vmem:[#allocation36_spill] sm:$0xff] }
 0xdfa   : > { %v6332_v32 = vpop.f32.mrf.mxu1  ;;  %v6493_v4 = vpop.f32.mrf.mxu0  ;;  %v5770_v44 = vmax.f32 %v19704_v28, %v19701_v14  ;;  %v5929_v58 = vmax.f32 %v5768_v45, %v19708_v24  ;;  %v6249_v45 = vmax.f32 %v6088_v19, %v19718_v37  ;;  %v19727_v55 = vld [vmem:[#allocation228_spill] sm:$0xff]  ;;  %v19728_v28 = vld [vmem:[#allocation226_spill] sm:$0xff]  ;;  %v19734_v24 = vld [vmem:[#allocation221_spill] sm:$0xff] }
 0xdfb   : > { %v7014_v18 = vsub.f32 %v6562_v43, %v19608_v21  ;;  %v6403_v15 = vmax.f32 %v6242_v53, %v6332_v32  ;;  %v6565_v6 = vmax.f32 %v6404_v60, %v10597_v51  ;;  %v19696_v21 = vld [vmem:[#allocation92_spill] sm:$0xff]  ;;  %v19711_v53 = vld [vmem:[#allocation167_spill] sm:$0xff]  ;;  %v6089_v14 = vmax.f32 %v5928_v1, %v19727_v55 }
 0xdfc   : > { %v10544_v0 = vpop.f32.mrf.mxu1  ;;  %v10600_v23 = vpop.f32.mrf.mxu0  ;;  %v5926_v50 = vmax.f32 %v5765_v61, %v19696_v21  ;;  %v6246_v43 = vmax.f32 %v6085_v29, %v19711_v53  ;;  %v19713_v61 = vld [vmem:[#allocation94_spill] sm:$0xff]  ;;  %v19738_v49 = vld [vmem:[#allocation220_spill] sm:$0xff] }
 0xdfd   : > { %v6564_v22 = vmax.f32 %v6403_v15, %v6493_v4  ;;  %v6406_v5 = vmax.f32 %v6245_v31, %v10544_v0  ;;  %10712 = vmatprep.mubr.msk.f32.mxu1 %vm6627_vm2, %v7014_v18  ;;  %10752 = vmatprep.mubr.msk.f32.mxu0 %vm6627_vm2, %v7014_v18  ;;  %v7017_v30 = vsub.f32 %v6565_v6, %v19710_v27  ;;  %v19714_v4 = vld [vmem:[#allocation218_spill] sm:$0xff]  ;;  %v19715_v31 = vld [vmem:[#allocation107_spill] sm:$0xff] }
 0xdfe   : > { %v6342_v59 = vpop.f32.mrf.mxu1  ;;  %v6503_v63 = vpop.f32.mrf.mxu0  ;;  %10713 = vmatmul.mubr.msk.f32.vlgmr.msra.gmra.mxu1 %vm6627_vm2, %v7015_v41  ;;  %10753 = vmatmul.mubr.msk.f32.vlgmr.msra.gmra.mxu0 %vm6627_vm2, %v7015_v41  ;;  %v6087_v35 = vmax.f32 %v5926_v50, %v19709_v38  ;;  %v5931_v32 = vmax.f32 %v5770_v44, %v19713_v61  ;;  %v19717_v18 = vmax.f32 %v19715_v31, %v19716_v48  ;;  %v19721_v0 = vld [vmem:[#allocation111_spill] sm:$0xff]  ;;  %v19735_v38 = vld [vmem:[#allocation34_spill] sm:$0xff] }
 0xdff   : > { %v7016_v62 = vsub.f32 %v6564_v22, %v19707_v39  ;;  %v6405_v13 = vmax.f32 %v6244_v12, %v6342_v59  ;;  %v6567_v42 = vmax.f32 %v6406_v5, %v10600_v23  ;;  %v6090_v12 = vmax.f32 %v5929_v58, %v19719_v34  ;;  %v19722_v23 = vld [vmem:[#allocation108_spill] sm:$0xff]  ;;  %v19725_v5 = vld [vmem:[#allocation135_spill] sm:$0xff] }
 0xe00   : > { %v10547_v51 = vpop.f32.mrf.mxu1  ;;  %v10603_v20 = vpop.f32.mrf.mxu0  ;;  %v5769_v15 = vmax.f32 %v19717_v18, %v19714_v4  ;;  %v19724_v29 = vmax.f32 %v19722_v23, %v19723_v2  ;;  %v6248_v21 = vmax.f32 %v6087_v35, %v19725_v5  ;;  %v19726_v50 = vld [vmem:[#allocation35_spill] sm:$0xff]  ;;  %v19729_v59 = vld [vmem:[#allocation184_spill] sm:$0xff]  ;;  %v6092_v58 = vmax.f32 %v5931_v32, %v19734_v24  ;;  %v19739_v32 = vld [vmem:[#allocation101_spill] sm:$0xff] }
 0xe01   : > { %v6566_v60 = vmax.f32 %v6405_v13, %v6503_v63  ;;  %v6408_v11 = vmax.f32 %v6247_v52, %v10547_v51  ;;  %10715 = vmatprep.mubr.msk.f32.mxu1 %vm6627_vm2, %v7016_v62  ;;  %10755 = vmatprep.mubr.msk.f32.mxu0 %vm6627_vm2, %v7016_v62  ;;  %v7019_v25 = vsub.f32 %v6567_v42, %v19726_v50  ;;  %v19730_v63 = vld [vmem:[#allocation116_spill] sm:$0xff]  ;;  %v19733_v62 = vld [vmem:[#allocation93_spill] sm:$0xff]  ;;  %v19743_v5 = vld [vmem:[#allocation30_spill] sm:$0xff] }
 0xe02   : > { %v6352_v10 = vpop.f32.mrf.mxu1  ;;  %v6513_v26 = vpop.f32.mrf.mxu0  ;;  %10716 = vmatmul.mubr.msk.f32.gmra.mxu1 %vm6627_vm2, %v7017_v30  ;;  %10756 = vmatmul.mubr.msk.f32.gmra.mxu0 %vm6627_vm2, %v7017_v30  ;;  %v5772_v22 = vmax.f32 %v19724_v29, %v19721_v0  ;;  %v5930_v44 = vmax.f32 %v5769_v15, %v19728_v28  ;;  %v19732_v52 = vmax.f32 %v19730_v63, %v19731_v36  ;;  %v19736_v30 = vld [vmem:[#allocation139_spill] sm:$0xff] }
 0xe03   : > { %v7018_v41 = vsub.f32 %v6566_v60, %v19720_v54  ;;  %v6407_v6 = vmax.f32 %v6246_v43, %v6352_v10  ;;  %v6569_v40 = vmax.f32 %v6408_v11, %v10603_v20  ;;  %v6251_v13 = vmax.f32 %v6090_v12, %v19733_v62  ;;  %v19737_v20 = vld [vmem:[#allocation33_spill] sm:$0xff]  ;;  %v19742_v12 = vld [vmem:[#allocation31_spill] sm:$0xff] }
 0xe04   : > { %v10550_v9 = vpop.f32.mrf.mxu1  ;;  %v10606_v17 = vpop.f32.mrf.mxu0  ;;  %v5771_v56 = vmax.f32 %v19732_v52, %v19729_v59  ;;  %v5933_v42 = vmax.f32 %v5772_v22, %v19736_v30  ;;  %v6091_v51 = vmax.f32 %v5930_v44, %v17255_v16  ;;  %v6250_v1 = vmax.f32 %v6089_v14, %v19738_v49  ;;  %v19740_v16 = vld [vmem:[#allocation104_spill] sm:$0xff]  ;;  %v19746_v59 = vld [vmem:[#allocation27_spill] sm:$0xff] }
 0xe05   : > { %v6568_v7 = vmax.f32 %v6407_v6, %v6513_v26  ;;  %v6410_v57 = vmax.f32 %v6249_v45, %v10550_v9  ;;  %10718 = vmatprep.mubr.msk.f32.mxu1 %vm6627_vm2, %v7018_v41  ;;  %10758 = vmatprep.mubr.msk.f32.mxu0 %vm6627_vm2, %v7018_v41  ;;  %v7021_v53 = vsub.f32 %v6569_v40, %v19737_v20  ;;  %v19741_v26 = vld [vmem:[#allocation32_spill] sm:$0xff] }
 0xe06   : > { %v6362_v19 = vpop.f32.mrf.mxu1  ;;  %v6523_v39 = vpop.f32.mrf.mxu0  ;;  %10719 = vmatmul.mubr.msk.f32.gmra.mxu1 %vm6627_vm2, %v7019_v25  ;;  %10759 = vmatmul.mubr.msk.f32.gmra.mxu0 %vm6627_vm2, %v7019_v25  ;;  %v5932_v31 = vmax.f32 %v5771_v56, %v19739_v32  ;;  %v6253_v15 = vmax.f32 %v6092_v58, %v19740_v16  ;;  %v6094_v10 = vmax.f32 %v5933_v42, %v17266_v33  ;;  %v19744_v25 = vld [vmem:[#allocation29_spill] sm:$0xff] }
 0xe07   : > { %v7020_v35 = vsub.f32 %v6568_v7, %v19735_v38  ;;  %v6409_v27 = vmax.f32 %v6248_v21, %v6362_v19  ;;  %v6571_v43 = vmax.f32 %v6410_v57, %v10606_v17  ;;  %v6252_v34 = vmax.f32 %v6091_v51, %v17257_v8 }
 0xe08   : > { %v10553_v60 = vpop.f32.mrf.mxu1  ;;  %v10609_v11 = vpop.f32.mrf.mxu0  ;;  %v6093_v23 = vmax.f32 %v5932_v31, %v17277_v3  ;;  %v6255_v8 = vmax.f32 %v6094_v10, %v17268_v46  ;;  %v19745_v46 = vld [vmem:[#allocation28_spill] sm:$0xff] }
 0xe09   : > { %v6570_v61 = vmax.f32 %v6409_v27, %v6523_v39  ;;  %v6412_v4 = vmax.f32 %v6251_v13, %v10553_v60  ;;  %10721 = vmatprep.mubr.msk.f32.mxu1 %vm6627_vm2, %v7020_v35  ;;  %10761 = vmatprep.mubr.msk.f32.mxu0 %vm6627_vm2, %v7020_v35  ;;  %v7023_v54 = vsub.f32 %v6571_v43, %v19742_v12  ;;  %v19748_v39 = vld [vmem:[#allocation25_spill] sm:$0xff] }
 0xe0a   : > { %v6372_v48 = vpop.f32.mrf.mxu1  ;;  %v6533_v18 = vpop.f32.mrf.mxu0  ;;  %10722 = vmatmul.mubr.msk.f32.gmra.mxu1 %vm6627_vm2, %v7021_v53  ;;  %10762 = vmatmul.mubr.msk.f32.gmra.mxu0 %vm6627_vm2, %v7021_v53  ;;  %v6254_v55 = vmax.f32 %v6093_v23, %v17279_v47  ;;  %v19747_v47 = vld [vmem:[#allocation26_spill] sm:$0xff] }
 0xe0b   : > { %v7022_v37 = vsub.f32 %v6570_v61, %v19741_v26  ;;  %v6411_v45 = vmax.f32 %v6250_v1, %v6372_v48  ;;  %v6573_v41 = vmax.f32 %v6412_v4, %v10609_v11 }
 0xe0c   : > { %v10556_v6 = vpop.f32.mrf.mxu1  ;;  %v10612_v0 = vpop.f32.mrf.mxu0 }
 0xe0d   : > { %v6572_v2 = vmax.f32 %v6411_v45, %v6533_v18  ;;  %v6414_v29 = vmax.f32 %v6253_v15, %v10556_v6  ;;  %10724 = vmatprep.mubr.msk.f32.mxu1 %vm6627_vm2, %v7022_v37  ;;  %10764 = vmatprep.mubr.msk.f32.mxu0 %vm6627_vm2, %v7022_v37  ;;  %v7025_v40 = vsub.f32 %v6573_v41, %v19744_v25 }
 0xe0e   : > { %v6382_v22 = vpop.f32.mrf.mxu1  ;;  %v6543_v33 = vpop.f32.mrf.mxu0  ;;  %10725 = vmatmul.mubr.msk.f32.gmra.mxu1 %vm6627_vm2, %v7023_v54  ;;  %10765 = vmatmul.mubr.msk.f32.gmra.mxu0 %vm6627_vm2, %v7023_v54 }
 0xe0f   : > { %v7024_v21 = vsub.f32 %v6572_v2, %v19743_v5  ;;  %v6413_v50 = vmax.f32 %v6252_v34, %v6382_v22  ;;  %v6575_v3 = vmax.f32 %v6414_v29, %v10612_v0  ;;  %v17447_v22 = vld [vmem:[%s17576_s8] ss:$0 sm:$0xff] }
 0xe10   : > { %v10559_v9 = vpop.f32.mrf.mxu1  ;;  %v10615_v17 = vpop.f32.mrf.mxu0 }
 0xe11   : > { %v6574_v14 = vmax.f32 %v6413_v50, %v6543_v33  ;;  %v6416_v7 = vmax.f32 %v6255_v8, %v10559_v9  ;;  %10727 = vmatprep.mubr.msk.f32.mxu1 %vm6627_vm2, %v7024_v21  ;;  %10767 = vmatprep.mubr.msk.f32.mxu0 %vm6627_vm2, %v7024_v21  ;;  %v7027_v63 = vsub.f32 %v6575_v3, %v19746_v59 }
 0xe12   : > { %v6392_v57 = vpop.f32.mrf.mxu1  ;;  %10728 = vmatmul.mubr.msk.f32.gmra.mxu1 %vm6627_vm2, %v7025_v40  ;;  %10768 = vmatmul.mubr.msk.f32.gmra.mxu0 %vm6627_vm2, %v7025_v40  ;;  %v6553_v52 = vpop.f32.mrf.mxu0 }
 0xe13   : > { %v7026_v28 = vsub.f32 %v6574_v14, %v19745_v46  ;;  %v6415_v44 = vmax.f32 %v6254_v55, %v6392_v57  ;;  %v6577_v36 = vmax.f32 %v6416_v7, %v10615_v17  ;;  %v19749_v46 = vld [vmem:[#allocation10_spill] sm:$0xff] }
 0xe14   : > { %v10634_v13 = vpop.f32.mrf.mxu1  ;;  %v10674_v24 = vpop.f32.mrf.mxu0 }
 0xe15   : > { %v6576_v56 = vmax.f32 %v6415_v44, %v6553_v52  ;;  %10730 = vmatprep.mubr.msk.f32.mxu1 %vm6627_vm2, %v7026_v28  ;;  %10770 = vmatprep.mubr.msk.f32.mxu0 %vm6627_vm2, %v7026_v28  ;;  %v7029_v62 = vsub.f32 %v6577_v36, %v19748_v39  ;;  %v6941_v6 = vadd.f32 %v10674_v24, %v10634_v13 }
 0xe16   : > { %10731 = vmatmul.mubr.msk.f32.gmra.mxu1 %vm6627_vm2, %v7027_v63  ;;  %10771 = vmatmul.mubr.msk.f32.gmra.mxu0 %vm6627_vm2, %v7027_v63  ;;  %v6742_v58 = vpop.f32.mrf.mxu1  ;;  %v6935_v38 = vpop.f32.mrf.mxu0 }
 0xe17   : > { %v7028_v19 = vsub.f32 %v6576_v56, %v19747_v47  ;;  %v6936_v2 = vadd.f32 %v6935_v38, %v6742_v58  ;;  %v19750_v47 = vld [vmem:[#allocation9_spill] sm:$0xff] }
 0xe18   : > { %v10637_v35 = vpop.f32.mrf.mxu1  ;;  %v10677_v27 = vpop.f32.mrf.mxu0 }
 0xe19   : > { %10733 = vmatprep.mubr.msk.f32.mxu1 %vm6627_vm2, %v7028_v19  ;;  %10773 = vmatprep.mubr.msk.f32.mxu0 %vm6627_vm2, %v7028_v19  ;;  %v6951_v5 = vadd.f32 %v10677_v27, %v10637_v35  ;;  %v19751_v35 = vld [vmem:[#allocation12_spill] sm:$0xff] }
 0xe1a   : > { %10734 = vmatmul.mubr.msk.f32.gmra.mxu1 %vm6627_vm2, %v7029_v62  ;;  %10774 = vmatmul.mubr.msk.f32.gmra.mxu0 %vm6627_vm2, %v7029_v62  ;;  %v6752_v30 = vpop.f32.mrf.mxu1  ;;  %v6945_v42 = vpop.f32.mrf.mxu0 }
 0xe1b   : > { %v6946_v3 = vadd.f32 %v6945_v42, %v6752_v30 }
 0xe1c   : > { %v10640_v51 = vpop.f32.mrf.mxu1  ;;  %v10680_v20 = vpop.f32.mrf.mxu0 }
 0xe1d   : > { %v6961_v14 = vadd.f32 %v10680_v20, %v10640_v51 }
 0xe1e   : > { %v6762_v53 = vpop.f32.mrf.mxu1  ;;  %v6955_v43 = vpop.f32.mrf.mxu0 }
 0xe1f   : > { %v6956_v36 = vadd.f32 %v6955_v43, %v6762_v53 }
 0xe20   : > { %v10643_v60 = vpop.f32.mrf.mxu1  ;;  %v10683_v11 = vpop.f32.mrf.mxu0 }
 0xe21   : > { %v6971_v24 = vadd.f32 %v10683_v11, %v10643_v60 }
 0xe22   : > { %v6772_v49 = vpop.f32.mrf.mxu1  ;;  %v6965_v1 = vpop.f32.mrf.mxu0 }
 0xe23   : > { %v6966_v20 = vadd.f32 %v6965_v1, %v6772_v49 }
 0xe24   : > { %v17411_v61 = vpop.f32.mrf.mxu1  ;;  %v17413_v4 = vpop.f32.mrf.mxu0 }
 0xe26   : > { %v17415_v32 = vpop.f32.mrf.mxu1  ;;  %v17417_v31 = vpop.f32.mrf.mxu0 }
 0xe28   : > { %v17419_v48 = vpop.f32.mrf.mxu1  ;;  %v17421_v18 = vpop.f32.mrf.mxu0 }
 0xe2a   : > { %v17423_v16 = vpop.f32.mrf.mxu1  ;;  %v17425_v15 = vpop.f32.mrf.mxu0 }
 0xe2c   : > { %v17427_v10 = vpop.f32.mrf.mxu1  ;;  %v17429_v26 = vpop.f32.mrf.mxu0 }
 0xe2e   : > { %v17431_v37 = vpop.f32.mrf.mxu1  ;;  %v17433_v45 = vpop.f32.mrf.mxu0 }
 0xe30   : > { %v17435_v34 = vpop.f32.mrf.mxu1  ;;  %v17437_v12 = vpop.f32.mrf.mxu0 }
 0xe32   : > { %v17439_v54 = vpop.f32.mrf.mxu1  ;;  %v17441_v41 = vpop.f32.mrf.mxu0 }
 0xebe   : > { %v10714_v0 = vpop.f32.mrf.mxu1  ;;  %v10754_v23 = vpop.f32.mrf.mxu0 }
 0xebf   : > { %v7233_v29 = vadd.f32 %v10714_v0, %v6941_v6  ;;  %v19752_v6 = vld [vmem:[#allocation11_spill] sm:$0xff] }
 0xec0   : > { %v7153_v33 = vpop.f32.mrf.mxu1  ;;  %v7323_v8 = vpop.f32.mrf.mxu0 }
 0xec1   : > { %v7403_v21 = vadd.f32 %v10754_v23, %v7233_v29  ;;  %v7232_v50 = vadd.f32 %v7153_v33, %v6936_v2  ;;  %v6981_v2 = vadd.f32 %v17413_v4, %v17411_v61 }
 0xec2   : > { %v10717_v25 = vpop.f32.mrf.mxu1  ;;  %v10757_v40 = vpop.f32.mrf.mxu0 }
 0xec3   : > { %v7426_v9 = vadd.f32 %v17447_v22, %v7403_v21  ;;  %v7402_v17 = vadd.f32 %v7323_v8, %v7232_v50  ;;  %v7235_v55 = vadd.f32 %v10717_v25, %v6951_v5  ;;  %v19753_v8 = vld [vmem:[#allocation14_spill] sm:$0xff]  ;;  %v6976_v50 = vadd.f32 %v17417_v31, %v17415_v32 }
 0xec4   : > { %v7163_v7 = vpop.f32.mrf.mxu1  ;;  %v7333_v57 = vpop.f32.mrf.mxu0 }
 0xec5   : > { %v7442_v28 = vadd.f32 %v7426_v9, %v19749_v46  ;;  %v7425_v44 = vadd.f32 %v17447_v22, %v7402_v17  ;;  %v7405_v59 = vadd.f32 %v10757_v40, %v7235_v55  ;;  %v7234_v63 = vadd.f32 %v7163_v7, %v6946_v3  ;;  %v19754_v3 = vld [vmem:[#allocation13_spill] sm:$0xff] }
 0xec6   : > { %v10720_v52 = vpop.f32.mrf.mxu1  ;;  %v10760_v56 = vpop.f32.mrf.mxu0  ;;  %v6991_v55 = vadd.f32 %v17421_v18, %v17419_v48 }
 0xec7   : > { %7458 = vst [vmem:[%s17454_s24 + $0x8] sm:$0xff] %v7442_v28  ;;  %v7441_v19 = vadd.f32 %v7425_v44, %v19750_v47  ;;  %v7428_v39 = vadd.f32 %v17447_v22, %v7405_v59  ;;  %v7404_v62 = vadd.f32 %v7333_v57, %v7234_v63  ;;  %v7237_v13 = vadd.f32 %v10720_v52, %v6961_v14  ;;  %v19755_v57 = vld [vmem:[#allocation16_spill] sm:$0xff] }
 0xec8   : > { %v7173_v58 = vpop.f32.mrf.mxu1  ;;  %v7343_v38 = vpop.f32.mrf.mxu0  ;;  %v6986_v44 = vadd.f32 %v17425_v15, %v17423_v16  ;;  %v7001_v47 = vadd.f32 %v17429_v26, %v17427_v10 }
 0xec9   : > { %7457 = vst [vmem:[%s17454_s24] sm:$0xff] %v7441_v19  ;;  %v7444_v27 = vadd.f32 %v7428_v39, %v19751_v35  ;;  %v7427_v30 = vadd.f32 %v17447_v22, %v7404_v62  ;;  %v7407_v42 = vadd.f32 %v10760_v56, %v7237_v13  ;;  %v7236_v51 = vadd.f32 %v7173_v58, %v6956_v36  ;;  %v19756_v36 = vld [vmem:[#allocation15_spill] sm:$0xff]  ;;  %v19757_v62 = vld [vmem:[#allocation18_spill] sm:$0xff] }
 0xeca   : > { %v10723_v53 = vpop.f32.mrf.mxu1  ;;  %v10763_v43 = vpop.f32.mrf.mxu0  ;;  %v6996_v58 = vadd.f32 %v17433_v45, %v17431_v37 }
 0xecb   : > { %7460 = vst [vmem:[%s17454_s24 + $0x18] sm:$0xff] %v7444_v27  ;;  %v7443_v0 = vadd.f32 %v7427_v30, %v19752_v6  ;;  %v7430_v23 = vadd.f32 %v17447_v22, %v7407_v42  ;;  %v7406_v60 = vadd.f32 %v7343_v38, %v7236_v51  ;;  %v7239_v11 = vadd.f32 %v10723_v53, %v6971_v24  ;;  %v19758_v27 = vld [vmem:[#allocation17_spill] sm:$0xff] }
 0xecc   : > { %v7183_v29 = vpop.f32.mrf.mxu1  ;;  %v7353_v33 = vpop.f32.mrf.mxu0  ;;  %v7011_v51 = vadd.f32 %v17437_v12, %v17435_v34 }
 0xecd   : > { %7459 = vst [vmem:[%s17454_s24 + $0x10] sm:$0xff] %v7443_v0  ;;  %v7446_v5 = vadd.f32 %v7430_v23, %v19753_v8  ;;  %v7429_v49 = vadd.f32 %v17447_v22, %v7406_v60  ;;  %v7409_v1 = vadd.f32 %v10763_v43, %v7239_v11  ;;  %v7238_v21 = vadd.f32 %v7183_v29, %v6966_v20  ;;  %v19759_v43 = vld [vmem:[#allocation20_spill] sm:$0xff] }
 0xece   : > { %v10726_v25 = vpop.f32.mrf.mxu1  ;;  %v10766_v40 = vpop.f32.mrf.mxu0  ;;  %v7006_v23 = vadd.f32 %v17441_v41, %v17439_v54 }
 0xecf   : > { %7462 = vst [vmem:[%s17454_s24 + $0x28] sm:$0xff] %v7446_v5  ;;  %v7445_v9 = vadd.f32 %v7429_v49, %v19754_v3  ;;  %v7432_v61 = vadd.f32 %v17447_v22, %v7409_v1  ;;  %v7408_v4 = vadd.f32 %v7353_v33, %v7238_v21  ;;  %v7241_v17 = vadd.f32 %v10726_v25, %v6981_v2  ;;  %v19760_v2 = vld [vmem:[#allocation19_spill] sm:$0xff]  ;;  %v19761_v5 = vld [vmem:[#allocation22_spill] sm:$0xff] }
 0xed0   : > { %v7193_v14 = vpop.f32.mrf.mxu1  ;;  %v7363_v7 = vpop.f32.mrf.mxu0 }
 0xed1   : > { %7461 = vst [vmem:[%s17454_s24 + $0x20] sm:$0xff] %v7445_v9  ;;  %v7448_v46 = vadd.f32 %v7432_v61, %v19755_v57  ;;  %v7431_v32 = vadd.f32 %v17447_v22, %v7408_v4  ;;  %v7411_v31 = vadd.f32 %v10766_v40, %v7241_v17  ;;  %v7240_v28 = vadd.f32 %v7193_v14, %v6976_v50  ;;  %v19762_v50 = vld [vmem:[#allocation21_spill] sm:$0xff]  ;;  %v19763_v9 = vld [vmem:[#allocation24_spill] sm:$0xff]  ;;  %v19764_v17 = vld [vmem:[#allocation23_spill] sm:$0xff] }
 0xed2   : > { %v10729_v59 = vpop.f32.mrf.mxu1  ;;  %v10769_v63 = vpop.f32.mrf.mxu0 }
 0xed3   : > { %7464 = vst [vmem:[%s17454_s24 + $0x38] sm:$0xff] %v7448_v46  ;;  %v7447_v52 = vadd.f32 %v7431_v32, %v19756_v36  ;;  %v7434_v48 = vadd.f32 %v17447_v22, %v7411_v31  ;;  %v7410_v18 = vadd.f32 %v7363_v7, %v7240_v28  ;;  %v7243_v56 = vadd.f32 %v10729_v59, %v6991_v55 }
 0xed4   : > { %v7203_v19 = vpop.f32.mrf.mxu1  ;;  %v7373_v39 = vpop.f32.mrf.mxu0 }
 0xed5   : > { %7463 = vst [vmem:[%s17454_s24 + $0x30] sm:$0xff] %v7447_v52  ;;  %v7450_v13 = vadd.f32 %v7434_v48, %v19757_v62  ;;  %v7433_v16 = vadd.f32 %v17447_v22, %v7410_v18  ;;  %v7413_v15 = vadd.f32 %v10769_v63, %v7243_v56  ;;  %v7242_v24 = vadd.f32 %v7203_v19, %v6986_v44 }
 0xed6   : > { %v10732_v38 = vpop.f32.mrf.mxu1  ;;  %v10772_v35 = vpop.f32.mrf.mxu0 }
 0xed7   : > { %7466 = vst [vmem:[%s17454_s24 + $0x48] sm:$0xff] %v7450_v13  ;;  %v7449_v30 = vadd.f32 %v7433_v16, %v19758_v27  ;;  %v7436_v10 = vadd.f32 %v17447_v22, %v7413_v15  ;;  %v7412_v26 = vadd.f32 %v7373_v39, %v7242_v24  ;;  %v7245_v42 = vadd.f32 %v10732_v38, %v7001_v47 }
 0xed8   : > { %v7213_v20 = vpop.f32.mrf.mxu1  ;;  %v7383_v53 = vpop.f32.mrf.mxu0 }
 0xed9   : > { %7465 = vst [vmem:[%s17454_s24 + $0x40] sm:$0xff] %v7449_v30  ;;  %v7452_v6 = vadd.f32 %v7436_v10, %v19759_v43  ;;  %v7435_v37 = vadd.f32 %v17447_v22, %v7412_v26  ;;  %v7415_v45 = vadd.f32 %v10772_v35, %v7245_v42  ;;  %v7244_v0 = vadd.f32 %v7213_v20, %v6996_v58 }
 0xeda   : > { %v10735_v60 = vpop.f32.mrf.mxu1  ;;  %v10775_v11 = vpop.f32.mrf.mxu0 }
 0xedb   : > { %7468 = vst [vmem:[%s17454_s24 + $0x58] sm:$0xff] %v7452_v6  ;;  %v7451_v34 = vadd.f32 %v7435_v37, %v19760_v2  ;;  %v7438_v12 = vadd.f32 %v17447_v22, %v7415_v45  ;;  %v7414_v29 = vadd.f32 %v7383_v53, %v7244_v0  ;;  %v7247_v33 = vadd.f32 %v10735_v60, %v7011_v51 }
 0xedc   : > { %v7223_v8 = vpop.f32.mrf.mxu1  ;;  %v7393_v21 = vpop.f32.mrf.mxu0 }
 0xedd   : > { %7467 = vst [vmem:[%s17454_s24 + $0x50] sm:$0xff] %v7451_v34  ;;  %v7454_v49 = vadd.f32 %v7438_v12, %v19761_v5  ;;  %v7437_v1 = vadd.f32 %v17447_v22, %v7414_v29  ;;  %v7417_v54 = vadd.f32 %v10775_v11, %v7247_v33  ;;  %v7246_v41 = vadd.f32 %v7223_v8, %v7006_v23 }
 0xedf   : > { %7470 = vst [vmem:[%s17454_s24 + $0x68] sm:$0xff] %v7454_v49  ;;  %v7453_v25 = vadd.f32 %v7437_v1, %v19762_v50  ;;  %v7440_v40 = vadd.f32 %v17447_v22, %v7417_v54  ;;  %v7416_v3 = vadd.f32 %v7393_v21, %v7246_v41 }
 0xee1   : > { %7469 = vst [vmem:[%s17454_s24 + $0x60] sm:$0xff] %v7453_v25  ;;  %v7456_v61 = vadd.f32 %v7440_v40, %v19763_v9  ;;  %v7439_v4 = vadd.f32 %v17447_v22, %v7416_v3 }
 0xee3   : > { %7472 = vst [vmem:[%s17454_s24 + $0x78] sm:$0xff] %v7456_v61  ;;  %v7455_v55 = vadd.f32 %v7439_v4, %v19764_v17 }
 0xee5   : > { %7471 = vst [vmem:[%s17454_s24 + $0x70] sm:$0xff] %v7455_v55 }
 0xee6   : > { %10871 = shalt.err (!%p10868_p0)
}
 0xee7   : > { %s10872_s22 = scalar_lea.hbm %s17519_s21, 2048  ;;  %s10876_s24 = scalar_lea.hbm %s17577_s9, 4096 }
 0xee8   : > { %p10873_p1 = scmp.ne.s32.totalorder %s17519_s21, %s10872_s22  ;;  %p10877_p4 = scmp.lt.s32.totalorder %s17519_s21, %s17577_s9 }
 0xee9   : > { %p10878_p7 = scmp.lt.s32.totalorder %s10876_s24, %s10872_s22 }
 0xeea   : > { %p10874_p2 = pnand %p10873_p1, %p11020_p5 }
 0xeeb   : > { %p10879_p8 = por %p10878_p7, %p10877_p4 }
 0xeec   : > { %p10875_p3 = pneg %p10874_p2 }
 0xeee   : > { %p10880_p6 = pnand %p10879_p8, %p10875_p3 }
 0xef0   : > { %10883 = shalt.err (!%p10880_p6)
}
 0xef1   : > { %s10930_s28 = smov 128   ;;  %s10931_s5 = smov 8  }
 0xef2   : > { %10780 = dma.vmem_to_hbm [thread:$0]  (%p11020_p5), %s17521_s26, 2048, %s17519_s21, %s17528_s13, %s10930_s28, %s10930_s28, %s10931_s5  }
 0xef3 PF: > { %p10792_p9 = scmp.ge.s32.totalorder %s10922_s12, 2  ;;  %s7502_s29 = sand.u32 1, %s10910_s30  }
 0xef4   : > { %p19765_p10 = scmp.ne.s32.totalorder %s18320_s20, 0  ;;  %s7503_s14 = scalar_lea.sflag [#allocation5], %s7502_s29 }
 0xef6   : > { %p10787_p11 = pnand %p10792_p9, %p19765_p10 }
 0xef8   : > { %p10788_p12 = pneg %p10787_p11 }
 0xefa   : > { %10905 = dma.done.wait (%p10788_p12), %s7503_s14, 2048  }
 0xefb   : > { %10907 = vsyncadd (%p10788_p12), %s7503_s14, 4294965248  ;;  %p20_p13 = scmp.ge.s32.totalorder %s11007_s15, 4   ;;  %s19766_s30 = smov %s10914_s10 }
 0xefc   : > { %s19767_s10 = smov %s10918_s11  ;;  %s19768_s11 = smov %s11018_s18 }
 0xefd   : > { %s19769_s12 = smov %s11007_s15  ;;  %22 = sbr.rel (!%p20_p13) target bundleno = 6 (0x6), region = 112 }
 0xf02   :  { %7508 = vsyncpa [#allocation4], 1 }
 0xf03   :  { %7510 = vsyncpa [#allocation4 + $0x1], 1 }
 0xf04   :  { %7511 = vsyncpa [#allocation5], 1 }
 0xf05   :  { %7513 = vsyncpa [#allocation5 + $0x1], 1 }

</bundles_post_ra>
